<compile_context>
chip_gen: v7x
topology: tpu7x:2x2x1
jax: 0.10.0
libtpu: 0.0.40
codegen_flags: <defaults>
</compile_context>

<pallas_src>
import functools

import numpy as np
import jax
import jax.numpy as jnp
from jax.experimental import pallas as pl
from jax.experimental.pallas import tpu as pltpu

BN_EPS = 1e-5
LANE = 128


def _round_up(x, m):
    return ((x + m - 1) // m) * m


def _cp(c):
    return _round_up(c, LANE)


# ---------------------------------------------------------------------------
# Pallas kernel: fused (A @ B + bias) [+ReLU], K-accumulated into the output.
# ---------------------------------------------------------------------------

def matmul_bias_kernel(a_ref, b_ref, bias_ref, o_ref, *, relu):
    k = pl.program_id(2)

    @pl.when(k == 0)
    def _():
        o_ref[...] = jnp.zeros_like(o_ref)

    # bf16 MXU inputs, f32 accumulation directly in the VMEM-resident output.
    o_ref[...] += jnp.dot(a_ref[...], b_ref[...],
                          preferred_element_type=jnp.float32)

    @pl.when(k == pl.num_programs(2) - 1)
    def _():
        y = o_ref[...] + bias_ref[...]
        if relu:
            y = jnp.maximum(y, 0.0)
        o_ref[...] = y


def _pick(dim, candidates):
    for c in candidates:
        if dim % c == 0:
            return c
    return dim


def matmul_bias(a, b, bias, relu):
    """maybe_relu(a @ b + bias). b: bf16 (K, N), bias: f32 (1, N); K, N % 128 == 0."""
    M, K = a.shape
    Kb, N = b.shape
    assert K == Kb and K % LANE == 0 and N % LANE == 0

    a = a.astype(jnp.bfloat16)              # halve A-stream DMA bytes
    Mp = _round_up(M, 8)
    if Mp != M:                             # only the 1x1-spatial layers (M=2)
        a = jnp.pad(a, ((0, Mp - M), (0, 0)))

    tm = _pick(Mp, (256, 128))              # >=2 M tiles at M=512 (megacore)
    tn = _pick(N, (256, 128))
    tk = _pick(K, (512, 384, 256, 128))

    out = pl.pallas_call(
        functools.partial(matmul_bias_kernel, relu=relu),
        out_shape=jax.ShapeDtypeStruct((Mp, N), jnp.float32),
        grid_spec=pltpu.PrefetchScalarGridSpec(
            num_scalar_prefetch=0,
            grid=(Mp // tm, N // tn, K // tk),
            in_specs=[
                pl.BlockSpec((tm, tk), lambda i, j, k: (i, k)),
                pl.BlockSpec((tk, tn), lambda i, j, k: (k, j)),
                pl.BlockSpec((1, tn), lambda i, j, k: (0, j)),
            ],
            out_specs=pl.BlockSpec((tm, tn), lambda i, j, k: (i, j)),
        ),
        compiler_params=pltpu.CompilerParams(
            dimension_semantics=("parallel", "parallel", "arbitrary")),
    )(a, b, bias)
    return out[:M] if Mp != M else out


# ---------------------------------------------------------------------------
# Conv wrappers (im2col / pool / upsample glue is XLA-fused under jit)
# ---------------------------------------------------------------------------

def _im2col3x3(x):
    N, H, W, C = x.shape
    xp = jnp.pad(x, ((0, 0), (1, 1), (1, 1), (0, 0)))
    cols = [xp[:, dy:dy + H, dx:dx + W, :] for dy in range(3) for dx in range(3)]
    return jnp.stack(cols, axis=3).reshape(N * H * W, 9 * C)


def conv3x3(x, w, b, relu=True):
    N, H, W, _ = x.shape
    y = matmul_bias(_im2col3x3(x), w, b, relu)
    return y.reshape(N, H, W, -1)


def conv1x1(x, w, b, relu=True):
    N, H, W, C = x.shape
    y = matmul_bias(x.reshape(N * H * W, C), w, b, relu)
    return y.reshape(N, H, W, -1)


def conv_transpose2x2(x, w, b4):
    """nn.ConvTranspose2d(k=2, s=2) on padded NHWC; w is (Cin_pad, 4*Cout_pad)."""
    N, H, W, C = x.shape
    cout_pad = w.shape[1] // 4
    y = matmul_bias(x.reshape(N * H * W, C), w, b4, relu=False)
    y = y.reshape(N, H, W, 2, 2, cout_pad).transpose(0, 1, 3, 2, 4, 5)
    return y.reshape(N, 2 * H, 2 * W, cout_pad)


def maxpool2x2(x):
    # Plain JAX (fused by XLA under jit); padded channels stay zero.
    N, H, W, C = x.shape
    return x.reshape(N, H // 2, 2, W // 2, 2, C).max(axis=(2, 4))


def _pad_channels(x, cp):
    C = x.shape[-1]
    if C == cp:
        return x
    return jnp.pad(x, ((0, 0),) * (x.ndim - 1) + ((0, cp - C),))


# ---------------------------------------------------------------------------
# Parameter packing (done once at init, on host, in numpy)
# ---------------------------------------------------------------------------

def _randn(key, shape):
    return np.asarray(jax.random.normal(key, shape, jnp.float32))


def _bn_fold(key, c):
    """Inference-mode BN (mean=0, var=1) -> per-channel (scale, bias)."""
    kg, kb = jax.random.split(key)
    gamma = 1.0 + 0.1 * _randn(kg, (c,))
    beta = 0.1 * _randn(kb, (c,))
    scale = gamma / np.sqrt(1.0 + BN_EPS)
    return scale, beta


def _expand_groups(w, cin, groups):
    """(cout, cin//g, kh, kw) grouped weight -> exact block-diagonal (cout, cin, kh, kw)."""
    cout = w.shape[0]
    cpg_in, cpg_out = cin // groups, cout // groups
    full = np.zeros((cout, cin) + w.shape[2:], np.float32)
    for g in range(groups):
        full[g * cpg_out:(g + 1) * cpg_out, g * cpg_in:(g + 1) * cpg_in] = \
            w[g * cpg_out:(g + 1) * cpg_out]
    return full


def _pack_conv3x3(key, cin, cout, in_pos, cin_pad, scale, groups=1):
    """Torch conv weight -> padded dense (9*cin_pad, cout_pad) bf16, BN folded."""
    w = 0.1 * _randn(key, (cout, cin // groups, 3, 3))
    w = _expand_groups(w, cin, groups)                       # (cout, cin, 3, 3)
    d = np.transpose(w, (2, 3, 1, 0)) * scale[None, None, None, :]   # (ky,kx,cin,cout)
    cout_pad = _cp(cout)
    dense = np.zeros((3, 3, cin_pad, cout_pad), np.float32)
    dense[:, :, in_pos, :cout] = d
    return jnp.asarray(dense.reshape(9 * cin_pad, cout_pad), jnp.bfloat16)


def _pack_conv1x1(key, cin, cout, in_pos, cin_pad, scale, groups=1):
    w = 0.1 * _randn(key, (cout, cin // groups, 1, 1))
    w = _expand_groups(w, cin, groups)[:, :, 0, 0]           # (cout, cin)
    d = w.T * scale[None, :]                                  # (cin, cout)
    cout_pad = _cp(cout)
    dense = np.zeros((cin_pad, cout_pad), np.float32)
    dense[in_pos, :cout] = d
    return jnp.asarray(dense, jnp.bfloat16)


def _pack_bias(bias_real, cout, width=None):
    width = _cp(cout) if width is None else width
    b = np.zeros((1, width), np.float32)
    b[0, :cout] = bias_real
    return jnp.asarray(b)


def _double_conv_params(key, cin, cout, cin_pad, in_pos=None):
    k1, k2, k3, k4 = jax.random.split(key, 4)
    if in_pos is None:
        in_pos = np.arange(cin)
    s1, b1 = _bn_fold(k2, cout)
    s2, b2 = _bn_fold(k4, cout)
    return [
        (_pack_conv3x3(k1, cin, cout, in_pos, cin_pad, s1), _pack_bias(b1, cout)),
        (_pack_conv3x3(k3, cout, cout, np.arange(cout), _cp(cout), s2), _pack_bias(b2, cout)),
    ]


def _ffb_params(key, planes):
    # Grouped 1x1/3x3 convs are packed as exact block-diagonal dense weights; at
    # the bottleneck (1x1 spatial, M=2) one dense 128-wide matmul beats 4 tiny ones.
    ks = jax.random.split(key, 10)
    pp, pos = _cp(planes), np.arange(planes)
    specs = [("w1", 1, 4), ("w2", 3, 2), ("w3", 1, 4), ("w4", 3, 2), ("w5", 1, 4)]
    p = {}
    for i, (name, ksz, g) in enumerate(specs):
        s, b = _bn_fold(ks[2 * i + 1], planes)
        if ksz == 1:
            w = _pack_conv1x1(ks[2 * i], planes, planes, pos, pp, s, groups=g)
        else:
            w = _pack_conv3x3(ks[2 * i], planes, planes, pos, pp, s, groups=g)
        p[name] = (w, _pack_bias(b, planes))
    return p


def _up_params(key, cin, cout):
    """nn.ConvTranspose2d(cin, cout, 2, 2) packed as (cin_pad, 4*cout_pad) bf16."""
    kw, kb = jax.random.split(key)
    wt = 0.1 * _randn(kw, (cin, cout, 2, 2))       # torch layout (Cin, Cout, kh, kw)
    bt = 0.1 * _randn(kb, (cout,))
    cin_pad, cout_pad = _cp(cin), _cp(cout)
    dense = np.zeros((cin_pad, 2, 2, cout_pad), np.float32)
    dense[:cin, :, :, :cout] = np.transpose(wt, (0, 2, 3, 1))
    b4 = np.zeros((1, 4 * cout_pad), np.float32)
    for d in range(4):
        b4[0, d * cout_pad:d * cout_pad + cout] = bt
    return {"w": jnp.asarray(dense.reshape(cin_pad, 4 * cout_pad), jnp.bfloat16),
            "b": jnp.asarray(b4)}


def init_unet_params(key, in_channels, out_channels, features):
    params = {"downs": [], "ups": []}
    keys = jax.random.split(key, 4 * len(features) + 8)
    ki = 0
    cin = in_channels
    for f in features:
        params["downs"].append(_double_conv_params(keys[ki], cin, f, _cp(cin))); ki += 1
        cin = f
    params["bottleneck"] = _double_conv_params(
        keys[ki], features[-1], features[-1] * 2, _cp(features[-1])); ki += 1
    params["ffb"] = _ffb_params(keys[ki], features[-1] * 2); ki += 1
    for f in reversed(features):
        up = _up_params(keys[ki], f * 2, f); ki += 1
        # concat layout in padded NHWC: skip channels at [0:f], upsampled at [cp(f):cp(f)+f]
        in_pos = np.concatenate([np.arange(f), _cp(f) + np.arange(f)])
        dc = _double_conv_params(keys[ki], 2 * f, f, 2 * _cp(f), in_pos=in_pos); ki += 1
        params["ups"].append({"up": up, "dc": dc})
    kw, kb = jax.random.split(keys[ki]); ki += 1
    params["final_w"] = _pack_conv1x1(kw, features[0], out_channels,
                                      np.arange(features[0]), _cp(features[0]),
                                      np.ones((out_channels,), np.float32))
    params["final_b"] = _pack_bias(0.1 * _randn(kb, (out_channels,)), out_channels)
    return params


# ---------------------------------------------------------------------------
# Forward pass (fully jitted)
# ---------------------------------------------------------------------------

def double_conv_forward(x, dc_params):
    for (w, b) in dc_params:
        x = conv3x3(x, w, b, relu=True)
    return x


def ffb_forward(x, p):
    out = conv1x1(x, *p["w1"])
    residual1 = out
    out = conv3x3(out, *p["w2"])
    residual2 = out
    out = conv1x1(out, *p["w3"])
    out = out + residual1
    out = conv3x3(out, *p["w4"])
    out = out + residual2
    out = conv1x1(out, *p["w5"])
    # downsample is None in UNET; the reference never adds that residual.
    return out


@functools.partial(jax.jit, static_argnums=(2,))
def unet_forward(x_nchw, params, out_channels):
    x = jnp.transpose(x_nchw, (0, 2, 3, 1)).astype(jnp.float32)   # NCHW -> NHWC
    x = _pad_channels(x, _cp(x.shape[-1]))                        # pad channels once
    skips = []
    for dc in params["downs"]:
        x = double_conv_forward(x, dc)
        skips.append(x)
        x = maxpool2x2(x)
    x = double_conv_forward(x, params["bottleneck"])
    x = ffb_forward(x, params["ffb"])
    skips = skips[::-1]
    for i, stage in enumerate(params["ups"]):
        x = conv_transpose2x2(x, stage["up"]["w"], stage["up"]["b"])
        # TODO(synk): TF.resize branch of the reference is dead for power-of-2 spatial sizes.
        x = jnp.concatenate([skips[i], x], axis=-1)   # torch.cat(dim=1) in padded NHWC
        x = double_conv_forward(x, stage["dc"])
    N, H, W, C = x.shape
    y = matmul_bias(x.reshape(N * H * W, C), params["final_w"],
                    params["final_b"], relu=False)
    y = y.reshape(N, H, W, -1)[..., :out_channels]
    return jnp.transpose(y, (0, 3, 1, 2))             # back to NCHW


if __name__ == "__main__":
    key = jax.random.PRNGKey(0)
    kx, kp = jax.random.split(key)
    in_channels, out_channels = 4, 2
    features = [8, 16, 32, 64]
    x = jax.random.normal(kx, (2, in_channels, 16, 16), jnp.float32)  # NCHW input
    params = init_unet_params(kp, in_channels, out_channels, features)
    y = unet_forward(x, params, out_channels)
    y = jax.block_until_ready(y)
    assert y.shape == (2, out_channels, 16, 16), y.shape
    assert bool(jnp.all(jnp.isfinite(y)))
    print("KERNEL_OK")
</pallas_src>

<mosaic_0001>
module attributes {stable_mosaic.version = 11 : i64} {
  func.func @matmul_bias_kernel(%arg0: i32, %arg1: i32, %arg2: i32, %arg3: memref<256x384xbf16, #tpu.memory_space<vmem>>, %arg4: memref<384x128xbf16, #tpu.memory_space<vmem>>, %arg5: memref<1x128xf32, #tpu.memory_space<vmem>>, %arg6: memref<256x128xf32, #tpu.memory_space<vmem>>) attributes {dimension_semantics = [#tpu.dimension_semantics<parallel>, #tpu.dimension_semantics<parallel>, #tpu.dimension_semantics<arbitrary>], iteration_bounds = array<i64: 2, 1, 3>, scalar_prefetch = 0 : i64, scratch_operands = 0 : i64, tpu.core_type = #tpu.core_type<tc>, window_params = [{transform_indices = @transform_0, window_bounds = array<i64: 256, 384>}, {transform_indices = @transform_1, window_bounds = array<i64: 384, 128>}, {transform_indices = @transform_2, window_bounds = array<i64: 1, 128>}, {transform_indices = @transform_3, window_bounds = array<i64: 256, 128>}]} {
    %c0_i32 = arith.constant 0 : i32
    %0 = arith.cmpi eq, %arg2, %c0_i32 : i32
    %1 = arith.extui %0 : i1 to i32
    %c0_i32_0 = arith.constant 0 : i32
    %2 = arith.cmpi ne, %1, %c0_i32_0 : i32
    scf.if %2 {
      %cst_9 = arith.constant 0.000000e+00 : f32
      %12 = vector.broadcast %cst_9 : f32 to vector<256x128xf32>
      %c0_10 = arith.constant 0 : index
      %c0_11 = arith.constant 0 : index
      %13 = vector.load %arg6[%c0_10, %c0_11] : memref<256x128xf32, #tpu.memory_space<vmem>>, vector<256x128xf32>
      tpu.vector_store %arg6[%c0_10, %c0_11], %12 {strides = array<i32>} : memref<256x128xf32, #tpu.memory_space<vmem>>, vector<256x128xf32>,
    } else {
    }
    %c0 = arith.constant 0 : index
    %c0_1 = arith.constant 0 : index
    %3 = vector.load %arg6[%c0, %c0_1] : memref<256x128xf32, #tpu.memory_space<vmem>>, vector<256x128xf32>
    %c0_2 = arith.constant 0 : index
    %c0_3 = arith.constant 0 : index
    %4 = vector.load %arg3[%c0_2, %c0_3] : memref<256x384xbf16, #tpu.memory_space<vmem>>, vector<256x384xbf16>
    %c0_4 = arith.constant 0 : index
    %c0_5 = arith.constant 0 : index
    %5 = vector.load %arg4[%c0_4, %c0_5] : memref<384x128xbf16, #tpu.memory_space<vmem>>, vector<384x128xbf16>
    %cst = arith.constant dense<0.000000e+00> : vector<256x128xf32>
    %6 = tpu.matmul %4, %5, %cst {dimension_numbers = #tpu.dot_dimension_numbers<[1], [0], [0], [1], [0, 0, 1, 1], [], []>} : vector<256x384xbf16>, vector<384x128xbf16>, vector<256x128xf32> -> vector<256x128xf32>
    %7 = arith.addf %3, %6 : vector<256x128xf32>
    %c0_6 = arith.constant 0 : index
    %c0_7 = arith.constant 0 : index
    %8 = vector.load %arg6[%c0_6, %c0_7] : memref<256x128xf32, #tpu.memory_space<vmem>>, vector<256x128xf32>
    tpu.vector_store %arg6[%c0_6, %c0_7], %7 {strides = array<i32>} : memref<256x128xf32, #tpu.memory_space<vmem>>, vector<256x128xf32>,
    %c2_i32 = arith.constant 2 : i32
    %9 = arith.cmpi eq, %arg2, %c2_i32 : i32
    %10 = arith.extui %9 : i1 to i32
    %c0_i32_8 = arith.constant 0 : i32
    %11 = arith.cmpi ne, %10, %c0_i32_8 : i32
    scf.if %11 {
      %c0_9 = arith.constant 0 : index
      %c0_10 = arith.constant 0 : index
      %12 = vector.load %arg6[%c0_9, %c0_10] : memref<256x128xf32, #tpu.memory_space<vmem>>, vector<256x128xf32>
      %c0_11 = arith.constant 0 : index
      %c0_12 = arith.constant 0 : index
      %13 = vector.load %arg5[%c0_11, %c0_12] : memref<1x128xf32, #tpu.memory_space<vmem>>, vector<1x128xf32>
      %14 = vector.broadcast %13 : vector<1x128xf32> to vector<256x128xf32>
      %15 = arith.addf %12, %14 : vector<256x128xf32>
      %cst_13 = arith.constant 0.000000e+00 : f32
      %16 = vector.broadcast %cst_13 : f32 to vector<256x128xf32>
      %17 = arith.maximumf %15, %16 : vector<256x128xf32>
      %c0_14 = arith.constant 0 : index
      %c0_15 = arith.constant 0 : index
      %18 = vector.load %arg6[%c0_14, %c0_15] : memref<256x128xf32, #tpu.memory_space<vmem>>, vector<256x128xf32>
      tpu.vector_store %arg6[%c0_14, %c0_15], %17 {strides = array<i32>} : memref<256x128xf32, #tpu.memory_space<vmem>>, vector<256x128xf32>,
    } else {
    }
    return
  }
  func.func @transform_0(%arg0: i32, %arg1: i32, %arg2: i32) -> (i32, i32) {
    %c0_i32 = arith.constant 0 : i32
    return %arg0, %arg2 : i32, i32
  }
  func.func @transform_1(%arg0: i32, %arg1: i32, %arg2: i32) -> (i32, i32) {
    %c0_i32 = arith.constant 0 : i32
    return %arg2, %arg1 : i32, i32
  }
  func.func @transform_2(%arg0: i32, %arg1: i32, %arg2: i32) -> (i32, i32) {
    %c0_i32 = arith.constant 0 : i32
    %c0_i32_0 = arith.constant 0 : i32
    return %c0_i32, %arg1 : i32, i32
  }
  func.func @transform_3(%arg0: i32, %arg1: i32, %arg2: i32) -> (i32, i32) {
    %c0_i32 = arith.constant 0 : i32
    return %arg0, %arg1 : i32, i32
  }
}

module attributes {stable_mosaic.version = 11 : i64} {
  func.func @matmul_bias_kernel(%arg0: i32, %arg1: i32, %arg2: i32, %arg3: memref<128x384xbf16, #tpu.memory_space<vmem>>, %arg4: memref<384x128xbf16, #tpu.memory_space<vmem>>, %arg5: memref<1x128xf32, #tpu.memory_space<vmem>>, %arg6: memref<128x128xf32, #tpu.memory_space<vmem>>) attributes {dimension_semantics = [#tpu.dimension_semantics<parallel>, #tpu.dimension_semantics<parallel>, #tpu.dimension_semantics<arbitrary>], iteration_bounds = array<i64: 1, 1, 3>, scalar_prefetch = 0 : i64, scratch_operands = 0 : i64, tpu.core_type = #tpu.core_type<tc>, window_params = [{transform_indices = @transform_0, window_bounds = array<i64: 128, 384>}, {transform_indices = @transform_1, window_bounds = array<i64: 384, 128>}, {transform_indices = @transform_2, window_bounds = array<i64: 1, 128>}, {transform_indices = @transform_3, window_bounds = array<i64: 128, 128>}]} {
    %c0_i32 = arith.constant 0 : i32
    %0 = arith.cmpi eq, %arg2, %c0_i32 : i32
    %1 = arith.extui %0 : i1 to i32
    %c0_i32_0 = arith.constant 0 : i32
    %2 = arith.cmpi ne, %1, %c0_i32_0 : i32
    scf.if %2 {
      %cst_9 = arith.constant 0.000000e+00 : f32
      %12 = vector.broadcast %cst_9 : f32 to vector<128x128xf32>
      %c0_10 = arith.constant 0 : index
      %c0_11 = arith.constant 0 : index
      %13 = vector.load %arg6[%c0_10, %c0_11] : memref<128x128xf32, #tpu.memory_space<vmem>>, vector<128x128xf32>
      tpu.vector_store %arg6[%c0_10, %c0_11], %12 {strides = array<i32>} : memref<128x128xf32, #tpu.memory_space<vmem>>, vector<128x128xf32>,
    } else {
    }
    %c0 = arith.constant 0 : index
    %c0_1 = arith.constant 0 : index
    %3 = vector.load %arg6[%c0, %c0_1] : memref<128x128xf32, #tpu.memory_space<vmem>>, vector<128x128xf32>
    %c0_2 = arith.constant 0 : index
    %c0_3 = arith.constant 0 : index
    %4 = vector.load %arg3[%c0_2, %c0_3] : memref<128x384xbf16, #tpu.memory_space<vmem>>, vector<128x384xbf16>
    %c0_4 = arith.constant 0 : index
    %c0_5 = arith.constant 0 : index
    %5 = vector.load %arg4[%c0_4, %c0_5] : memref<384x128xbf16, #tpu.memory_space<vmem>>, vector<384x128xbf16>
    %cst = arith.constant dense<0.000000e+00> : vector<128x128xf32>
    %6 = tpu.matmul %4, %5, %cst {dimension_numbers = #tpu.dot_dimension_numbers<[1], [0], [0], [1], [0, 0, 1, 1], [], []>} : vector<128x384xbf16>, vector<384x128xbf16>, vector<128x128xf32> -> vector<128x128xf32>
    %7 = arith.addf %3, %6 : vector<128x128xf32>
    %c0_6 = arith.constant 0 : index
    %c0_7 = arith.constant 0 : index
    %8 = vector.load %arg6[%c0_6, %c0_7] : memref<128x128xf32, #tpu.memory_space<vmem>>, vector<128x128xf32>
    tpu.vector_store %arg6[%c0_6, %c0_7], %7 {strides = array<i32>} : memref<128x128xf32, #tpu.memory_space<vmem>>, vector<128x128xf32>,
    %c2_i32 = arith.constant 2 : i32
    %9 = arith.cmpi eq, %arg2, %c2_i32 : i32
    %10 = arith.extui %9 : i1 to i32
    %c0_i32_8 = arith.constant 0 : i32
    %11 = arith.cmpi ne, %10, %c0_i32_8 : i32
    scf.if %11 {
      %c0_9 = arith.constant 0 : index
      %c0_10 = arith.constant 0 : index
      %12 = vector.load %arg6[%c0_9, %c0_10] : memref<128x128xf32, #tpu.memory_space<vmem>>, vector<128x128xf32>
      %c0_11 = arith.constant 0 : index
      %c0_12 = arith.constant 0 : index
      %13 = vector.load %arg5[%c0_11, %c0_12] : memref<1x128xf32, #tpu.memory_space<vmem>>, vector<1x128xf32>
      %14 = vector.broadcast %13 : vector<1x128xf32> to vector<128x128xf32>
      %15 = arith.addf %12, %14 : vector<128x128xf32>
      %cst_13 = arith.constant 0.000000e+00 : f32
      %16 = vector.broadcast %cst_13 : f32 to vector<128x128xf32>
      %17 = arith.maximumf %15, %16 : vector<128x128xf32>
      %c0_14 = arith.constant 0 : index
      %c0_15 = arith.constant 0 : index
      %18 = vector.load %arg6[%c0_14, %c0_15] : memref<128x128xf32, #tpu.memory_space<vmem>>, vector<128x128xf32>
      tpu.vector_store %arg6[%c0_14, %c0_15], %17 {strides = array<i32>} : memref<128x128xf32, #tpu.memory_space<vmem>>, vector<128x128xf32>,
    } else {
    }
    return
  }
  func.func @transform_0(%arg0: i32, %arg1: i32, %arg2: i32) -> (i32, i32) {
    %c0_i32 = arith.constant 0 : i32
    return %arg0, %arg2 : i32, i32
  }
  func.func @transform_1(%arg0: i32, %arg1: i32, %arg2: i32) -> (i32, i32) {
    %c0_i32 = arith.constant 0 : i32
    return %arg2, %arg1 : i32, i32
  }
  func.func @transform_2(%arg0: i32, %arg1: i32, %arg2: i32) -> (i32, i32) {
    %c0_i32 = arith.constant 0 : i32
    %c0_i32_0 = arith.constant 0 : i32
    return %c0_i32, %arg1 : i32, i32
  }
  func.func @transform_3(%arg0: i32, %arg1: i32, %arg2: i32) -> (i32, i32) {
    %c0_i32 = arith.constant 0 : i32
    return %arg0, %arg1 : i32, i32
  }
}

module attributes {stable_mosaic.version = 11 : i64} {
  func.func @matmul_bias_kernel(%arg0: i32, %arg1: i32, %arg2: i32, %arg3: memref<32x384xbf16, #tpu.memory_space<vmem>>, %arg4: memref<384x128xbf16, #tpu.memory_space<vmem>>, %arg5: memref<1x128xf32, #tpu.memory_space<vmem>>, %arg6: memref<32x128xf32, #tpu.memory_space<vmem>>) attributes {dimension_semantics = [#tpu.dimension_semantics<parallel>, #tpu.dimension_semantics<parallel>, #tpu.dimension_semantics<arbitrary>], iteration_bounds = array<i64: 1, 1, 3>, scalar_prefetch = 0 : i64, scratch_operands = 0 : i64, tpu.core_type = #tpu.core_type<tc>, window_params = [{transform_indices = @transform_0, window_bounds = array<i64: 32, 384>}, {transform_indices = @transform_1, window_bounds = array<i64: 384, 128>}, {transform_indices = @transform_2, window_bounds = array<i64: 1, 128>}, {transform_indices = @transform_3, window_bounds = array<i64: 32, 128>}]} {
    %c0_i32 = arith.constant 0 : i32
    %0 = arith.cmpi eq, %arg2, %c0_i32 : i32
    %1 = arith.extui %0 : i1 to i32
    %c0_i32_0 = arith.constant 0 : i32
    %2 = arith.cmpi ne, %1, %c0_i32_0 : i32
    scf.if %2 {
      %cst_9 = arith.constant 0.000000e+00 : f32
      %12 = vector.broadcast %cst_9 : f32 to vector<32x128xf32>
      %c0_10 = arith.constant 0 : index
      %c0_11 = arith.constant 0 : index
      %13 = vector.load %arg6[%c0_10, %c0_11] : memref<32x128xf32, #tpu.memory_space<vmem>>, vector<32x128xf32>
      tpu.vector_store %arg6[%c0_10, %c0_11], %12 {strides = array<i32>} : memref<32x128xf32, #tpu.memory_space<vmem>>, vector<32x128xf32>,
    } else {
    }
    %c0 = arith.constant 0 : index
    %c0_1 = arith.constant 0 : index
    %3 = vector.load %arg6[%c0, %c0_1] : memref<32x128xf32, #tpu.memory_space<vmem>>, vector<32x128xf32>
    %c0_2 = arith.constant 0 : index
    %c0_3 = arith.constant 0 : index
    %4 = vector.load %arg3[%c0_2, %c0_3] : memref<32x384xbf16, #tpu.memory_space<vmem>>, vector<32x384xbf16>
    %c0_4 = arith.constant 0 : index
    %c0_5 = arith.constant 0 : index
    %5 = vector.load %arg4[%c0_4, %c0_5] : memref<384x128xbf16, #tpu.memory_space<vmem>>, vector<384x128xbf16>
    %cst = arith.constant dense<0.000000e+00> : vector<32x128xf32>
    %6 = tpu.matmul %4, %5, %cst {dimension_numbers = #tpu.dot_dimension_numbers<[1], [0], [0], [1], [0, 0, 1, 1], [], []>} : vector<32x384xbf16>, vector<384x128xbf16>, vector<32x128xf32> -> vector<32x128xf32>
    %7 = arith.addf %3, %6 : vector<32x128xf32>
    %c0_6 = arith.constant 0 : index
    %c0_7 = arith.constant 0 : index
    %8 = vector.load %arg6[%c0_6, %c0_7] : memref<32x128xf32, #tpu.memory_space<vmem>>, vector<32x128xf32>
    tpu.vector_store %arg6[%c0_6, %c0_7], %7 {strides = array<i32>} : memref<32x128xf32, #tpu.memory_space<vmem>>, vector<32x128xf32>,
    %c2_i32 = arith.constant 2 : i32
    %9 = arith.cmpi eq, %arg2, %c2_i32 : i32
    %10 = arith.extui %9 : i1 to i32
    %c0_i32_8 = arith.constant 0 : i32
    %11 = arith.cmpi ne, %10, %c0_i32_8 : i32
    scf.if %11 {
      %c0_9 = arith.constant 0 : index
      %c0_10 = arith.constant 0 : index
      %12 = vector.load %arg6[%c0_9, %c0_10] : memref<32x128xf32, #tpu.memory_space<vmem>>, vector<32x128xf32>
      %c0_11 = arith.constant 0 : index
      %c0_12 = arith.constant 0 : index
      %13 = vector.load %arg5[%c0_11, %c0_12] : memref<1x128xf32, #tpu.memory_space<vmem>>, vector<1x128xf32>
      %14 = vector.broadcast %13 : vector<1x128xf32> to vector<32x128xf32>
      %15 = arith.addf %12, %14 : vector<32x128xf32>
      %cst_13 = arith.constant 0.000000e+00 : f32
      %16 = vector.broadcast %cst_13 : f32 to vector<32x128xf32>
      %17 = arith.maximumf %15, %16 : vector<32x128xf32>
      %c0_14 = arith.constant 0 : index
      %c0_15 = arith.constant 0 : index
      %18 = vector.load %arg6[%c0_14, %c0_15] : memref<32x128xf32, #tpu.memory_space<vmem>>, vector<32x128xf32>
      tpu.vector_store %arg6[%c0_14, %c0_15], %17 {strides = array<i32>} : memref<32x128xf32, #tpu.memory_space<vmem>>, vector<32x128xf32>,
    } else {
    }
    return
  }
  func.func @transform_0(%arg0: i32, %arg1: i32, %arg2: i32) -> (i32, i32) {
    %c0_i32 = arith.constant 0 : i32
    return %arg0, %arg2 : i32, i32
  }
  func.func @transform_1(%arg0: i32, %arg1: i32, %arg2: i32) -> (i32, i32) {
    %c0_i32 = arith.constant 0 : i32
    return %arg2, %arg1 : i32, i32
  }
  func.func @transform_2(%arg0: i32, %arg1: i32, %arg2: i32) -> (i32, i32) {
    %c0_i32 = arith.constant 0 : i32
    %c0_i32_0 = arith.constant 0 : i32
    return %c0_i32, %arg1 : i32, i32
  }
  func.func @transform_3(%arg0: i32, %arg1: i32, %arg2: i32) -> (i32, i32) {
    %c0_i32 = arith.constant 0 : i32
    return %arg0, %arg1 : i32, i32
  }
}

module attributes {stable_mosaic.version = 11 : i64} {
  func.func @matmul_bias_kernel(%arg0: i32, %arg1: i32, %arg2: i32, %arg3: memref<8x384xbf16, #tpu.memory_space<vmem>>, %arg4: memref<384x128xbf16, #tpu.memory_space<vmem>>, %arg5: memref<1x128xf32, #tpu.memory_space<vmem>>, %arg6: memref<8x128xf32, #tpu.memory_space<vmem>>) attributes {dimension_semantics = [#tpu.dimension_semantics<parallel>, #tpu.dimension_semantics<parallel>, #tpu.dimension_semantics<arbitrary>], iteration_bounds = array<i64: 1, 1, 3>, scalar_prefetch = 0 : i64, scratch_operands = 0 : i64, tpu.core_type = #tpu.core_type<tc>, window_params = [{transform_indices = @transform_0, window_bounds = array<i64: 8, 384>}, {transform_indices = @transform_1, window_bounds = array<i64: 384, 128>}, {transform_indices = @transform_2, window_bounds = array<i64: 1, 128>}, {transform_indices = @transform_3, window_bounds = array<i64: 8, 128>}]} {
    %c0_i32 = arith.constant 0 : i32
    %0 = arith.cmpi eq, %arg2, %c0_i32 : i32
    %1 = arith.extui %0 : i1 to i32
    %c0_i32_0 = arith.constant 0 : i32
    %2 = arith.cmpi ne, %1, %c0_i32_0 : i32
    scf.if %2 {
      %cst_9 = arith.constant 0.000000e+00 : f32
      %12 = vector.broadcast %cst_9 : f32 to vector<8x128xf32>
      %c0_10 = arith.constant 0 : index
      %c0_11 = arith.constant 0 : index
      %13 = vector.load %arg6[%c0_10, %c0_11] : memref<8x128xf32, #tpu.memory_space<vmem>>, vector<8x128xf32>
      tpu.vector_store %arg6[%c0_10, %c0_11], %12 {strides = array<i32>} : memref<8x128xf32, #tpu.memory_space<vmem>>, vector<8x128xf32>,
    } else {
    }
    %c0 = arith.constant 0 : index
    %c0_1 = arith.constant 0 : index
    %3 = vector.load %arg6[%c0, %c0_1] : memref<8x128xf32, #tpu.memory_space<vmem>>, vector<8x128xf32>
    %c0_2 = arith.constant 0 : index
    %c0_3 = arith.constant 0 : index
    %4 = vector.load %arg3[%c0_2, %c0_3] : memref<8x384xbf16, #tpu.memory_space<vmem>>, vector<8x384xbf16>
    %c0_4 = arith.constant 0 : index
    %c0_5 = arith.constant 0 : index
    %5 = vector.load %arg4[%c0_4, %c0_5] : memref<384x128xbf16, #tpu.memory_space<vmem>>, vector<384x128xbf16>
    %cst = arith.constant dense<0.000000e+00> : vector<8x128xf32>
    %6 = tpu.matmul %4, %5, %cst {dimension_numbers = #tpu.dot_dimension_numbers<[1], [0], [0], [1], [0, 0, 1, 1], [], []>} : vector<8x384xbf16>, vector<384x128xbf16>, vector<8x128xf32> -> vector<8x128xf32>
    %7 = arith.addf %3, %6 : vector<8x128xf32>
    %c0_6 = arith.constant 0 : index
    %c0_7 = arith.constant 0 : index
    %8 = vector.load %arg6[%c0_6, %c0_7] : memref<8x128xf32, #tpu.memory_space<vmem>>, vector<8x128xf32>
    tpu.vector_store %arg6[%c0_6, %c0_7], %7 {strides = array<i32>} : memref<8x128xf32, #tpu.memory_space<vmem>>, vector<8x128xf32>,
    %c2_i32 = arith.constant 2 : i32
    %9 = arith.cmpi eq, %arg2, %c2_i32 : i32
    %10 = arith.extui %9 : i1 to i32
    %c0_i32_8 = arith.constant 0 : i32
    %11 = arith.cmpi ne, %10, %c0_i32_8 : i32
    scf.if %11 {
      %c0_9 = arith.constant 0 : index
      %c0_10 = arith.constant 0 : index
      %12 = vector.load %arg6[%c0_9, %c0_10] : memref<8x128xf32, #tpu.memory_space<vmem>>, vector<8x128xf32>
      %c0_11 = arith.constant 0 : index
      %c0_12 = arith.constant 0 : index
      %13 = vector.load %arg5[%c0_11, %c0_12] : memref<1x128xf32, #tpu.memory_space<vmem>>, vector<1x128xf32>
      %14 = vector.broadcast %13 : vector<1x128xf32> to vector<8x128xf32>
      %15 = arith.addf %12, %14 : vector<8x128xf32>
      %cst_13 = arith.constant 0.000000e+00 : f32
      %16 = vector.broadcast %cst_13 : f32 to vector<8x128xf32>
      %17 = arith.maximumf %15, %16 : vector<8x128xf32>
      %c0_14 = arith.constant 0 : index
      %c0_15 = arith.constant 0 : index
      %18 = vector.load %arg6[%c0_14, %c0_15] : memref<8x128xf32, #tpu.memory_space<vmem>>, vector<8x128xf32>
      tpu.vector_store %arg6[%c0_14, %c0_15], %17 {strides = array<i32>} : memref<8x128xf32, #tpu.memory_space<vmem>>, vector<8x128xf32>,
    } else {
    }
    return
  }
  func.func @transform_0(%arg0: i32, %arg1: i32, %arg2: i32) -> (i32, i32) {
    %c0_i32 = arith.constant 0 : i32
    return %arg0, %arg2 : i32, i32
  }
  func.func @transform_1(%arg0: i32, %arg1: i32, %arg2: i32) -> (i32, i32) {
    %c0_i32 = arith.constant 0 : i32
    return %arg2, %arg1 : i32, i32
  }
  func.func @transform_2(%arg0: i32, %arg1: i32, %arg2: i32) -> (i32, i32) {
    %c0_i32 = arith.constant 0 : i32
    %c0_i32_0 = arith.constant 0 : i32
    return %c0_i32, %arg1 : i32, i32
  }
  func.func @transform_3(%arg0: i32, %arg1: i32, %arg2: i32) -> (i32, i32) {
    %c0_i32 = arith.constant 0 : i32
    return %arg0, %arg1 : i32, i32
  }
}

module attributes {stable_mosaic.version = 11 : i64} {
  func.func @matmul_bias_kernel(%arg0: i32, %arg1: i32, %arg2: i32, %arg3: memref<8x128xbf16, #tpu.memory_space<vmem>>, %arg4: memref<128x128xbf16, #tpu.memory_space<vmem>>, %arg5: memref<1x128xf32, #tpu.memory_space<vmem>>, %arg6: memref<8x128xf32, #tpu.memory_space<vmem>>) attributes {dimension_semantics = [#tpu.dimension_semantics<parallel>, #tpu.dimension_semantics<parallel>, #tpu.dimension_semantics<arbitrary>], iteration_bounds = array<i64: 1, 1, 1>, scalar_prefetch = 0 : i64, scratch_operands = 0 : i64, tpu.core_type = #tpu.core_type<tc>, window_params = [{transform_indices = @transform_0, window_bounds = array<i64: 8, 128>}, {transform_indices = @transform_1, window_bounds = array<i64: 128, 128>}, {transform_indices = @transform_2, window_bounds = array<i64: 1, 128>}, {transform_indices = @transform_3, window_bounds = array<i64: 8, 128>}]} {
    %c0_i32 = arith.constant 0 : i32
    %0 = arith.cmpi eq, %arg2, %c0_i32 : i32
    %1 = arith.extui %0 : i1 to i32
    %c0_i32_0 = arith.constant 0 : i32
    %2 = arith.cmpi ne, %1, %c0_i32_0 : i32
    scf.if %2 {
      %cst_10 = arith.constant 0.000000e+00 : f32
      %12 = vector.broadcast %cst_10 : f32 to vector<8x128xf32>
      %c0_11 = arith.constant 0 : index
      %c0_12 = arith.constant 0 : index
      %13 = vector.load %arg6[%c0_11, %c0_12] : memref<8x128xf32, #tpu.memory_space<vmem>>, vector<8x128xf32>
      tpu.vector_store %arg6[%c0_11, %c0_12], %12 {strides = array<i32>} : memref<8x128xf32, #tpu.memory_space<vmem>>, vector<8x128xf32>,
    } else {
    }
    %c0 = arith.constant 0 : index
    %c0_1 = arith.constant 0 : index
    %3 = vector.load %arg6[%c0, %c0_1] : memref<8x128xf32, #tpu.memory_space<vmem>>, vector<8x128xf32>
    %c0_2 = arith.constant 0 : index
    %c0_3 = arith.constant 0 : index
    %4 = vector.load %arg3[%c0_2, %c0_3] : memref<8x128xbf16, #tpu.memory_space<vmem>>, vector<8x128xbf16>
    %c0_4 = arith.constant 0 : index
    %c0_5 = arith.constant 0 : index
    %5 = vector.load %arg4[%c0_4, %c0_5] : memref<128x128xbf16, #tpu.memory_space<vmem>>, vector<128x128xbf16>
    %cst = arith.constant dense<0.000000e+00> : vector<8x128xf32>
    %6 = tpu.matmul %4, %5, %cst {dimension_numbers = #tpu.dot_dimension_numbers<[1], [0], [0], [1], [0, 0, 1, 1], [], []>} : vector<8x128xbf16>, vector<128x128xbf16>, vector<8x128xf32> -> vector<8x128xf32>
    %7 = arith.addf %3, %6 : vector<8x128xf32>
    %c0_6 = arith.constant 0 : index
    %c0_7 = arith.constant 0 : index
    %8 = vector.load %arg6[%c0_6, %c0_7] : memref<8x128xf32, #tpu.memory_space<vmem>>, vector<8x128xf32>
    tpu.vector_store %arg6[%c0_6, %c0_7], %7 {strides = array<i32>} : memref<8x128xf32, #tpu.memory_space<vmem>>, vector<8x128xf32>,
    %c0_i32_8 = arith.constant 0 : i32
    %9 = arith.cmpi eq, %arg2, %c0_i32_8 : i32
    %10 = arith.extui %9 : i1 to i32
    %c0_i32_9 = arith.constant 0 : i32
    %11 = arith.cmpi ne, %10, %c0_i32_9 : i32
    scf.if %11 {
      %c0_10 = arith.constant 0 : index
      %c0_11 = arith.constant 0 : index
      %12 = vector.load %arg6[%c0_10, %c0_11] : memref<8x128xf32, #tpu.memory_space<vmem>>, vector<8x128xf32>
      %c0_12 = arith.constant 0 : index
      %c0_13 = arith.constant 0 : index
      %13 = vector.load %arg5[%c0_12, %c0_13] : memref<1x128xf32, #tpu.memory_space<vmem>>, vector<1x128xf32>
      %14 = vector.broadcast %13 : vector<1x128xf32> to vector<8x128xf32>
      %15 = arith.addf %12, %14 : vector<8x128xf32>
      %cst_14 = arith.constant 0.000000e+00 : f32
      %16 = vector.broadcast %cst_14 : f32 to vector<8x128xf32>
      %17 = arith.maximumf %15, %16 : vector<8x128xf32>
      %c0_15 = arith.constant 0 : index
      %c0_16 = arith.constant 0 : index
      %18 = vector.load %arg6[%c0_15, %c0_16] : memref<8x128xf32, #tpu.memory_space<vmem>>, vector<8x128xf32>
      tpu.vector_store %arg6[%c0_15, %c0_16], %17 {strides = array<i32>} : memref<8x128xf32, #tpu.memory_space<vmem>>, vector<8x128xf32>,
    } else {
    }
    return
  }
  func.func @transform_0(%arg0: i32, %arg1: i32, %arg2: i32) -> (i32, i32) {
    %c0_i32 = arith.constant 0 : i32
    return %arg0, %arg2 : i32, i32
  }
  func.func @transform_1(%arg0: i32, %arg1: i32, %arg2: i32) -> (i32, i32) {
    %c0_i32 = arith.constant 0 : i32
    return %arg2, %arg1 : i32, i32
  }
  func.func @transform_2(%arg0: i32, %arg1: i32, %arg2: i32) -> (i32, i32) {
    %c0_i32 = arith.constant 0 : i32
    %c0_i32_0 = arith.constant 0 : i32
    return %c0_i32, %arg1 : i32, i32
  }
  func.func @transform_3(%arg0: i32, %arg1: i32, %arg2: i32) -> (i32, i32) {
    %c0_i32 = arith.constant 0 : i32
    return %arg0, %arg1 : i32, i32
  }
}

module attributes {stable_mosaic.version = 11 : i64} {
  func.func @matmul_bias_kernel(%arg0: i32, %arg1: i32, %arg2: i32, %arg3: memref<8x128xbf16, #tpu.memory_space<vmem>>, %arg4: memref<128x256xbf16, #tpu.memory_space<vmem>>, %arg5: memref<1x256xf32, #tpu.memory_space<vmem>>, %arg6: memref<8x256xf32, #tpu.memory_space<vmem>>) attributes {dimension_semantics = [#tpu.dimension_semantics<parallel>, #tpu.dimension_semantics<parallel>, #tpu.dimension_semantics<arbitrary>], iteration_bounds = array<i64: 1, 2, 1>, scalar_prefetch = 0 : i64, scratch_operands = 0 : i64, tpu.core_type = #tpu.core_type<tc>, window_params = [{transform_indices = @transform_0, window_bounds = array<i64: 8, 128>}, {transform_indices = @transform_1, window_bounds = array<i64: 128, 256>}, {transform_indices = @transform_2, window_bounds = array<i64: 1, 256>}, {transform_indices = @transform_3, window_bounds = array<i64: 8, 256>}]} {
    %c0_i32 = arith.constant 0 : i32
    %0 = arith.cmpi eq, %arg2, %c0_i32 : i32
    %1 = arith.extui %0 : i1 to i32
    %c0_i32_0 = arith.constant 0 : i32
    %2 = arith.cmpi ne, %1, %c0_i32_0 : i32
    scf.if %2 {
      %cst_10 = arith.constant 0.000000e+00 : f32
      %12 = vector.broadcast %cst_10 : f32 to vector<8x256xf32>
      %c0_11 = arith.constant 0 : index
      %c0_12 = arith.constant 0 : index
      %13 = vector.load %arg6[%c0_11, %c0_12] : memref<8x256xf32, #tpu.memory_space<vmem>>, vector<8x256xf32>
      tpu.vector_store %arg6[%c0_11, %c0_12], %12 {strides = array<i32>} : memref<8x256xf32, #tpu.memory_space<vmem>>, vector<8x256xf32>,
    } else {
    }
    %c0 = arith.constant 0 : index
    %c0_1 = arith.constant 0 : index
    %3 = vector.load %arg6[%c0, %c0_1] : memref<8x256xf32, #tpu.memory_space<vmem>>, vector<8x256xf32>
    %c0_2 = arith.constant 0 : index
    %c0_3 = arith.constant 0 : index
    %4 = vector.load %arg3[%c0_2, %c0_3] : memref<8x128xbf16, #tpu.memory_space<vmem>>, vector<8x128xbf16>
    %c0_4 = arith.constant 0 : index
    %c0_5 = arith.constant 0 : index
    %5 = vector.load %arg4[%c0_4, %c0_5] : memref<128x256xbf16, #tpu.memory_space<vmem>>, vector<128x256xbf16>
    %cst = arith.constant dense<0.000000e+00> : vector<8x256xf32>
    %6 = tpu.matmul %4, %5, %cst {dimension_numbers = #tpu.dot_dimension_numbers<[1], [0], [0], [1], [0, 0, 1, 1], [], []>} : vector<8x128xbf16>, vector<128x256xbf16>, vector<8x256xf32> -> vector<8x256xf32>
    %7 = arith.addf %3, %6 : vector<8x256xf32>
    %c0_6 = arith.constant 0 : index
    %c0_7 = arith.constant 0 : index
    %8 = vector.load %arg6[%c0_6, %c0_7] : memref<8x256xf32, #tpu.memory_space<vmem>>, vector<8x256xf32>
    tpu.vector_store %arg6[%c0_6, %c0_7], %7 {strides = array<i32>} : memref<8x256xf32, #tpu.memory_space<vmem>>, vector<8x256xf32>,
    %c0_i32_8 = arith.constant 0 : i32
    %9 = arith.cmpi eq, %arg2, %c0_i32_8 : i32
    %10 = arith.extui %9 : i1 to i32
    %c0_i32_9 = arith.constant 0 : i32
    %11 = arith.cmpi ne, %10, %c0_i32_9 : i32
    scf.if %11 {
      %c0_10 = arith.constant 0 : index
      %c0_11 = arith.constant 0 : index
      %12 = vector.load %arg6[%c0_10, %c0_11] : memref<8x256xf32, #tpu.memory_space<vmem>>, vector<8x256xf32>
      %c0_12 = arith.constant 0 : index
      %c0_13 = arith.constant 0 : index
      %13 = vector.load %arg5[%c0_12, %c0_13] : memref<1x256xf32, #tpu.memory_space<vmem>>, vector<1x256xf32>
      %14 = vector.broadcast %13 : vector<1x256xf32> to vector<8x256xf32>
      %15 = arith.addf %12, %14 : vector<8x256xf32>
      %c0_14 = arith.constant 0 : index
      %c0_15 = arith.constant 0 : index
      %16 = vector.load %arg6[%c0_14, %c0_15] : memref<8x256xf32, #tpu.memory_space<vmem>>, vector<8x256xf32>
      tpu.vector_store %arg6[%c0_14, %c0_15], %15 {strides = array<i32>} : memref<8x256xf32, #tpu.memory_space<vmem>>, vector<8x256xf32>,
    } else {
    }
    return
  }
  func.func @transform_0(%arg0: i32, %arg1: i32, %arg2: i32) -> (i32, i32) {
    %c0_i32 = arith.constant 0 : i32
    return %arg0, %arg2 : i32, i32
  }
  func.func @transform_1(%arg0: i32, %arg1: i32, %arg2: i32) -> (i32, i32) {
    %c0_i32 = arith.constant 0 : i32
    return %arg2, %arg1 : i32, i32
  }
  func.func @transform_2(%arg0: i32, %arg1: i32, %arg2: i32) -> (i32, i32) {
    %c0_i32 = arith.constant 0 : i32
    %c0_i32_0 = arith.constant 0 : i32
    return %c0_i32, %arg1 : i32, i32
  }
  func.func @transform_3(%arg0: i32, %arg1: i32, %arg2: i32) -> (i32, i32) {
    %c0_i32 = arith.constant 0 : i32
    return %arg0, %arg1 : i32, i32
  }
}

module attributes {stable_mosaic.version = 11 : i64} {
  func.func @matmul_bias_kernel(%arg0: i32, %arg1: i32, %arg2: i32, %arg3: memref<8x384xbf16, #tpu.memory_space<vmem>>, %arg4: memref<384x128xbf16, #tpu.memory_space<vmem>>, %arg5: memref<1x128xf32, #tpu.memory_space<vmem>>, %arg6: memref<8x128xf32, #tpu.memory_space<vmem>>) attributes {dimension_semantics = [#tpu.dimension_semantics<parallel>, #tpu.dimension_semantics<parallel>, #tpu.dimension_semantics<arbitrary>], iteration_bounds = array<i64: 1, 1, 6>, scalar_prefetch = 0 : i64, scratch_operands = 0 : i64, tpu.core_type = #tpu.core_type<tc>, window_params = [{transform_indices = @transform_0, window_bounds = array<i64: 8, 384>}, {transform_indices = @transform_1, window_bounds = array<i64: 384, 128>}, {transform_indices = @transform_2, window_bounds = array<i64: 1, 128>}, {transform_indices = @transform_3, window_bounds = array<i64: 8, 128>}]} {
    %c0_i32 = arith.constant 0 : i32
    %0 = arith.cmpi eq, %arg2, %c0_i32 : i32
    %1 = arith.extui %0 : i1 to i32
    %c0_i32_0 = arith.constant 0 : i32
    %2 = arith.cmpi ne, %1, %c0_i32_0 : i32
    scf.if %2 {
      %cst_9 = arith.constant 0.000000e+00 : f32
      %12 = vector.broadcast %cst_9 : f32 to vector<8x128xf32>
      %c0_10 = arith.constant 0 : index
      %c0_11 = arith.constant 0 : index
      %13 = vector.load %arg6[%c0_10, %c0_11] : memref<8x128xf32, #tpu.memory_space<vmem>>, vector<8x128xf32>
      tpu.vector_store %arg6[%c0_10, %c0_11], %12 {strides = array<i32>} : memref<8x128xf32, #tpu.memory_space<vmem>>, vector<8x128xf32>,
    } else {
    }
    %c0 = arith.constant 0 : index
    %c0_1 = arith.constant 0 : index
    %3 = vector.load %arg6[%c0, %c0_1] : memref<8x128xf32, #tpu.memory_space<vmem>>, vector<8x128xf32>
    %c0_2 = arith.constant 0 : index
    %c0_3 = arith.constant 0 : index
    %4 = vector.load %arg3[%c0_2, %c0_3] : memref<8x384xbf16, #tpu.memory_space<vmem>>, vector<8x384xbf16>
    %c0_4 = arith.constant 0 : index
    %c0_5 = arith.constant 0 : index
    %5 = vector.load %arg4[%c0_4, %c0_5] : memref<384x128xbf16, #tpu.memory_space<vmem>>, vector<384x128xbf16>
    %cst = arith.constant dense<0.000000e+00> : vector<8x128xf32>
    %6 = tpu.matmul %4, %5, %cst {dimension_numbers = #tpu.dot_dimension_numbers<[1], [0], [0], [1], [0, 0, 1, 1], [], []>} : vector<8x384xbf16>, vector<384x128xbf16>, vector<8x128xf32> -> vector<8x128xf32>
    %7 = arith.addf %3, %6 : vector<8x128xf32>
    %c0_6 = arith.constant 0 : index
    %c0_7 = arith.constant 0 : index
    %8 = vector.load %arg6[%c0_6, %c0_7] : memref<8x128xf32, #tpu.memory_space<vmem>>, vector<8x128xf32>
    tpu.vector_store %arg6[%c0_6, %c0_7], %7 {strides = array<i32>} : memref<8x128xf32, #tpu.memory_space<vmem>>, vector<8x128xf32>,
    %c5_i32 = arith.constant 5 : i32
    %9 = arith.cmpi eq, %arg2, %c5_i32 : i32
    %10 = arith.extui %9 : i1 to i32
    %c0_i32_8 = arith.constant 0 : i32
    %11 = arith.cmpi ne, %10, %c0_i32_8 : i32
    scf.if %11 {
      %c0_9 = arith.constant 0 : index
      %c0_10 = arith.constant 0 : index
      %12 = vector.load %arg6[%c0_9, %c0_10] : memref<8x128xf32, #tpu.memory_space<vmem>>, vector<8x128xf32>
      %c0_11 = arith.constant 0 : index
      %c0_12 = arith.constant 0 : index
      %13 = vector.load %arg5[%c0_11, %c0_12] : memref<1x128xf32, #tpu.memory_space<vmem>>, vector<1x128xf32>
      %14 = vector.broadcast %13 : vector<1x128xf32> to vector<8x128xf32>
      %15 = arith.addf %12, %14 : vector<8x128xf32>
      %cst_13 = arith.constant 0.000000e+00 : f32
      %16 = vector.broadcast %cst_13 : f32 to vector<8x128xf32>
      %17 = arith.maximumf %15, %16 : vector<8x128xf32>
      %c0_14 = arith.constant 0 : index
      %c0_15 = arith.constant 0 : index
      %18 = vector.load %arg6[%c0_14, %c0_15] : memref<8x128xf32, #tpu.memory_space<vmem>>, vector<8x128xf32>
      tpu.vector_store %arg6[%c0_14, %c0_15], %17 {strides = array<i32>} : memref<8x128xf32, #tpu.memory_space<vmem>>, vector<8x128xf32>,
    } else {
    }
    return
  }
  func.func @transform_0(%arg0: i32, %arg1: i32, %arg2: i32) -> (i32, i32) {
    %c0_i32 = arith.constant 0 : i32
    return %arg0, %arg2 : i32, i32
  }
  func.func @transform_1(%arg0: i32, %arg1: i32, %arg2: i32) -> (i32, i32) {
    %c0_i32 = arith.constant 0 : i32
    return %arg2, %arg1 : i32, i32
  }
  func.func @transform_2(%arg0: i32, %arg1: i32, %arg2: i32) -> (i32, i32) {
    %c0_i32 = arith.constant 0 : i32
    %c0_i32_0 = arith.constant 0 : i32
    return %c0_i32, %arg1 : i32, i32
  }
  func.func @transform_3(%arg0: i32, %arg1: i32, %arg2: i32) -> (i32, i32) {
    %c0_i32 = arith.constant 0 : i32
    return %arg0, %arg1 : i32, i32
  }
}

module attributes {stable_mosaic.version = 11 : i64} {
  func.func @matmul_bias_kernel(%arg0: i32, %arg1: i32, %arg2: i32, %arg3: memref<32x384xbf16, #tpu.memory_space<vmem>>, %arg4: memref<384x128xbf16, #tpu.memory_space<vmem>>, %arg5: memref<1x128xf32, #tpu.memory_space<vmem>>, %arg6: memref<32x128xf32, #tpu.memory_space<vmem>>) attributes {dimension_semantics = [#tpu.dimension_semantics<parallel>, #tpu.dimension_semantics<parallel>, #tpu.dimension_semantics<arbitrary>], iteration_bounds = array<i64: 1, 1, 6>, scalar_prefetch = 0 : i64, scratch_operands = 0 : i64, tpu.core_type = #tpu.core_type<tc>, window_params = [{transform_indices = @transform_0, window_bounds = array<i64: 32, 384>}, {transform_indices = @transform_1, window_bounds = array<i64: 384, 128>}, {transform_indices = @transform_2, window_bounds = array<i64: 1, 128>}, {transform_indices = @transform_3, window_bounds = array<i64: 32, 128>}]} {
    %c0_i32 = arith.constant 0 : i32
    %0 = arith.cmpi eq, %arg2, %c0_i32 : i32
    %1 = arith.extui %0 : i1 to i32
    %c0_i32_0 = arith.constant 0 : i32
    %2 = arith.cmpi ne, %1, %c0_i32_0 : i32
    scf.if %2 {
      %cst_9 = arith.constant 0.000000e+00 : f32
      %12 = vector.broadcast %cst_9 : f32 to vector<32x128xf32>
      %c0_10 = arith.constant 0 : index
      %c0_11 = arith.constant 0 : index
      %13 = vector.load %arg6[%c0_10, %c0_11] : memref<32x128xf32, #tpu.memory_space<vmem>>, vector<32x128xf32>
      tpu.vector_store %arg6[%c0_10, %c0_11], %12 {strides = array<i32>} : memref<32x128xf32, #tpu.memory_space<vmem>>, vector<32x128xf32>,
    } else {
    }
    %c0 = arith.constant 0 : index
    %c0_1 = arith.constant 0 : index
    %3 = vector.load %arg6[%c0, %c0_1] : memref<32x128xf32, #tpu.memory_space<vmem>>, vector<32x128xf32>
    %c0_2 = arith.constant 0 : index
    %c0_3 = arith.constant 0 : index
    %4 = vector.load %arg3[%c0_2, %c0_3] : memref<32x384xbf16, #tpu.memory_space<vmem>>, vector<32x384xbf16>
    %c0_4 = arith.constant 0 : index
    %c0_5 = arith.constant 0 : index
    %5 = vector.load %arg4[%c0_4, %c0_5] : memref<384x128xbf16, #tpu.memory_space<vmem>>, vector<384x128xbf16>
    %cst = arith.constant dense<0.000000e+00> : vector<32x128xf32>
    %6 = tpu.matmul %4, %5, %cst {dimension_numbers = #tpu.dot_dimension_numbers<[1], [0], [0], [1], [0, 0, 1, 1], [], []>} : vector<32x384xbf16>, vector<384x128xbf16>, vector<32x128xf32> -> vector<32x128xf32>
    %7 = arith.addf %3, %6 : vector<32x128xf32>
    %c0_6 = arith.constant 0 : index
    %c0_7 = arith.constant 0 : index
    %8 = vector.load %arg6[%c0_6, %c0_7] : memref<32x128xf32, #tpu.memory_space<vmem>>, vector<32x128xf32>
    tpu.vector_store %arg6[%c0_6, %c0_7], %7 {strides = array<i32>} : memref<32x128xf32, #tpu.memory_space<vmem>>, vector<32x128xf32>,
    %c5_i32 = arith.constant 5 : i32
    %9 = arith.cmpi eq, %arg2, %c5_i32 : i32
    %10 = arith.extui %9 : i1 to i32
    %c0_i32_8 = arith.constant 0 : i32
    %11 = arith.cmpi ne, %10, %c0_i32_8 : i32
    scf.if %11 {
      %c0_9 = arith.constant 0 : index
      %c0_10 = arith.constant 0 : index
      %12 = vector.load %arg6[%c0_9, %c0_10] : memref<32x128xf32, #tpu.memory_space<vmem>>, vector<32x128xf32>
      %c0_11 = arith.constant 0 : index
      %c0_12 = arith.constant 0 : index
      %13 = vector.load %arg5[%c0_11, %c0_12] : memref<1x128xf32, #tpu.memory_space<vmem>>, vector<1x128xf32>
      %14 = vector.broadcast %13 : vector<1x128xf32> to vector<32x128xf32>
      %15 = arith.addf %12, %14 : vector<32x128xf32>
      %cst_13 = arith.constant 0.000000e+00 : f32
      %16 = vector.broadcast %cst_13 : f32 to vector<32x128xf32>
      %17 = arith.maximumf %15, %16 : vector<32x128xf32>
      %c0_14 = arith.constant 0 : index
      %c0_15 = arith.constant 0 : index
      %18 = vector.load %arg6[%c0_14, %c0_15] : memref<32x128xf32, #tpu.memory_space<vmem>>, vector<32x128xf32>
      tpu.vector_store %arg6[%c0_14, %c0_15], %17 {strides = array<i32>} : memref<32x128xf32, #tpu.memory_space<vmem>>, vector<32x128xf32>,
    } else {
    }
    return
  }
  func.func @transform_0(%arg0: i32, %arg1: i32, %arg2: i32) -> (i32, i32) {
    %c0_i32 = arith.constant 0 : i32
    return %arg0, %arg2 : i32, i32
  }
  func.func @transform_1(%arg0: i32, %arg1: i32, %arg2: i32) -> (i32, i32) {
    %c0_i32 = arith.constant 0 : i32
    return %arg2, %arg1 : i32, i32
  }
  func.func @transform_2(%arg0: i32, %arg1: i32, %arg2: i32) -> (i32, i32) {
    %c0_i32 = arith.constant 0 : i32
    %c0_i32_0 = arith.constant 0 : i32
    return %c0_i32, %arg1 : i32, i32
  }
  func.func @transform_3(%arg0: i32, %arg1: i32, %arg2: i32) -> (i32, i32) {
    %c0_i32 = arith.constant 0 : i32
    return %arg0, %arg1 : i32, i32
  }
}

module attributes {stable_mosaic.version = 11 : i64} {
  func.func @matmul_bias_kernel(%arg0: i32, %arg1: i32, %arg2: i32, %arg3: memref<32x128xbf16, #tpu.memory_space<vmem>>, %arg4: memref<128x256xbf16, #tpu.memory_space<vmem>>, %arg5: memref<1x256xf32, #tpu.memory_space<vmem>>, %arg6: memref<32x256xf32, #tpu.memory_space<vmem>>) attributes {dimension_semantics = [#tpu.dimension_semantics<parallel>, #tpu.dimension_semantics<parallel>, #tpu.dimension_semantics<arbitrary>], iteration_bounds = array<i64: 1, 2, 1>, scalar_prefetch = 0 : i64, scratch_operands = 0 : i64, tpu.core_type = #tpu.core_type<tc>, window_params = [{transform_indices = @transform_0, window_bounds = array<i64: 32, 128>}, {transform_indices = @transform_1, window_bounds = array<i64: 128, 256>}, {transform_indices = @transform_2, window_bounds = array<i64: 1, 256>}, {transform_indices = @transform_3, window_bounds = array<i64: 32, 256>}]} {
    %c0_i32 = arith.constant 0 : i32
    %0 = arith.cmpi eq, %arg2, %c0_i32 : i32
    %1 = arith.extui %0 : i1 to i32
    %c0_i32_0 = arith.constant 0 : i32
    %2 = arith.cmpi ne, %1, %c0_i32_0 : i32
    scf.if %2 {
      %cst_10 = arith.constant 0.000000e+00 : f32
      %12 = vector.broadcast %cst_10 : f32 to vector<32x256xf32>
      %c0_11 = arith.constant 0 : index
      %c0_12 = arith.constant 0 : index
      %13 = vector.load %arg6[%c0_11, %c0_12] : memref<32x256xf32, #tpu.memory_space<vmem>>, vector<32x256xf32>
      tpu.vector_store %arg6[%c0_11, %c0_12], %12 {strides = array<i32>} : memref<32x256xf32, #tpu.memory_space<vmem>>, vector<32x256xf32>,
    } else {
    }
    %c0 = arith.constant 0 : index
    %c0_1 = arith.constant 0 : index
    %3 = vector.load %arg6[%c0, %c0_1] : memref<32x256xf32, #tpu.memory_space<vmem>>, vector<32x256xf32>
    %c0_2 = arith.constant 0 : index
    %c0_3 = arith.constant 0 : index
    %4 = vector.load %arg3[%c0_2, %c0_3] : memref<32x128xbf16, #tpu.memory_space<vmem>>, vector<32x128xbf16>
    %c0_4 = arith.constant 0 : index
    %c0_5 = arith.constant 0 : index
    %5 = vector.load %arg4[%c0_4, %c0_5] : memref<128x256xbf16, #tpu.memory_space<vmem>>, vector<128x256xbf16>
    %cst = arith.constant dense<0.000000e+00> : vector<32x256xf32>
    %6 = tpu.matmul %4, %5, %cst {dimension_numbers = #tpu.dot_dimension_numbers<[1], [0], [0], [1], [0, 0, 1, 1], [], []>} : vector<32x128xbf16>, vector<128x256xbf16>, vector<32x256xf32> -> vector<32x256xf32>
    %7 = arith.addf %3, %6 : vector<32x256xf32>
    %c0_6 = arith.constant 0 : index
    %c0_7 = arith.constant 0 : index
    %8 = vector.load %arg6[%c0_6, %c0_7] : memref<32x256xf32, #tpu.memory_space<vmem>>, vector<32x256xf32>
    tpu.vector_store %arg6[%c0_6, %c0_7], %7 {strides = array<i32>} : memref<32x256xf32, #tpu.memory_space<vmem>>, vector<32x256xf32>,
    %c0_i32_8 = arith.constant 0 : i32
    %9 = arith.cmpi eq, %arg2, %c0_i32_8 : i32
    %10 = arith.extui %9 : i1 to i32
    %c0_i32_9 = arith.constant 0 : i32
    %11 = arith.cmpi ne, %10, %c0_i32_9 : i32
    scf.if %11 {
      %c0_10 = arith.constant 0 : index
      %c0_11 = arith.constant 0 : index
      %12 = vector.load %arg6[%c0_10, %c0_11] : memref<32x256xf32, #tpu.memory_space<vmem>>, vector<32x256xf32>
      %c0_12 = arith.constant 0 : index
      %c0_13 = arith.constant 0 : index
      %13 = vector.load %arg5[%c0_12, %c0_13] : memref<1x256xf32, #tpu.memory_space<vmem>>, vector<1x256xf32>
      %14 = vector.broadcast %13 : vector<1x256xf32> to vector<32x256xf32>
      %15 = arith.addf %12, %14 : vector<32x256xf32>
      %c0_14 = arith.constant 0 : index
      %c0_15 = arith.constant 0 : index
      %16 = vector.load %arg6[%c0_14, %c0_15] : memref<32x256xf32, #tpu.memory_space<vmem>>, vector<32x256xf32>
      tpu.vector_store %arg6[%c0_14, %c0_15], %15 {strides = array<i32>} : memref<32x256xf32, #tpu.memory_space<vmem>>, vector<32x256xf32>,
    } else {
    }
    return
  }
  func.func @transform_0(%arg0: i32, %arg1: i32, %arg2: i32) -> (i32, i32) {
    %c0_i32 = arith.constant 0 : i32
    return %arg0, %arg2 : i32, i32
  }
  func.func @transform_1(%arg0: i32, %arg1: i32, %arg2: i32) -> (i32, i32) {
    %c0_i32 = arith.constant 0 : i32
    return %arg2, %arg1 : i32, i32
  }
  func.func @transform_2(%arg0: i32, %arg1: i32, %arg2: i32) -> (i32, i32) {
    %c0_i32 = arith.constant 0 : i32
    %c0_i32_0 = arith.constant 0 : i32
    return %c0_i32, %arg1 : i32, i32
  }
  func.func @transform_3(%arg0: i32, %arg1: i32, %arg2: i32) -> (i32, i32) {
    %c0_i32 = arith.constant 0 : i32
    return %arg0, %arg1 : i32, i32
  }
}

module attributes {stable_mosaic.version = 11 : i64} {
  func.func @matmul_bias_kernel(%arg0: i32, %arg1: i32, %arg2: i32, %arg3: memref<128x384xbf16, #tpu.memory_space<vmem>>, %arg4: memref<384x128xbf16, #tpu.memory_space<vmem>>, %arg5: memref<1x128xf32, #tpu.memory_space<vmem>>, %arg6: memref<128x128xf32, #tpu.memory_space<vmem>>) attributes {dimension_semantics = [#tpu.dimension_semantics<parallel>, #tpu.dimension_semantics<parallel>, #tpu.dimension_semantics<arbitrary>], iteration_bounds = array<i64: 1, 1, 6>, scalar_prefetch = 0 : i64, scratch_operands = 0 : i64, tpu.core_type = #tpu.core_type<tc>, window_params = [{transform_indices = @transform_0, window_bounds = array<i64: 128, 384>}, {transform_indices = @transform_1, window_bounds = array<i64: 384, 128>}, {transform_indices = @transform_2, window_bounds = array<i64: 1, 128>}, {transform_indices = @transform_3, window_bounds = array<i64: 128, 128>}]} {
    %c0_i32 = arith.constant 0 : i32
    %0 = arith.cmpi eq, %arg2, %c0_i32 : i32
    %1 = arith.extui %0 : i1 to i32
    %c0_i32_0 = arith.constant 0 : i32
    %2 = arith.cmpi ne, %1, %c0_i32_0 : i32
    scf.if %2 {
      %cst_9 = arith.constant 0.000000e+00 : f32
      %12 = vector.broadcast %cst_9 : f32 to vector<128x128xf32>
      %c0_10 = arith.constant 0 : index
      %c0_11 = arith.constant 0 : index
      %13 = vector.load %arg6[%c0_10, %c0_11] : memref<128x128xf32, #tpu.memory_space<vmem>>, vector<128x128xf32>
      tpu.vector_store %arg6[%c0_10, %c0_11], %12 {strides = array<i32>} : memref<128x128xf32, #tpu.memory_space<vmem>>, vector<128x128xf32>,
    } else {
    }
    %c0 = arith.constant 0 : index
    %c0_1 = arith.constant 0 : index
    %3 = vector.load %arg6[%c0, %c0_1] : memref<128x128xf32, #tpu.memory_space<vmem>>, vector<128x128xf32>
    %c0_2 = arith.constant 0 : index
    %c0_3 = arith.constant 0 : index
    %4 = vector.load %arg3[%c0_2, %c0_3] : memref<128x384xbf16, #tpu.memory_space<vmem>>, vector<128x384xbf16>
    %c0_4 = arith.constant 0 : index
    %c0_5 = arith.constant 0 : index
    %5 = vector.load %arg4[%c0_4, %c0_5] : memref<384x128xbf16, #tpu.memory_space<vmem>>, vector<384x128xbf16>
    %cst = arith.constant dense<0.000000e+00> : vector<128x128xf32>
    %6 = tpu.matmul %4, %5, %cst {dimension_numbers = #tpu.dot_dimension_numbers<[1], [0], [0], [1], [0, 0, 1, 1], [], []>} : vector<128x384xbf16>, vector<384x128xbf16>, vector<128x128xf32> -> vector<128x128xf32>
    %7 = arith.addf %3, %6 : vector<128x128xf32>
    %c0_6 = arith.constant 0 : index
    %c0_7 = arith.constant 0 : index
    %8 = vector.load %arg6[%c0_6, %c0_7] : memref<128x128xf32, #tpu.memory_space<vmem>>, vector<128x128xf32>
    tpu.vector_store %arg6[%c0_6, %c0_7], %7 {strides = array<i32>} : memref<128x128xf32, #tpu.memory_space<vmem>>, vector<128x128xf32>,
    %c5_i32 = arith.constant 5 : i32
    %9 = arith.cmpi eq, %arg2, %c5_i32 : i32
    %10 = arith.extui %9 : i1 to i32
    %c0_i32_8 = arith.constant 0 : i32
    %11 = arith.cmpi ne, %10, %c0_i32_8 : i32
    scf.if %11 {
      %c0_9 = arith.constant 0 : index
      %c0_10 = arith.constant 0 : index
      %12 = vector.load %arg6[%c0_9, %c0_10] : memref<128x128xf32, #tpu.memory_space<vmem>>, vector<128x128xf32>
      %c0_11 = arith.constant 0 : index
      %c0_12 = arith.constant 0 : index
      %13 = vector.load %arg5[%c0_11, %c0_12] : memref<1x128xf32, #tpu.memory_space<vmem>>, vector<1x128xf32>
      %14 = vector.broadcast %13 : vector<1x128xf32> to vector<128x128xf32>
      %15 = arith.addf %12, %14 : vector<128x128xf32>
      %cst_13 = arith.constant 0.000000e+00 : f32
      %16 = vector.broadcast %cst_13 : f32 to vector<128x128xf32>
      %17 = arith.maximumf %15, %16 : vector<128x128xf32>
      %c0_14 = arith.constant 0 : index
      %c0_15 = arith.constant 0 : index
      %18 = vector.load %arg6[%c0_14, %c0_15] : memref<128x128xf32, #tpu.memory_space<vmem>>, vector<128x128xf32>
      tpu.vector_store %arg6[%c0_14, %c0_15], %17 {strides = array<i32>} : memref<128x128xf32, #tpu.memory_space<vmem>>, vector<128x128xf32>,
    } else {
    }
    return
  }
  func.func @transform_0(%arg0: i32, %arg1: i32, %arg2: i32) -> (i32, i32) {
    %c0_i32 = arith.constant 0 : i32
    return %arg0, %arg2 : i32, i32
  }
  func.func @transform_1(%arg0: i32, %arg1: i32, %arg2: i32) -> (i32, i32) {
    %c0_i32 = arith.constant 0 : i32
    return %arg2, %arg1 : i32, i32
  }
  func.func @transform_2(%arg0: i32, %arg1: i32, %arg2: i32) -> (i32, i32) {
    %c0_i32 = arith.constant 0 : i32
    %c0_i32_0 = arith.constant 0 : i32
    return %c0_i32, %arg1 : i32, i32
  }
  func.func @transform_3(%arg0: i32, %arg1: i32, %arg2: i32) -> (i32, i32) {
    %c0_i32 = arith.constant 0 : i32
    return %arg0, %arg1 : i32, i32
  }
}

module attributes {stable_mosaic.version = 11 : i64} {
  func.func @matmul_bias_kernel(%arg0: i32, %arg1: i32, %arg2: i32, %arg3: memref<128x128xbf16, #tpu.memory_space<vmem>>, %arg4: memref<128x256xbf16, #tpu.memory_space<vmem>>, %arg5: memref<1x256xf32, #tpu.memory_space<vmem>>, %arg6: memref<128x256xf32, #tpu.memory_space<vmem>>) attributes {dimension_semantics = [#tpu.dimension_semantics<parallel>, #tpu.dimension_semantics<parallel>, #tpu.dimension_semantics<arbitrary>], iteration_bounds = array<i64: 1, 2, 1>, scalar_prefetch = 0 : i64, scratch_operands = 0 : i64, tpu.core_type = #tpu.core_type<tc>, window_params = [{transform_indices = @transform_0, window_bounds = array<i64: 128, 128>}, {transform_indices = @transform_1, window_bounds = array<i64: 128, 256>}, {transform_indices = @transform_2, window_bounds = array<i64: 1, 256>}, {transform_indices = @transform_3, window_bounds = array<i64: 128, 256>}]} {
    %c0_i32 = arith.constant 0 : i32
    %0 = arith.cmpi eq, %arg2, %c0_i32 : i32
    %1 = arith.extui %0 : i1 to i32
    %c0_i32_0 = arith.constant 0 : i32
    %2 = arith.cmpi ne, %1, %c0_i32_0 : i32
    scf.if %2 {
      %cst_10 = arith.constant 0.000000e+00 : f32
      %12 = vector.broadcast %cst_10 : f32 to vector<128x256xf32>
      %c0_11 = arith.constant 0 : index
      %c0_12 = arith.constant 0 : index
      %13 = vector.load %arg6[%c0_11, %c0_12] : memref<128x256xf32, #tpu.memory_space<vmem>>, vector<128x256xf32>
      tpu.vector_store %arg6[%c0_11, %c0_12], %12 {strides = array<i32>} : memref<128x256xf32, #tpu.memory_space<vmem>>, vector<128x256xf32>,
    } else {
    }
    %c0 = arith.constant 0 : index
    %c0_1 = arith.constant 0 : index
    %3 = vector.load %arg6[%c0, %c0_1] : memref<128x256xf32, #tpu.memory_space<vmem>>, vector<128x256xf32>
    %c0_2 = arith.constant 0 : index
    %c0_3 = arith.constant 0 : index
    %4 = vector.load %arg3[%c0_2, %c0_3] : memref<128x128xbf16, #tpu.memory_space<vmem>>, vector<128x128xbf16>
    %c0_4 = arith.constant 0 : index
    %c0_5 = arith.constant 0 : index
    %5 = vector.load %arg4[%c0_4, %c0_5] : memref<128x256xbf16, #tpu.memory_space<vmem>>, vector<128x256xbf16>
    %cst = arith.constant dense<0.000000e+00> : vector<128x256xf32>
    %6 = tpu.matmul %4, %5, %cst {dimension_numbers = #tpu.dot_dimension_numbers<[1], [0], [0], [1], [0, 0, 1, 1], [], []>} : vector<128x128xbf16>, vector<128x256xbf16>, vector<128x256xf32> -> vector<128x256xf32>
    %7 = arith.addf %3, %6 : vector<128x256xf32>
    %c0_6 = arith.constant 0 : index
    %c0_7 = arith.constant 0 : index
    %8 = vector.load %arg6[%c0_6, %c0_7] : memref<128x256xf32, #tpu.memory_space<vmem>>, vector<128x256xf32>
    tpu.vector_store %arg6[%c0_6, %c0_7], %7 {strides = array<i32>} : memref<128x256xf32, #tpu.memory_space<vmem>>, vector<128x256xf32>,
    %c0_i32_8 = arith.constant 0 : i32
    %9 = arith.cmpi eq, %arg2, %c0_i32_8 : i32
    %10 = arith.extui %9 : i1 to i32
    %c0_i32_9 = arith.constant 0 : i32
    %11 = arith.cmpi ne, %10, %c0_i32_9 : i32
    scf.if %11 {
      %c0_10 = arith.constant 0 : index
      %c0_11 = arith.constant 0 : index
      %12 = vector.load %arg6[%c0_10, %c0_11] : memref<128x256xf32, #tpu.memory_space<vmem>>, vector<128x256xf32>
      %c0_12 = arith.constant 0 : index
      %c0_13 = arith.constant 0 : index
      %13 = vector.load %arg5[%c0_12, %c0_13] : memref<1x256xf32, #tpu.memory_space<vmem>>, vector<1x256xf32>
      %14 = vector.broadcast %13 : vector<1x256xf32> to vector<128x256xf32>
      %15 = arith.addf %12, %14 : vector<128x256xf32>
      %c0_14 = arith.constant 0 : index
      %c0_15 = arith.constant 0 : index
      %16 = vector.load %arg6[%c0_14, %c0_15] : memref<128x256xf32, #tpu.memory_space<vmem>>, vector<128x256xf32>
      tpu.vector_store %arg6[%c0_14, %c0_15], %15 {strides = array<i32>} : memref<128x256xf32, #tpu.memory_space<vmem>>, vector<128x256xf32>,
    } else {
    }
    return
  }
  func.func @transform_0(%arg0: i32, %arg1: i32, %arg2: i32) -> (i32, i32) {
    %c0_i32 = arith.constant 0 : i32
    return %arg0, %arg2 : i32, i32
  }
  func.func @transform_1(%arg0: i32, %arg1: i32, %arg2: i32) -> (i32, i32) {
    %c0_i32 = arith.constant 0 : i32
    return %arg2, %arg1 : i32, i32
  }
  func.func @transform_2(%arg0: i32, %arg1: i32, %arg2: i32) -> (i32, i32) {
    %c0_i32 = arith.constant 0 : i32
    %c0_i32_0 = arith.constant 0 : i32
    return %c0_i32, %arg1 : i32, i32
  }
  func.func @transform_3(%arg0: i32, %arg1: i32, %arg2: i32) -> (i32, i32) {
    %c0_i32 = arith.constant 0 : i32
    return %arg0, %arg1 : i32, i32
  }
}

module attributes {stable_mosaic.version = 11 : i64} {
  func.func @matmul_bias_kernel(%arg0: i32, %arg1: i32, %arg2: i32, %arg3: memref<256x384xbf16, #tpu.memory_space<vmem>>, %arg4: memref<384x128xbf16, #tpu.memory_space<vmem>>, %arg5: memref<1x128xf32, #tpu.memory_space<vmem>>, %arg6: memref<256x128xf32, #tpu.memory_space<vmem>>) attributes {dimension_semantics = [#tpu.dimension_semantics<parallel>, #tpu.dimension_semantics<parallel>, #tpu.dimension_semantics<arbitrary>], iteration_bounds = array<i64: 2, 1, 6>, scalar_prefetch = 0 : i64, scratch_operands = 0 : i64, tpu.core_type = #tpu.core_type<tc>, window_params = [{transform_indices = @transform_0, window_bounds = array<i64: 256, 384>}, {transform_indices = @transform_1, window_bounds = array<i64: 384, 128>}, {transform_indices = @transform_2, window_bounds = array<i64: 1, 128>}, {transform_indices = @transform_3, window_bounds = array<i64: 256, 128>}]} {
    %c0_i32 = arith.constant 0 : i32
    %0 = arith.cmpi eq, %arg2, %c0_i32 : i32
    %1 = arith.extui %0 : i1 to i32
    %c0_i32_0 = arith.constant 0 : i32
    %2 = arith.cmpi ne, %1, %c0_i32_0 : i32
    scf.if %2 {
      %cst_9 = arith.constant 0.000000e+00 : f32
      %12 = vector.broadcast %cst_9 : f32 to vector<256x128xf32>
      %c0_10 = arith.constant 0 : index
      %c0_11 = arith.constant 0 : index
      %13 = vector.load %arg6[%c0_10, %c0_11] : memref<256x128xf32, #tpu.memory_space<vmem>>, vector<256x128xf32>
      tpu.vector_store %arg6[%c0_10, %c0_11], %12 {strides = array<i32>} : memref<256x128xf32, #tpu.memory_space<vmem>>, vector<256x128xf32>,
    } else {
    }
    %c0 = arith.constant 0 : index
    %c0_1 = arith.constant 0 : index
    %3 = vector.load %arg6[%c0, %c0_1] : memref<256x128xf32, #tpu.memory_space<vmem>>, vector<256x128xf32>
    %c0_2 = arith.constant 0 : index
    %c0_3 = arith.constant 0 : index
    %4 = vector.load %arg3[%c0_2, %c0_3] : memref<256x384xbf16, #tpu.memory_space<vmem>>, vector<256x384xbf16>
    %c0_4 = arith.constant 0 : index
    %c0_5 = arith.constant 0 : index
    %5 = vector.load %arg4[%c0_4, %c0_5] : memref<384x128xbf16, #tpu.memory_space<vmem>>, vector<384x128xbf16>
    %cst = arith.constant dense<0.000000e+00> : vector<256x128xf32>
    %6 = tpu.matmul %4, %5, %cst {dimension_numbers = #tpu.dot_dimension_numbers<[1], [0], [0], [1], [0, 0, 1, 1], [], []>} : vector<256x384xbf16>, vector<384x128xbf16>, vector<256x128xf32> -> vector<256x128xf32>
    %7 = arith.addf %3, %6 : vector<256x128xf32>
    %c0_6 = arith.constant 0 : index
    %c0_7 = arith.constant 0 : index
    %8 = vector.load %arg6[%c0_6, %c0_7] : memref<256x128xf32, #tpu.memory_space<vmem>>, vector<256x128xf32>
    tpu.vector_store %arg6[%c0_6, %c0_7], %7 {strides = array<i32>} : memref<256x128xf32, #tpu.memory_space<vmem>>, vector<256x128xf32>,
    %c5_i32 = arith.constant 5 : i32
    %9 = arith.cmpi eq, %arg2, %c5_i32 : i32
    %10 = arith.extui %9 : i1 to i32
    %c0_i32_8 = arith.constant 0 : i32
    %11 = arith.cmpi ne, %10, %c0_i32_8 : i32
    scf.if %11 {
      %c0_9 = arith.constant 0 : index
      %c0_10 = arith.constant 0 : index
      %12 = vector.load %arg6[%c0_9, %c0_10] : memref<256x128xf32, #tpu.memory_space<vmem>>, vector<256x128xf32>
      %c0_11 = arith.constant 0 : index
      %c0_12 = arith.constant 0 : index
      %13 = vector.load %arg5[%c0_11, %c0_12] : memref<1x128xf32, #tpu.memory_space<vmem>>, vector<1x128xf32>
      %14 = vector.broadcast %13 : vector<1x128xf32> to vector<256x128xf32>
      %15 = arith.addf %12, %14 : vector<256x128xf32>
      %cst_13 = arith.constant 0.000000e+00 : f32
      %16 = vector.broadcast %cst_13 : f32 to vector<256x128xf32>
      %17 = arith.maximumf %15, %16 : vector<256x128xf32>
      %c0_14 = arith.constant 0 : index
      %c0_15 = arith.constant 0 : index
      %18 = vector.load %arg6[%c0_14, %c0_15] : memref<256x128xf32, #tpu.memory_space<vmem>>, vector<256x128xf32>
      tpu.vector_store %arg6[%c0_14, %c0_15], %17 {strides = array<i32>} : memref<256x128xf32, #tpu.memory_space<vmem>>, vector<256x128xf32>,
    } else {
    }
    return
  }
  func.func @transform_0(%arg0: i32, %arg1: i32, %arg2: i32) -> (i32, i32) {
    %c0_i32 = arith.constant 0 : i32
    return %arg0, %arg2 : i32, i32
  }
  func.func @transform_1(%arg0: i32, %arg1: i32, %arg2: i32) -> (i32, i32) {
    %c0_i32 = arith.constant 0 : i32
    return %arg2, %arg1 : i32, i32
  }
  func.func @transform_2(%arg0: i32, %arg1: i32, %arg2: i32) -> (i32, i32) {
    %c0_i32 = arith.constant 0 : i32
    %c0_i32_0 = arith.constant 0 : i32
    return %c0_i32, %arg1 : i32, i32
  }
  func.func @transform_3(%arg0: i32, %arg1: i32, %arg2: i32) -> (i32, i32) {
    %c0_i32 = arith.constant 0 : i32
    return %arg0, %arg1 : i32, i32
  }
}

module attributes {stable_mosaic.version = 11 : i64} {
  func.func @matmul_bias_kernel(%arg0: i32, %arg1: i32, %arg2: i32, %arg3: memref<256x128xbf16, #tpu.memory_space<vmem>>, %arg4: memref<128x128xbf16, #tpu.memory_space<vmem>>, %arg5: memref<1x128xf32, #tpu.memory_space<vmem>>, %arg6: memref<256x128xf32, #tpu.memory_space<vmem>>) attributes {dimension_semantics = [#tpu.dimension_semantics<parallel>, #tpu.dimension_semantics<parallel>, #tpu.dimension_semantics<arbitrary>], iteration_bounds = array<i64: 2, 1, 1>, scalar_prefetch = 0 : i64, scratch_operands = 0 : i64, tpu.core_type = #tpu.core_type<tc>, window_params = [{transform_indices = @transform_0, window_bounds = array<i64: 256, 128>}, {transform_indices = @transform_1, window_bounds = array<i64: 128, 128>}, {transform_indices = @transform_2, window_bounds = array<i64: 1, 128>}, {transform_indices = @transform_3, window_bounds = array<i64: 256, 128>}]} {
    %c0_i32 = arith.constant 0 : i32
    %0 = arith.cmpi eq, %arg2, %c0_i32 : i32
    %1 = arith.extui %0 : i1 to i32
    %c0_i32_0 = arith.constant 0 : i32
    %2 = arith.cmpi ne, %1, %c0_i32_0 : i32
    scf.if %2 {
      %cst_10 = arith.constant 0.000000e+00 : f32
      %12 = vector.broadcast %cst_10 : f32 to vector<256x128xf32>
      %c0_11 = arith.constant 0 : index
      %c0_12 = arith.constant 0 : index
      %13 = vector.load %arg6[%c0_11, %c0_12] : memref<256x128xf32, #tpu.memory_space<vmem>>, vector<256x128xf32>
      tpu.vector_store %arg6[%c0_11, %c0_12], %12 {strides = array<i32>} : memref<256x128xf32, #tpu.memory_space<vmem>>, vector<256x128xf32>,
    } else {
    }
    %c0 = arith.constant 0 : index
    %c0_1 = arith.constant 0 : index
    %3 = vector.load %arg6[%c0, %c0_1] : memref<256x128xf32, #tpu.memory_space<vmem>>, vector<256x128xf32>
    %c0_2 = arith.constant 0 : index
    %c0_3 = arith.constant 0 : index
    %4 = vector.load %arg3[%c0_2, %c0_3] : memref<256x128xbf16, #tpu.memory_space<vmem>>, vector<256x128xbf16>
    %c0_4 = arith.constant 0 : index
    %c0_5 = arith.constant 0 : index
    %5 = vector.load %arg4[%c0_4, %c0_5] : memref<128x128xbf16, #tpu.memory_space<vmem>>, vector<128x128xbf16>
    %cst = arith.constant dense<0.000000e+00> : vector<256x128xf32>
    %6 = tpu.matmul %4, %5, %cst {dimension_numbers = #tpu.dot_dimension_numbers<[1], [0], [0], [1], [0, 0, 1, 1], [], []>} : vector<256x128xbf16>, vector<128x128xbf16>, vector<256x128xf32> -> vector<256x128xf32>
    %7 = arith.addf %3, %6 : vector<256x128xf32>
    %c0_6 = arith.constant 0 : index
    %c0_7 = arith.constant 0 : index
    %8 = vector.load %arg6[%c0_6, %c0_7] : memref<256x128xf32, #tpu.memory_space<vmem>>, vector<256x128xf32>
    tpu.vector_store %arg6[%c0_6, %c0_7], %7 {strides = array<i32>} : memref<256x128xf32, #tpu.memory_space<vmem>>, vector<256x128xf32>,
    %c0_i32_8 = arith.constant 0 : i32
    %9 = arith.cmpi eq, %arg2, %c0_i32_8 : i32
    %10 = arith.extui %9 : i1 to i32
    %c0_i32_9 = arith.constant 0 : i32
    %11 = arith.cmpi ne, %10, %c0_i32_9 : i32
    scf.if %11 {
      %c0_10 = arith.constant 0 : index
      %c0_11 = arith.constant 0 : index
      %12 = vector.load %arg6[%c0_10, %c0_11] : memref<256x128xf32, #tpu.memory_space<vmem>>, vector<256x128xf32>
      %c0_12 = arith.constant 0 : index
      %c0_13 = arith.constant 0 : index
      %13 = vector.load %arg5[%c0_12, %c0_13] : memref<1x128xf32, #tpu.memory_space<vmem>>, vector<1x128xf32>
      %14 = vector.broadcast %13 : vector<1x128xf32> to vector<256x128xf32>
      %15 = arith.addf %12, %14 : vector<256x128xf32>
      %c0_14 = arith.constant 0 : index
      %c0_15 = arith.constant 0 : index
      %16 = vector.load %arg6[%c0_14, %c0_15] : memref<256x128xf32, #tpu.memory_space<vmem>>, vector<256x128xf32>
      tpu.vector_store %arg6[%c0_14, %c0_15], %15 {strides = array<i32>} : memref<256x128xf32, #tpu.memory_space<vmem>>, vector<256x128xf32>,
    } else {
    }
    return
  }
  func.func @transform_0(%arg0: i32, %arg1: i32, %arg2: i32) -> (i32, i32) {
    %c0_i32 = arith.constant 0 : i32
    return %arg0, %arg2 : i32, i32
  }
  func.func @transform_1(%arg0: i32, %arg1: i32, %arg2: i32) -> (i32, i32) {
    %c0_i32 = arith.constant 0 : i32
    return %arg2, %arg1 : i32, i32
  }
  func.func @transform_2(%arg0: i32, %arg1: i32, %arg2: i32) -> (i32, i32) {
    %c0_i32 = arith.constant 0 : i32
    %c0_i32_0 = arith.constant 0 : i32
    return %c0_i32, %arg1 : i32, i32
  }
  func.func @transform_3(%arg0: i32, %arg1: i32, %arg2: i32) -> (i32, i32) {
    %c0_i32 = arith.constant 0 : i32
    return %arg0, %arg1 : i32, i32
  }
}

</mosaic_0001>

<bundles_post_ra>
// kernel: unet_forward.28
= control target key start
LH: loop header
LB: loop body
LE: loop exit
PB: predicated region body
PF: predicated region fallthrough
CT: control target
= control target key end

     0   :  { %s2213_s12 = smov 0   ;;  %s2215_s13 = smov 0   ;;  %s2744_s0 = inlined_call_operand.vmem [shape: bf16[512,1152], index: 0, kind: input, shape index: {}]   ;;  %s2745_s1 = inlined_call_operand.vmem [shape: bf16[1152,128], index: 1, kind: input, shape index: {}]   ;;  %s2746_s2 = inlined_call_operand.vmem [shape: f32[1,128], index: 2, kind: input, shape index: {}]   ;;  %s2747_s3 = inlined_call_operand.vmem [shape: f32[512,128], index: 3, kind: output, shape index: {}]  }
   0x1   :  { %s2217_s14 = smov 0   ;;  %s2219_s15 = smov 0  }
   0x2   :  { %s2221_s16 = smov 0   ;;  %s2223_s17 = smov 0  }
   0x3   :  { %s2225_s18 = smov 0  }
   0x4 LB: > { %s25_s19 = sadd.s32 1, %s2182_s16  ;;  %s32_s20 = sadd.s32 1, %s2186_s17  ;;  %s2190_s18 = sphi %s2225_s18, %s13_s18   ;;  %s2186_s17 = sphi %s2223_s17, %s2753_s17   ;;  %s2182_s16 = sphi %s2221_s16, %s2752_s16   ;;  %s2178_s15 = sphi %s2219_s15, %s2751_s15   ;;  %s2174_s14 = sphi %s2217_s14, %s2750_s14   ;;  %s2170_s13 = sphi %s2215_s13, %s2749_s13   ;;  %s2166_s12 = sphi %s2213_s12, %s2748_s12  }
   0x5   : > { %p26_p0 = scmp.ge.s32.totalorder %s25_s19, 3  ;;  %p48_p1 = scmp.ne.s32.totalorder %s2170_s13, %s2166_s12 }
   0x6   : > { %p49_p2 = scmp.eq.s32.totalorder %s2190_s18, 0  ;;  %s41_s24 = sadd.s32 1, %s2170_s13 }
   0x7   : > { %s2755_s19 = smov (%p26_p0, %s25_s19), 0  ;;  %s2757_s20 = smov (!%p26_p0, %s32_s20), %s2186_s17 }
   0x8   : > { %p50_p3 = por %p49_p2, %p48_p1  ;;  %p34_p4 = scmp.ge.s32.totalorder %s2757_s20, 2 }
   0x9   : > { %s37_s21 = ssub.s32 %s2182_s16, %s2755_s19  ;;  %p1639_p6 = scmp.ge.s32.totalorder %s2190_s18, 6 }
   0xa   : > { %s2759_s20 = smov (%p34_p4, %s2757_s20), 0 }
   0xb   : > { %s36_s22 = ssub.s32 %s2186_s17, %s2759_s20  ;;  %162 = sbr.rel (%p1639_p6) target bundleno = 64 (0x40), region = 20 }
   0xc   : > { %s38_s23 = sor.u32 %s37_s21, %s36_s22 }
   0xd   : > { %p39_p5 = scmp.eq.s32.totalorder %s38_s23, 0 }
   0xf   : > { %s2264_s25 = scalar_select %p39_p5, %s2170_s13, %s41_s24  }
  0x12   : > { %165 = sbr.rel (!%p50_p3) target bundleno = 64 (0x40), region = 24  ;;  %s167_s26 = sand.u32 (%p50_p3), 1, %s2170_s13  }
  0x13   : > { %s171_s27 = smul.u32 (%p50_p3), 3, %s2182_s16 }
  0x14   : > { %s1988_s28 = smul.u32 (%p50_p3), 384, %s167_s26 }
  0x15   : > { %s1989_s29 = smul.u32 (%p50_p3), 288, %s2186_s17 }
  0x16   : > { %s2278_s8 = scalar_lea.vmem (%p50_p3), [#allocation2], %s1988_s28 }
  0x17   : > { %s173_s30 = sadd.s32 (%p50_p3), %s1989_s29, %s171_s27 }
  0x18   : > { %s1642_s4 = sshll.u32 (%p50_p3), %s173_s30, 2 }
  0x19   : > { %s2273_s7 = scalar_lea.vmem %s2744_s0, %s1642_s4 }
  0x1a   : > { %v190_v0 = vld [vmem:[%s2273_s7] sm:$0xff]  ;;  %v194_v2 = vld [vmem:[%s2273_s7 + $0x48] sm:$0xff]  ;;  %v198_v4 = vld [vmem:[%s2273_s7 + $0x90] sm:$0xff] }
  0x1b   : > { %v192_v1 = vld [vmem:[%s2273_s7 + $0x24] sm:$0xff]  ;;  %191 = vst [vmem:[%s2278_s8] sm:$0xff] %v190_v0  ;;  %195 = vst [vmem:[%s2278_s8 + $0x18] sm:$0xff] %v194_v2  ;;  %v196_v3 = vld [vmem:[%s2273_s7 + $0x6c] sm:$0xff] }
  0x1c   : > { %193 = vst [vmem:[%s2278_s8 + $0xc] sm:$0xff] %v192_v1  ;;  %v200_v5 = vld [vmem:[%s2273_s7 + $0xb4] sm:$0xff]  ;;  %197 = vst [vmem:[%s2278_s8 + $0x24] sm:$0xff] %v196_v3  ;;  %v204_v7 = vld [vmem:[%s2273_s7 + $0xfc] sm:$0xff] }
  0x1d   : > { %199 = vst [vmem:[%s2278_s8 + $0x30] sm:$0xff] %v198_v4  ;;  %201 = vst [vmem:[%s2278_s8 + $0x3c] sm:$0xff] %v200_v5  ;;  %v202_v6 = vld [vmem:[%s2273_s7 + $0xd8] sm:$0xff]  ;;  %v206_v8 = vld [vmem:[%s2273_s7 + $0x120] sm:$0xff] }
  0x1e   : > { %203 = vst [vmem:[%s2278_s8 + $0x48] sm:$0xff] %v202_v6  ;;  %205 = vst [vmem:[%s2278_s8 + $0x54] sm:$0xff] %v204_v7  ;;  %v208_v9 = vld [vmem:[%s2273_s7 + $0x144] sm:$0xff]  ;;  %v212_v11 = vld [vmem:[%s2273_s7 + $0x18c] sm:$0xff] }
  0x1f   : > { %207 = vst [vmem:[%s2278_s8 + $0x60] sm:$0xff] %v206_v8  ;;  %v210_v10 = vld [vmem:[%s2273_s7 + $0x168] sm:$0xff]  ;;  %209 = vst [vmem:[%s2278_s8 + $0x6c] sm:$0xff] %v208_v9  ;;  %v214_v12 = vld [vmem:[%s2273_s7 + $0x1b0] sm:$0xff] }
  0x20   : > { %211 = vst [vmem:[%s2278_s8 + $0x78] sm:$0xff] %v210_v10  ;;  %213 = vst [vmem:[%s2278_s8 + $0x84] sm:$0xff] %v212_v11  ;;  %v216_v13 = vld [vmem:[%s2273_s7 + $0x1d4] sm:$0xff]  ;;  %v220_v15 = vld [vmem:[%s2273_s7 + $0x21c] sm:$0xff] }
  0x21   : > { %v218_v14 = vld [vmem:[%s2273_s7 + $0x1f8] sm:$0xff]  ;;  %215 = vst [vmem:[%s2278_s8 + $0x90] sm:$0xff] %v214_v12  ;;  %217 = vst [vmem:[%s2278_s8 + $0x9c] sm:$0xff] %v216_v13  ;;  %v222_v16 = vld [vmem:[%s2273_s7 + $0x240] sm:$0xff] }
  0x22   : > { %219 = vst [vmem:[%s2278_s8 + $0xa8] sm:$0xff] %v218_v14  ;;  %v224_v17 = vld [vmem:[%s2273_s7 + $0x264] sm:$0xff]  ;;  %221 = vst [vmem:[%s2278_s8 + $0xb4] sm:$0xff] %v220_v15  ;;  %v228_v19 = vld [vmem:[%s2273_s7 + $0x2ac] sm:$0xff] }
  0x23   : > { %223 = vst [vmem:[%s2278_s8 + $0xc0] sm:$0xff] %v222_v16  ;;  %225 = vst [vmem:[%s2278_s8 + $0xcc] sm:$0xff] %v224_v17  ;;  %v226_v18 = vld [vmem:[%s2273_s7 + $0x288] sm:$0xff]  ;;  %v230_v20 = vld [vmem:[%s2273_s7 + $0x2d0] sm:$0xff] }
  0x24   : > { %227 = vst [vmem:[%s2278_s8 + $0xd8] sm:$0xff] %v226_v18  ;;  %229 = vst [vmem:[%s2278_s8 + $0xe4] sm:$0xff] %v228_v19  ;;  %v232_v21 = vld [vmem:[%s2273_s7 + $0x2f4] sm:$0xff]  ;;  %v236_v23 = vld [vmem:[%s2273_s7 + $0x33c] sm:$0xff] }
  0x25   : > { %231 = vst [vmem:[%s2278_s8 + $0xf0] sm:$0xff] %v230_v20  ;;  %v234_v22 = vld [vmem:[%s2273_s7 + $0x318] sm:$0xff]  ;;  %233 = vst [vmem:[%s2278_s8 + $0xfc] sm:$0xff] %v232_v21  ;;  %v238_v24 = vld [vmem:[%s2273_s7 + $0x360] sm:$0xff] }
  0x26   : > { %235 = vst [vmem:[%s2278_s8 + $0x108] sm:$0xff] %v234_v22  ;;  %237 = vst [vmem:[%s2278_s8 + $0x114] sm:$0xff] %v236_v23  ;;  %v240_v25 = vld [vmem:[%s2273_s7 + $0x384] sm:$0xff]  ;;  %v244_v27 = vld [vmem:[%s2273_s7 + $0x3cc] sm:$0xff] }
  0x27   : > { %v242_v26 = vld [vmem:[%s2273_s7 + $0x3a8] sm:$0xff]  ;;  %239 = vst [vmem:[%s2278_s8 + $0x120] sm:$0xff] %v238_v24  ;;  %241 = vst [vmem:[%s2278_s8 + $0x12c] sm:$0xff] %v240_v25  ;;  %v246_v28 = vld [vmem:[%s2273_s7 + $0x3f0] sm:$0xff] }
  0x28   : > { %243 = vst [vmem:[%s2278_s8 + $0x138] sm:$0xff] %v242_v26  ;;  %v248_v29 = vld [vmem:[%s2273_s7 + $0x414] sm:$0xff]  ;;  %245 = vst [vmem:[%s2278_s8 + $0x144] sm:$0xff] %v244_v27  ;;  %v252_v31 = vld [vmem:[%s2273_s7 + $0x45c] sm:$0xff] }
  0x29   : > { %247 = vst [vmem:[%s2278_s8 + $0x150] sm:$0xff] %v246_v28  ;;  %249 = vst [vmem:[%s2278_s8 + $0x15c] sm:$0xff] %v248_v29  ;;  %v250_v30 = vld [vmem:[%s2273_s7 + $0x438] sm:$0xff]  ;;  %v1643_v32 = vld [vmem:[%s2273_s7 + $0x8] sm:$0xf] }
  0x2a   : > { %251 = vst [vmem:[%s2278_s8 + $0x168] sm:$0xff] %v250_v30  ;;  %253 = vst [vmem:[%s2278_s8 + $0x174] sm:$0xff] %v252_v31  ;;  %v1645_v33 = vld [vmem:[%s2273_s7 + $0x2c] sm:$0xf]  ;;  %v1647_v34 = vld [vmem:[%s2273_s7 + $0x50] sm:$0xf] }
  0x2b   : > { %1644 = vst [vmem:[%s2278_s8 + $0x8] sm:$0xf] %v1643_v32  ;;  %v1649_v35 = vld [vmem:[%s2273_s7 + $0x74] sm:$0xf]  ;;  %1646 = vst [vmem:[%s2278_s8 + $0x14] sm:$0xf] %v1645_v33 }
  0x2c   : > { %1648 = vst [vmem:[%s2278_s8 + $0x20] sm:$0xf] %v1647_v34  ;;  %1650 = vst [vmem:[%s2278_s8 + $0x2c] sm:$0xf] %v1649_v35  ;;  %v1651_v36 = vld [vmem:[%s2273_s7 + $0x98] sm:$0xf] }
  0x2d   : > { %v1653_v37 = vld [vmem:[%s2273_s7 + $0xbc] sm:$0xf]  ;;  %v1655_v38 = vld [vmem:[%s2273_s7 + $0xe0] sm:$0xf]  ;;  %1652 = vst [vmem:[%s2278_s8 + $0x38] sm:$0xf] %v1651_v36 }
  0x2e   : > { %1654 = vst [vmem:[%s2278_s8 + $0x44] sm:$0xf] %v1653_v37  ;;  %1656 = vst [vmem:[%s2278_s8 + $0x50] sm:$0xf] %v1655_v38  ;;  %v1657_v39 = vld [vmem:[%s2273_s7 + $0x104] sm:$0xf] }
  0x2f   : > { %v1659_v40 = vld [vmem:[%s2273_s7 + $0x128] sm:$0xf]  ;;  %v1661_v41 = vld [vmem:[%s2273_s7 + $0x14c] sm:$0xf]  ;;  %1658 = vst [vmem:[%s2278_s8 + $0x5c] sm:$0xf] %v1657_v39 }
  0x30   : > { %1660 = vst [vmem:[%s2278_s8 + $0x68] sm:$0xf] %v1659_v40  ;;  %1662 = vst [vmem:[%s2278_s8 + $0x74] sm:$0xf] %v1661_v41  ;;  %v1663_v42 = vld [vmem:[%s2273_s7 + $0x170] sm:$0xf] }
  0x31   : > { %v1665_v43 = vld [vmem:[%s2273_s7 + $0x194] sm:$0xf]  ;;  %v1667_v44 = vld [vmem:[%s2273_s7 + $0x1b8] sm:$0xf]  ;;  %1664 = vst [vmem:[%s2278_s8 + $0x80] sm:$0xf] %v1663_v42 }
  0x32   : > { %1666 = vst [vmem:[%s2278_s8 + $0x8c] sm:$0xf] %v1665_v43  ;;  %1668 = vst [vmem:[%s2278_s8 + $0x98] sm:$0xf] %v1667_v44  ;;  %v1669_v45 = vld [vmem:[%s2273_s7 + $0x1dc] sm:$0xf] }
  0x33   : > { %v1671_v46 = vld [vmem:[%s2273_s7 + $0x200] sm:$0xf]  ;;  %v1673_v47 = vld [vmem:[%s2273_s7 + $0x224] sm:$0xf]  ;;  %1670 = vst [vmem:[%s2278_s8 + $0xa4] sm:$0xf] %v1669_v45 }
  0x34   : > { %1672 = vst [vmem:[%s2278_s8 + $0xb0] sm:$0xf] %v1671_v46  ;;  %1674 = vst [vmem:[%s2278_s8 + $0xbc] sm:$0xf] %v1673_v47  ;;  %v1675_v48 = vld [vmem:[%s2273_s7 + $0x248] sm:$0xf] }
  0x35   : > { %v1677_v49 = vld [vmem:[%s2273_s7 + $0x26c] sm:$0xf]  ;;  %v1679_v50 = vld [vmem:[%s2273_s7 + $0x290] sm:$0xf]  ;;  %1676 = vst [vmem:[%s2278_s8 + $0xc8] sm:$0xf] %v1675_v48 }
  0x36   : > { %1678 = vst [vmem:[%s2278_s8 + $0xd4] sm:$0xf] %v1677_v49  ;;  %1680 = vst [vmem:[%s2278_s8 + $0xe0] sm:$0xf] %v1679_v50  ;;  %v1681_v51 = vld [vmem:[%s2273_s7 + $0x2b4] sm:$0xf] }
  0x37   : > { %v1683_v52 = vld [vmem:[%s2273_s7 + $0x2d8] sm:$0xf]  ;;  %v1685_v53 = vld [vmem:[%s2273_s7 + $0x2fc] sm:$0xf]  ;;  %1682 = vst [vmem:[%s2278_s8 + $0xec] sm:$0xf] %v1681_v51 }
  0x38   : > { %1684 = vst [vmem:[%s2278_s8 + $0xf8] sm:$0xf] %v1683_v52  ;;  %1686 = vst [vmem:[%s2278_s8 + $0x104] sm:$0xf] %v1685_v53  ;;  %v1687_v54 = vld [vmem:[%s2273_s7 + $0x320] sm:$0xf] }
  0x39   : > { %v1689_v55 = vld [vmem:[%s2273_s7 + $0x344] sm:$0xf]  ;;  %v1691_v56 = vld [vmem:[%s2273_s7 + $0x368] sm:$0xf]  ;;  %1688 = vst [vmem:[%s2278_s8 + $0x110] sm:$0xf] %v1687_v54 }
  0x3a   : > { %1690 = vst [vmem:[%s2278_s8 + $0x11c] sm:$0xf] %v1689_v55  ;;  %1692 = vst [vmem:[%s2278_s8 + $0x128] sm:$0xf] %v1691_v56  ;;  %v1693_v57 = vld [vmem:[%s2273_s7 + $0x38c] sm:$0xf] }
  0x3b   : > { %v1695_v58 = vld [vmem:[%s2273_s7 + $0x3b0] sm:$0xf]  ;;  %v1697_v59 = vld [vmem:[%s2273_s7 + $0x3d4] sm:$0xf]  ;;  %1694 = vst [vmem:[%s2278_s8 + $0x134] sm:$0xf] %v1693_v57 }
  0x3c   : > { %1696 = vst [vmem:[%s2278_s8 + $0x140] sm:$0xf] %v1695_v58  ;;  %1698 = vst [vmem:[%s2278_s8 + $0x14c] sm:$0xf] %v1697_v59  ;;  %v1699_v60 = vld [vmem:[%s2273_s7 + $0x3f8] sm:$0xf] }
  0x3d   : > { %v1701_v61 = vld [vmem:[%s2273_s7 + $0x41c] sm:$0xf]  ;;  %v1703_v62 = vld [vmem:[%s2273_s7 + $0x440] sm:$0xf]  ;;  %1700 = vst [vmem:[%s2278_s8 + $0x158] sm:$0xf] %v1699_v60 }
  0x3e   : > { %1702 = vst [vmem:[%s2278_s8 + $0x164] sm:$0xf] %v1701_v61  ;;  %1704 = vst [vmem:[%s2278_s8 + $0x170] sm:$0xf] %v1703_v62  ;;  %v1705_v63 = vld [vmem:[%s2273_s7 + $0x464] sm:$0xf] }
  0x3f   : > { %1706 = vst [vmem:[%s2278_s8 + $0x17c] sm:$0xf] %v1705_v63 }
  0x40 PF: > { %p1707_p7 = scmp.ge.s32.totalorder %s2190_s18, 1  ;;  %p341_p8 = scmp.lt.s32.totalorder %s2190_s18, 7 }
  0x42   : > { %p342_p9 = pnand %p1707_p7, %p341_p8 }
  0x43   : > { %s348_s9 = sand.u32 (!%p342_p9), 1, %s2166_s12   ;;  %s387_s10 = smul.u32 (!%p342_p9), 48, %s2174_s14 }
  0x44   : > { %345 = sbr.rel (%p342_p9) target bundleno = 453 (0x1c5), region = 54  ;;  %s1709_s21 = sshll.u32 (!%p342_p9), %s2178_s15, 5 }
  0x45   : > { %s1990_s11 = smul.u32 (!%p342_p9), 384, %s348_s9  ;;  %p388_p10 = scmp.lt.s32.totalorder (!%p342_p9), %s387_s10, 143 }
  0x46   : > { %p400_p11 = scmp.lt.s32.totalorder (!%p342_p9), %s1709_s21, 63  ;;  %p1711_p12 = scmp.ne.s32.totalorder (!%p342_p9), %s2174_s14, 0 }
  0x47   : > { %s2420_s12 = scalar_lea.vmem (!%p342_p9), [#allocation2], %s1990_s11 }
  0x4b   : > { %s2761_s10 = smov (!%p388_p10, %s387_s10), 143  ;;  %s2763_s21 = smov (!%p400_p11, %s1709_s21), 63 }
  0x4c   : > { %s1708_s22 = sshll.u32 %s2761_s10, 2  ;;  %s1710_s27 = sshll.u32 %s2763_s21, 3  ;;  %v2192_v0 = vmov (!%p1711_p12), 0.0  }
  0x4d   : > { %s2413_s26 = scalar_lea.vmem %s2745_s1, %s1708_s22  ;;  %s2418_s30 = scalar_lea.vmem %s2747_s3, %s1710_s27 }
  0x4e   : > { %412 = sbr.rel (%p1711_p12) target bundleno = 94 (0x5e), region = 62  ;;  %413 = vst [vmem:[%s2418_s30] sm:$0xff] (!%p1711_p12), %v2192_v0  ;;  %414 = vst [vmem:[%s2418_s30 + $0x8] sm:$0xff] (!%p1711_p12), %v2192_v0 }
  0x4f   : > { %415 = vst [vmem:[%s2418_s30 + $0x10] sm:$0xff] (!%p1711_p12), %v2192_v0  ;;  %416 = vst [vmem:[%s2418_s30 + $0x18] sm:$0xff] (!%p1711_p12), %v2192_v0 }
  0x50   : > { %417 = vst [vmem:[%s2418_s30 + $0x20] sm:$0xff] (!%p1711_p12), %v2192_v0  ;;  %418 = vst [vmem:[%s2418_s30 + $0x28] sm:$0xff] (!%p1711_p12), %v2192_v0 }
  0x51   : > { %419 = vst [vmem:[%s2418_s30 + $0x30] sm:$0xff] (!%p1711_p12), %v2192_v0  ;;  %420 = vst [vmem:[%s2418_s30 + $0x38] sm:$0xff] (!%p1711_p12), %v2192_v0 }
  0x52   : > { %421 = vst [vmem:[%s2418_s30 + $0x40] sm:$0xff] (!%p1711_p12), %v2192_v0  ;;  %422 = vst [vmem:[%s2418_s30 + $0x48] sm:$0xff] (!%p1711_p12), %v2192_v0 }
  0x53   : > { %423 = vst [vmem:[%s2418_s30 + $0x50] sm:$0xff] (!%p1711_p12), %v2192_v0  ;;  %424 = vst [vmem:[%s2418_s30 + $0x58] sm:$0xff] (!%p1711_p12), %v2192_v0 }
  0x54   : > { %425 = vst [vmem:[%s2418_s30 + $0x60] sm:$0xff] (!%p1711_p12), %v2192_v0  ;;  %426 = vst [vmem:[%s2418_s30 + $0x68] sm:$0xff] (!%p1711_p12), %v2192_v0 }
  0x55   : > { %427 = vst [vmem:[%s2418_s30 + $0x70] sm:$0xff] %v2192_v0  ;;  %428 = vst [vmem:[%s2418_s30 + $0x78] sm:$0xff] %v2192_v0 }
  0x56   : > { %429 = vst [vmem:[%s2418_s30 + $0x80] sm:$0xff] %v2192_v0  ;;  %430 = vst [vmem:[%s2418_s30 + $0x88] sm:$0xff] %v2192_v0 }
  0x57   : > { %431 = vst [vmem:[%s2418_s30 + $0x90] sm:$0xff] %v2192_v0  ;;  %432 = vst [vmem:[%s2418_s30 + $0x98] sm:$0xff] %v2192_v0 }
  0x58   : > { %433 = vst [vmem:[%s2418_s30 + $0xa0] sm:$0xff] %v2192_v0  ;;  %434 = vst [vmem:[%s2418_s30 + $0xa8] sm:$0xff] %v2192_v0 }
  0x59   : > { %435 = vst [vmem:[%s2418_s30 + $0xb0] sm:$0xff] %v2192_v0  ;;  %436 = vst [vmem:[%s2418_s30 + $0xb8] sm:$0xff] %v2192_v0 }
  0x5a   : > { %437 = vst [vmem:[%s2418_s30 + $0xc0] sm:$0xff] %v2192_v0  ;;  %438 = vst [vmem:[%s2418_s30 + $0xc8] sm:$0xff] %v2192_v0 }
  0x5b   : > { %439 = vst [vmem:[%s2418_s30 + $0xd0] sm:$0xff] %v2192_v0  ;;  %440 = vst [vmem:[%s2418_s30 + $0xd8] sm:$0xff] %v2192_v0 }
  0x5c   : > { %441 = vst [vmem:[%s2418_s30 + $0xe0] sm:$0xff] %v2192_v0  ;;  %442 = vst [vmem:[%s2418_s30 + $0xe8] sm:$0xff] %v2192_v0 }
  0x5d   : > { %443 = vst [vmem:[%s2418_s30 + $0xf0] sm:$0xff] %v2192_v0  ;;  %444 = vst [vmem:[%s2418_s30 + $0xf8] sm:$0xff] %v2192_v0 }
  0x5e PF: > { %v2048_v1 = vld [vmem:[%s2413_s26 + $0x40] sm:$0xff]   ;;  %v2050_v3 = vld [vmem:[%s2413_s26 + $0x48] sm:$0xff]   ;;  %v2052_v5 = vld [vmem:[%s2413_s26 + $0x50] sm:$0xff]   ;;  %p1784_p13 = scmp.ne.s32.totalorder %s2174_s14, 2 }
  0x5f   : > { %v2049_v2 = vld [vmem:[%s2413_s26] sm:$0xff]   ;;  %1788 = vmatprep.subr.bf16.mxu0 %v2048_v1  ;;  %1972 = vmatprep.subr.bf16.mxu1 %v2048_v1  ;;  %v2051_v4 = vld [vmem:[%s2413_s26 + $0x8] sm:$0xff]   ;;  %v2053_v6 = vld [vmem:[%s2413_s26 + $0x10] sm:$0xff]  }
  0x60   : > { %1789 = vmatpush3.bf16.msra.mxu0 %v2049_v2  ;;  %1980 = vmatpush3.bf16.msra.mxu1 %v2049_v2  ;;  %v2054_v7 = vld [vmem:[%s2413_s26 + $0x58] sm:$0xff]   ;;  %v2056_v9 = vld [vmem:[%s2413_s26 + $0x60] sm:$0xff]   ;;  %v2058_v11 = vld [vmem:[%s2413_s26 + $0x68] sm:$0xff]  }
  0x61   : > { %1790 = vmatprep.subr.bf16.mxu0 %v2050_v3  ;;  %1973 = vmatprep.subr.bf16.mxu1 %v2050_v3  ;;  %v2055_v8 = vld [vmem:[%s2413_s26 + $0x18] sm:$0xff]   ;;  %v2057_v10 = vld [vmem:[%s2413_s26 + $0x20] sm:$0xff]   ;;  %v2059_v14 = vld [vmem:[%s2413_s26 + $0x28] sm:$0xff]  }
  0x62   : > { %v2066_v12 = vld [vmem:[%s2420_s12 + $0x4] ss:$12 sps:$4 sm:$0xff]   ;;  %v2062_v17 = vld [vmem:[%s2413_s26 + $0x78] sm:$0xff]   ;;  %v2064_v20 = vld [vmem:[%s2420_s12] ss:$12 sps:$4 sm:$0xff]  }
  0x63   : > { %v2069_v13 = vld [vmem:[%s2420_s12 + $0x124] ss:$12 sps:$4 sm:$0xff]   ;;  %1021 = vmatprep.mubr.bf16.mxu0 %v2066_v12  ;;  %v2063_v18 = vld [vmem:[%s2413_s26 + $0x38] sm:$0xff]   ;;  %v2067_v21 = vld [vmem:[%s2420_s12 + $0x120] ss:$12 sps:$4 sm:$0xff]  }
  0x64   : > { %1791 = vmatpush3.bf16.msra.mxu0 %v2051_v4  ;;  %1981 = vmatpush3.bf16.msra.mxu1 %v2051_v4  ;;  %v2060_v15 = vld [vmem:[%s2413_s26 + $0x70] sm:$0xff]   ;;  %v2070_v19 = vld [vmem:[%s2413_s26 + $0x80] sm:$0xff]   ;;  %v2072_v22 = vld [vmem:[%s2420_s12 + $0x1c] ss:$12 sps:$4 sm:$0xff]  }
  0x65   : > { %1792 = vmatprep.subr.bf16.mxu0 %v2052_v5  ;;  %1974 = vmatprep.subr.bf16.mxu1 %v2052_v5  ;;  %v2061_v16 = vld [vmem:[%s2413_s26 + $0x30] sm:$0xff]   ;;  %v2071_v23 = vld [vmem:[%s2413_s26 + $0x88] sm:$0xff]   ;;  %v2076_v25 = vld [vmem:[%s2420_s12 + $0x18] ss:$12 sps:$4 sm:$0xff]  }
  0x66   : > { %1117 = vmatprep.mubr.bf16.mxu1 %v2069_v13  ;;  %v2074_v24 = vld [vmem:[%s2420_s12 + $0x13c] ss:$12 sps:$4 sm:$0xff]   ;;  %v2078_v26 = vld [vmem:[%s2413_s26 + $0x90] sm:$0xff]   ;;  %v2077_v27 = vld [vmem:[%s2420_s12 + $0x138] ss:$12 sps:$4 sm:$0xff]  }
  0x67   : > { %v2079_v28 = vld [vmem:[%s2413_s26 + $0x98] sm:$0xff]   ;;  %v2080_v29 = vld [vmem:[%s2420_s12 + $0x34] ss:$12 sps:$4 sm:$0xff]   ;;  %v2087_v34 = vld [vmem:[%s2413_s26 + $0xa8] sm:$0xff]  }
  0x68   : > { %1793 = vmatpush3.bf16.msra.mxu0 %v2053_v6  ;;  %1982 = vmatpush3.bf16.msra.mxu1 %v2053_v6  ;;  %v2082_v30 = vld [vmem:[%s2420_s12 + $0x154] ss:$12 sps:$4 sm:$0xff]   ;;  %v2084_v32 = vld [vmem:[%s2420_s12 + $0x30] ss:$12 sps:$4 sm:$0xff]   ;;  %v2088_v35 = vld [vmem:[%s2420_s12 + $0x4c] ss:$12 sps:$4 sm:$0xff]  }
  0x69   : > { %1794 = vmatprep.subr.bf16.mxu0 %v2054_v7  ;;  %1975 = vmatprep.subr.bf16.mxu1 %v2054_v7  ;;  %v2086_v31 = vld [vmem:[%s2413_s26 + $0xa0] sm:$0xff]   ;;  %v2085_v33 = vld [vmem:[%s2420_s12 + $0x150] ss:$12 sps:$4 sm:$0xff]   ;;  %v2090_v36 = vld [vmem:[%s2420_s12 + $0x16c] ss:$12 sps:$4 sm:$0xff]  }
  0x6a   : > { %v2094_v37 = vld [vmem:[%s2413_s26 + $0xb0] sm:$0xff]   ;;  %v2095_v41 = vld [vmem:[%s2413_s26 + $0xb8] sm:$0xff]   ;;  %v2099_v43 = vld [vmem:[%s2420_s12 + $0x60] ss:$12 sps:$4 sm:$0xff]  }
  0x6b   : > { %v2092_v38 = vld [vmem:[%s2420_s12 + $0x48] ss:$12 sps:$4 sm:$0xff]   ;;  %v2096_v40 = vld [vmem:[%s2420_s12 + $0x64] ss:$12 sps:$4 sm:$0xff]   ;;  %v2100_v44 = vld [vmem:[%s2420_s12 + $0x20] ss:$12 sps:$4 sm:$0xff]  }
  0x6c   : > { %1795 = vmatpush3.bf16.msra.mxu0 %v2055_v8  ;;  %1983 = vmatpush3.bf16.msra.mxu1 %v2055_v8  ;;  %v2093_v39 = vld [vmem:[%s2420_s12 + $0x168] ss:$12 sps:$4 sm:$0xff]   ;;  %v2103_v46 = vld [vmem:[%s2420_s12 + $0x38] ss:$12 sps:$4 sm:$0xff]   ;;  %v2105_v48 = vld [vmem:[%s2420_s12 + $0x50] ss:$12 sps:$4 sm:$0xff]  }
  0x6d   : > { %1796 = vmatprep.subr.bf16.mxu0 %v2056_v9  ;;  %1976 = vmatprep.subr.bf16.mxu1 %v2056_v9  ;;  %v2098_v42 = vld [vmem:[%s2420_s12 + $0x8] ss:$12 sps:$4 sm:$0xff]   ;;  %v2104_v47 = vld [vmem:[%s2420_s12 + $0x78] ss:$12 sps:$4 sm:$0xff]   ;;  %v2109_v51 = vld [vmem:[%s2420_s12 + $0x90] ss:$12 sps:$4 sm:$0xff]  }
  0x6e   : > { %v2101_v45 = vld [vmem:[%s2420_s12 + $0x7c] ss:$12 sps:$4 sm:$0xff]   ;;  %v2106_v49 = vld [vmem:[%s2420_s12 + $0x94] ss:$12 sps:$4 sm:$0xff]   ;;  %v2111_v53 = vld [vmem:[%s2420_s12 + $0xac] ss:$12 sps:$4 sm:$0xff]  }
  0x6f   : > { %v2108_v50 = vld [vmem:[%s2420_s12 + $0x68] ss:$12 sps:$4 sm:$0xff]   ;;  %v2110_v52 = vld [vmem:[%s2420_s12 + $0x80] ss:$12 sps:$4 sm:$0xff]   ;;  %v2113_v54 = vld [vmem:[%s2420_s12 + $0x98] ss:$12 sps:$4 sm:$0xff]  }
  0x70   : > { %1797 = vmatpush3.bf16.msra.mxu0 %v2057_v10  ;;  %1984 = vmatpush3.bf16.msra.mxu1 %v2057_v10  ;;  %v2114_v55 = vld [vmem:[%s2420_s12 + $0xa8] ss:$12 sps:$4 sm:$0xff]   ;;  %v2115_v56 = vld [vmem:[%s2420_s12 + $0xb0] ss:$12 sps:$4 sm:$0xff]   ;;  %v2119_v59 = vld [vmem:[%s2420_s12 + $0xc0] ss:$12 sps:$4 sm:$0xff]  }
  0x71   : > { %1798 = vmatprep.subr.bf16.mxu0 %v2058_v11  ;;  %1977 = vmatprep.subr.bf16.mxu1 %v2058_v11  ;;  %v2116_v57 = vld [vmem:[%s2420_s12 + $0xc4] ss:$12 sps:$4 sm:$0xff]   ;;  %v2118_v58 = vld [vmem:[%s2420_s12 + $0xc8] ss:$12 sps:$4 sm:$0xff]   ;;  %v2120_v60 = vld [vmem:[%s2420_s12 + $0xe0] ss:$12 sps:$4 sm:$0xff]  }
  0x72   : > { %v2121_v61 = vld [vmem:[%s2420_s12 + $0xdc] ss:$12 sps:$4 sm:$0xff]   ;;  %v2123_v62 = vld [vmem:[%s2420_s12 + $0xf8] ss:$12 sps:$4 sm:$0xff]   ;;  %v2126_v1 = vld [vmem:[%s2420_s12 + $0xf4] ss:$12 sps:$4 sm:$0xff]  }
  0x73   : > { %v2124_v63 = vld [vmem:[%s2420_s12 + $0xd8] ss:$12 sps:$4 sm:$0xff]   ;;  %v2125_v0 = vld [vmem:[%s2420_s12 + $0x110] ss:$12 sps:$4 sm:$0xff]   ;;  %v2128_v2 = vld [vmem:[%s2420_s12 + $0x128] ss:$12 sps:$4 sm:$0xff]  }
  0x74   : > { %1799 = vmatpush3.bf16.msra.mxu0 %v2059_v14  ;;  %1985 = vmatpush3.bf16.msra.mxu1 %v2059_v14  ;;  %v2129_v3 = vld [vmem:[%s2420_s12 + $0xf0] ss:$12 sps:$4 sm:$0xff]   ;;  %v2130_v4 = vld [vmem:[%s2420_s12 + $0x140] ss:$12 sps:$4 sm:$0xff]   ;;  %v2133_v6 = vld [vmem:[%s2420_s12 + $0x158] ss:$12 sps:$4 sm:$0xff]  }
  0x75   : > { %1800 = vmatprep.subr.bf16.mxu0 %v2060_v15  ;;  %1978 = vmatprep.subr.bf16.mxu1 %v2060_v15  ;;  %v2131_v5 = vld [vmem:[%s2420_s12 + $0x10c] ss:$12 sps:$4 sm:$0xff]   ;;  %v2134_v7 = vld [vmem:[%s2420_s12 + $0x108] ss:$12 sps:$4 sm:$0xff]   ;;  %v2135_v8 = vld [vmem:[%s2420_s12 + $0x170] ss:$12 sps:$4 sm:$0xff]  }
  0x78   : > { %1801 = vmatpush3.bf16.msra.mxu0 %v2061_v16  ;;  %1986 = vmatpush3.bf16.msra.mxu1 %v2061_v16 }
  0x79   : > { %1802 = vmatprep.subr.bf16.mxu0 %v2062_v17  ;;  %1979 = vmatprep.subr.bf16.mxu1 %v2062_v17 }
  0x7c   : > { %1803 = vmatpush3.bf16.msra.mxu0 %v2063_v18  ;;  %1987 = vmatpush3.bf16.msra.mxu1 %v2063_v18 }
  0x7d   : > { %1924 = vmatprep.subr.bf16.mxu1 %v2070_v19 }
  0x7f   : > { %1022 = vmatmul.mubr.bf16.vlgmr.msra.gmra.mrb[0].mxu0 %v2064_v20  ;;  %1118 = vmatmul.mubr.bf16.vlgmr.msra.gmra.mrb[0].mxu1 %v2067_v21 }
  0x80   : > { %1925 = vmatpush3.bf16.msra.mxu1 %v2070_v19  ;;  %1029 = vmatprep.mubr.bf16.mxu0 %v2072_v22 }
  0x81   : > { %1926 = vmatprep.subr.bf16.mxu1 %v2071_v23  ;;  %1125 = vmatprep.mubr.bf16.mxu1 %v2074_v24 }
  0x84   : > { %1927 = vmatpush3.bf16.msra.mxu1 %v2071_v23 }
  0x85   : > { %1928 = vmatprep.subr.bf16.mxu1 %v2078_v26 }
  0x87   : > { %1030 = vmatmul.mubr.bf16.gmra.mrb[4].mxu0 %v2076_v25  ;;  %1126 = vmatmul.mubr.bf16.gmra.mrb[4].mxu1 %v2077_v27 }
  0x88   : > { %1929 = vmatpush3.bf16.msra.mxu1 %v2078_v26  ;;  %1037 = vmatprep.mubr.bf16.mxu0 %v2080_v29 }
  0x89   : > { %1930 = vmatprep.subr.bf16.mxu1 %v2079_v28  ;;  %1133 = vmatprep.mubr.bf16.mxu1 %v2082_v30 }
  0x8c   : > { %1931 = vmatpush3.bf16.msra.mxu1 %v2079_v28 }
  0x8d   : > { %1932 = vmatprep.subr.bf16.mxu1 %v2086_v31 }
  0x8f   : > { %1038 = vmatmul.mubr.bf16.gmra.mrb[8].mxu0 %v2084_v32  ;;  %1134 = vmatmul.mubr.bf16.gmra.mrb[8].mxu1 %v2085_v33 }
  0x90   : > { %1933 = vmatpush3.bf16.msra.mxu1 %v2086_v31  ;;  %1045 = vmatprep.mubr.bf16.mxu0 %v2088_v35 }
  0x91   : > { %1934 = vmatprep.subr.bf16.mxu1 %v2087_v34  ;;  %1141 = vmatprep.mubr.bf16.mxu1 %v2090_v36 }
  0x94   : > { %1935 = vmatpush3.bf16.msra.mxu1 %v2087_v34 }
  0x95   : > { %1936 = vmatprep.subr.bf16.mxu1 %v2094_v37 }
  0x97   : > { %1046 = vmatmul.mubr.bf16.gmra.mrb[12].mxu0 %v2092_v38  ;;  %1142 = vmatmul.mubr.bf16.gmra.mrb[12].mxu1 %v2093_v39 }
  0x98   : > { %1937 = vmatpush3.bf16.msra.mxu1 %v2094_v37  ;;  %1053 = vmatprep.mubr.bf16.mxu0 %v2096_v40 }
  0x99   : > { %1938 = vmatprep.subr.bf16.mxu1 %v2095_v41  ;;  %1940 = vmatprep.mubr.bf16.mxu1 %v2098_v42 }
  0x9c   : > { %1939 = vmatpush3.bf16.msra.mxu1 %v2095_v41 }
  0x9f   : > { %1054 = vmatmul.mubr.bf16.gmra.mrb[16].mxu0 %v2099_v43  ;;  %1941 = vmatmul.mubr.bf16.vlgmr.msra.gmra.mrb[16].mxu1 %v2100_v44 }
  0xa0   : > { %1061 = vmatprep.mubr.bf16.mxu0 %v2101_v45  ;;  %1944 = vmatprep.mubr.bf16.mxu1 %v2103_v46 }
  0xa7   : > { %1062 = vmatmul.mubr.bf16.gmra.mrb[20].mxu0 %v2104_v47  ;;  %1945 = vmatmul.mubr.bf16.gmra.mrb[20].mxu1 %v2105_v48 }
  0xa8   : > { %1069 = vmatprep.mubr.bf16.mxu0 %v2106_v49  ;;  %1948 = vmatprep.mubr.bf16.mxu1 %v2108_v50 }
  0xaf   : > { %1070 = vmatmul.mubr.bf16.gmra.mrb[24].mxu0 %v2109_v51  ;;  %1949 = vmatmul.mubr.bf16.gmra.mrb[24].mxu1 %v2110_v52 }
  0xb0   : > { %1077 = vmatprep.mubr.bf16.mxu0 %v2111_v53  ;;  %1952 = vmatprep.mubr.bf16.mxu1 %v2113_v54 }
  0xb7   : > { %1078 = vmatmul.mubr.bf16.gmra.mrb[28].mxu0 %v2114_v55  ;;  %1953 = vmatmul.mubr.bf16.gmra.mrb[28].mxu1 %v2115_v56 }
  0xb8   : > { %1085 = vmatprep.mubr.bf16.mxu0 %v2116_v57  ;;  %1956 = vmatprep.mubr.bf16.mxu1 %v2118_v58  ;;  %v447_v58 = vld [vmem:[%s2418_s30 + $0x10] sm:$0xff] }
  0xbf   : > { %1086 = vmatmul.mubr.bf16.gmra.mrb[32].mxu0 %v2119_v59  ;;  %1957 = vmatmul.mubr.bf16.gmra.mrb[32].mxu1 %v2120_v60 }
  0xc0   : > { %1093 = vmatprep.mubr.bf16.mxu0 %v2121_v61  ;;  %1960 = vmatprep.mubr.bf16.mxu1 %v2123_v62  ;;  %v445_v62 = vld [vmem:[%s2418_s30] sm:$0xff] }
  0xc7   : > { %1094 = vmatmul.mubr.bf16.gmra.mrb[36].mxu0 %v2124_v63  ;;  %1961 = vmatmul.mubr.bf16.gmra.mrb[36].mxu1 %v2125_v0 }
  0xc8   : > { %1101 = vmatprep.mubr.bf16.mxu0 %v2126_v1  ;;  %1964 = vmatprep.mubr.bf16.mxu1 %v2128_v2 }
  0xcf   : > { %1102 = vmatmul.mubr.bf16.gmra.mrb[40].mxu0 %v2129_v3  ;;  %1965 = vmatmul.mubr.bf16.gmra.mrb[40].mxu1 %v2130_v4  ;;  %v448_v3 = vld [vmem:[%s2418_s30 + $0x18] sm:$0xff] }
  0xd0   : > { %1109 = vmatprep.mubr.bf16.mxu0 %v2131_v5  ;;  %1968 = vmatprep.mubr.bf16.mxu1 %v2133_v6 }
  0xd7   : > { %1110 = vmatmul.mubr.bf16.gmra.mrb[44].mxu0 %v2134_v7  ;;  %1969 = vmatmul.mubr.bf16.gmra.mrb[44].mxu1 %v2135_v8  ;;  %v446_v8 = vld [vmem:[%s2418_s30 + $0x8] sm:$0xff] }
 0x152   : > { %v1804_v9 = vpop.f32.mrb[0].mxu0  ;;  %v1876_v10 = vpop.f32.mrb[0].mxu1 }
 0x153   : > { %v1805_v11 = vpop.f32.mrb[1].mxu0  ;;  %v1877_v12 = vpop.f32.mrb[1].mxu1 }
 0x154   : > { %v1806_v13 = vadd.f32 %v1805_v11, %v1804_v9  ;;  %v2527_v14 = vadd.f32 %v1877_v12, %v1876_v10  ;;  %v1807_v15 = vpop.f32.mrb[2].mxu0  ;;  %v1879_v16 = vpop.f32.mrb[2].mxu1 }
 0x155   : > { %v1808_v17 = vpop.f32.mrb[3].mxu0  ;;  %v1880_v18 = vpop.f32.mrb[3].mxu1 }
 0x156   : > { %v1809_v19 = vadd.f32 %v1808_v17, %v1807_v15  ;;  %v2529_v20 = vadd.f32 %v1880_v18, %v1879_v16  ;;  %v451_v17 = vld [vmem:[%s2418_s30 + $0x30] sm:$0xff] }
 0x15a   : > { %v1810_v21 = vpop.f32.mrb[4].mxu0  ;;  %v1882_v22 = vpop.f32.mrb[4].mxu1 }
 0x15b   : > { %v1811_v23 = vpop.f32.mrb[5].mxu0  ;;  %v1883_v24 = vpop.f32.mrb[5].mxu1 }
 0x15c   : > { %v1812_v25 = vadd.f32 %v1811_v23, %v1810_v21  ;;  %v2531_v26 = vadd.f32 %v1883_v24, %v1882_v22  ;;  %v1813_v27 = vpop.f32.mrb[6].mxu0  ;;  %v1885_v28 = vpop.f32.mrb[6].mxu1  ;;  %v449_v23 = vld [vmem:[%s2418_s30 + $0x20] sm:$0xff] }
 0x15d   : > { %v1814_v29 = vpop.f32.mrb[7].mxu0  ;;  %v1886_v30 = vpop.f32.mrb[7].mxu1 }
 0x15e   : > { %v1815_v31 = vadd.f32 %v1814_v29, %v1813_v27  ;;  %v2533_v32 = vadd.f32 %v1886_v30, %v1885_v28  ;;  %v452_v28 = vld [vmem:[%s2418_s30 + $0x38] sm:$0xff] }
 0x162   : > { %v1816_v33 = vpop.f32.mrb[8].mxu0  ;;  %v1888_v34 = vpop.f32.mrb[8].mxu1 }
 0x163   : > { %v1817_v35 = vpop.f32.mrb[9].mxu0  ;;  %v1889_v36 = vpop.f32.mrb[9].mxu1 }
 0x164   : > { %v1818_v37 = vadd.f32 %v1817_v35, %v1816_v33  ;;  %v2535_v38 = vadd.f32 %v1889_v36, %v1888_v34  ;;  %v1819_v39 = vpop.f32.mrb[10].mxu0  ;;  %v1891_v40 = vpop.f32.mrb[10].mxu1  ;;  %v450_v34 = vld [vmem:[%s2418_s30 + $0x28] sm:$0xff] }
 0x165   : > { %v1820_v41 = vpop.f32.mrb[11].mxu0  ;;  %v1892_v42 = vpop.f32.mrb[11].mxu1 }
 0x166   : > { %v1821_v43 = vadd.f32 %v1820_v41, %v1819_v39  ;;  %v2537_v44 = vadd.f32 %v1892_v42, %v1891_v40 }
 0x16a   : > { %v1822_v45 = vpop.f32.mrb[12].mxu0  ;;  %v1894_v46 = vpop.f32.mrb[12].mxu1 }
 0x16b   : > { %v1823_v47 = vpop.f32.mrb[13].mxu0  ;;  %v1895_v48 = vpop.f32.mrb[13].mxu1 }
 0x16c   : > { %v1824_v49 = vadd.f32 %v1823_v47, %v1822_v45  ;;  %v2539_v50 = vadd.f32 %v1895_v48, %v1894_v46  ;;  %v1825_v51 = vpop.f32.mrb[14].mxu0  ;;  %v1897_v52 = vpop.f32.mrb[14].mxu1  ;;  %v455_v45 = vld [vmem:[%s2418_s30 + $0x50] sm:$0xff] }
 0x16d   : > { %v1826_v53 = vpop.f32.mrb[15].mxu0  ;;  %v1898_v54 = vpop.f32.mrb[15].mxu1 }
 0x16e   : > { %v1827_v55 = vadd.f32 %v1826_v53, %v1825_v51  ;;  %v2541_v56 = vadd.f32 %v1898_v54, %v1897_v52  ;;  %v456_v54 = vld [vmem:[%s2418_s30 + $0x58] sm:$0xff] }
 0x172   : > { %v1828_v57 = vpop.f32.mrb[16].mxu0  ;;  %v1942_v59 = vpop.f32.mrb[16].mxu1 }
 0x173   : > { %v1193_v60 = vadd.f32 %v1942_v59, %v1812_v25  ;;  %v1829_v61 = vpop.f32.mrb[17].mxu0  ;;  %v1184_v63 = vpop.f32.mrb[17].mxu1 }
 0x174   : > { %v1830_v0 = vadd.f32 %v1829_v61, %v1828_v57  ;;  %v1185_v1 = vadd.f32 %v1806_v13, %v1184_v63  ;;  %v1831_v2 = vpop.f32.mrb[18].mxu0  ;;  %v1943_v4 = vpop.f32.mrb[18].mxu1 }
 0x175   : > { %v1313_v5 = vadd.f32 %v1193_v60, %v447_v58  ;;  %v1196_v6 = vadd.f32 %v1943_v4, %v1815_v31  ;;  %v1832_v7 = vpop.f32.mrb[19].mxu0  ;;  %v1187_v9 = vpop.f32.mrb[19].mxu1  ;;  %v454_v60 = vld [vmem:[%s2418_s30 + $0x48] sm:$0xff] }
 0x176   : > { %v1311_v10 = vadd.f32 %v1185_v1, %v445_v62  ;;  %v1833_v11 = vadd.f32 %v1832_v7, %v1831_v2  ;;  %v1188_v12 = vadd.f32 %v1809_v19, %v1187_v9 }
 0x177   : > { %1345 = vst [vmem:[%s2418_s30 + $0x10] sm:$0xff] %v1313_v5  ;;  %v1314_v15 = vadd.f32 %v1196_v6, %v448_v3  ;;  %v457_v6 = vld [vmem:[%s2418_s30 + $0x60] sm:$0xff] }
 0x178   : > { %1343 = vst [vmem:[%s2418_s30] sm:$0xff] %v1311_v10  ;;  %v1312_v13 = vadd.f32 %v1188_v12, %v446_v8  ;;  %v459_v12 = vld [vmem:[%s2418_s30 + $0x70] sm:$0xff] }
 0x179   : > { %1346 = vst [vmem:[%s2418_s30 + $0x18] sm:$0xff] %v1314_v15 }
 0x17a   : > { %1344 = vst [vmem:[%s2418_s30 + $0x8] sm:$0xff] %v1312_v13  ;;  %v1834_v16 = vpop.f32.mrb[20].mxu0  ;;  %v1946_v18 = vpop.f32.mrb[20].mxu1  ;;  %v458_v13 = vld [vmem:[%s2418_s30 + $0x68] sm:$0xff] }
 0x17b   : > { %v1209_v21 = vadd.f32 %v1946_v18, %v1824_v49  ;;  %v1835_v22 = vpop.f32.mrb[21].mxu0  ;;  %v1200_v24 = vpop.f32.mrb[21].mxu1  ;;  %v453_v49 = vld [vmem:[%s2418_s30 + $0x40] sm:$0xff] }
 0x17c   : > { %v1836_v25 = vadd.f32 %v1835_v22, %v1834_v16  ;;  %v1201_v27 = vadd.f32 %v1818_v37, %v1200_v24  ;;  %v1837_v19 = vpop.f32.mrb[22].mxu0  ;;  %v1947_v29 = vpop.f32.mrb[22].mxu1 }
 0x17d   : > { %v1317_v30 = vadd.f32 %v1209_v21, %v451_v17  ;;  %v1212_v31 = vadd.f32 %v1947_v29, %v1827_v55  ;;  %v1838_v33 = vpop.f32.mrb[23].mxu0  ;;  %v1203_v35 = vpop.f32.mrb[23].mxu1 }
 0x17e   : > { %v1315_v36 = vadd.f32 %v1201_v27, %v449_v23  ;;  %v1839_v39 = vadd.f32 %v1838_v33, %v1837_v19  ;;  %v1204_v40 = vadd.f32 %v1821_v43, %v1203_v35  ;;  %v460_v23 = vld [vmem:[%s2418_s30 + $0x78] sm:$0xff] }
 0x17f   : > { %1349 = vst [vmem:[%s2418_s30 + $0x30] sm:$0xff] %v1317_v30  ;;  %v1318_v41 = vadd.f32 %v1212_v31, %v452_v28 }
 0x180   : > { %1347 = vst [vmem:[%s2418_s30 + $0x20] sm:$0xff] %v1315_v36  ;;  %v1316_v37 = vadd.f32 %v1204_v40, %v450_v34  ;;  %v461_v36 = vld [vmem:[%s2418_s30 + $0x80] sm:$0xff] }
 0x181   : > { %1350 = vst [vmem:[%s2418_s30 + $0x38] sm:$0xff] %v1318_v41 }
 0x182   : > { %1348 = vst [vmem:[%s2418_s30 + $0x28] sm:$0xff] %v1316_v37  ;;  %v1840_v42 = vpop.f32.mrb[24].mxu0  ;;  %v1950_v46 = vpop.f32.mrb[24].mxu1 }
 0x183   : > { %v1225_v47 = vadd.f32 %v1950_v46, %v1836_v25  ;;  %v1841_v48 = vpop.f32.mrb[25].mxu0  ;;  %v1216_v51 = vpop.f32.mrb[25].mxu1 }
 0x184   : > { %v1842_v52 = vadd.f32 %v1841_v48, %v1840_v42  ;;  %v1217_v53 = vadd.f32 %v1830_v0, %v1216_v51  ;;  %v1843_v43 = vpop.f32.mrb[26].mxu0  ;;  %v1951_v55 = vpop.f32.mrb[26].mxu1  ;;  %v462_v42 = vld [vmem:[%s2418_s30 + $0x88] sm:$0xff] }
 0x185   : > { %v1321_v57 = vadd.f32 %v1225_v47, %v455_v45  ;;  %v1228_v58 = vadd.f32 %v1951_v55, %v1839_v39  ;;  %v1844_v59 = vpop.f32.mrb[27].mxu0  ;;  %v1219_v61 = vpop.f32.mrb[27].mxu1  ;;  %v463_v55 = vld [vmem:[%s2418_s30 + $0x90] sm:$0xff] }
 0x186   : > { %v1319_v62 = vadd.f32 %v1217_v53, %v453_v49  ;;  %v1845_v63 = vadd.f32 %v1844_v59, %v1843_v43  ;;  %v1220_v1 = vadd.f32 %v1833_v11, %v1219_v61  ;;  %v464_v61 = vld [vmem:[%s2418_s30 + $0x98] sm:$0xff] }
 0x187   : > { %1353 = vst [vmem:[%s2418_s30 + $0x50] sm:$0xff] %v1321_v57  ;;  %v1322_v2 = vadd.f32 %v1228_v58, %v456_v54 }
 0x188   : > { %1351 = vst [vmem:[%s2418_s30 + $0x40] sm:$0xff] %v1319_v62  ;;  %v1320_v0 = vadd.f32 %v1220_v1, %v454_v60 }
 0x189   : > { %1354 = vst [vmem:[%s2418_s30 + $0x58] sm:$0xff] %v1322_v2 }
 0x18a   : > { %1352 = vst [vmem:[%s2418_s30 + $0x48] sm:$0xff] %v1320_v0  ;;  %v1846_v3 = vpop.f32.mrb[28].mxu0  ;;  %v1954_v4 = vpop.f32.mrb[28].mxu1  ;;  %v471_v0 = vld [vmem:[%s2418_s30 + $0xd0] sm:$0xff] }
 0x18b   : > { %v1847_v5 = vpop.f32.mrb[29].mxu0  ;;  %v1232_v7 = vpop.f32.mrb[29].mxu1 }
 0x18c   : > { %v1848_v8 = vadd.f32 %v1847_v5, %v1846_v3  ;;  %v1233_v9 = vadd.f32 %v1842_v52, %v1232_v7  ;;  %v1849_v10 = vpop.f32.mrb[30].mxu0  ;;  %v1955_v11 = vpop.f32.mrb[30].mxu1 }
 0x18d   : > { %v1850_v15 = vpop.f32.mrb[31].mxu0  ;;  %v1235_v16 = vpop.f32.mrb[31].mxu1 }
 0x18e   : > { %v1241_v17 = vadd.f32 %v1954_v4, %v1848_v8  ;;  %v1323_v18 = vadd.f32 %v1233_v9, %v457_v6  ;;  %v1851_v21 = vadd.f32 %v1850_v15, %v1849_v10  ;;  %v1236_v22 = vadd.f32 %v1845_v63, %v1235_v16  ;;  %v469_v6 = vld [vmem:[%s2418_s30 + $0xc0] sm:$0xff] }
 0x190   : > { %v1325_v24 = vadd.f32 %v1241_v17, %v459_v12  ;;  %1355 = vst [vmem:[%s2418_s30 + $0x60] sm:$0xff] %v1323_v18  ;;  %v1244_v25 = vadd.f32 %v1955_v11, %v1851_v21  ;;  %v1324_v27 = vadd.f32 %v1236_v22, %v458_v13  ;;  %v472_v11 = vld [vmem:[%s2418_s30 + $0xd8] sm:$0xff]  ;;  %v465_v13 = vld [vmem:[%s2418_s30 + $0xa0] sm:$0xff]  ;;  %v470_v17 = vld [vmem:[%s2418_s30 + $0xc8] sm:$0xff] }
 0x192   : > { %1357 = vst [vmem:[%s2418_s30 + $0x70] sm:$0xff] %v1325_v24  ;;  %v1326_v19 = vadd.f32 %v1244_v25, %v460_v23  ;;  %1356 = vst [vmem:[%s2418_s30 + $0x68] sm:$0xff] %v1324_v27  ;;  %v1852_v28 = vpop.f32.mrb[32].mxu0  ;;  %v1958_v29 = vpop.f32.mrb[32].mxu1  ;;  %v466_v25 = vld [vmem:[%s2418_s30 + $0xa8] sm:$0xff] }
 0x193   : > { %v1853_v30 = vpop.f32.mrb[33].mxu0  ;;  %v1248_v31 = vpop.f32.mrb[33].mxu1 }
 0x194   : > { %1358 = vst [vmem:[%s2418_s30 + $0x78] sm:$0xff] %v1326_v19  ;;  %v1854_v33 = vadd.f32 %v1853_v30, %v1852_v28  ;;  %v1855_v34 = vpop.f32.mrb[34].mxu0  ;;  %v1959_v35 = vpop.f32.mrb[34].mxu1  ;;  %v475_v30 = vld [vmem:[%s2418_s30 + $0xf0] sm:$0xff] }
 0x195   : > { %v1856_v39 = vpop.f32.mrb[35].mxu0  ;;  %v1251_v40 = vpop.f32.mrb[35].mxu1 }
 0x196   : > { %v1249_v41 = vadd.f32 %v1854_v33, %v1248_v31  ;;  %v1857_v37 = vadd.f32 %v1856_v39, %v1855_v34  ;;  %v473_v34 = vld [vmem:[%s2418_s30 + $0xe0] sm:$0xff] }
 0x198   : > { %v1327_v45 = vadd.f32 %v1249_v41, %v461_v36  ;;  %v1252_v46 = vadd.f32 %v1857_v37, %v1251_v40  ;;  %v476_v41 = vld [vmem:[%s2418_s30 + $0xf8] sm:$0xff] }
 0x19a   : > { %1359 = vst [vmem:[%s2418_s30 + $0x80] sm:$0xff] %v1327_v45  ;;  %v1328_v47 = vadd.f32 %v1252_v46, %v462_v42  ;;  %v1858_v48 = vpop.f32.mrb[36].mxu0  ;;  %v2578_v49 = vpop.f32.mrb[36].mxu1  ;;  %v467_v45 = vld [vmem:[%s2418_s30 + $0xb0] sm:$0xff] }
 0x19b   : > { %v1859_v51 = vpop.f32.mrb[37].mxu0  ;;  %v1264_v52 = vpop.f32.mrb[37].mxu1 }
 0x19c   : > { %1360 = vst [vmem:[%s2418_s30 + $0x88] sm:$0xff] %v1328_v47  ;;  %v1860_v53 = vadd.f32 %v1859_v51, %v1858_v48  ;;  %v1861_v43 = vpop.f32.mrb[38].mxu0  ;;  %v2581_v54 = vpop.f32.mrb[38].mxu1  ;;  %v474_v47 = vld [vmem:[%s2418_s30 + $0xe8] sm:$0xff] }
 0x19d   : > { %v1862_v57 = vpop.f32.mrb[39].mxu0  ;;  %v1267_v58 = vpop.f32.mrb[39].mxu1 }
 0x19e   : > { %v1257_v59 = vadd.f32 %v1958_v29, %v1860_v53  ;;  %v1863_v60 = vadd.f32 %v1862_v57, %v1861_v43 }
 0x1a0   : > { %v1329_v62 = vadd.f32 %v1257_v59, %v463_v55  ;;  %v1260_v63 = vadd.f32 %v1959_v35, %v1863_v60  ;;  %v468_v55 = vld [vmem:[%s2418_s30 + $0xb8] sm:$0xff] }
 0x1a2   : > { %1361 = vst [vmem:[%s2418_s30 + $0x90] sm:$0xff] %v1329_v62  ;;  %v1330_v1 = vadd.f32 %v1260_v63, %v464_v61  ;;  %v1864_v2 = vpop.f32.mrb[40].mxu0  ;;  %v1966_v3 = vpop.f32.mrb[40].mxu1  ;;  %v1381_v62 = vld [vmem:[%s2418_s30 + $0x10] sm:$0xff] (!%p1784_p13)  ;;  %v1382_v63 = vld [vmem:[%s2418_s30 + $0x18] sm:$0xff] (!%p1784_p13) }
 0x1a3   : > { %v1289_v4 = vadd.f32 %v1966_v3, %v2531_v26  ;;  %v1865_v5 = vpop.f32.mrb[41].mxu0  ;;  %v1280_v7 = vpop.f32.mrb[41].mxu1 }
 0x1a4   : > { %1362 = vst [vmem:[%s2418_s30 + $0x98] sm:$0xff] %v1330_v1  ;;  %v1866_v8 = vadd.f32 %v1865_v5, %v1864_v2  ;;  %v1281_v9 = vadd.f32 %v2527_v14, %v1280_v7  ;;  %v1867_v10 = vpop.f32.mrb[42].mxu0  ;;  %v1967_v12 = vpop.f32.mrb[42].mxu1  ;;  %v1383_v1 = vld [vmem:[%s2418_s30 + $0x20] sm:$0xff] (!%p1784_p13)  ;;  %v1385_v5 = vld [vmem:[%s2418_s30 + $0x30] sm:$0xff] (!%p1784_p13) }
 0x1a5   : > { %v1337_v15 = vadd.f32 %v1289_v4, %v471_v0  ;;  %v1292_v16 = vadd.f32 %v1967_v12, %v2533_v32  ;;  %v1868_v26 = vpop.f32.mrb[43].mxu0  ;;  %v1283_v18 = vpop.f32.mrb[43].mxu1  ;;  %v1384_v4 = vld [vmem:[%s2418_s30 + $0x28] sm:$0xff] (!%p1784_p13) }
 0x1a6   : > { %v1265_v21 = vadd.f32 %v1866_v8, %v1264_v52  ;;  %v1335_v22 = vadd.f32 %v1281_v9, %v469_v6  ;;  %v1869_v23 = vadd.f32 %v1868_v26, %v1867_v10  ;;  %v1284_v14 = vadd.f32 %v2529_v20, %v1283_v18  ;;  %v1386_v6 = vld [vmem:[%s2418_s30 + $0x38] sm:$0xff] (!%p1784_p13)  ;;  %v1388_v12 = vld [vmem:[%s2418_s30 + $0x48] sm:$0xff] (!%p1784_p13) }
 0x1a7   : > { %1369 = vst [vmem:[%s2418_s30 + $0xd0] sm:$0xff] %v1337_v15  ;;  %v1338_v24 = vadd.f32 %v1292_v16, %v472_v11  ;;  %v1387_v11 = vld [vmem:[%s2418_s30 + $0x40] sm:$0xff] (!%p1784_p13)  ;;  %v1389_v15 = vld [vmem:[%s2418_s30 + $0x50] sm:$0xff] (!%p1784_p13)  ;;  %v1390_v18 = vld [vmem:[%s2418_s30 + $0x58] sm:$0xff] (!%p1784_p13) }
 0x1a8   : > { %v1331_v27 = vadd.f32 %v1265_v21, %v465_v13  ;;  %1367 = vst [vmem:[%s2418_s30 + $0xc0] sm:$0xff] %v1335_v22  ;;  %v1268_v19 = vadd.f32 %v1869_v23, %v1267_v58  ;;  %v1336_v32 = vadd.f32 %v1284_v14, %v470_v17  ;;  %v1391_v21 = vld [vmem:[%s2418_s30 + $0x60] sm:$0xff] (!%p1784_p13)  ;;  %v1392_v22 = vld [vmem:[%s2418_s30 + $0x68] sm:$0xff] (!%p1784_p13) }
 0x1a9   : > { %1370 = vst [vmem:[%s2418_s30 + $0xd8] sm:$0xff] %v1338_v24 }
 0x1aa   : > { %1363 = vst [vmem:[%s2418_s30 + $0xa0] sm:$0xff] %v1331_v27  ;;  %v1332_v28 = vadd.f32 %v1268_v19, %v466_v25  ;;  %1368 = vst [vmem:[%s2418_s30 + $0xc8] sm:$0xff] %v1336_v32  ;;  %v1870_v29 = vpop.f32.mrb[44].mxu0  ;;  %v1970_v31 = vpop.f32.mrb[44].mxu1  ;;  %v1393_v27 = vld [vmem:[%s2418_s30 + $0x70] sm:$0xff] (!%p1784_p13)  ;;  %v1394_v19 = vld [vmem:[%s2418_s30 + $0x78] sm:$0xff] (!%p1784_p13) }
 0x1ab   : > { %v1305_v20 = vadd.f32 %v1970_v31, %v2539_v50  ;;  %v1871_v33 = vpop.f32.mrb[45].mxu0  ;;  %v1296_v35 = vpop.f32.mrb[45].mxu1  ;;  %v1395_v31 = vld [vmem:[%s2418_s30 + $0x80] sm:$0xff] (!%p1784_p13) }
 0x1ac   : > { %1364 = vst [vmem:[%s2418_s30 + $0xa8] sm:$0xff] %v1332_v28  ;;  %v1872_v36 = vadd.f32 %v1871_v33, %v1870_v29  ;;  %v1297_v39 = vadd.f32 %v2535_v38, %v1296_v35  ;;  %v1873_v40 = vpop.f32.mrb[46].mxu0  ;;  %v1971_v37 = vpop.f32.mrb[46].mxu1 }
 0x1ad   : > { %v1341_v42 = vadd.f32 %v1305_v20, %v475_v30  ;;  %v1308_v46 = vadd.f32 %v1971_v37, %v2541_v56  ;;  %v1874_v50 = vpop.f32.mrb[47].mxu0  ;;  %v1299_v48 = vpop.f32.mrb[47].mxu1  ;;  %v1396_v20 = vld [vmem:[%s2418_s30 + $0x88] sm:$0xff] (!%p1784_p13) }
 0x1ae   : > { %v1273_v51 = vadd.f32 %v2578_v49, %v1872_v36  ;;  %v1339_v52 = vadd.f32 %v1297_v39, %v473_v34  ;;  %v1875_v38 = vadd.f32 %v1874_v50, %v1873_v40  ;;  %v1300_v53 = vadd.f32 %v2537_v44, %v1299_v48  ;;  %1378 = sbr.rel (%p1784_p13) target bundleno = 453 (0x1c5), region = 66  ;;  %v1379_v44 = vld [vmem:[%s2418_s30] sm:$0xff] (!%p1784_p13)  ;;  %v1397_v39 = vld [vmem:[%s2418_s30 + $0x90] sm:$0xff] (!%p1784_p13)  ;;  %v1398_v40 = vld [vmem:[%s2418_s30 + $0x98] sm:$0xff] (!%p1784_p13) }
 0x1af   : > { %1373 = vst [vmem:[%s2418_s30 + $0xf0] sm:$0xff] %v1341_v42  ;;  %v1342_v43 = vadd.f32 %v1308_v46, %v476_v41  ;;  %v2626_v49 = vld [vmem:[%s2746_s2] ss:$0 sm:$0xff] (!%p1784_p13) }
 0x1b0   : > { %v1333_v57 = vadd.f32 %v1273_v51, %v467_v45  ;;  %1371 = vst [vmem:[%s2418_s30 + $0xe0] sm:$0xff] %v1339_v52  ;;  %v1276_v58 = vadd.f32 %v2581_v54, %v1875_v38  ;;  %v1340_v56 = vadd.f32 %v1300_v53, %v474_v47  ;;  %v1380_v54 = vld [vmem:[%s2418_s30 + $0x8] sm:$0xff] (!%p1784_p13)  ;;  %v1418_v60 = vadd.f32 (!%p1784_p13), %v2626_v49, %v1379_v44 }
 0x1b1   : > { %1374 = vst [vmem:[%s2418_s30 + $0xf8] sm:$0xff] %v1342_v43  ;;  %v1419_v61 = vadd.f32 (!%p1784_p13), %v2626_v49, %v1380_v54  ;;  %v1420_v2 = vadd.f32 (!%p1784_p13), %v2626_v49, %v1381_v62  ;;  %v1421_v0 = vadd.f32 (!%p1784_p13), %v2626_v49, %v1382_v63  ;;  %v1422_v3 = vadd.f32 (!%p1784_p13), %v2626_v49, %v1383_v1  ;;  %v1399_v41 = vld [vmem:[%s2418_s30 + $0xa0] sm:$0xff] (!%p1784_p13)  ;;  %v1405_v62 = vld [vmem:[%s2418_s30 + $0xd0] sm:$0xff] (!%p1784_p13)  ;;  %v1406_v63 = vld [vmem:[%s2418_s30 + $0xd8] sm:$0xff] (!%p1784_p13) }
 0x1b2   : > { %1365 = vst [vmem:[%s2418_s30 + $0xb0] sm:$0xff] %v1333_v57  ;;  %v1334_v59 = vadd.f32 %v1276_v58, %v468_v55  ;;  %1372 = vst [vmem:[%s2418_s30 + $0xe8] sm:$0xff] %v1340_v56  ;;  %v1450_v7 = vmax.f32 (!%p1784_p13), %v1418_v60, 0.0  ;;  %v1423_v9 = vadd.f32 (!%p1784_p13), %v2626_v49, %v1384_v4  ;;  %v1424_v10 = vadd.f32 (!%p1784_p13), %v2626_v49, %v1385_v5  ;;  %v1403_v56 = vld [vmem:[%s2418_s30 + $0xc0] sm:$0xff] (!%p1784_p13) }
 0x1b3   : > { %v1451_v8 = vmax.f32 (!%p1784_p13), %v1419_v61, 0.0  ;;  %v1452_v13 = vmax.f32 (!%p1784_p13), %v1420_v2, 0.0  ;;  %v1453_v16 = vmax.f32 (!%p1784_p13), %v1421_v0, 0.0  ;;  %v1454_v26 = vmax.f32 (!%p1784_p13), %v1422_v3, 0.0  ;;  %v1400_v50 = vld [vmem:[%s2418_s30 + $0xa8] sm:$0xff] (!%p1784_p13) }
 0x1b4   : > { %1366 = vst [vmem:[%s2418_s30 + $0xb8] sm:$0xff] %v1334_v59  ;;  %v1425_v17 = vadd.f32 (!%p1784_p13), %v2626_v49, %v1386_v6  ;;  %1482 = vst [vmem:[%s2418_s30] sm:$0xff] (!%p1784_p13), %v1450_v7  ;;  %v1455_v23 = vmax.f32 (!%p1784_p13), %v1423_v9, 0.0  ;;  %v1456_v14 = vmax.f32 (!%p1784_p13), %v1424_v10, 0.0  ;;  %v1426_v24 = vadd.f32 (!%p1784_p13), %v2626_v49, %v1387_v11  ;;  %v1404_v59 = vld [vmem:[%s2418_s30 + $0xc8] sm:$0xff] (!%p1784_p13) }
 0x1b5   : > { %1483 = vst [vmem:[%s2418_s30 + $0x8] sm:$0xff] %v1451_v8  ;;  %v1427_v25 = vadd.f32 %v2626_v49, %v1388_v12  ;;  %1484 = vst [vmem:[%s2418_s30 + $0x10] sm:$0xff] %v1452_v13  ;;  %v1428_v28 = vadd.f32 %v2626_v49, %v1389_v15  ;;  %v1429_v29 = vadd.f32 %v2626_v49, %v1390_v18 }
 0x1b6   : > { %1485 = vst [vmem:[%s2418_s30 + $0x18] sm:$0xff] %v1453_v16  ;;  %1486 = vst [vmem:[%s2418_s30 + $0x20] sm:$0xff] %v1454_v26  ;;  %v1457_v32 = vmax.f32 %v1425_v17, 0.0  ;;  %v1430_v30 = vadd.f32 %v2626_v49, %v1391_v21  ;;  %v1458_v33 = vmax.f32 %v1426_v24, 0.0  ;;  %v1431_v35 = vadd.f32 %v2626_v49, %v1392_v22  ;;  %v1409_v6 = vld [vmem:[%s2418_s30 + $0xf0] sm:$0xff] }
 0x1b7   : > { %1487 = vst [vmem:[%s2418_s30 + $0x28] sm:$0xff] %v1455_v23  ;;  %1488 = vst [vmem:[%s2418_s30 + $0x30] sm:$0xff] %v1456_v14  ;;  %v1459_v34 = vmax.f32 %v1427_v25, 0.0  ;;  %v1432_v36 = vadd.f32 %v2626_v49, %v1393_v27  ;;  %v1460_v37 = vmax.f32 %v1428_v28, 0.0  ;;  %v1461_v42 = vmax.f32 %v1429_v29, 0.0  ;;  %v1407_v1 = vld [vmem:[%s2418_s30 + $0xe0] sm:$0xff] }
 0x1b8   : > { %1489 = vst [vmem:[%s2418_s30 + $0x38] sm:$0xff] %v1457_v32  ;;  %v1462_v45 = vmax.f32 %v1430_v30, 0.0  ;;  %v1433_v46 = vadd.f32 %v2626_v49, %v1394_v19  ;;  %1490 = vst [vmem:[%s2418_s30 + $0x40] sm:$0xff] %v1458_v33  ;;  %v1463_v48 = vmax.f32 %v1431_v35, 0.0  ;;  %v1434_v52 = vadd.f32 %v2626_v49, %v1395_v31  ;;  %v1410_v11 = vld [vmem:[%s2418_s30 + $0xf8] sm:$0xff] }
 0x1b9   : > { %v1401_v47 = vld [vmem:[%s2418_s30 + $0xb0] sm:$0xff]  ;;  %1491 = vst [vmem:[%s2418_s30 + $0x48] sm:$0xff] %v1459_v34  ;;  %v1464_v51 = vmax.f32 %v1432_v36, 0.0  ;;  %v1435_v38 = vadd.f32 %v2626_v49, %v1396_v20  ;;  %1492 = vst [vmem:[%s2418_s30 + $0x50] sm:$0xff] %v1460_v37  ;;  %v1436_v55 = vadd.f32 %v2626_v49, %v1397_v39  ;;  %v1437_v57 = vadd.f32 %v2626_v49, %v1398_v40  ;;  %v1408_v5 = vld [vmem:[%s2418_s30 + $0xe8] sm:$0xff] }
 0x1ba   : > { %1493 = vst [vmem:[%s2418_s30 + $0x58] sm:$0xff] %v1461_v42  ;;  %1494 = vst [vmem:[%s2418_s30 + $0x60] sm:$0xff] %v1462_v45  ;;  %v1465_v43 = vmax.f32 %v1433_v46, 0.0  ;;  %v1438_v58 = vadd.f32 %v2626_v49, %v1399_v41  ;;  %v1466_v44 = vmax.f32 %v1434_v52, 0.0  ;;  %v1439_v60 = vadd.f32 %v2626_v49, %v1400_v50 }
 0x1bb   : > { %v1402_v53 = vld [vmem:[%s2418_s30 + $0xb8] sm:$0xff]  ;;  %1495 = vst [vmem:[%s2418_s30 + $0x68] sm:$0xff] %v1463_v48  ;;  %1496 = vst [vmem:[%s2418_s30 + $0x70] sm:$0xff] %v1464_v51  ;;  %v1467_v54 = vmax.f32 %v1435_v38, 0.0  ;;  %v1440_v61 = vadd.f32 %v2626_v49, %v1401_v47  ;;  %v1468_v2 = vmax.f32 %v1436_v55, 0.0  ;;  %v1469_v0 = vmax.f32 %v1437_v57, 0.0 }
 0x1bc   : > { %1497 = vst [vmem:[%s2418_s30 + $0x78] sm:$0xff] %v1465_v43  ;;  %v1470_v3 = vmax.f32 %v1438_v58, 0.0  ;;  %v1441_v4 = vadd.f32 %v2626_v49, %v1402_v53  ;;  %1498 = vst [vmem:[%s2418_s30 + $0x80] sm:$0xff] %v1466_v44  ;;  %v1471_v7 = vmax.f32 %v1439_v60, 0.0  ;;  %v1442_v9 = vadd.f32 %v2626_v49, %v1403_v56 }
 0x1bd   : > { %1499 = vst [vmem:[%s2418_s30 + $0x88] sm:$0xff] %v1467_v54  ;;  %v1472_v8 = vmax.f32 %v1440_v61, 0.0  ;;  %v1443_v10 = vadd.f32 %v2626_v49, %v1404_v59  ;;  %1500 = vst [vmem:[%s2418_s30 + $0x90] sm:$0xff] %v1468_v2  ;;  %v1444_v15 = vadd.f32 %v2626_v49, %v1405_v62  ;;  %v1445_v13 = vadd.f32 %v2626_v49, %v1406_v63 }
 0x1be   : > { %1501 = vst [vmem:[%s2418_s30 + $0x98] sm:$0xff] %v1469_v0  ;;  %1502 = vst [vmem:[%s2418_s30 + $0xa0] sm:$0xff] %v1470_v3  ;;  %v1473_v12 = vmax.f32 %v1441_v4, 0.0  ;;  %v1446_v16 = vadd.f32 %v2626_v49, %v1407_v1  ;;  %v1474_v26 = vmax.f32 %v1442_v9, 0.0  ;;  %v1447_v18 = vadd.f32 %v2626_v49, %v1408_v5 }
 0x1bf   : > { %1503 = vst [vmem:[%s2418_s30 + $0xa8] sm:$0xff] %v1471_v7  ;;  %1504 = vst [vmem:[%s2418_s30 + $0xb0] sm:$0xff] %v1472_v8  ;;  %v1475_v17 = vmax.f32 %v1443_v10, 0.0  ;;  %v1448_v21 = vadd.f32 %v2626_v49, %v1409_v6  ;;  %v1476_v22 = vmax.f32 %v1444_v15, 0.0  ;;  %v1477_v23 = vmax.f32 %v1445_v13, 0.0 }
 0x1c0   : > { %1505 = vst [vmem:[%s2418_s30 + $0xb8] sm:$0xff] %v1473_v12  ;;  %v1478_v14 = vmax.f32 %v1446_v16, 0.0  ;;  %v1449_v24 = vadd.f32 %v2626_v49, %v1410_v11  ;;  %1506 = vst [vmem:[%s2418_s30 + $0xc0] sm:$0xff] %v1474_v26  ;;  %v1479_v25 = vmax.f32 %v1447_v18, 0.0 }
 0x1c1   : > { %1507 = vst [vmem:[%s2418_s30 + $0xc8] sm:$0xff] %v1475_v17  ;;  %v1480_v27 = vmax.f32 %v1448_v21, 0.0  ;;  %1508 = vst [vmem:[%s2418_s30 + $0xd0] sm:$0xff] %v1476_v22 }
 0x1c2   : > { %1509 = vst [vmem:[%s2418_s30 + $0xd8] sm:$0xff] %v1477_v23  ;;  %1510 = vst [vmem:[%s2418_s30 + $0xe0] sm:$0xff] %v1478_v14  ;;  %v1481_v19 = vmax.f32 %v1449_v24, 0.0 }
 0x1c3   : > { %1511 = vst [vmem:[%s2418_s30 + $0xe8] sm:$0xff] %v1479_v25  ;;  %1512 = vst [vmem:[%s2418_s30 + $0xf0] sm:$0xff] %v1480_v27 }
 0x1c4   : > { %1513 = vst [vmem:[%s2418_s30 + $0xf8] sm:$0xff] %v1481_v19 }
 0x1c5 PF: > { %s13_s18 = sadd.s32 1, %s2190_s18   ;;  %s2748_s12 = smov %s2170_s13 }
 0x1c6   : > { %p10_p0 = scmp.ge.s32.totalorder %s13_s18, 8   ;;  %s2749_s13 = smov %s2264_s25 }
 0x1c7   : > { %s2750_s14 = smov %s2182_s16  ;;  %s2751_s15 = smov %s2186_s17 }
 0x1c8   : > { %s2752_s16 = smov %s2755_s19  ;;  %s2753_s17 = smov %s2759_s20 }
 0x1c9   :  { %12 = sbr.rel (!%p10_p0) target bundleno = 4 (0x4), region = 113 }

// kernel: unet_forward.30
= control target key start
LH: loop header
LB: loop body
LE: loop exit
PB: predicated region body
PF: predicated region fallthrough
CT: control target
= control target key end

     0   :  { %s1516_s12 = smov 0   ;;  %s1518_s13 = smov 0   ;;  %s1946_s0 = inlined_call_operand.vmem [shape: bf16[128,1152], index: 0, kind: input, shape index: {}]   ;;  %s1947_s1 = inlined_call_operand.vmem [shape: bf16[1152,128], index: 1, kind: input, shape index: {}]   ;;  %s1948_s2 = inlined_call_operand.vmem [shape: f32[1,128], index: 2, kind: input, shape index: {}]   ;;  %s1949_s3 = inlined_call_operand.vmem [shape: f32[128,128], index: 3, kind: output, shape index: {}]  }
   0x1   :  { %s1520_s14 = smov 0   ;;  %s1522_s15 = smov 0  }
   0x2   :  { %s1524_s16 = smov 0  }
   0x3 LB: > { %s25_s17 = sadd.s32 1, %s1489_s15  ;;  %p48_p1 = scmp.ne.s32.totalorder %s1481_s13, %s1477_s12  ;;  %s1493_s16 = sphi %s1524_s16, %s13_s16   ;;  %s1489_s15 = sphi %s1522_s15, %s1953_s15   ;;  %s1485_s14 = sphi %s1520_s14, %s1952_s14   ;;  %s1481_s13 = sphi %s1518_s13, %s1951_s13   ;;  %s1477_s12 = sphi %s1516_s12, %s1950_s12  }
   0x4   : > { %p26_p0 = scmp.ge.s32.totalorder %s25_s17, 3  ;;  %p49_p2 = scmp.eq.s32.totalorder %s1493_s16, 0 }
   0x5   : > { %s41_s19 = sadd.s32 1, %s1481_s13  ;;  %p1152_p5 = scmp.ge.s32.totalorder %s1493_s16, 3 }
   0x6   : > { %s1955_s17 = smov (%p26_p0, %s25_s17), 0  ;;  %p50_p3 = por %p49_p2, %p48_p1 }
   0x7   : > { %s37_s18 = ssub.s32 %s1489_s15, %s1955_s17  ;;  %162 = sbr.rel (%p1152_p5) target bundleno = 37 (0x25), region = 20 }
   0x8   : > { %p39_p4 = scmp.eq.s32.totalorder %s37_s18, 0 }
   0xa   : > { %s1551_s20 = scalar_select %p39_p4, %s1481_s13, %s41_s19  }
   0xe   : > { %165 = sbr.rel (!%p50_p3) target bundleno = 37 (0x25), region = 24  ;;  %s167_s21 = sand.u32 (%p50_p3), 1, %s1481_s13  }
   0xf   : > { %s1243_s22 = smul.u32 (%p50_p3), 12, %s1489_s15 }
  0x10   : > { %s1356_s23 = smul.u32 (%p50_p3), 192, %s167_s21 }
  0x11   : > { %s1559_s26 = scalar_lea.vmem (%p50_p3), %s1946_s0, %s1243_s22 }
  0x12   : > { %v190_v0 = vld [vmem:[%s1559_s26] sm:$0xff] (%p50_p3)  ;;  %v194_v2 = vld [vmem:[%s1559_s26 + $0x48] sm:$0xff] (%p50_p3)  ;;  %s1564_s27 = scalar_lea.vmem (%p50_p3), [#allocation2], %s1356_s23  ;;  %v198_v4 = vld [vmem:[%s1559_s26 + $0x90] sm:$0xff] (%p50_p3) }
  0x13   : > { %v192_v1 = vld [vmem:[%s1559_s26 + $0x24] sm:$0xff] (%p50_p3)  ;;  %191 = vst [vmem:[%s1564_s27] sm:$0xff] (%p50_p3), %v190_v0  ;;  %195 = vst [vmem:[%s1564_s27 + $0x18] sm:$0xff] (%p50_p3), %v194_v2  ;;  %v196_v3 = vld [vmem:[%s1559_s26 + $0x6c] sm:$0xff] (%p50_p3) }
  0x14   : > { %193 = vst [vmem:[%s1564_s27 + $0xc] sm:$0xff] (%p50_p3), %v192_v1  ;;  %v200_v5 = vld [vmem:[%s1559_s26 + $0xb4] sm:$0xff] (%p50_p3)  ;;  %197 = vst [vmem:[%s1564_s27 + $0x24] sm:$0xff] (%p50_p3), %v196_v3  ;;  %v204_v7 = vld [vmem:[%s1559_s26 + $0xfc] sm:$0xff] (%p50_p3) }
  0x15   : > { %199 = vst [vmem:[%s1564_s27 + $0x30] sm:$0xff] %v198_v4  ;;  %201 = vst [vmem:[%s1564_s27 + $0x3c] sm:$0xff] %v200_v5  ;;  %v202_v6 = vld [vmem:[%s1559_s26 + $0xd8] sm:$0xff]  ;;  %v206_v8 = vld [vmem:[%s1559_s26 + $0x120] sm:$0xff] }
  0x16   : > { %203 = vst [vmem:[%s1564_s27 + $0x48] sm:$0xff] %v202_v6  ;;  %205 = vst [vmem:[%s1564_s27 + $0x54] sm:$0xff] %v204_v7  ;;  %v208_v9 = vld [vmem:[%s1559_s26 + $0x144] sm:$0xff]  ;;  %v212_v11 = vld [vmem:[%s1559_s26 + $0x18c] sm:$0xff] }
  0x17   : > { %207 = vst [vmem:[%s1564_s27 + $0x60] sm:$0xff] %v206_v8  ;;  %v210_v10 = vld [vmem:[%s1559_s26 + $0x168] sm:$0xff]  ;;  %209 = vst [vmem:[%s1564_s27 + $0x6c] sm:$0xff] %v208_v9  ;;  %v214_v12 = vld [vmem:[%s1559_s26 + $0x1b0] sm:$0xff] }
  0x18   : > { %211 = vst [vmem:[%s1564_s27 + $0x78] sm:$0xff] %v210_v10  ;;  %213 = vst [vmem:[%s1564_s27 + $0x84] sm:$0xff] %v212_v11  ;;  %v216_v13 = vld [vmem:[%s1559_s26 + $0x1d4] sm:$0xff]  ;;  %v220_v15 = vld [vmem:[%s1559_s26 + $0x21c] sm:$0xff] }
  0x19   : > { %v218_v14 = vld [vmem:[%s1559_s26 + $0x1f8] sm:$0xff]  ;;  %215 = vst [vmem:[%s1564_s27 + $0x90] sm:$0xff] %v214_v12  ;;  %217 = vst [vmem:[%s1564_s27 + $0x9c] sm:$0xff] %v216_v13  ;;  %v1154_v16 = vld [vmem:[%s1559_s26 + $0x8] sm:$0xf] }
  0x1a   : > { %219 = vst [vmem:[%s1564_s27 + $0xa8] sm:$0xff] %v218_v14  ;;  %v1156_v17 = vld [vmem:[%s1559_s26 + $0x2c] sm:$0xf]  ;;  %221 = vst [vmem:[%s1564_s27 + $0xb4] sm:$0xff] %v220_v15  ;;  %v1158_v18 = vld [vmem:[%s1559_s26 + $0x50] sm:$0xf] }
  0x1b   : > { %1155 = vst [vmem:[%s1564_s27 + $0x8] sm:$0xf] %v1154_v16  ;;  %1157 = vst [vmem:[%s1564_s27 + $0x14] sm:$0xf] %v1156_v17  ;;  %v1160_v19 = vld [vmem:[%s1559_s26 + $0x74] sm:$0xf] }
  0x1c   : > { %v1162_v20 = vld [vmem:[%s1559_s26 + $0x98] sm:$0xf]  ;;  %1159 = vst [vmem:[%s1564_s27 + $0x20] sm:$0xf] %v1158_v18  ;;  %1161 = vst [vmem:[%s1564_s27 + $0x2c] sm:$0xf] %v1160_v19 }
  0x1d   : > { %1163 = vst [vmem:[%s1564_s27 + $0x38] sm:$0xf] %v1162_v20  ;;  %v1164_v21 = vld [vmem:[%s1559_s26 + $0xbc] sm:$0xf]  ;;  %v1166_v22 = vld [vmem:[%s1559_s26 + $0xe0] sm:$0xf] }
  0x1e   : > { %v1168_v23 = vld [vmem:[%s1559_s26 + $0x104] sm:$0xf]  ;;  %1165 = vst [vmem:[%s1564_s27 + $0x44] sm:$0xf] %v1164_v21  ;;  %1167 = vst [vmem:[%s1564_s27 + $0x50] sm:$0xf] %v1166_v22 }
  0x1f   : > { %1169 = vst [vmem:[%s1564_s27 + $0x5c] sm:$0xf] %v1168_v23  ;;  %v1170_v24 = vld [vmem:[%s1559_s26 + $0x128] sm:$0xf]  ;;  %v1172_v25 = vld [vmem:[%s1559_s26 + $0x14c] sm:$0xf] }
  0x20   : > { %v1174_v26 = vld [vmem:[%s1559_s26 + $0x170] sm:$0xf]  ;;  %1171 = vst [vmem:[%s1564_s27 + $0x68] sm:$0xf] %v1170_v24  ;;  %1173 = vst [vmem:[%s1564_s27 + $0x74] sm:$0xf] %v1172_v25 }
  0x21   : > { %1175 = vst [vmem:[%s1564_s27 + $0x80] sm:$0xf] %v1174_v26  ;;  %v1176_v27 = vld [vmem:[%s1559_s26 + $0x194] sm:$0xf]  ;;  %v1178_v28 = vld [vmem:[%s1559_s26 + $0x1b8] sm:$0xf] }
  0x22   : > { %v1180_v29 = vld [vmem:[%s1559_s26 + $0x1dc] sm:$0xf]  ;;  %1177 = vst [vmem:[%s1564_s27 + $0x8c] sm:$0xf] %v1176_v27  ;;  %1179 = vst [vmem:[%s1564_s27 + $0x98] sm:$0xf] %v1178_v28 }
  0x23   : > { %1181 = vst [vmem:[%s1564_s27 + $0xa4] sm:$0xf] %v1180_v29  ;;  %v1182_v30 = vld [vmem:[%s1559_s26 + $0x200] sm:$0xf]  ;;  %v1184_v31 = vld [vmem:[%s1559_s26 + $0x224] sm:$0xf] }
  0x24   : > { %1183 = vst [vmem:[%s1564_s27 + $0xb0] sm:$0xf] %v1182_v30  ;;  %1185 = vst [vmem:[%s1564_s27 + $0xbc] sm:$0xf] %v1184_v31 }
  0x25 PF: > { %p1186_p6 = scmp.ge.s32.totalorder %s1493_s16, 1  ;;  %p277_p7 = scmp.lt.s32.totalorder %s1493_s16, 4 }
  0x27   : > { %p278_p8 = pnand %p1186_p6, %p277_p7 }
  0x28   : > { %s284_s28 = sand.u32 (!%p278_p8), 1, %s1477_s12   ;;  %s323_s29 = smul.u32 (!%p278_p8), 48, %s1485_s14 }
  0x29   : > { %281 = sbr.rel (%p278_p8) target bundleno = 381 (0x17d), region = 54  ;;  %p1188_p10 = scmp.ne.s32.totalorder (!%p278_p8), %s1485_s14, 0 }
  0x2a   : > { %s1357_s30 = smul.u32 (!%p278_p8), 192, %s284_s28  ;;  %p324_p9 = scmp.lt.s32.totalorder (!%p278_p8), %s323_s29, 143 }
  0x2c   : > { %s1636_s8 = scalar_lea.vmem (!%p278_p8), [#allocation2], %s1357_s30 }
  0x30   : > { %s1957_s29 = smov (!%p324_p9, %s323_s29), 143  ;;  %348 = sbr.rel (%p1188_p10) target bundleno = 58 (0x3a), region = 62 }
  0x31   : > { %s1187_s4 = sshll.u32 %s1957_s29, 2  ;;  %v1495_v32 = vmov (!%p1188_p10), 0.0  }
  0x32   : > { %s1634_s7 = scalar_lea.vmem %s1947_s1, %s1187_s4  ;;  %349 = vst [vmem:[%s1949_s3] sm:$0xff] (!%p1188_p10), %v1495_v32  ;;  %350 = vst [vmem:[%s1949_s3 + $0x8] sm:$0xff] (!%p1188_p10), %v1495_v32 }
  0x33   : > { %351 = vst [vmem:[%s1949_s3 + $0x10] sm:$0xff] (!%p1188_p10), %v1495_v32  ;;  %352 = vst [vmem:[%s1949_s3 + $0x18] sm:$0xff] (!%p1188_p10), %v1495_v32 }
  0x34   : > { %353 = vst [vmem:[%s1949_s3 + $0x20] sm:$0xff] (!%p1188_p10), %v1495_v32  ;;  %354 = vst [vmem:[%s1949_s3 + $0x28] sm:$0xff] (!%p1188_p10), %v1495_v32 }
  0x35   : > { %355 = vst [vmem:[%s1949_s3 + $0x30] sm:$0xff] (!%p1188_p10), %v1495_v32  ;;  %356 = vst [vmem:[%s1949_s3 + $0x38] sm:$0xff] (!%p1188_p10), %v1495_v32 }
  0x36   : > { %357 = vst [vmem:[%s1949_s3 + $0x40] sm:$0xff] (!%p1188_p10), %v1495_v32  ;;  %358 = vst [vmem:[%s1949_s3 + $0x48] sm:$0xff] (!%p1188_p10), %v1495_v32 }
  0x37   : > { %359 = vst [vmem:[%s1949_s3 + $0x50] sm:$0xff] %v1495_v32  ;;  %360 = vst [vmem:[%s1949_s3 + $0x58] sm:$0xff] %v1495_v32 }
  0x38   : > { %361 = vst [vmem:[%s1949_s3 + $0x60] sm:$0xff] %v1495_v32  ;;  %362 = vst [vmem:[%s1949_s3 + $0x68] sm:$0xff] %v1495_v32 }
  0x39   : > { %363 = vst [vmem:[%s1949_s3 + $0x70] sm:$0xff] %v1495_v32  ;;  %364 = vst [vmem:[%s1949_s3 + $0x78] sm:$0xff] %v1495_v32 }
  0x3a PF: > { %v1399_v33 = vld [vmem:[%s1634_s7 + $0x40] sm:$0xff]   ;;  %v1402_v36 = vld [vmem:[%s1634_s7 + $0x48] sm:$0xff]   ;;  %v1405_v39 = vld [vmem:[%s1634_s7 + $0x50] sm:$0xff]   ;;  %p1237_p11 = scmp.ne.s32.totalorder %s1485_s14, 2 }
  0x3b   : > { %v1400_v34 = vld [vmem:[%s1634_s7] sm:$0xff]   ;;  %1244 = vmatprep.subr.bf16.mxu0 %v1399_v33  ;;  %v1403_v37 = vld [vmem:[%s1634_s7 + $0x8] sm:$0xff]   ;;  %v1406_v40 = vld [vmem:[%s1634_s7 + $0x10] sm:$0xff]  }
  0x3c   : > { %v1401_v35 = vld [vmem:[%s1634_s7 + $0x80] sm:$0xff]   ;;  %1245 = vmatpush3.bf16.msra.mxu0 %v1400_v34  ;;  %v1404_v38 = vld [vmem:[%s1634_s7 + $0x88] sm:$0xff]   ;;  %v1407_v41 = vld [vmem:[%s1634_s7 + $0x90] sm:$0xff]  }
  0x3d   : > { %1324 = vmatprep.subr.bf16.mxu1 %v1401_v35  ;;  %1246 = vmatprep.subr.bf16.mxu0 %v1402_v36  ;;  %v1408_v42 = vld [vmem:[%s1634_s7 + $0x58] sm:$0xff]   ;;  %v1411_v45 = vld [vmem:[%s1634_s7 + $0x60] sm:$0xff]   ;;  %v1414_v48 = vld [vmem:[%s1634_s7 + $0x68] sm:$0xff]  }
  0x3e   : > { %1325 = vmatpush3.bf16.msra.mxu1 %v1401_v35  ;;  %v1409_v43 = vld [vmem:[%s1634_s7 + $0x18] sm:$0xff]   ;;  %v1413_v46 = vld [vmem:[%s1634_s7 + $0xa0] sm:$0xff]   ;;  %v1416_v49 = vld [vmem:[%s1634_s7 + $0xa8] sm:$0xff]  }
  0x3f   : > { %1326 = vmatprep.subr.bf16.mxu1 %v1404_v38  ;;  %v1410_v44 = vld [vmem:[%s1634_s7 + $0x98] sm:$0xff]   ;;  %v1412_v47 = vld [vmem:[%s1634_s7 + $0x20] sm:$0xff]   ;;  %v1415_v50 = vld [vmem:[%s1634_s7 + $0x28] sm:$0xff]  }
  0x40   : > { %1247 = vmatpush3.bf16.msra.mxu0 %v1403_v37  ;;  %v1417_v51 = vld [vmem:[%s1634_s7 + $0x70] sm:$0xff]   ;;  %v1420_v54 = vld [vmem:[%s1634_s7 + $0x78] sm:$0xff]   ;;  %v1423_v59 = vld [vmem:[%s1636_s8] ss:$12 sps:$4 sm:$0xff]  }
  0x41   : > { %1248 = vmatprep.subr.bf16.mxu0 %v1405_v39  ;;  %v1418_v52 = vld [vmem:[%s1634_s7 + $0x30] sm:$0xff]   ;;  %v1422_v55 = vld [vmem:[%s1634_s7 + $0xb8] sm:$0xff]   ;;  %v1427_v61 = vld [vmem:[%s1636_s8 + $0x20] ss:$12 sps:$4 sm:$0xff]  }
  0x42   : > { %1327 = vmatpush3.bf16.msra.mxu1 %v1404_v38  ;;  %v1419_v53 = vld [vmem:[%s1634_s7 + $0xb0] sm:$0xff]   ;;  %v1421_v58 = vld [vmem:[%s1634_s7 + $0x38] sm:$0xff]   ;;  %v1443_v5 = vld [vmem:[%s1636_s8 + $0x80] ss:$12 sps:$4 sm:$0xff]  }
  0x43   : > { %1328 = vmatprep.subr.bf16.mxu1 %v1407_v41  ;;  %v1425_v56 = vld [vmem:[%s1636_s8 + $0x4] ss:$12 sps:$4 sm:$0xff]   ;;  %v1426_v57 = vld [vmem:[%s1636_s8 + $0x8] ss:$12 sps:$4 sm:$0xff]   ;;  %v1436_v4 = vld [vmem:[%s1636_s8 + $0x4c] ss:$12 sps:$4 sm:$0xff]  }
  0x44   : > { %1249 = vmatpush3.bf16.msra.mxu0 %v1406_v40  ;;  %765 = vmatprep.mubr.bf16.mxu0 %v1425_v56  ;;  %v1428_v60 = vld [vmem:[%s1636_s8 + $0x1c] ss:$12 sps:$4 sm:$0xff]   ;;  %v1434_v62 = vld [vmem:[%s1636_s8 + $0x38] ss:$12 sps:$4 sm:$0xff]   ;;  %v1431_v0 = vld [vmem:[%s1636_s8 + $0x34] ss:$12 sps:$4 sm:$0xff]  }
  0x45   : > { %1250 = vmatprep.subr.bf16.mxu0 %v1408_v42  ;;  %1340 = vmatprep.mubr.bf16.mxu1 %v1426_v57  ;;  %v1430_v63 = vld [vmem:[%s1636_s8 + $0x18] ss:$12 sps:$4 sm:$0xff]   ;;  %v1435_v1 = vld [vmem:[%s1636_s8 + $0x50] ss:$12 sps:$4 sm:$0xff]   ;;  %v1442_v2 = vld [vmem:[%s1636_s8 + $0x68] ss:$12 sps:$4 sm:$0xff]  }
  0x46   : > { %1329 = vmatpush3.bf16.msra.mxu1 %v1407_v41  ;;  %v1433_v3 = vld [vmem:[%s1636_s8 + $0x30] ss:$12 sps:$4 sm:$0xff]   ;;  %v1450_v6 = vld [vmem:[%s1636_s8 + $0x98] ss:$12 sps:$4 sm:$0xff]   ;;  %v1438_v7 = vld [vmem:[%s1636_s8 + $0x48] ss:$12 sps:$4 sm:$0xff]  }
  0x47   : > { %1330 = vmatprep.subr.bf16.mxu1 %v1410_v44  ;;  %v1439_v8 = vld [vmem:[%s1636_s8 + $0x64] ss:$12 sps:$4 sm:$0xff]   ;;  %v1441_v10 = vld [vmem:[%s1636_s8 + $0x60] ss:$12 sps:$4 sm:$0xff]   ;;  %v1444_v11 = vld [vmem:[%s1636_s8 + $0x7c] ss:$12 sps:$4 sm:$0xff]  }
  0x48   : > { %1251 = vmatpush3.bf16.msra.mxu0 %v1409_v43  ;;  %v1451_v9 = vld [vmem:[%s1636_s8 + $0xb0] ss:$12 sps:$4 sm:$0xff]   ;;  %v1446_v12 = vld [vmem:[%s1636_s8 + $0x78] ss:$12 sps:$4 sm:$0xff]   ;;  %v1447_v13 = vld [vmem:[%s1636_s8 + $0x94] ss:$12 sps:$4 sm:$0xff]  }
  0x49   : > { %1252 = vmatprep.subr.bf16.mxu0 %v1411_v45  ;;  %v1449_v14 = vld [vmem:[%s1636_s8 + $0x90] ss:$12 sps:$4 sm:$0xff]   ;;  %v1452_v15 = vld [vmem:[%s1636_s8 + $0xac] ss:$12 sps:$4 sm:$0xff]   ;;  %v1454_v16 = vld [vmem:[%s1636_s8 + $0xa8] ss:$12 sps:$4 sm:$0xff]  }
  0x4a   : > { %1331 = vmatpush3.bf16.msra.mxu1 %v1410_v44  ;;  %v365_v23 = vld [vmem:[%s1949_s3] sm:$0xff]  ;;  %v366_v28 = vld [vmem:[%s1949_s3 + $0x8] sm:$0xff]  ;;  %v367_v38 = vld [vmem:[%s1949_s3 + $0x10] sm:$0xff] }
  0x4b   : > { %1332 = vmatprep.subr.bf16.mxu1 %v1413_v46  ;;  %v368_v44 = vld [vmem:[%s1949_s3 + $0x18] sm:$0xff] }
  0x4c   : > { %1253 = vmatpush3.bf16.msra.mxu0 %v1412_v47 }
  0x4d   : > { %1254 = vmatprep.subr.bf16.mxu0 %v1414_v48 }
  0x4e   : > { %1333 = vmatpush3.bf16.msra.mxu1 %v1413_v46 }
  0x4f   : > { %1334 = vmatprep.subr.bf16.mxu1 %v1416_v49 }
  0x50   : > { %1255 = vmatpush3.bf16.msra.mxu0 %v1415_v50 }
  0x51   : > { %1256 = vmatprep.subr.bf16.mxu0 %v1417_v51 }
  0x52   : > { %1335 = vmatpush3.bf16.msra.mxu1 %v1416_v49 }
  0x53   : > { %1336 = vmatprep.subr.bf16.mxu1 %v1419_v53 }
  0x54   : > { %1257 = vmatpush3.bf16.msra.mxu0 %v1418_v52 }
  0x55   : > { %1258 = vmatprep.subr.bf16.mxu0 %v1420_v54 }
  0x56   : > { %1337 = vmatpush3.bf16.msra.mxu1 %v1419_v53 }
  0x57   : > { %1338 = vmatprep.subr.bf16.mxu1 %v1422_v55 }
  0x58   : > { %1259 = vmatpush3.bf16.msra.mxu0 %v1421_v58 }
  0x5a   : > { %1339 = vmatpush3.bf16.msra.mxu1 %v1422_v55  ;;  %v369_v55 = vld [vmem:[%s1949_s3 + $0x20] sm:$0xff] }
  0x5b   : > { %766 = vmatmul.mubr.bf16.vlgmr.msra.gmra.mrb[0].mxu0 %v1423_v59 }
  0x5c   : > { %773 = vmatprep.mubr.bf16.mxu0 %v1428_v60  ;;  %v370_v60 = vld [vmem:[%s1949_s3 + $0x28] sm:$0xff] }
  0x5d   : > { %1341 = vmatmul.mubr.bf16.vlgmr.msra.gmra.mrb[0].mxu1 %v1427_v61 }
  0x5e   : > { %1344 = vmatprep.mubr.bf16.mxu1 %v1434_v62 }
  0x63   : > { %774 = vmatmul.mubr.bf16.gmra.mrb[4].mxu0 %v1430_v63 }
  0x64   : > { %781 = vmatprep.mubr.bf16.mxu0 %v1431_v0 }
  0x65   : > { %1345 = vmatmul.mubr.bf16.gmra.mrb[4].mxu1 %v1435_v1 }
  0x66   : > { %1348 = vmatprep.mubr.bf16.mxu1 %v1442_v2 }
  0x6b   : > { %782 = vmatmul.mubr.bf16.gmra.mrb[8].mxu0 %v1433_v3 }
  0x6c   : > { %789 = vmatprep.mubr.bf16.mxu0 %v1436_v4 }
  0x6d   : > { %1349 = vmatmul.mubr.bf16.gmra.mrb[8].mxu1 %v1443_v5 }
  0x6e   : > { %1352 = vmatprep.mubr.bf16.mxu1 %v1450_v6  ;;  %v371_v6 = vld [vmem:[%s1949_s3 + $0x30] sm:$0xff] }
  0x73   : > { %790 = vmatmul.mubr.bf16.gmra.mrb[12].mxu0 %v1438_v7 }
  0x74   : > { %797 = vmatprep.mubr.bf16.mxu0 %v1439_v8 }
  0x75   : > { %1353 = vmatmul.mubr.bf16.gmra.mrb[12].mxu1 %v1451_v9 }
  0x7b   : > { %798 = vmatmul.mubr.bf16.gmra.mrb[16].mxu0 %v1441_v10 }
  0x7c   : > { %805 = vmatprep.mubr.bf16.mxu0 %v1444_v11 }
  0x83   : > { %806 = vmatmul.mubr.bf16.gmra.mrb[20].mxu0 %v1446_v12  ;;  %v372_v12 = vld [vmem:[%s1949_s3 + $0x38] sm:$0xff] }
  0x84   : > { %813 = vmatprep.mubr.bf16.mxu0 %v1447_v13 }
  0x8b   : > { %814 = vmatmul.mubr.bf16.gmra.mrb[24].mxu0 %v1449_v14 }
  0x8c   : > { %821 = vmatprep.mubr.bf16.mxu0 %v1452_v15 }
  0x93   : > { %822 = vmatmul.mubr.bf16.gmra.mrb[28].mxu0 %v1454_v16 }
 0x12e   : > { %v1260_v17 = vpop.f32.mrb[0].mxu0 }
 0x12f   : > { %v1261_v18 = vpop.f32.mrb[1].mxu0 }
 0x130   : > { %v1262_v19 = vadd.f32 %v1261_v18, %v1260_v17  ;;  %v1263_v20 = vpop.f32.mrb[2].mxu0  ;;  %v1342_v21 = vpop.f32.mrb[0].mxu1 }
 0x131   : > { %v1264_v22 = vpop.f32.mrb[3].mxu0  ;;  %v864_v24 = vpop.f32.mrb[1].mxu1 }
 0x132   : > { %v1265_v25 = vadd.f32 %v1264_v22, %v1263_v20  ;;  %v865_v26 = vadd.f32 %v1262_v19, %v864_v24  ;;  %v1343_v27 = vpop.f32.mrb[2].mxu1  ;;  %v373_v22 = vld [vmem:[%s1949_s3 + $0x40] sm:$0xff] }
 0x133   : > { %v867_v29 = vpop.f32.mrb[3].mxu1 }
 0x134   : > { %v927_v30 = vadd.f32 %v865_v26, %v365_v23  ;;  %v868_v31 = vadd.f32 %v1265_v25, %v867_v29  ;;  %v374_v25 = vld [vmem:[%s1949_s3 + $0x48] sm:$0xff] }
 0x136   : > { %943 = vst [vmem:[%s1949_s3] sm:$0xff] %v927_v30  ;;  %v928_v32 = vadd.f32 %v868_v31, %v366_v28  ;;  %v1266_v33 = vpop.f32.mrb[4].mxu0 }
 0x137   : > { %v1267_v34 = vpop.f32.mrb[5].mxu0 }
 0x138   : > { %944 = vst [vmem:[%s1949_s3 + $0x8] sm:$0xff] %v928_v32  ;;  %v1268_v35 = vadd.f32 %v1267_v34, %v1266_v33  ;;  %v1269_v36 = vpop.f32.mrb[6].mxu0  ;;  %v1346_v37 = vpop.f32.mrb[4].mxu1  ;;  %v375_v33 = vld [vmem:[%s1949_s3 + $0x50] sm:$0xff] }
 0x139   : > { %v1270_v39 = vpop.f32.mrb[7].mxu0  ;;  %v880_v40 = vpop.f32.mrb[5].mxu1 }
 0x13a   : > { %v873_v41 = vadd.f32 %v1342_v21, %v1268_v35  ;;  %v1271_v42 = vadd.f32 %v1270_v39, %v1269_v36  ;;  %v1347_v43 = vpop.f32.mrb[6].mxu1 }
 0x13b   : > { %v883_v45 = vpop.f32.mrb[7].mxu1 }
 0x13c   : > { %v929_v46 = vadd.f32 %v873_v41, %v367_v38  ;;  %v876_v47 = vadd.f32 %v1343_v27, %v1271_v42 }
 0x13e   : > { %945 = vst [vmem:[%s1949_s3 + $0x10] sm:$0xff] %v929_v46  ;;  %v930_v48 = vadd.f32 %v876_v47, %v368_v44  ;;  %v1272_v49 = vpop.f32.mrb[8].mxu0  ;;  %v377_v46 = vld [vmem:[%s1949_s3 + $0x60] sm:$0xff] }
 0x13f   : > { %v1273_v50 = vpop.f32.mrb[9].mxu0 }
 0x140   : > { %946 = vst [vmem:[%s1949_s3 + $0x18] sm:$0xff] %v930_v48  ;;  %v1274_v51 = vadd.f32 %v1273_v50, %v1272_v49  ;;  %v1275_v52 = vpop.f32.mrb[10].mxu0  ;;  %v1350_v53 = vpop.f32.mrb[8].mxu1  ;;  %v378_v49 = vld [vmem:[%s1949_s3 + $0x68] sm:$0xff] }
 0x141   : > { %v1276_v54 = vpop.f32.mrb[11].mxu0  ;;  %v896_v56 = vpop.f32.mrb[9].mxu1 }
 0x142   : > { %v1277_v57 = vadd.f32 %v1276_v54, %v1275_v52  ;;  %v881_v58 = vadd.f32 %v1274_v51, %v880_v40  ;;  %v1351_v59 = vpop.f32.mrb[10].mxu1 }
 0x143   : > { %v899_v61 = vpop.f32.mrb[11].mxu1 }
 0x144   : > { %v931_v62 = vadd.f32 %v881_v58, %v369_v55  ;;  %v884_v63 = vadd.f32 %v1277_v57, %v883_v45  ;;  %v379_v57 = vld [vmem:[%s1949_s3 + $0x70] sm:$0xff] }
 0x146   : > { %947 = vst [vmem:[%s1949_s3 + $0x20] sm:$0xff] %v931_v62  ;;  %v932_v0 = vadd.f32 %v884_v63, %v370_v60  ;;  %v1278_v1 = vpop.f32.mrb[12].mxu0 }
 0x147   : > { %v1279_v2 = vpop.f32.mrb[13].mxu0 }
 0x148   : > { %948 = vst [vmem:[%s1949_s3 + $0x28] sm:$0xff] %v932_v0  ;;  %v1280_v3 = vadd.f32 %v1279_v2, %v1278_v1  ;;  %v1281_v4 = vpop.f32.mrb[14].mxu0  ;;  %v1354_v5 = vpop.f32.mrb[12].mxu1  ;;  %v963_v1 = vld [vmem:[%s1949_s3] sm:$0xff] (!%p1237_p11) }
 0x149   : > { %v1282_v7 = vpop.f32.mrb[15].mxu0  ;;  %v912_v8 = vpop.f32.mrb[13].mxu1  ;;  %v1238_v2 = vld [vmem:[%s1948_s2] ss:$0 sm:$0xff] (!%p1237_p11) }
 0x14a   : > { %v889_v9 = vadd.f32 %v1346_v37, %v1280_v3  ;;  %v1283_v10 = vadd.f32 %v1282_v7, %v1281_v4  ;;  %v1355_v11 = vpop.f32.mrb[14].mxu1  ;;  %v376_v37 = vld [vmem:[%s1949_s3 + $0x58] sm:$0xff]  ;;  %v964_v3 = vld [vmem:[%s1949_s3 + $0x8] sm:$0xff] (!%p1237_p11)  ;;  %v986_v4 = vadd.f32 (!%p1237_p11), %v1238_v2, %v963_v1 }
 0x14b   : > { %v915_v13 = vpop.f32.mrb[15].mxu1  ;;  %v966_v7 = vld [vmem:[%s1949_s3 + $0x18] sm:$0xff] (!%p1237_p11) }
 0x14c   : > { %v933_v14 = vadd.f32 %v889_v9, %v371_v6  ;;  %v892_v15 = vadd.f32 %v1347_v43, %v1283_v10  ;;  %v965_v6 = vld [vmem:[%s1949_s3 + $0x10] sm:$0xff] (!%p1237_p11)  ;;  %v989_v10 = vadd.f32 (!%p1237_p11), %v1238_v2, %v966_v7 }
 0x14d   : > { %v988_v9 = vadd.f32 (!%p1237_p11), %v1238_v2, %v965_v6 }
 0x14e   : > { %949 = vst [vmem:[%s1949_s3 + $0x30] sm:$0xff] %v933_v14  ;;  %v934_v16 = vadd.f32 %v892_v15, %v372_v12  ;;  %v1284_v17 = vpop.f32.mrb[16].mxu0  ;;  %v1002_v15 = vmax.f32 (!%p1237_p11), %v986_v4, 0.0 }
 0x14f   : > { %v1285_v18 = vpop.f32.mrb[17].mxu0  ;;  %v968_v12 = vld [vmem:[%s1949_s3 + $0x28] sm:$0xff] (!%p1237_p11) }
 0x150   : > { %950 = vst [vmem:[%s1949_s3 + $0x38] sm:$0xff] %v934_v16  ;;  %v1286_v19 = vadd.f32 %v1285_v18, %v1284_v17  ;;  %v1287_v20 = vpop.f32.mrb[18].mxu0  ;;  %v991_v17 = vadd.f32 (!%p1237_p11), %v1238_v2, %v968_v12  ;;  %1018 = vst [vmem:[%s1949_s3] sm:$0xff] (!%p1237_p11), %v1002_v15 }
 0x151   : > { %v1288_v21 = vpop.f32.mrb[19].mxu0 }
 0x152   : > { %v1289_v23 = vadd.f32 %v1288_v21, %v1287_v20  ;;  %v897_v24 = vadd.f32 %v1286_v19, %v896_v56 }
 0x154   : > { %v935_v26 = vadd.f32 %v897_v24, %v373_v22  ;;  %v900_v27 = vadd.f32 %v1289_v23, %v899_v61  ;;  %v380_v61 = vld [vmem:[%s1949_s3 + $0x78] sm:$0xff]  ;;  %v1004_v22 = vmax.f32 (!%p1237_p11), %v988_v9, 0.0  ;;  %v1005_v23 = vmax.f32 (!%p1237_p11), %v989_v10, 0.0 }
 0x156   : > { %951 = vst [vmem:[%s1949_s3 + $0x40] sm:$0xff] %v935_v26  ;;  %v936_v28 = vadd.f32 %v900_v27, %v374_v25  ;;  %v1290_v29 = vpop.f32.mrb[20].mxu0  ;;  %1020 = vst [vmem:[%s1949_s3 + $0x10] sm:$0xff] (!%p1237_p11), %v1004_v22 }
 0x157   : > { %v1291_v30 = vpop.f32.mrb[21].mxu0  ;;  %v970_v14 = vld [vmem:[%s1949_s3 + $0x38] sm:$0xff] (!%p1237_p11)  ;;  %1021 = vst [vmem:[%s1949_s3 + $0x18] sm:$0xff] (!%p1237_p11), %v1005_v23 }
 0x158   : > { %952 = vst [vmem:[%s1949_s3 + $0x48] sm:$0xff] %v936_v28  ;;  %v1292_v31 = vadd.f32 %v1291_v30, %v1290_v29  ;;  %v1293_v32 = vpop.f32.mrb[22].mxu0  ;;  %v993_v25 = vadd.f32 (!%p1237_p11), %v1238_v2, %v970_v14  ;;  %v1007_v29 = vmax.f32 (!%p1237_p11), %v991_v17, 0.0 }
 0x159   : > { %v1294_v34 = vpop.f32.mrb[23].mxu0 }
 0x15a   : > { %v905_v35 = vadd.f32 %v1350_v53, %v1292_v31  ;;  %v1295_v36 = vadd.f32 %v1294_v34, %v1293_v32  ;;  %1023 = vst [vmem:[%s1949_s3 + $0x28] sm:$0xff] (!%p1237_p11), %v1007_v29 }
 0x15c   : > { %v937_v38 = vadd.f32 %v905_v35, %v375_v33  ;;  %v908_v39 = vadd.f32 %v1351_v59, %v1295_v36  ;;  %v1009_v35 = vmax.f32 (!%p1237_p11), %v993_v25, 0.0 }
 0x15d   : > { %v971_v19 = vld [vmem:[%s1949_s3 + $0x40] sm:$0xff] (!%p1237_p11) }
 0x15e   : > { %953 = vst [vmem:[%s1949_s3 + $0x50] sm:$0xff] %v937_v38  ;;  %v938_v40 = vadd.f32 %v908_v39, %v376_v37  ;;  %v1296_v41 = vpop.f32.mrb[24].mxu0  ;;  %v994_v31 = vadd.f32 (!%p1237_p11), %v1238_v2, %v971_v19  ;;  %1025 = vst [vmem:[%s1949_s3 + $0x38] sm:$0xff] (!%p1237_p11), %v1009_v35 }
 0x15f   : > { %v1297_v42 = vpop.f32.mrb[25].mxu0  ;;  %v972_v20 = vld [vmem:[%s1949_s3 + $0x48] sm:$0xff] (!%p1237_p11) }
 0x160   : > { %954 = vst [vmem:[%s1949_s3 + $0x58] sm:$0xff] %v938_v40  ;;  %v1298_v43 = vadd.f32 %v1297_v42, %v1296_v41  ;;  %v1299_v44 = vpop.f32.mrb[26].mxu0  ;;  %v995_v32 = vadd.f32 (!%p1237_p11), %v1238_v2, %v972_v20  ;;  %v1010_v39 = vmax.f32 (!%p1237_p11), %v994_v31, 0.0 }
 0x161   : > { %v1300_v45 = vpop.f32.mrb[27].mxu0 }
 0x162   : > { %v1301_v47 = vadd.f32 %v1300_v45, %v1299_v44  ;;  %v913_v48 = vadd.f32 %v1298_v43, %v912_v8  ;;  %v967_v8 = vld [vmem:[%s1949_s3 + $0x20] sm:$0xff] (!%p1237_p11)  ;;  %v1011_v40 = vmax.f32 (!%p1237_p11), %v995_v32, 0.0  ;;  %1026 = vst [vmem:[%s1949_s3 + $0x40] sm:$0xff] (!%p1237_p11), %v1010_v39 }
 0x164   : > { %v939_v50 = vadd.f32 %v913_v48, %v377_v46  ;;  %v916_v51 = vadd.f32 %v1301_v47, %v915_v13  ;;  %v969_v13 = vld [vmem:[%s1949_s3 + $0x30] sm:$0xff] (!%p1237_p11)  ;;  %1027 = vst [vmem:[%s1949_s3 + $0x48] sm:$0xff] (!%p1237_p11), %v1011_v40 }
 0x165   : > { %v992_v18 = vadd.f32 (!%p1237_p11), %v1238_v2, %v969_v13  ;;  %v973_v21 = vld [vmem:[%s1949_s3 + $0x50] sm:$0xff] (!%p1237_p11) }
 0x166   : > { %955 = vst [vmem:[%s1949_s3 + $0x60] sm:$0xff] %v939_v50  ;;  %v940_v52 = vadd.f32 %v916_v51, %v378_v49  ;;  %v1302_v53 = vpop.f32.mrb[28].mxu0  ;;  %v996_v36 = vadd.f32 (!%p1237_p11), %v1238_v2, %v973_v21 }
 0x167   : > { %v1303_v54 = vpop.f32.mrb[29].mxu0  ;;  %v974_v26 = vld [vmem:[%s1949_s3 + $0x58] sm:$0xff] (!%p1237_p11)  ;;  %v1008_v30 = vmax.f32 (!%p1237_p11), %v992_v18, 0.0 }
 0x168   : > { %956 = vst [vmem:[%s1949_s3 + $0x68] sm:$0xff] %v940_v52  ;;  %v1304_v55 = vadd.f32 %v1303_v54, %v1302_v53  ;;  %v1305_v56 = vpop.f32.mrb[30].mxu0  ;;  %v997_v37 = vadd.f32 (!%p1237_p11), %v1238_v2, %v974_v26  ;;  %v1012_v43 = vmax.f32 (!%p1237_p11), %v996_v36, 0.0 }
 0x169   : > { %v1306_v58 = vpop.f32.mrb[31].mxu0  ;;  %1024 = vst [vmem:[%s1949_s3 + $0x30] sm:$0xff] (!%p1237_p11), %v1008_v30 }
 0x16a   : > { %v921_v59 = vadd.f32 %v1354_v5, %v1304_v55  ;;  %v1307_v60 = vadd.f32 %v1306_v58, %v1305_v56  ;;  %962 = sbr.rel (%p1237_p11) target bundleno = 381 (0x17d), region = 66  ;;  %v987_v5 = vadd.f32 (!%p1237_p11), %v1238_v2, %v964_v3  ;;  %v1013_v44 = vmax.f32 (!%p1237_p11), %v997_v37, 0.0  ;;  %1028 = vst [vmem:[%s1949_s3 + $0x50] sm:$0xff] (!%p1237_p11), %v1012_v43 }
 0x16c   : > { %v941_v62 = vadd.f32 %v921_v59, %v379_v57  ;;  %v924_v63 = vadd.f32 %v1355_v11, %v1307_v60  ;;  %v990_v11 = vadd.f32 (!%p1237_p11), %v1238_v2, %v967_v8  ;;  %v1003_v16 = vmax.f32 (!%p1237_p11), %v987_v5, 0.0  ;;  %1029 = vst [vmem:[%s1949_s3 + $0x58] sm:$0xff] (!%p1237_p11), %v1013_v44 }
 0x16d   : > { %v975_v27 = vld [vmem:[%s1949_s3 + $0x60] sm:$0xff] (!%p1237_p11) }
 0x16e   : > { %957 = vst [vmem:[%s1949_s3 + $0x70] sm:$0xff] %v941_v62  ;;  %v942_v0 = vadd.f32 %v924_v63, %v380_v61  ;;  %v1006_v24 = vmax.f32 (!%p1237_p11), %v990_v11, 0.0  ;;  %1019 = vst [vmem:[%s1949_s3 + $0x8] sm:$0xff] (!%p1237_p11), %v1003_v16  ;;  %v998_v38 = vadd.f32 (!%p1237_p11), %v1238_v2, %v975_v27 }
 0x16f   : > { %v976_v28 = vld [vmem:[%s1949_s3 + $0x68] sm:$0xff] (!%p1237_p11) }
 0x170   : > { %958 = vst [vmem:[%s1949_s3 + $0x78] sm:$0xff] %v942_v0  ;;  %1022 = vst [vmem:[%s1949_s3 + $0x20] sm:$0xff] (!%p1237_p11), %v1006_v24  ;;  %v999_v41 = vadd.f32 (!%p1237_p11), %v1238_v2, %v976_v28  ;;  %v1014_v45 = vmax.f32 (!%p1237_p11), %v998_v38, 0.0 }
 0x172   : > { %v1015_v47 = vmax.f32 %v999_v41, 0.0  ;;  %1030 = vst [vmem:[%s1949_s3 + $0x60] sm:$0xff] %v1014_v45 }
 0x174   : > { %1031 = vst [vmem:[%s1949_s3 + $0x68] sm:$0xff] %v1015_v47 }
 0x175   : > { %v977_v33 = vld [vmem:[%s1949_s3 + $0x70] sm:$0xff] }
 0x176   : > { %v1000_v42 = vadd.f32 %v1238_v2, %v977_v33 }
 0x177   : > { %v978_v34 = vld [vmem:[%s1949_s3 + $0x78] sm:$0xff] }
 0x178   : > { %v1001_v46 = vadd.f32 %v1238_v2, %v978_v34  ;;  %v1016_v48 = vmax.f32 %v1000_v42, 0.0 }
 0x17a   : > { %v1017_v49 = vmax.f32 %v1001_v46, 0.0  ;;  %1032 = vst [vmem:[%s1949_s3 + $0x70] sm:$0xff] %v1016_v48 }
 0x17c   : > { %1033 = vst [vmem:[%s1949_s3 + $0x78] sm:$0xff] %v1017_v49 }
 0x17d PF: > { %s13_s16 = sadd.s32 1, %s1493_s16   ;;  %s1950_s12 = smov %s1481_s13 }
 0x17e   : > { %p10_p12 = scmp.ge.s32.totalorder %s13_s16, 5   ;;  %s1951_s13 = smov %s1551_s20 }
 0x17f   : > { %s1952_s14 = smov %s1489_s15  ;;  %s1953_s15 = smov %s1955_s17 }
 0x180   :  { %12 = sbr.rel (!%p10_p12) target bundleno = 3 (0x3), region = 113 }

// kernel: unet_forward.32
= control target key start
LH: loop header
LB: loop body
LE: loop exit
PB: predicated region body
PF: predicated region fallthrough
CT: control target
= control target key end

     0   :  { %s1036_s12 = smov 0   ;;  %s1038_s13 = smov 0   ;;  %s1200_s0 = inlined_call_operand.vmem [shape: bf16[32,1152], index: 0, kind: input, shape index: {}]   ;;  %s1201_s1 = inlined_call_operand.vmem [shape: bf16[1152,128], index: 1, kind: input, shape index: {}]   ;;  %s1202_s2 = inlined_call_operand.vmem [shape: f32[1,128], index: 2, kind: input, shape index: {}]   ;;  %s1203_s3 = inlined_call_operand.vmem [shape: f32[32,128], index: 3, kind: output, shape index: {}]  }
   0x1   :  { %s1040_s14 = smov 0   ;;  %s1042_s15 = smov 0  }
   0x2   :  { %s1044_s16 = smov 0  }
   0x3 LB: > { %s25_s17 = sadd.s32 1, %s1009_s15  ;;  %p48_p1 = scmp.ne.s32.totalorder %s1001_s13, %s997_s12  ;;  %s1013_s16 = sphi %s1044_s16, %s13_s16   ;;  %s1009_s15 = sphi %s1042_s15, %s1207_s15   ;;  %s1005_s14 = sphi %s1040_s14, %s1206_s14   ;;  %s1001_s13 = sphi %s1038_s13, %s1205_s13   ;;  %s997_s12 = sphi %s1036_s12, %s1204_s12  }
   0x4   : > { %p26_p0 = scmp.ge.s32.totalorder %s25_s17, 3  ;;  %p49_p2 = scmp.eq.s32.totalorder %s1013_s16, 0 }
   0x5   : > { %s41_s19 = sadd.s32 1, %s1001_s13  ;;  %p792_p5 = scmp.ge.s32.totalorder %s1013_s16, 3 }
   0x6   : > { %s1209_s17 = smov (%p26_p0, %s25_s17), 0  ;;  %p50_p3 = por %p49_p2, %p48_p1 }
   0x7   : > { %s37_s18 = ssub.s32 %s1009_s15, %s1209_s17  ;;  %162 = sbr.rel (%p792_p5) target bundleno = 23 (0x17), region = 20 }
   0x8   : > { %p39_p4 = scmp.eq.s32.totalorder %s37_s18, 0 }
   0xa   : > { %s1071_s20 = scalar_select %p39_p4, %s1001_s13, %s41_s19  }
   0xe   : > { %165 = sbr.rel (!%p50_p3) target bundleno = 23 (0x17), region = 24  ;;  %s167_s21 = sand.u32 (%p50_p3), 1, %s1001_s13  }
   0xf   : > { %s841_s22 = smul.u32 (%p50_p3), 12, %s1009_s15 }
  0x10   : > { %s900_s23 = smul.u32 (%p50_p3), 48, %s167_s21 }
  0x11   : > { %s175_s26 = scalar_lea.vmem (%p50_p3), %s1200_s0, %s841_s22 }
  0x12   : > { %v190_v0 = vld [vmem:[%s175_s26] sm:$0xff] (%p50_p3)  ;;  %v194_v2 = vld [vmem:[%s175_s26 + $0x48] sm:$0xff] (%p50_p3)  ;;  %s169_s27 = scalar_lea.vmem (%p50_p3), [#allocation2], %s900_s23  ;;  %v798_v6 = vld [vmem:[%s175_s26 + $0x50] sm:$0xf] (%p50_p3) }
  0x13   : > { %v192_v1 = vld [vmem:[%s175_s26 + $0x24] sm:$0xff] (%p50_p3)  ;;  %191 = vst [vmem:[%s169_s27] sm:$0xff] (%p50_p3), %v190_v0  ;;  %195 = vst [vmem:[%s169_s27 + $0x18] sm:$0xff] (%p50_p3), %v194_v2  ;;  %v196_v3 = vld [vmem:[%s175_s26 + $0x6c] sm:$0xff] (%p50_p3) }
  0x14   : > { %193 = vst [vmem:[%s169_s27 + $0xc] sm:$0xff] (%p50_p3), %v192_v1  ;;  %v794_v4 = vld [vmem:[%s175_s26 + $0x8] sm:$0xf] (%p50_p3)  ;;  %v796_v5 = vld [vmem:[%s175_s26 + $0x2c] sm:$0xf] (%p50_p3)  ;;  %197 = vst [vmem:[%s169_s27 + $0x24] sm:$0xff] (%p50_p3), %v196_v3 }
  0x15   : > { %795 = vst [vmem:[%s169_s27 + $0x8] sm:$0xf] %v794_v4  ;;  %797 = vst [vmem:[%s169_s27 + $0x14] sm:$0xf] %v796_v5  ;;  %v800_v7 = vld [vmem:[%s175_s26 + $0x74] sm:$0xf] }
  0x16   : > { %799 = vst [vmem:[%s169_s27 + $0x20] sm:$0xf] %v798_v6  ;;  %801 = vst [vmem:[%s169_s27 + $0x2c] sm:$0xf] %v800_v7 }
  0x17 PF: > { %p802_p6 = scmp.ge.s32.totalorder %s1013_s16, 1  ;;  %p229_p7 = scmp.lt.s32.totalorder %s1013_s16, 4 }
  0x19   : > { %p230_p8 = pnand %p802_p6, %p229_p7 }
  0x1a   : > { %s236_s28 = sand.u32 (!%p230_p8), 1, %s997_s12   ;;  %s275_s29 = smul.u32 (!%p230_p8), 48, %s1005_s14 }
  0x1b   : > { %233 = sbr.rel (%p230_p8) target bundleno = 316 (0x13c), region = 54  ;;  %p804_p10 = scmp.ne.s32.totalorder (!%p230_p8), %s1005_s14, 0 }
  0x1c   : > { %s901_s30 = smul.u32 (!%p230_p8), 48, %s236_s28  ;;  %p276_p9 = scmp.lt.s32.totalorder (!%p230_p8), %s275_s29, 143 }
  0x1e   : > { %s1088_s8 = scalar_lea.vmem (!%p230_p8), [#allocation2], %s901_s30 }
  0x22   : > { %s1211_s29 = smov (!%p276_p9, %s275_s29), 143  ;;  %300 = sbr.rel (%p804_p10) target bundleno = 41 (0x29), region = 62 }
  0x23   : > { %s803_s4 = sshll.u32 %s1211_s29, 2  ;;  %v1015_v8 = vmov (!%p804_p10), 0.0  }
  0x24   : > { %s1086_s7 = scalar_lea.vmem %s1201_s1, %s803_s4  ;;  %301 = vst [vmem:[%s1203_s3] sm:$0xff] (!%p804_p10), %v1015_v8  ;;  %302 = vst [vmem:[%s1203_s3 + $0x8] sm:$0xff] (!%p804_p10), %v1015_v8 }
  0x25   : > { %303 = vst [vmem:[%s1203_s3 + $0x10] sm:$0xff] (!%p804_p10), %v1015_v8  ;;  %304 = vst [vmem:[%s1203_s3 + $0x18] sm:$0xff] (!%p804_p10), %v1015_v8 }
  0x29 PF: > { %v943_v9 = vld [vmem:[%s1086_s7 + $0x40] sm:$0xff]   ;;  %v946_v12 = vld [vmem:[%s1086_s7 + $0x48] sm:$0xff]   ;;  %v949_v15 = vld [vmem:[%s1086_s7 + $0x50] sm:$0xff]   ;;  %p835_p11 = scmp.ne.s32.totalorder %s1005_s14, 2 }
  0x2a   : > { %v944_v10 = vld [vmem:[%s1086_s7] sm:$0xff]   ;;  %842 = vmatprep.subr.bf16.mxu0 %v943_v9  ;;  %v947_v13 = vld [vmem:[%s1086_s7 + $0x8] sm:$0xff]   ;;  %v950_v16 = vld [vmem:[%s1086_s7 + $0x10] sm:$0xff]  }
  0x2b   : > { %v945_v11 = vld [vmem:[%s1086_s7 + $0x80] sm:$0xff]   ;;  %843 = vmatpush3.bf16.msra.mxu0 %v944_v10  ;;  %v948_v14 = vld [vmem:[%s1086_s7 + $0x88] sm:$0xff]   ;;  %v951_v17 = vld [vmem:[%s1086_s7 + $0x90] sm:$0xff]  }
  0x2c   : > { %880 = vmatprep.subr.bf16.mxu1 %v945_v11  ;;  %844 = vmatprep.subr.bf16.mxu0 %v946_v12  ;;  %v952_v18 = vld [vmem:[%s1086_s7 + $0x58] sm:$0xff]   ;;  %v955_v21 = vld [vmem:[%s1086_s7 + $0x60] sm:$0xff]   ;;  %v958_v24 = vld [vmem:[%s1086_s7 + $0x68] sm:$0xff]  }
  0x2d   : > { %881 = vmatpush3.bf16.msra.mxu1 %v945_v11  ;;  %v953_v19 = vld [vmem:[%s1086_s7 + $0x18] sm:$0xff]   ;;  %v957_v22 = vld [vmem:[%s1086_s7 + $0xa0] sm:$0xff]   ;;  %v960_v25 = vld [vmem:[%s1086_s7 + $0xa8] sm:$0xff]  }
  0x2e   : > { %882 = vmatprep.subr.bf16.mxu1 %v948_v14  ;;  %v954_v20 = vld [vmem:[%s1086_s7 + $0x98] sm:$0xff]   ;;  %v956_v23 = vld [vmem:[%s1086_s7 + $0x20] sm:$0xff]   ;;  %v959_v26 = vld [vmem:[%s1086_s7 + $0x28] sm:$0xff]  }
  0x2f   : > { %845 = vmatpush3.bf16.msra.mxu0 %v947_v13  ;;  %v961_v27 = vld [vmem:[%s1086_s7 + $0x70] sm:$0xff]   ;;  %v964_v30 = vld [vmem:[%s1086_s7 + $0x78] sm:$0xff]   ;;  %v305_v45 = vld [vmem:[%s1203_s3] sm:$0xff] }
  0x30   : > { %846 = vmatprep.subr.bf16.mxu0 %v949_v15  ;;  %v962_v28 = vld [vmem:[%s1086_s7 + $0x30] sm:$0xff]   ;;  %v966_v31 = vld [vmem:[%s1086_s7 + $0xb8] sm:$0xff]   ;;  %v306_v50 = vld [vmem:[%s1203_s3 + $0x8] sm:$0xff] }
  0x31   : > { %883 = vmatpush3.bf16.msra.mxu1 %v948_v14  ;;  %v963_v29 = vld [vmem:[%s1086_s7 + $0xb0] sm:$0xff]   ;;  %v965_v34 = vld [vmem:[%s1086_s7 + $0x38] sm:$0xff]   ;;  %v836_v4 = vld [vmem:[%s1202_s2] ss:$0 sm:$0xff] (!%p835_p11) }
  0x32   : > { %884 = vmatprep.subr.bf16.mxu1 %v951_v17  ;;  %v969_v32 = vld [vmem:[%s1088_s8 + $0x4] ss:$12 sps:$4 sm:$0xff]   ;;  %v970_v33 = vld [vmem:[%s1088_s8 + $0x8] ss:$12 sps:$4 sm:$0xff]   ;;  %v967_v35 = vld [vmem:[%s1088_s8] ss:$12 sps:$4 sm:$0xff]  }
  0x33   : > { %847 = vmatpush3.bf16.msra.mxu0 %v950_v16  ;;  %573 = vmatprep.mubr.bf16.mxu0 %v969_v32  ;;  %v972_v36 = vld [vmem:[%s1088_s8 + $0x1c] ss:$12 sps:$4 sm:$0xff]   ;;  %v971_v37 = vld [vmem:[%s1088_s8 + $0x20] ss:$12 sps:$4 sm:$0xff]   ;;  %v974_v38 = vld [vmem:[%s1088_s8 + $0x18] ss:$12 sps:$4 sm:$0xff]  }
  0x34   : > { %848 = vmatprep.subr.bf16.mxu0 %v952_v18  ;;  %896 = vmatprep.mubr.bf16.mxu1 %v970_v33  ;;  %v307_v59 = vld [vmem:[%s1203_s3 + $0x10] sm:$0xff]  ;;  %v308_v63 = vld [vmem:[%s1203_s3 + $0x18] sm:$0xff] }
  0x35   : > { %885 = vmatpush3.bf16.msra.mxu1 %v951_v17 }
  0x36   : > { %886 = vmatprep.subr.bf16.mxu1 %v954_v20 }
  0x37   : > { %849 = vmatpush3.bf16.msra.mxu0 %v953_v19 }
  0x38   : > { %850 = vmatprep.subr.bf16.mxu0 %v955_v21 }
  0x39   : > { %887 = vmatpush3.bf16.msra.mxu1 %v954_v20 }
  0x3a   : > { %888 = vmatprep.subr.bf16.mxu1 %v957_v22 }
  0x3b   : > { %851 = vmatpush3.bf16.msra.mxu0 %v956_v23 }
  0x3c   : > { %852 = vmatprep.subr.bf16.mxu0 %v958_v24 }
  0x3d   : > { %889 = vmatpush3.bf16.msra.mxu1 %v957_v22 }
  0x3e   : > { %890 = vmatprep.subr.bf16.mxu1 %v960_v25 }
  0x3f   : > { %853 = vmatpush3.bf16.msra.mxu0 %v959_v26 }
  0x40   : > { %854 = vmatprep.subr.bf16.mxu0 %v961_v27 }
  0x41   : > { %891 = vmatpush3.bf16.msra.mxu1 %v960_v25 }
  0x42   : > { %892 = vmatprep.subr.bf16.mxu1 %v963_v29 }
  0x43   : > { %855 = vmatpush3.bf16.msra.mxu0 %v962_v28 }
  0x44   : > { %856 = vmatprep.subr.bf16.mxu0 %v964_v30 }
  0x45   : > { %893 = vmatpush3.bf16.msra.mxu1 %v963_v29 }
  0x46   : > { %894 = vmatprep.subr.bf16.mxu1 %v966_v31 }
  0x47   : > { %857 = vmatpush3.bf16.msra.mxu0 %v965_v34 }
  0x49   : > { %895 = vmatpush3.bf16.msra.mxu1 %v966_v31 }
  0x4a   : > { %574 = vmatmul.mubr.bf16.vlgmr.msra.gmra.mrb[0].mxu0 %v967_v35 }
  0x4b   : > { %581 = vmatprep.mubr.bf16.mxu0 %v972_v36 }
  0x4c   : > { %897 = vmatmul.mubr.bf16.vlgmr.msra.gmra.mrb[0].mxu1 %v971_v37 }
  0x52   : > { %582 = vmatmul.mubr.bf16.gmra.mrb[4].mxu0 %v974_v38 }
 0x11d   : > { %v858_v39 = vpop.f32.mrb[0].mxu0 }
 0x11e   : > { %v859_v40 = vpop.f32.mrb[1].mxu0 }
 0x11f   : > { %v860_v41 = vadd.f32 %v859_v40, %v858_v39  ;;  %v861_v42 = vpop.f32.mrb[2].mxu0  ;;  %v898_v43 = vpop.f32.mrb[0].mxu1 }
 0x120   : > { %v862_v44 = vpop.f32.mrb[3].mxu0  ;;  %v624_v46 = vpop.f32.mrb[1].mxu1 }
 0x121   : > { %v863_v47 = vadd.f32 %v862_v44, %v861_v42  ;;  %v625_v48 = vadd.f32 %v860_v41, %v624_v46  ;;  %v899_v49 = vpop.f32.mrb[2].mxu1 }
 0x122   : > { %v627_v51 = vpop.f32.mrb[3].mxu1 }
 0x123   : > { %v639_v52 = vadd.f32 %v625_v48, %v305_v45  ;;  %v628_v53 = vadd.f32 %v863_v47, %v627_v51 }
 0x125   : > { %643 = vst [vmem:[%s1203_s3] sm:$0xff] %v639_v52  ;;  %v640_v54 = vadd.f32 %v628_v53, %v306_v50  ;;  %v864_v55 = vpop.f32.mrb[4].mxu0 }
 0x126   : > { %v865_v56 = vpop.f32.mrb[5].mxu0 }
 0x127   : > { %644 = vst [vmem:[%s1203_s3 + $0x8] sm:$0xff] %v640_v54  ;;  %v866_v57 = vadd.f32 %v865_v56, %v864_v55  ;;  %v867_v58 = vpop.f32.mrb[6].mxu0 }
 0x128   : > { %v868_v60 = vpop.f32.mrb[7].mxu0 }
 0x129   : > { %v633_v61 = vadd.f32 %v898_v43, %v866_v57  ;;  %v869_v62 = vadd.f32 %v868_v60, %v867_v58  ;;  %650 = sbr.rel (%p835_p11) target bundleno = 316 (0x13c), region = 66 }
 0x12b   : > { %v641_v0 = vadd.f32 %v633_v61, %v307_v59  ;;  %v636_v1 = vadd.f32 %v899_v49, %v869_v62 }
 0x12c   : > { %v651_v3 = vld [vmem:[%s1203_s3] sm:$0xff] (!%p835_p11) }
 0x12d   : > { %645 = vst [vmem:[%s1203_s3 + $0x10] sm:$0xff] %v641_v0  ;;  %v642_v2 = vadd.f32 %v636_v1, %v308_v63  ;;  %v662_v6 = vadd.f32 (!%p835_p11), %v836_v4, %v651_v3 }
 0x12e   : > { %v652_v5 = vld [vmem:[%s1203_s3 + $0x8] sm:$0xff] (!%p835_p11) }
 0x12f   : > { %646 = vst [vmem:[%s1203_s3 + $0x18] sm:$0xff] %v642_v2  ;;  %v663_v7 = vadd.f32 (!%p835_p11), %v836_v4, %v652_v5  ;;  %v666_v12 = vmax.f32 (!%p835_p11), %v662_v6, 0.0 }
 0x131   : > { %v667_v13 = vmax.f32 %v663_v7, 0.0  ;;  %670 = vst [vmem:[%s1203_s3] sm:$0xff] %v666_v12 }
 0x133   : > { %671 = vst [vmem:[%s1203_s3 + $0x8] sm:$0xff] %v667_v13 }
 0x134   : > { %v653_v8 = vld [vmem:[%s1203_s3 + $0x10] sm:$0xff] }
 0x135   : > { %v664_v10 = vadd.f32 %v836_v4, %v653_v8 }
 0x136   : > { %v654_v9 = vld [vmem:[%s1203_s3 + $0x18] sm:$0xff] }
 0x137   : > { %v665_v11 = vadd.f32 %v836_v4, %v654_v9  ;;  %v668_v14 = vmax.f32 %v664_v10, 0.0 }
 0x139   : > { %v669_v15 = vmax.f32 %v665_v11, 0.0  ;;  %672 = vst [vmem:[%s1203_s3 + $0x10] sm:$0xff] %v668_v14 }
 0x13b   : > { %673 = vst [vmem:[%s1203_s3 + $0x18] sm:$0xff] %v669_v15 }
 0x13c PF: > { %s13_s16 = sadd.s32 1, %s1013_s16   ;;  %s1204_s12 = smov %s1001_s13 }
 0x13d   : > { %p10_p12 = scmp.ge.s32.totalorder %s13_s16, 5   ;;  %s1205_s13 = smov %s1071_s20 }
 0x13e   : > { %s1206_s14 = smov %s1009_s15  ;;  %s1207_s15 = smov %s1209_s17 }
 0x13f   :  { %12 = sbr.rel (!%p10_p12) target bundleno = 3 (0x3), region = 113 }

// kernel: unet_forward.34
= control target key start
LH: loop header
LB: loop body
LE: loop exit
PB: predicated region body
PF: predicated region fallthrough
CT: control target
= control target key end

     0   :  { %s865_s12 = smov 0   ;;  %s867_s13 = smov 0   ;;  %s952_s0 = inlined_call_operand.vmem [shape: bf16[8,1152], index: 0, kind: input, shape index: {}]   ;;  %s953_s1 = inlined_call_operand.vmem [shape: bf16[1152,128], index: 1, kind: input, shape index: {}]   ;;  %s954_s2 = inlined_call_operand.vmem [shape: f32[1,128], index: 2, kind: input, shape index: {}]   ;;  %s955_s3 = inlined_call_operand.vmem [shape: f32[8,128], index: 3, kind: output, shape index: {}]  }
   0x1   :  { %s869_s14 = smov 0  }
   0x2 LB: > { %s25_s15 = sadd.s32 1, %s836_s13  ;;  %p677_p0 = scmp.ge.s32.totalorder %s840_s14, 1  ;;  %s840_s14 = sphi %s869_s14, %s13_s14   ;;  %s836_s13 = sphi %s867_s13, %s957_s13   ;;  %s832_s12 = sphi %s865_s12, %s956_s12  }
   0x3   : > { %p26_p1 = scmp.ge.s32.totalorder %s25_s15, 3  ;;  %p189_p2 = scmp.lt.s32.totalorder %s840_s14, 4 }
   0x5   : > { %s959_s15 = smov (%p26_p1, %s25_s15), 0  ;;  %p190_p3 = pnand %p677_p0, %p189_p2 }
   0x6   : > { %s230_s16 = smul.u32 (!%p190_p3), 3, %s832_s12  ;;  %p680_p6 = scmp.ne.s32.totalorder (!%p190_p3), %s832_s12, 0 }
   0x7   : > { %193 = sbr.rel (%p190_p3) target bundleno = 289 (0x121), region = 32 }
   0x8   : > { %s240_s17 = smul.u32 (!%p190_p3), 48, %s832_s12  ;;  %p233_p4 = scmp.lt.s32.totalorder (!%p190_p3), %s230_s16, 8 }
   0xa   : > { %p241_p5 = scmp.lt.s32.totalorder (!%p190_p3), %s240_s17, 143 }
   0xe   : > { %s961_s16 = smov (!%p233_p4, %s230_s16), 8  ;;  %s963_s17 = smov (!%p241_p5, %s240_s17), 143 }
   0xf   : > { %s678_s18 = sshll.u32 %s961_s16, 2  ;;  %s679_s22 = sshll.u32 %s963_s17, 2  ;;  %v842_v0 = vmov (!%p680_p6), 0.0  }
  0x10   : > { %s890_s21 = scalar_lea.vmem %s952_s0, %s678_s18  ;;  %s895_s25 = scalar_lea.vmem %s953_s1, %s679_s22  ;;  %264 = vst [vmem:[%s955_s3] sm:$0xff] (!%p680_p6), %v842_v0 }
  0x11   : > { %263 = sbr.rel (%p680_p6) target bundleno = 24 (0x18), region = 36 }
  0x18 PF: > { %v791_v1 = vld [vmem:[%s895_s25 + $0x40] sm:$0xff]   ;;  %v843_v2 = vmov 0.0   ;;  %vm844_vm0 = vmmov 0   ;;  %v794_v5 = vld [vmem:[%s895_s25 + $0x48] sm:$0xff]   ;;  %v797_v8 = vld [vmem:[%s895_s25 + $0x50] sm:$0xff]   ;;  %p708_p7 = scmp.ne.s32.totalorder %s832_s12, 2 }
  0x19   : > { %744 = vmatprep.subr.bf16.mxu1 %v843_v2  ;;  %v792_v3 = vld [vmem:[%s895_s25] sm:$0xff]   ;;  %713 = vmatprep.subr.bf16.mxu0 %v791_v1  ;;  %v795_v6 = vld [vmem:[%s895_s25 + $0x8] sm:$0xff]   ;;  %v798_v9 = vld [vmem:[%s895_s25 + $0x10] sm:$0xff]  }
  0x1a   : > { %v793_v4 = vld [vmem:[%s895_s25 + $0x80] sm:$0xff]   ;;  %760 = vmatprep.mubr.msk.bf16.mxu1 %vm844_vm0, %v843_v2  ;;  %714 = vmatpush3.bf16.msra.mxu0 %v792_v3  ;;  %v796_v7 = vld [vmem:[%s895_s25 + $0x88] sm:$0xff]   ;;  %v799_v10 = vld [vmem:[%s895_s25 + $0x90] sm:$0xff]  }
  0x1b   : > { %745 = vmatpush3.bf16.msra.mxu1 %v793_v4  ;;  %715 = vmatprep.subr.bf16.mxu0 %v794_v5  ;;  %v800_v11 = vld [vmem:[%s895_s25 + $0x58] sm:$0xff]   ;;  %v803_v14 = vld [vmem:[%s895_s25 + $0x60] sm:$0xff]   ;;  %v806_v17 = vld [vmem:[%s895_s25 + $0x68] sm:$0xff]  }
  0x1c   : > { %746 = vmatprep.subr.bf16.mxu1 %v843_v2  ;;  %v801_v12 = vld [vmem:[%s895_s25 + $0x18] sm:$0xff]   ;;  %v804_v15 = vld [vmem:[%s895_s25 + $0x20] sm:$0xff]   ;;  %v807_v18 = vld [vmem:[%s895_s25 + $0x28] sm:$0xff]  }
  0x1d   : > { %v802_v13 = vld [vmem:[%s895_s25 + $0x98] sm:$0xff]   ;;  %v805_v16 = vld [vmem:[%s895_s25 + $0xa0] sm:$0xff]   ;;  %v808_v19 = vld [vmem:[%s895_s25 + $0xa8] sm:$0xff]  }
  0x1e   : > { %716 = vmatpush3.bf16.msra.mxu0 %v795_v6  ;;  %v809_v20 = vld [vmem:[%s895_s25 + $0x70] sm:$0xff]   ;;  %v812_v23 = vld [vmem:[%s895_s25 + $0x78] sm:$0xff]   ;;  %v266_v24 = vld [vmem:[%s890_s21] sm:$0xff] }
  0x1f   : > { %747 = vmatpush3.bf16.msra.mxu1 %v796_v7  ;;  %717 = vmatprep.subr.bf16.mxu0 %v797_v8  ;;  %v810_v21 = vld [vmem:[%s895_s25 + $0x30] sm:$0xff]   ;;  %v682_v25 = vcombine.high %v266_v24, %v266_v24  ;;  %v813_v26 = vld [vmem:[%s895_s25 + $0x38] sm:$0xff]   ;;  %v681_v28 = vcombine.low %v266_v24, %v266_v24  ;;  %v817_v29 = vld [vmem:[%s890_s21 + $0x8] ss:$0 sps:$4 sm:$0xff]  }
  0x20   : > { %748 = vmatprep.subr.bf16.mxu1 %v843_v2  ;;  %v811_v22 = vld [vmem:[%s895_s25 + $0xb0] sm:$0xff]   ;;  %v814_v27 = vld [vmem:[%s895_s25 + $0xb8] sm:$0xff]   ;;  %v265_v36 = vld [vmem:[%s955_s3] sm:$0xff] }
  0x21   : > { %503 = vmatprep.mubr.bf16.mxu0 %v682_v25  ;;  %v709_v43 = vld [vmem:[%s954_s2] ss:$0 sm:$0xff] (!%p708_p7) }
  0x22   : > { %718 = vmatpush3.bf16.msra.mxu0 %v798_v9 }
  0x23   : > { %749 = vmatpush3.bf16.msra.mxu1 %v799_v10  ;;  %719 = vmatprep.subr.bf16.mxu0 %v800_v11 }
  0x24   : > { %750 = vmatprep.subr.bf16.mxu1 %v843_v2 }
  0x26   : > { %720 = vmatpush3.bf16.msra.mxu0 %v801_v12 }
  0x27   : > { %751 = vmatpush3.bf16.msra.mxu1 %v802_v13  ;;  %721 = vmatprep.subr.bf16.mxu0 %v803_v14 }
  0x28   : > { %752 = vmatprep.subr.bf16.mxu1 %v843_v2 }
  0x2a   : > { %722 = vmatpush3.bf16.msra.mxu0 %v804_v15 }
  0x2b   : > { %753 = vmatpush3.bf16.msra.mxu1 %v805_v16  ;;  %723 = vmatprep.subr.bf16.mxu0 %v806_v17 }
  0x2c   : > { %754 = vmatprep.subr.bf16.mxu1 %v843_v2 }
  0x2e   : > { %724 = vmatpush3.bf16.msra.mxu0 %v807_v18 }
  0x2f   : > { %755 = vmatpush3.bf16.msra.mxu1 %v808_v19  ;;  %725 = vmatprep.subr.bf16.mxu0 %v809_v20 }
  0x30   : > { %756 = vmatprep.subr.bf16.mxu1 %v843_v2 }
  0x32   : > { %726 = vmatpush3.bf16.msra.mxu0 %v810_v21 }
  0x33   : > { %757 = vmatpush3.bf16.msra.mxu1 %v811_v22  ;;  %727 = vmatprep.subr.bf16.mxu0 %v812_v23 }
  0x34   : > { %758 = vmatprep.subr.bf16.mxu1 %v843_v2 }
  0x36   : > { %728 = vmatpush3.bf16.msra.mxu0 %v813_v26 }
  0x37   : > { %759 = vmatpush3.bf16.msra.mxu1 %v814_v27 }
  0x39   : > { %504 = vmatmul.mubr.bf16.vlgmr.msra.gmra.mrb[0].mxu0 %v681_v28 }
  0x3a   : > { %761 = vmatmul.mubr.bf16.vlgmr.msra.gmra.mrb[0].mxu1 %v817_v29 }
 0x10c   : > { %v729_v30 = vpop.f32.mrb[0].mxu0 }
 0x10d   : > { %v545_v31 = vpop.f32.mrb[0].mxu1  ;;  %v730_v32 = vpop.f32.mrb[1].mxu0 }
 0x10e   : > { %v731_v33 = vadd.f32 %v730_v32, %v729_v30  ;;  %v762_v34 = vpop.f32.mrb[1].mxu1  ;;  %v732_v35 = vpop.f32.mrb[2].mxu0  ;;  %556 = sbr.rel (%p708_p7) target bundleno = 289 (0x121), region = 40 }
 0x10f   : > { %v548_v37 = vpop.f32.mrb[2].mxu1  ;;  %v733_v38 = vpop.f32.mrb[3].mxu0 }
 0x110   : > { %v546_v39 = vadd.f32 %v731_v33, %v545_v31  ;;  %v763_v40 = vpop.f32.mrb[3].mxu1 }
 0x112   : > { %v551_v41 = vadd.f32 %v546_v39, %v265_v36 }
 0x114   : > { %552 = vst [vmem:[%s955_s3] sm:$0xff] %v551_v41 }
 0x11b   : > { %v557_v42 = vld [vmem:[%s955_s3] sm:$0xff] }
 0x11c   : > { %v565_v44 = vadd.f32 %v709_v43, %v557_v42 }
 0x11e   : > { %v566_v45 = vmax.f32 %v565_v44, 0.0 }
 0x120   : > { %567 = vst [vmem:[%s955_s3] sm:$0xff] %v566_v45 }
 0x121 PF: > { %s13_s14 = sadd.s32 1, %s840_s14   ;;  %s956_s12 = smov %s836_s13 }
 0x122   : > { %p10_p8 = scmp.ge.s32.totalorder %s13_s14, 5   ;;  %s957_s13 = smov %s959_s15 }
 0x124   :  { %12 = sbr.rel (!%p10_p8) target bundleno = 2 (0x2), region = 76 }

// kernel: unet_forward.38
= control target key start
LH: loop header
LB: loop body
LE: loop exit
PB: predicated region body
PF: predicated region fallthrough
CT: control target
= control target key end

     0   :  { %v194_v0 = vmov 0.0   ;;  %vm195_vm0 = vmmov 0   ;;  %s249_s1 = inlined_call_operand.vmem [shape: bf16[128,128], index: 1, kind: input, shape index: {}]   ;;  %s250_s0 = inlined_call_operand.vmem [shape: bf16[8,128], index: 0, kind: input, shape index: {}]   ;;  %s251_s2 = inlined_call_operand.vmem [shape: f32[1,128], index: 2, kind: input, shape index: {}]   ;;  %s252_s3 = inlined_call_operand.vmem [shape: f32[8,128], index: 3, kind: output, shape index: {}]  }
   0x1   :  { %164 = vmatprep.subr.bf16.mxu0 %v194_v0  ;;  %v186_v1 = vld [vmem:[%s249_s1] sm:$0xff]   ;;  %180 = vmatprep.mubr.msk.bf16.mxu0 %vm195_vm0, %v194_v0  ;;  %v187_v2 = vld [vmem:[%s249_s1 + $0x8] sm:$0xff]   ;;  %v188_v3 = vld [vmem:[%s249_s1 + $0x10] sm:$0xff]  }
   0x2   :  { %165 = vmatpush3.bf16.msra.mxu0 %v186_v1  ;;  %v189_v4 = vld [vmem:[%s249_s1 + $0x18] sm:$0xff]   ;;  %v190_v5 = vld [vmem:[%s249_s1 + $0x20] sm:$0xff]   ;;  %v191_v6 = vld [vmem:[%s249_s1 + $0x28] sm:$0xff]  }
   0x3   :  { %166 = vmatprep.subr.bf16.mxu0 %v194_v0  ;;  %v192_v7 = vld [vmem:[%s249_s1 + $0x30] sm:$0xff]   ;;  %v193_v8 = vld [vmem:[%s249_s1 + $0x38] sm:$0xff]   ;;  %v21_v9 = vld [vmem:[%s250_s0] sm:$0xf] }
   0x4   :  { %v154_v11 = vld [vmem:[%s251_s2] ss:$0 sm:$0xff] }
   0x6   :  { %167 = vmatpush3.bf16.msra.mxu0 %v187_v2 }
   0x7   :  { %168 = vmatprep.subr.bf16.mxu0 %v194_v0 }
   0xa   :  { %169 = vmatpush3.bf16.msra.mxu0 %v188_v3 }
   0xb   :  { %170 = vmatprep.subr.bf16.mxu0 %v194_v0 }
   0xe   :  { %171 = vmatpush3.bf16.msra.mxu0 %v189_v4 }
   0xf   :  { %172 = vmatprep.subr.bf16.mxu0 %v194_v0 }
  0x12   :  { %173 = vmatpush3.bf16.msra.mxu0 %v190_v5 }
  0x13   :  { %174 = vmatprep.subr.bf16.mxu0 %v194_v0 }
  0x16   :  { %175 = vmatpush3.bf16.msra.mxu0 %v191_v6 }
  0x17   :  { %176 = vmatprep.subr.bf16.mxu0 %v194_v0 }
  0x1a   :  { %177 = vmatpush3.bf16.msra.mxu0 %v192_v7 }
  0x1b   :  { %178 = vmatprep.subr.bf16.mxu0 %v194_v0 }
  0x1e   :  { %179 = vmatpush3.bf16.msra.mxu0 %v193_v8 }
  0x21   :  { %181 = vmatmul.mubr.bf16.vlgmr.msra.gmra.mrb[0].mxu0 %v21_v9 }
  0xf4   :  { %v120_v10 = vpop.f32.mrb[0].mxu0 }
  0xf5   :  { %v182_v12 = vpop.f32.mrb[1].mxu0  ;;  %v139_v14 = vadd.f32 %v154_v11, %v120_v10 }
  0xf6   :  { %v123_v13 = vpop.f32.mrb[2].mxu0 }
  0xf7   :  { %v183_v15 = vpop.f32.mrb[3].mxu0  ;;  %v140_v16 = vmax.f32 %v139_v14, 0.0 }
  0xf9   :  { %141 = vst [vmem:[%s252_s3] sm:$0xff] %v140_v16 }

// kernel: unet_forward.43
= control target key start
LH: loop header
LB: loop body
LE: loop exit
PB: predicated region body
PF: predicated region fallthrough
CT: control target
= control target key end

     0   :  { %s802_s12 = smov 0   ;;  %s804_s13 = smov 0   ;;  %s923_s0 = inlined_call_operand.vmem [shape: bf16[8,128], index: 0, kind: input, shape index: {}]   ;;  %s924_s1 = inlined_call_operand.vmem [shape: bf16[128,512], index: 1, kind: input, shape index: {}]   ;;  %s925_s2 = inlined_call_operand.vmem [shape: f32[1,512], index: 2, kind: input, shape index: {}]   ;;  %s926_s3 = inlined_call_operand.vmem [shape: f32[8,512], index: 3, kind: output, shape index: {}]  }
   0x1   :  { %s806_s14 = smov 0   ;;  %s808_s15 = smov 0  }
   0x2   :  { %s810_s16 = smov 0  }
   0x3 LB: > { %s28_s17 = sadd.s32 1, %s774_s15  ;;  %p76_p1 = scmp.ne.s32.totalorder %s766_s13, %s762_s12  ;;  %s778_s16 = sphi %s810_s16, %s13_s16   ;;  %s774_s15 = sphi %s808_s15, %s930_s15   ;;  %s770_s14 = sphi %s806_s14, %s929_s14   ;;  %s766_s13 = sphi %s804_s13, %s928_s13   ;;  %s762_s12 = sphi %s802_s12, %s927_s12  }
   0x4   : > { %p30_p0 = scmp.ge.s32.totalorder %s28_s17, 2  ;;  %p77_p2 = scmp.eq.s32.totalorder %s778_s16, 0 }
   0x5   : > { %s69_s19 = sadd.s32 1, %s766_s13  ;;  %p646_p5 = scmp.ge.s32.totalorder %s778_s16, 2 }
   0x6   : > { %s932_s17 = smov (%p30_p0, %s28_s17), 0  ;;  %p78_p3 = por %p77_p2, %p76_p1 }
   0x7   : > { %s65_s18 = ssub.s32 %s774_s15, %s932_s17  ;;  %166 = sbr.rel (%p646_p5) target bundleno = 26 (0x1a), region = 20 }
   0x8   : > { %p67_p4 = scmp.eq.s32.totalorder %s65_s18, 0 }
   0xa   : > { %s837_s20 = scalar_select %p67_p4, %s766_s13, %s69_s19  }
   0xe   : > { %169 = sbr.rel (!%p78_p3) target bundleno = 26 (0x1a), region = 24  ;;  %s171_s21 = sand.u32 (%p78_p3), 1, %s766_s13  }
   0xf   : > { %s673_s22 = sshll.u32 (%p78_p3), %s774_s15, 3  ;;  %s647_s23 = sshll.u32 (%p78_p3), %s171_s21, 7 }
  0x10   : > { %s845_s26 = scalar_lea.vmem (%p78_p3), %s924_s1, %s673_s22  ;;  %s173_s27 = scalar_lea.vmem (%p78_p3), [#allocation2], %s647_s23 }
  0x11   : > { %v237_v0 = vld [vmem:[%s845_s26] sm:$0xff] (%p78_p3)  ;;  %v239_v1 = vld [vmem:[%s845_s26 + $0x10] sm:$0xff] (%p78_p3) }
  0x12   : > { %v241_v2 = vld [vmem:[%s845_s26 + $0x20] sm:$0xff] (%p78_p3)  ;;  %238 = vst [vmem:[%s173_s27] sm:$0xff] (%p78_p3), %v237_v0  ;;  %240 = vst [vmem:[%s173_s27 + $0x8] sm:$0xff] (%p78_p3), %v239_v1  ;;  %v243_v3 = vld [vmem:[%s845_s26 + $0x30] sm:$0xff] (%p78_p3) }
  0x13   : > { %242 = vst [vmem:[%s173_s27 + $0x10] sm:$0xff] (%p78_p3), %v241_v2  ;;  %v245_v4 = vld [vmem:[%s845_s26 + $0x40] sm:$0xff] (%p78_p3)  ;;  %v247_v5 = vld [vmem:[%s845_s26 + $0x50] sm:$0xff] (%p78_p3)  ;;  %244 = vst [vmem:[%s173_s27 + $0x18] sm:$0xff] (%p78_p3), %v243_v3 }
  0x14   : > { %246 = vst [vmem:[%s173_s27 + $0x20] sm:$0xff] (%p78_p3), %v245_v4  ;;  %248 = vst [vmem:[%s173_s27 + $0x28] sm:$0xff] (%p78_p3), %v247_v5  ;;  %v249_v6 = vld [vmem:[%s845_s26 + $0x60] sm:$0xff] (%p78_p3)  ;;  %v251_v7 = vld [vmem:[%s845_s26 + $0x70] sm:$0xff] (%p78_p3) }
  0x15   : > { %v253_v8 = vld [vmem:[%s845_s26 + $0x80] sm:$0xff]  ;;  %250 = vst [vmem:[%s173_s27 + $0x30] sm:$0xff] %v249_v6  ;;  %252 = vst [vmem:[%s173_s27 + $0x38] sm:$0xff] %v251_v7  ;;  %v255_v9 = vld [vmem:[%s845_s26 + $0x90] sm:$0xff] }
  0x16   : > { %254 = vst [vmem:[%s173_s27 + $0x40] sm:$0xff] %v253_v8  ;;  %v257_v10 = vld [vmem:[%s845_s26 + $0xa0] sm:$0xff]  ;;  %v259_v11 = vld [vmem:[%s845_s26 + $0xb0] sm:$0xff]  ;;  %256 = vst [vmem:[%s173_s27 + $0x48] sm:$0xff] %v255_v9 }
  0x17   : > { %258 = vst [vmem:[%s173_s27 + $0x50] sm:$0xff] %v257_v10  ;;  %260 = vst [vmem:[%s173_s27 + $0x58] sm:$0xff] %v259_v11  ;;  %v261_v12 = vld [vmem:[%s845_s26 + $0xc0] sm:$0xff]  ;;  %v263_v13 = vld [vmem:[%s845_s26 + $0xd0] sm:$0xff] }
  0x18   : > { %v265_v14 = vld [vmem:[%s845_s26 + $0xe0] sm:$0xff]  ;;  %262 = vst [vmem:[%s173_s27 + $0x60] sm:$0xff] %v261_v12  ;;  %264 = vst [vmem:[%s173_s27 + $0x68] sm:$0xff] %v263_v13  ;;  %v267_v15 = vld [vmem:[%s845_s26 + $0xf0] sm:$0xff] }
  0x19   : > { %266 = vst [vmem:[%s173_s27 + $0x70] sm:$0xff] %v265_v14  ;;  %268 = vst [vmem:[%s173_s27 + $0x78] sm:$0xff] %v267_v15 }
  0x1a PF: > { %p650_p6 = scmp.ge.s32.totalorder %s778_s16, 1  ;;  %p281_p7 = scmp.lt.s32.totalorder %s778_s16, 3 }
  0x1c   : > { %p282_p8 = pnand %p650_p6, %p281_p7 }
  0x1d   : > { %s288_s28 = sand.u32 (!%p282_p8), 1, %s762_s12   ;;  %s652_s29 = sshll.u32 (!%p282_p8), %s770_s14, 1  ;;  %v780_v16 = vmov (!%p282_p8), 0   ;;  %v781_v22 = vmov (!%p282_p8), 0.0   ;;  %v359_v34 = vld [vmem:[%s923_s0] sm:$0xf] (!%p282_p8)  ;;  %v508_v35 = vlaneseq (!%p282_p8) }
  0x1e   : > { %285 = sbr.rel (%p282_p8) target bundleno = 290 (0x122), region = 66  ;;  %s651_s30 = sshll.u32 (!%p282_p8), %s288_s28, 7  ;;  %488 = vmatprep.mubr.bf16.mxu0 (!%p282_p8), %v780_v16 }
  0x1f   : > { %p336_p9 = scmp.lt.s32.totalorder (!%p282_p8), %s652_s29, 3  ;;  %s867_s4 = scalar_lea.vmem (!%p282_p8), [#allocation2], %s651_s30  ;;  %v509_v40 = vshrl.u32 (!%p282_p8), %v508_v35, 7 }
  0x20   : > { %v716_v17 = vld [vmem:[%s867_s4 + $0x4] ss:$8 sps:$4 sm:$0xff] (!%p282_p8)   ;;  %v718_v18 = vld [vmem:[%s867_s4] ss:$8 sps:$4 sm:$0xff] (!%p282_p8)   ;;  %v719_v19 = vld [vmem:[%s867_s4 + $0x14] ss:$8 sps:$4 sm:$0xff] (!%p282_p8)  }
  0x21   : > { %456 = vmatprep.subr.bf16.mxu0 (!%p282_p8), %v716_v17  ;;  %v721_v20 = vld [vmem:[%s867_s4 + $0x10] ss:$8 sps:$4 sm:$0xff] (!%p282_p8)   ;;  %v722_v21 = vld [vmem:[%s867_s4 + $0x24] ss:$8 sps:$4 sm:$0xff] (!%p282_p8)   ;;  %v724_v23 = vld [vmem:[%s867_s4 + $0x20] ss:$8 sps:$4 sm:$0xff] (!%p282_p8)  }
  0x22   : > { %457 = vmatpush1.bf16.msra.mxu0 (!%p282_p8), %v718_v18  ;;  %v725_v24 = vld [vmem:[%s867_s4 + $0x34] ss:$8 sps:$4 sm:$0xff] (!%p282_p8)   ;;  %v727_v25 = vld [vmem:[%s867_s4 + $0x30] ss:$8 sps:$4 sm:$0xff] (!%p282_p8)   ;;  %v728_v26 = vld [vmem:[%s867_s4 + $0x44] ss:$8 sps:$4 sm:$0xff] (!%p282_p8)  }
  0x23   : > { %458 = vmatprep.subr.bf16.mxu0 (!%p282_p8), %v719_v19  ;;  %v730_v27 = vld [vmem:[%s867_s4 + $0x40] ss:$8 sps:$4 sm:$0xff] (!%p282_p8)   ;;  %v731_v28 = vld [vmem:[%s867_s4 + $0x54] ss:$8 sps:$4 sm:$0xff] (!%p282_p8)   ;;  %v733_v29 = vld [vmem:[%s867_s4 + $0x50] ss:$8 sps:$4 sm:$0xff] (!%p282_p8)  }
  0x24   : > { %v734_v30 = vld [vmem:[%s867_s4 + $0x64] ss:$8 sps:$4 sm:$0xff] (!%p282_p8)   ;;  %v736_v31 = vld [vmem:[%s867_s4 + $0x60] ss:$8 sps:$4 sm:$0xff] (!%p282_p8)   ;;  %v737_v32 = vld [vmem:[%s867_s4 + $0x74] ss:$8 sps:$4 sm:$0xff] (!%p282_p8)  }
  0x25   : > { %s934_s29 = smov (!%p336_p9, %s652_s29), 3  ;;  %v739_v33 = vld [vmem:[%s867_s4 + $0x70] ss:$8 sps:$4 sm:$0xff]   ;;  %v510_v43 = vsub.s32 0, %v509_v40  ;;  %v514_v44 = vsub.s32 1, %v509_v40 }
  0x26   : > { %s654_s5 = sshll.u32 %s934_s29, 3  ;;  %459 = vmatpush1.bf16.msra.mxu0 %v721_v20  ;;  %s338_s14 = scalar_lea.vmem %s925_s2, %s934_s29 }
  0x27   : > { %s879_s8 = scalar_lea.vmem %s926_s3, %s654_s5  ;;  %460 = vmatprep.subr.bf16.mxu0 %v722_v21  ;;  %v506_v45 = vld [vmem:[%s338_s14] sm:$0x3] }
  0x28   : > { %355 = vst [vmem:[%s879_s8] sm:$0xff] %v781_v22  ;;  %356 = vst [vmem:[%s879_s8 + $0x8] sm:$0xff] %v781_v22  ;;  %v511_v46 = vrot.slane %v506_v45, %v510_v43  ;;  %v515_v47 = vrot.slane %v506_v45, %v514_v44 }
  0x2a   : > { %461 = vmatpush1.bf16.msra.mxu0 %v724_v23 }
  0x2b   : > { %462 = vmatprep.subr.bf16.mxu0 %v725_v24 }
  0x2e   : > { %463 = vmatpush1.bf16.msra.mxu0 %v727_v25 }
  0x2f   : > { %464 = vmatprep.subr.bf16.mxu0 %v728_v26  ;;  %v357_v36 = vld [vmem:[%s879_s8] sm:$0xff] }
  0x32   : > { %465 = vmatpush1.bf16.msra.mxu0 %v730_v27 }
  0x33   : > { %466 = vmatprep.subr.bf16.mxu0 %v731_v28 }
  0x36   : > { %467 = vmatpush1.bf16.msra.mxu0 %v733_v29 }
  0x37   : > { %468 = vmatprep.subr.bf16.mxu0 %v734_v30 }
  0x3a   : > { %469 = vmatpush1.bf16.msra.mxu0 %v736_v31 }
  0x3b   : > { %470 = vmatprep.subr.bf16.mxu0 %v737_v32 }
  0x3e   : > { %471 = vmatpush1.bf16.msra.mxu0 %v739_v33 }
  0x41   : > { %489 = vmatmul.mubr.bf16.vlgmr.msra.gmra.mrb[0].mxu0 %v359_v34 }
 0x114   : > { %v490_v37 = vpop.f32.mrb[0].mxu0 }
 0x115   : > { %v497_v38 = vadd.f32 %v490_v37, %v357_v36  ;;  %v492_v39 = vpop.f32.mrb[1].mxu0 }
 0x116   : > { %v494_v41 = vpop.f32.mrb[2].mxu0  ;;  %500 = vst [vmem:[%s879_s8 + $0x8] sm:$0xff] %v492_v39  ;;  %v519_v50 = vadd.f32 %v515_v47, %v492_v39 }
 0x117   : > { %499 = vst [vmem:[%s879_s8] sm:$0xff] %v497_v38  ;;  %v495_v42 = vpop.f32.mrb[3].mxu0 }
 0x118   : > { %521 = vst [vmem:[%s879_s8 + $0x8] sm:$0xff] %v519_v50 }
 0x11e   : > { %v504_v48 = vld [vmem:[%s879_s8] sm:$0xff] }
 0x11f   : > { %v518_v49 = vadd.f32 %v511_v46, %v504_v48 }
 0x121   : > { %520 = vst [vmem:[%s879_s8] sm:$0xff] %v518_v49 }
 0x122 PF: > { %s13_s16 = sadd.s32 1, %s778_s16   ;;  %s927_s12 = smov %s766_s13 }
 0x123   : > { %p10_p10 = scmp.ge.s32.totalorder %s13_s16, 4   ;;  %s928_s13 = smov %s837_s20 }
 0x124   : > { %s929_s14 = smov %s774_s15  ;;  %s930_s15 = smov %s932_s17 }
 0x125   :  { %12 = sbr.rel (!%p10_p10) target bundleno = 3 (0x3), region = 119 }

// kernel: unet_forward.44
= control target key start
LH: loop header
LB: loop body
LE: loop exit
PB: predicated region body
PF: predicated region fallthrough
CT: control target
= control target key end

     0   :  { %s865_s12 = smov 0   ;;  %s867_s13 = smov 0   ;;  %s952_s0 = inlined_call_operand.vmem [shape: bf16[8,2304], index: 0, kind: input, shape index: {}]   ;;  %s953_s1 = inlined_call_operand.vmem [shape: bf16[2304,128], index: 1, kind: input, shape index: {}]   ;;  %s954_s2 = inlined_call_operand.vmem [shape: f32[1,128], index: 2, kind: input, shape index: {}]   ;;  %s955_s3 = inlined_call_operand.vmem [shape: f32[8,128], index: 3, kind: output, shape index: {}]  }
   0x1   :  { %s869_s14 = smov 0  }
   0x2 LB: > { %s25_s15 = sadd.s32 1, %s836_s13  ;;  %p677_p0 = scmp.ge.s32.totalorder %s840_s14, 1  ;;  %s840_s14 = sphi %s869_s14, %s13_s14   ;;  %s836_s13 = sphi %s867_s13, %s957_s13   ;;  %s832_s12 = sphi %s865_s12, %s956_s12  }
   0x3   : > { %p26_p1 = scmp.ge.s32.totalorder %s25_s15, 6  ;;  %p189_p2 = scmp.lt.s32.totalorder %s840_s14, 7 }
   0x5   : > { %s959_s15 = smov (%p26_p1, %s25_s15), 0  ;;  %p190_p3 = pnand %p677_p0, %p189_p2 }
   0x6   : > { %s230_s16 = smul.u32 (!%p190_p3), 3, %s832_s12  ;;  %p680_p6 = scmp.ne.s32.totalorder (!%p190_p3), %s832_s12, 0 }
   0x7   : > { %193 = sbr.rel (%p190_p3) target bundleno = 289 (0x121), region = 32 }
   0x8   : > { %s240_s17 = smul.u32 (!%p190_p3), 48, %s832_s12  ;;  %p233_p4 = scmp.lt.s32.totalorder (!%p190_p3), %s230_s16, 17 }
   0xa   : > { %p241_p5 = scmp.lt.s32.totalorder (!%p190_p3), %s240_s17, 287 }
   0xe   : > { %s961_s16 = smov (!%p233_p4, %s230_s16), 17  ;;  %s963_s17 = smov (!%p241_p5, %s240_s17), 287 }
   0xf   : > { %s678_s18 = sshll.u32 %s961_s16, 2  ;;  %s679_s22 = sshll.u32 %s963_s17, 2  ;;  %v842_v0 = vmov (!%p680_p6), 0.0  }
  0x10   : > { %s890_s21 = scalar_lea.vmem %s952_s0, %s678_s18  ;;  %s895_s25 = scalar_lea.vmem %s953_s1, %s679_s22  ;;  %264 = vst [vmem:[%s955_s3] sm:$0xff] (!%p680_p6), %v842_v0 }
  0x11   : > { %263 = sbr.rel (%p680_p6) target bundleno = 24 (0x18), region = 36 }
  0x18 PF: > { %v791_v1 = vld [vmem:[%s895_s25 + $0x40] sm:$0xff]   ;;  %v843_v2 = vmov 0.0   ;;  %vm844_vm0 = vmmov 0   ;;  %v794_v5 = vld [vmem:[%s895_s25 + $0x48] sm:$0xff]   ;;  %v797_v8 = vld [vmem:[%s895_s25 + $0x50] sm:$0xff]   ;;  %p708_p7 = scmp.ne.s32.totalorder %s832_s12, 5 }
  0x19   : > { %744 = vmatprep.subr.bf16.mxu1 %v843_v2  ;;  %v792_v3 = vld [vmem:[%s895_s25] sm:$0xff]   ;;  %713 = vmatprep.subr.bf16.mxu0 %v791_v1  ;;  %v795_v6 = vld [vmem:[%s895_s25 + $0x8] sm:$0xff]   ;;  %v798_v9 = vld [vmem:[%s895_s25 + $0x10] sm:$0xff]  }
  0x1a   : > { %v793_v4 = vld [vmem:[%s895_s25 + $0x80] sm:$0xff]   ;;  %760 = vmatprep.mubr.msk.bf16.mxu1 %vm844_vm0, %v843_v2  ;;  %714 = vmatpush3.bf16.msra.mxu0 %v792_v3  ;;  %v796_v7 = vld [vmem:[%s895_s25 + $0x88] sm:$0xff]   ;;  %v799_v10 = vld [vmem:[%s895_s25 + $0x90] sm:$0xff]  }
  0x1b   : > { %745 = vmatpush3.bf16.msra.mxu1 %v793_v4  ;;  %715 = vmatprep.subr.bf16.mxu0 %v794_v5  ;;  %v800_v11 = vld [vmem:[%s895_s25 + $0x58] sm:$0xff]   ;;  %v803_v14 = vld [vmem:[%s895_s25 + $0x60] sm:$0xff]   ;;  %v806_v17 = vld [vmem:[%s895_s25 + $0x68] sm:$0xff]  }
  0x1c   : > { %746 = vmatprep.subr.bf16.mxu1 %v843_v2  ;;  %v801_v12 = vld [vmem:[%s895_s25 + $0x18] sm:$0xff]   ;;  %v804_v15 = vld [vmem:[%s895_s25 + $0x20] sm:$0xff]   ;;  %v807_v18 = vld [vmem:[%s895_s25 + $0x28] sm:$0xff]  }
  0x1d   : > { %v802_v13 = vld [vmem:[%s895_s25 + $0x98] sm:$0xff]   ;;  %v805_v16 = vld [vmem:[%s895_s25 + $0xa0] sm:$0xff]   ;;  %v808_v19 = vld [vmem:[%s895_s25 + $0xa8] sm:$0xff]  }
  0x1e   : > { %716 = vmatpush3.bf16.msra.mxu0 %v795_v6  ;;  %v809_v20 = vld [vmem:[%s895_s25 + $0x70] sm:$0xff]   ;;  %v812_v23 = vld [vmem:[%s895_s25 + $0x78] sm:$0xff]   ;;  %v266_v24 = vld [vmem:[%s890_s21] sm:$0xff] }
  0x1f   : > { %747 = vmatpush3.bf16.msra.mxu1 %v796_v7  ;;  %717 = vmatprep.subr.bf16.mxu0 %v797_v8  ;;  %v810_v21 = vld [vmem:[%s895_s25 + $0x30] sm:$0xff]   ;;  %v682_v25 = vcombine.high %v266_v24, %v266_v24  ;;  %v813_v26 = vld [vmem:[%s895_s25 + $0x38] sm:$0xff]   ;;  %v681_v28 = vcombine.low %v266_v24, %v266_v24  ;;  %v817_v29 = vld [vmem:[%s890_s21 + $0x8] ss:$0 sps:$4 sm:$0xff]  }
  0x20   : > { %748 = vmatprep.subr.bf16.mxu1 %v843_v2  ;;  %v811_v22 = vld [vmem:[%s895_s25 + $0xb0] sm:$0xff]   ;;  %v814_v27 = vld [vmem:[%s895_s25 + $0xb8] sm:$0xff]   ;;  %v265_v36 = vld [vmem:[%s955_s3] sm:$0xff] }
  0x21   : > { %503 = vmatprep.mubr.bf16.mxu0 %v682_v25  ;;  %v709_v43 = vld [vmem:[%s954_s2] ss:$0 sm:$0xff] (!%p708_p7) }
  0x22   : > { %718 = vmatpush3.bf16.msra.mxu0 %v798_v9 }
  0x23   : > { %749 = vmatpush3.bf16.msra.mxu1 %v799_v10  ;;  %719 = vmatprep.subr.bf16.mxu0 %v800_v11 }
  0x24   : > { %750 = vmatprep.subr.bf16.mxu1 %v843_v2 }
  0x26   : > { %720 = vmatpush3.bf16.msra.mxu0 %v801_v12 }
  0x27   : > { %751 = vmatpush3.bf16.msra.mxu1 %v802_v13  ;;  %721 = vmatprep.subr.bf16.mxu0 %v803_v14 }
  0x28   : > { %752 = vmatprep.subr.bf16.mxu1 %v843_v2 }
  0x2a   : > { %722 = vmatpush3.bf16.msra.mxu0 %v804_v15 }
  0x2b   : > { %753 = vmatpush3.bf16.msra.mxu1 %v805_v16  ;;  %723 = vmatprep.subr.bf16.mxu0 %v806_v17 }
  0x2c   : > { %754 = vmatprep.subr.bf16.mxu1 %v843_v2 }
  0x2e   : > { %724 = vmatpush3.bf16.msra.mxu0 %v807_v18 }
  0x2f   : > { %755 = vmatpush3.bf16.msra.mxu1 %v808_v19  ;;  %725 = vmatprep.subr.bf16.mxu0 %v809_v20 }
  0x30   : > { %756 = vmatprep.subr.bf16.mxu1 %v843_v2 }
  0x32   : > { %726 = vmatpush3.bf16.msra.mxu0 %v810_v21 }
  0x33   : > { %757 = vmatpush3.bf16.msra.mxu1 %v811_v22  ;;  %727 = vmatprep.subr.bf16.mxu0 %v812_v23 }
  0x34   : > { %758 = vmatprep.subr.bf16.mxu1 %v843_v2 }
  0x36   : > { %728 = vmatpush3.bf16.msra.mxu0 %v813_v26 }
  0x37   : > { %759 = vmatpush3.bf16.msra.mxu1 %v814_v27 }
  0x39   : > { %504 = vmatmul.mubr.bf16.vlgmr.msra.gmra.mrb[0].mxu0 %v681_v28 }
  0x3a   : > { %761 = vmatmul.mubr.bf16.vlgmr.msra.gmra.mrb[0].mxu1 %v817_v29 }
 0x10c   : > { %v729_v30 = vpop.f32.mrb[0].mxu0 }
 0x10d   : > { %v545_v31 = vpop.f32.mrb[0].mxu1  ;;  %v730_v32 = vpop.f32.mrb[1].mxu0 }
 0x10e   : > { %v731_v33 = vadd.f32 %v730_v32, %v729_v30  ;;  %v762_v34 = vpop.f32.mrb[1].mxu1  ;;  %v732_v35 = vpop.f32.mrb[2].mxu0  ;;  %556 = sbr.rel (%p708_p7) target bundleno = 289 (0x121), region = 40 }
 0x10f   : > { %v548_v37 = vpop.f32.mrb[2].mxu1  ;;  %v733_v38 = vpop.f32.mrb[3].mxu0 }
 0x110   : > { %v546_v39 = vadd.f32 %v731_v33, %v545_v31  ;;  %v763_v40 = vpop.f32.mrb[3].mxu1 }
 0x112   : > { %v551_v41 = vadd.f32 %v546_v39, %v265_v36 }
 0x114   : > { %552 = vst [vmem:[%s955_s3] sm:$0xff] %v551_v41 }
 0x11b   : > { %v557_v42 = vld [vmem:[%s955_s3] sm:$0xff] }
 0x11c   : > { %v565_v44 = vadd.f32 %v709_v43, %v557_v42 }
 0x11e   : > { %v566_v45 = vmax.f32 %v565_v44, 0.0 }
 0x120   : > { %567 = vst [vmem:[%s955_s3] sm:$0xff] %v566_v45 }
 0x121 PF: > { %s13_s14 = sadd.s32 1, %s840_s14   ;;  %s956_s12 = smov %s836_s13 }
 0x122   : > { %p10_p8 = scmp.ge.s32.totalorder %s13_s14, 8   ;;  %s957_s13 = smov %s959_s15 }
 0x124   :  { %12 = sbr.rel (!%p10_p8) target bundleno = 2 (0x2), region = 76 }

// kernel: unet_forward.47
= control target key start
LH: loop header
LB: loop body
LE: loop exit
PB: predicated region body
PF: predicated region fallthrough
CT: control target
= control target key end

     0   :  { %s1036_s12 = smov 0   ;;  %s1038_s13 = smov 0   ;;  %s1200_s0 = inlined_call_operand.vmem [shape: bf16[32,2304], index: 0, kind: input, shape index: {}]   ;;  %s1201_s1 = inlined_call_operand.vmem [shape: bf16[2304,128], index: 1, kind: input, shape index: {}]   ;;  %s1202_s2 = inlined_call_operand.vmem [shape: f32[1,128], index: 2, kind: input, shape index: {}]   ;;  %s1203_s3 = inlined_call_operand.vmem [shape: f32[32,128], index: 3, kind: output, shape index: {}]  }
   0x1   :  { %s1040_s14 = smov 0   ;;  %s1042_s15 = smov 0  }
   0x2   :  { %s1044_s16 = smov 0  }
   0x3 LB: > { %s25_s17 = sadd.s32 1, %s1009_s15  ;;  %p48_p1 = scmp.ne.s32.totalorder %s1001_s13, %s997_s12  ;;  %s1013_s16 = sphi %s1044_s16, %s13_s16   ;;  %s1009_s15 = sphi %s1042_s15, %s1207_s15   ;;  %s1005_s14 = sphi %s1040_s14, %s1206_s14   ;;  %s1001_s13 = sphi %s1038_s13, %s1205_s13   ;;  %s997_s12 = sphi %s1036_s12, %s1204_s12  }
   0x4   : > { %p26_p0 = scmp.ge.s32.totalorder %s25_s17, 6  ;;  %p49_p2 = scmp.eq.s32.totalorder %s1013_s16, 0 }
   0x5   : > { %s41_s19 = sadd.s32 1, %s1001_s13  ;;  %p792_p5 = scmp.ge.s32.totalorder %s1013_s16, 6 }
   0x6   : > { %s1209_s17 = smov (%p26_p0, %s25_s17), 0  ;;  %p50_p3 = por %p49_p2, %p48_p1 }
   0x7   : > { %s37_s18 = ssub.s32 %s1009_s15, %s1209_s17  ;;  %162 = sbr.rel (%p792_p5) target bundleno = 23 (0x17), region = 20 }
   0x8   : > { %p39_p4 = scmp.eq.s32.totalorder %s37_s18, 0 }
   0xa   : > { %s1071_s20 = scalar_select %p39_p4, %s1001_s13, %s41_s19  }
   0xe   : > { %165 = sbr.rel (!%p50_p3) target bundleno = 23 (0x17), region = 24  ;;  %s167_s21 = sand.u32 (%p50_p3), 1, %s1001_s13  }
   0xf   : > { %s841_s22 = smul.u32 (%p50_p3), 12, %s1009_s15 }
  0x10   : > { %s900_s23 = smul.u32 (%p50_p3), 48, %s167_s21 }
  0x11   : > { %s175_s26 = scalar_lea.vmem (%p50_p3), %s1200_s0, %s841_s22 }
  0x12   : > { %v190_v0 = vld [vmem:[%s175_s26] sm:$0xff] (%p50_p3)  ;;  %v192_v1 = vld [vmem:[%s175_s26 + $0x48] sm:$0xff] (%p50_p3)  ;;  %v194_v2 = vld [vmem:[%s175_s26 + $0x90] sm:$0xff] (%p50_p3)  ;;  %s169_s27 = scalar_lea.vmem (%p50_p3), [#allocation2], %s900_s23 }
  0x13   : > { %191 = vst [vmem:[%s169_s27] sm:$0xff] (%p50_p3), %v190_v0  ;;  %193 = vst [vmem:[%s169_s27 + $0xc] sm:$0xff] (%p50_p3), %v192_v1  ;;  %v196_v3 = vld [vmem:[%s175_s26 + $0xd8] sm:$0xff] (%p50_p3)  ;;  %v794_v4 = vld [vmem:[%s175_s26 + $0x8] sm:$0xf] (%p50_p3) }
  0x14   : > { %195 = vst [vmem:[%s169_s27 + $0x18] sm:$0xff] (%p50_p3), %v194_v2  ;;  %v796_v5 = vld [vmem:[%s175_s26 + $0x50] sm:$0xf] (%p50_p3)  ;;  %197 = vst [vmem:[%s169_s27 + $0x24] sm:$0xff] (%p50_p3), %v196_v3  ;;  %v798_v6 = vld [vmem:[%s175_s26 + $0x98] sm:$0xf] (%p50_p3) }
  0x15   : > { %795 = vst [vmem:[%s169_s27 + $0x8] sm:$0xf] %v794_v4  ;;  %797 = vst [vmem:[%s169_s27 + $0x14] sm:$0xf] %v796_v5  ;;  %v800_v7 = vld [vmem:[%s175_s26 + $0xe0] sm:$0xf] }
  0x16   : > { %799 = vst [vmem:[%s169_s27 + $0x20] sm:$0xf] %v798_v6  ;;  %801 = vst [vmem:[%s169_s27 + $0x2c] sm:$0xf] %v800_v7 }
  0x17 PF: > { %p802_p6 = scmp.ge.s32.totalorder %s1013_s16, 1  ;;  %p229_p7 = scmp.lt.s32.totalorder %s1013_s16, 7 }
  0x19   : > { %p230_p8 = pnand %p802_p6, %p229_p7 }
  0x1a   : > { %s236_s28 = sand.u32 (!%p230_p8), 1, %s997_s12   ;;  %s275_s29 = smul.u32 (!%p230_p8), 48, %s1005_s14 }
  0x1b   : > { %233 = sbr.rel (%p230_p8) target bundleno = 316 (0x13c), region = 54  ;;  %p804_p10 = scmp.ne.s32.totalorder (!%p230_p8), %s1005_s14, 0 }
  0x1c   : > { %s901_s30 = smul.u32 (!%p230_p8), 48, %s236_s28  ;;  %p276_p9 = scmp.lt.s32.totalorder (!%p230_p8), %s275_s29, 287 }
  0x1e   : > { %s1088_s8 = scalar_lea.vmem (!%p230_p8), [#allocation2], %s901_s30 }
  0x22   : > { %s1211_s29 = smov (!%p276_p9, %s275_s29), 287  ;;  %300 = sbr.rel (%p804_p10) target bundleno = 41 (0x29), region = 62 }
  0x23   : > { %s803_s4 = sshll.u32 %s1211_s29, 2  ;;  %v1015_v8 = vmov (!%p804_p10), 0.0  }
  0x24   : > { %s1086_s7 = scalar_lea.vmem %s1201_s1, %s803_s4  ;;  %301 = vst [vmem:[%s1203_s3] sm:$0xff] (!%p804_p10), %v1015_v8  ;;  %302 = vst [vmem:[%s1203_s3 + $0x8] sm:$0xff] (!%p804_p10), %v1015_v8 }
  0x25   : > { %303 = vst [vmem:[%s1203_s3 + $0x10] sm:$0xff] (!%p804_p10), %v1015_v8  ;;  %304 = vst [vmem:[%s1203_s3 + $0x18] sm:$0xff] (!%p804_p10), %v1015_v8 }
  0x29 PF: > { %v943_v9 = vld [vmem:[%s1086_s7 + $0x40] sm:$0xff]   ;;  %v946_v12 = vld [vmem:[%s1086_s7 + $0x48] sm:$0xff]   ;;  %v949_v15 = vld [vmem:[%s1086_s7 + $0x50] sm:$0xff]   ;;  %p835_p11 = scmp.ne.s32.totalorder %s1005_s14, 5 }
  0x2a   : > { %v944_v10 = vld [vmem:[%s1086_s7] sm:$0xff]   ;;  %842 = vmatprep.subr.bf16.mxu0 %v943_v9  ;;  %v947_v13 = vld [vmem:[%s1086_s7 + $0x8] sm:$0xff]   ;;  %v950_v16 = vld [vmem:[%s1086_s7 + $0x10] sm:$0xff]  }
  0x2b   : > { %v945_v11 = vld [vmem:[%s1086_s7 + $0x80] sm:$0xff]   ;;  %843 = vmatpush3.bf16.msra.mxu0 %v944_v10  ;;  %v948_v14 = vld [vmem:[%s1086_s7 + $0x88] sm:$0xff]   ;;  %v951_v17 = vld [vmem:[%s1086_s7 + $0x90] sm:$0xff]  }
  0x2c   : > { %880 = vmatprep.subr.bf16.mxu1 %v945_v11  ;;  %844 = vmatprep.subr.bf16.mxu0 %v946_v12  ;;  %v952_v18 = vld [vmem:[%s1086_s7 + $0x58] sm:$0xff]   ;;  %v955_v21 = vld [vmem:[%s1086_s7 + $0x60] sm:$0xff]   ;;  %v958_v24 = vld [vmem:[%s1086_s7 + $0x68] sm:$0xff]  }
  0x2d   : > { %881 = vmatpush3.bf16.msra.mxu1 %v945_v11  ;;  %v953_v19 = vld [vmem:[%s1086_s7 + $0x18] sm:$0xff]   ;;  %v957_v22 = vld [vmem:[%s1086_s7 + $0xa0] sm:$0xff]   ;;  %v960_v25 = vld [vmem:[%s1086_s7 + $0xa8] sm:$0xff]  }
  0x2e   : > { %882 = vmatprep.subr.bf16.mxu1 %v948_v14  ;;  %v954_v20 = vld [vmem:[%s1086_s7 + $0x98] sm:$0xff]   ;;  %v956_v23 = vld [vmem:[%s1086_s7 + $0x20] sm:$0xff]   ;;  %v959_v26 = vld [vmem:[%s1086_s7 + $0x28] sm:$0xff]  }
  0x2f   : > { %845 = vmatpush3.bf16.msra.mxu0 %v947_v13  ;;  %v961_v27 = vld [vmem:[%s1086_s7 + $0x70] sm:$0xff]   ;;  %v964_v30 = vld [vmem:[%s1086_s7 + $0x78] sm:$0xff]   ;;  %v305_v45 = vld [vmem:[%s1203_s3] sm:$0xff] }
  0x30   : > { %846 = vmatprep.subr.bf16.mxu0 %v949_v15  ;;  %v962_v28 = vld [vmem:[%s1086_s7 + $0x30] sm:$0xff]   ;;  %v966_v31 = vld [vmem:[%s1086_s7 + $0xb8] sm:$0xff]   ;;  %v306_v50 = vld [vmem:[%s1203_s3 + $0x8] sm:$0xff] }
  0x31   : > { %883 = vmatpush3.bf16.msra.mxu1 %v948_v14  ;;  %v963_v29 = vld [vmem:[%s1086_s7 + $0xb0] sm:$0xff]   ;;  %v965_v34 = vld [vmem:[%s1086_s7 + $0x38] sm:$0xff]   ;;  %v836_v4 = vld [vmem:[%s1202_s2] ss:$0 sm:$0xff] (!%p835_p11) }
  0x32   : > { %884 = vmatprep.subr.bf16.mxu1 %v951_v17  ;;  %v969_v32 = vld [vmem:[%s1088_s8 + $0x4] ss:$12 sps:$4 sm:$0xff]   ;;  %v970_v33 = vld [vmem:[%s1088_s8 + $0x8] ss:$12 sps:$4 sm:$0xff]   ;;  %v967_v35 = vld [vmem:[%s1088_s8] ss:$12 sps:$4 sm:$0xff]  }
  0x33   : > { %847 = vmatpush3.bf16.msra.mxu0 %v950_v16  ;;  %573 = vmatprep.mubr.bf16.mxu0 %v969_v32  ;;  %v972_v36 = vld [vmem:[%s1088_s8 + $0x1c] ss:$12 sps:$4 sm:$0xff]   ;;  %v971_v37 = vld [vmem:[%s1088_s8 + $0x20] ss:$12 sps:$4 sm:$0xff]   ;;  %v974_v38 = vld [vmem:[%s1088_s8 + $0x18] ss:$12 sps:$4 sm:$0xff]  }
  0x34   : > { %848 = vmatprep.subr.bf16.mxu0 %v952_v18  ;;  %896 = vmatprep.mubr.bf16.mxu1 %v970_v33  ;;  %v307_v59 = vld [vmem:[%s1203_s3 + $0x10] sm:$0xff]  ;;  %v308_v63 = vld [vmem:[%s1203_s3 + $0x18] sm:$0xff] }
  0x35   : > { %885 = vmatpush3.bf16.msra.mxu1 %v951_v17 }
  0x36   : > { %886 = vmatprep.subr.bf16.mxu1 %v954_v20 }
  0x37   : > { %849 = vmatpush3.bf16.msra.mxu0 %v953_v19 }
  0x38   : > { %850 = vmatprep.subr.bf16.mxu0 %v955_v21 }
  0x39   : > { %887 = vmatpush3.bf16.msra.mxu1 %v954_v20 }
  0x3a   : > { %888 = vmatprep.subr.bf16.mxu1 %v957_v22 }
  0x3b   : > { %851 = vmatpush3.bf16.msra.mxu0 %v956_v23 }
  0x3c   : > { %852 = vmatprep.subr.bf16.mxu0 %v958_v24 }
  0x3d   : > { %889 = vmatpush3.bf16.msra.mxu1 %v957_v22 }
  0x3e   : > { %890 = vmatprep.subr.bf16.mxu1 %v960_v25 }
  0x3f   : > { %853 = vmatpush3.bf16.msra.mxu0 %v959_v26 }
  0x40   : > { %854 = vmatprep.subr.bf16.mxu0 %v961_v27 }
  0x41   : > { %891 = vmatpush3.bf16.msra.mxu1 %v960_v25 }
  0x42   : > { %892 = vmatprep.subr.bf16.mxu1 %v963_v29 }
  0x43   : > { %855 = vmatpush3.bf16.msra.mxu0 %v962_v28 }
  0x44   : > { %856 = vmatprep.subr.bf16.mxu0 %v964_v30 }
  0x45   : > { %893 = vmatpush3.bf16.msra.mxu1 %v963_v29 }
  0x46   : > { %894 = vmatprep.subr.bf16.mxu1 %v966_v31 }
  0x47   : > { %857 = vmatpush3.bf16.msra.mxu0 %v965_v34 }
  0x49   : > { %895 = vmatpush3.bf16.msra.mxu1 %v966_v31 }
  0x4a   : > { %574 = vmatmul.mubr.bf16.vlgmr.msra.gmra.mrb[0].mxu0 %v967_v35 }
  0x4b   : > { %581 = vmatprep.mubr.bf16.mxu0 %v972_v36 }
  0x4c   : > { %897 = vmatmul.mubr.bf16.vlgmr.msra.gmra.mrb[0].mxu1 %v971_v37 }
  0x52   : > { %582 = vmatmul.mubr.bf16.gmra.mrb[4].mxu0 %v974_v38 }
 0x11d   : > { %v858_v39 = vpop.f32.mrb[0].mxu0 }
 0x11e   : > { %v859_v40 = vpop.f32.mrb[1].mxu0 }
 0x11f   : > { %v860_v41 = vadd.f32 %v859_v40, %v858_v39  ;;  %v861_v42 = vpop.f32.mrb[2].mxu0  ;;  %v898_v43 = vpop.f32.mrb[0].mxu1 }
 0x120   : > { %v862_v44 = vpop.f32.mrb[3].mxu0  ;;  %v624_v46 = vpop.f32.mrb[1].mxu1 }
 0x121   : > { %v863_v47 = vadd.f32 %v862_v44, %v861_v42  ;;  %v625_v48 = vadd.f32 %v860_v41, %v624_v46  ;;  %v899_v49 = vpop.f32.mrb[2].mxu1 }
 0x122   : > { %v627_v51 = vpop.f32.mrb[3].mxu1 }
 0x123   : > { %v639_v52 = vadd.f32 %v625_v48, %v305_v45  ;;  %v628_v53 = vadd.f32 %v863_v47, %v627_v51 }
 0x125   : > { %643 = vst [vmem:[%s1203_s3] sm:$0xff] %v639_v52  ;;  %v640_v54 = vadd.f32 %v628_v53, %v306_v50  ;;  %v864_v55 = vpop.f32.mrb[4].mxu0 }
 0x126   : > { %v865_v56 = vpop.f32.mrb[5].mxu0 }
 0x127   : > { %644 = vst [vmem:[%s1203_s3 + $0x8] sm:$0xff] %v640_v54  ;;  %v866_v57 = vadd.f32 %v865_v56, %v864_v55  ;;  %v867_v58 = vpop.f32.mrb[6].mxu0 }
 0x128   : > { %v868_v60 = vpop.f32.mrb[7].mxu0 }
 0x129   : > { %v633_v61 = vadd.f32 %v898_v43, %v866_v57  ;;  %v869_v62 = vadd.f32 %v868_v60, %v867_v58  ;;  %650 = sbr.rel (%p835_p11) target bundleno = 316 (0x13c), region = 66 }
 0x12b   : > { %v641_v0 = vadd.f32 %v633_v61, %v307_v59  ;;  %v636_v1 = vadd.f32 %v899_v49, %v869_v62 }
 0x12c   : > { %v651_v3 = vld [vmem:[%s1203_s3] sm:$0xff] (!%p835_p11) }
 0x12d   : > { %645 = vst [vmem:[%s1203_s3 + $0x10] sm:$0xff] %v641_v0  ;;  %v642_v2 = vadd.f32 %v636_v1, %v308_v63  ;;  %v662_v6 = vadd.f32 (!%p835_p11), %v836_v4, %v651_v3 }
 0x12e   : > { %v652_v5 = vld [vmem:[%s1203_s3 + $0x8] sm:$0xff] (!%p835_p11) }
 0x12f   : > { %646 = vst [vmem:[%s1203_s3 + $0x18] sm:$0xff] %v642_v2  ;;  %v663_v7 = vadd.f32 (!%p835_p11), %v836_v4, %v652_v5  ;;  %v666_v12 = vmax.f32 (!%p835_p11), %v662_v6, 0.0 }
 0x131   : > { %v667_v13 = vmax.f32 %v663_v7, 0.0  ;;  %670 = vst [vmem:[%s1203_s3] sm:$0xff] %v666_v12 }
 0x133   : > { %671 = vst [vmem:[%s1203_s3 + $0x8] sm:$0xff] %v667_v13 }
 0x134   : > { %v653_v8 = vld [vmem:[%s1203_s3 + $0x10] sm:$0xff] }
 0x135   : > { %v664_v10 = vadd.f32 %v836_v4, %v653_v8 }
 0x136   : > { %v654_v9 = vld [vmem:[%s1203_s3 + $0x18] sm:$0xff] }
 0x137   : > { %v665_v11 = vadd.f32 %v836_v4, %v654_v9  ;;  %v668_v14 = vmax.f32 %v664_v10, 0.0 }
 0x139   : > { %v669_v15 = vmax.f32 %v665_v11, 0.0  ;;  %672 = vst [vmem:[%s1203_s3 + $0x10] sm:$0xff] %v668_v14 }
 0x13b   : > { %673 = vst [vmem:[%s1203_s3 + $0x18] sm:$0xff] %v669_v15 }
 0x13c PF: > { %s13_s16 = sadd.s32 1, %s1013_s16   ;;  %s1204_s12 = smov %s1001_s13 }
 0x13d   : > { %p10_p12 = scmp.ge.s32.totalorder %s13_s16, 8   ;;  %s1205_s13 = smov %s1071_s20 }
 0x13e   : > { %s1206_s14 = smov %s1009_s15  ;;  %s1207_s15 = smov %s1209_s17 }
 0x13f   :  { %12 = sbr.rel (!%p10_p12) target bundleno = 3 (0x3), region = 113 }

// kernel: unet_forward.49
= control target key start
LH: loop header
LB: loop body
LE: loop exit
PB: predicated region body
PF: predicated region fallthrough
CT: control target
= control target key end

     0   :  { %s910_s12 = smov 0   ;;  %s912_s13 = smov 0   ;;  %s1032_s0 = inlined_call_operand.vmem [shape: bf16[32,128], index: 0, kind: input, shape index: {}]   ;;  %s1033_s1 = inlined_call_operand.vmem [shape: bf16[128,512], index: 1, kind: input, shape index: {}]   ;;  %s1034_s2 = inlined_call_operand.vmem [shape: f32[1,512], index: 2, kind: input, shape index: {}]   ;;  %s1035_s3 = inlined_call_operand.vmem [shape: f32[32,512], index: 3, kind: output, shape index: {}]  }
   0x1   :  { %s914_s14 = smov 0   ;;  %s916_s15 = smov 0  }
   0x2   :  { %s918_s16 = smov 0  }
   0x3 LB: > { %s28_s17 = sadd.s32 1, %s883_s15  ;;  %s728_s18 = sadd.s32 4294967295, %s887_s16   ;;  %s887_s16 = sphi %s918_s16, %s13_s16   ;;  %s883_s15 = sphi %s916_s15, %s1040_s15   ;;  %s879_s14 = sphi %s914_s14, %s1039_s14   ;;  %s875_s13 = sphi %s912_s13, %s1038_s13   ;;  %s871_s12 = sphi %s910_s12, %s1037_s12  }
   0x4   : > { %p30_p0 = scmp.ge.s32.totalorder %s28_s17, 2  ;;  %p76_p1 = scmp.ne.s32.totalorder %s875_s13, %s871_s12 }
   0x5   : > { %p77_p2 = scmp.eq.s32.totalorder %s887_s16, 0  ;;  %p134_p4 = scmp.eq.s32.totalorder %s728_s18, 1 }
   0x6   : > { %s1042_s17 = smov (%p30_p0, %s28_s17), 0  ;;  %s69_s20 = sadd.s32 1, %s875_s13 }
   0x7   : > { %p78_p3 = por %p77_p2, %p76_p1  ;;  %s65_s19 = ssub.s32 %s883_s15, %s1042_s17 }
   0x8   : > { %p67_p5 = scmp.eq.s32.totalorder %s65_s19, 0  ;;  %p945_p6 = por %p134_p4, %p76_p1 }
   0x9   : > { %p732_p7 = scmp.ge.s32.totalorder %s887_s16, 2 }
   0xa   : > { %s950_s22 = scalar_select %p67_p5, %s875_s13, %s69_s20  }
   0xb   : > { %168 = sbr.rel (%p732_p7) target bundleno = 30 (0x1e), region = 20 }
  0x12   : > { %171 = sbr.rel (!%p78_p3) target bundleno = 30 (0x1e), region = 24  ;;  %s173_s23 = sand.u32 (%p78_p3), 1, %s875_s13  }
  0x13   : > { %s763_s24 = sshll.u32 (%p78_p3), %s883_s15, 3  ;;  %s733_s25 = sshll.u32 (%p78_p3), %s173_s23, 7 }
  0x14   : > { %s958_s28 = scalar_lea.vmem (%p78_p3), %s1033_s1, %s763_s24  ;;  %s175_s29 = scalar_lea.vmem (%p78_p3), [#allocation2], %s733_s25 }
  0x15   : > { %v239_v0 = vld [vmem:[%s958_s28] sm:$0xff] (%p78_p3)  ;;  %v241_v1 = vld [vmem:[%s958_s28 + $0x10] sm:$0xff] (%p78_p3) }
  0x16   : > { %v243_v2 = vld [vmem:[%s958_s28 + $0x20] sm:$0xff] (%p78_p3)  ;;  %240 = vst [vmem:[%s175_s29] sm:$0xff] (%p78_p3), %v239_v0  ;;  %242 = vst [vmem:[%s175_s29 + $0x8] sm:$0xff] (%p78_p3), %v241_v1  ;;  %v245_v3 = vld [vmem:[%s958_s28 + $0x30] sm:$0xff] (%p78_p3) }
  0x17   : > { %244 = vst [vmem:[%s175_s29 + $0x10] sm:$0xff] (%p78_p3), %v243_v2  ;;  %v247_v4 = vld [vmem:[%s958_s28 + $0x40] sm:$0xff] (%p78_p3)  ;;  %v249_v5 = vld [vmem:[%s958_s28 + $0x50] sm:$0xff] (%p78_p3)  ;;  %246 = vst [vmem:[%s175_s29 + $0x18] sm:$0xff] (%p78_p3), %v245_v3 }
  0x18   : > { %248 = vst [vmem:[%s175_s29 + $0x20] sm:$0xff] (%p78_p3), %v247_v4  ;;  %250 = vst [vmem:[%s175_s29 + $0x28] sm:$0xff] (%p78_p3), %v249_v5  ;;  %v251_v6 = vld [vmem:[%s958_s28 + $0x60] sm:$0xff] (%p78_p3)  ;;  %v253_v7 = vld [vmem:[%s958_s28 + $0x70] sm:$0xff] (%p78_p3) }
  0x19   : > { %v255_v8 = vld [vmem:[%s958_s28 + $0x80] sm:$0xff]  ;;  %252 = vst [vmem:[%s175_s29 + $0x30] sm:$0xff] %v251_v6  ;;  %254 = vst [vmem:[%s175_s29 + $0x38] sm:$0xff] %v253_v7  ;;  %v257_v9 = vld [vmem:[%s958_s28 + $0x90] sm:$0xff] }
  0x1a   : > { %256 = vst [vmem:[%s175_s29 + $0x40] sm:$0xff] %v255_v8  ;;  %v259_v10 = vld [vmem:[%s958_s28 + $0xa0] sm:$0xff]  ;;  %v261_v11 = vld [vmem:[%s958_s28 + $0xb0] sm:$0xff]  ;;  %258 = vst [vmem:[%s175_s29 + $0x48] sm:$0xff] %v257_v9 }
  0x1b   : > { %260 = vst [vmem:[%s175_s29 + $0x50] sm:$0xff] %v259_v10  ;;  %262 = vst [vmem:[%s175_s29 + $0x58] sm:$0xff] %v261_v11  ;;  %v263_v12 = vld [vmem:[%s958_s28 + $0xc0] sm:$0xff]  ;;  %v265_v13 = vld [vmem:[%s958_s28 + $0xd0] sm:$0xff] }
  0x1c   : > { %v267_v14 = vld [vmem:[%s958_s28 + $0xe0] sm:$0xff]  ;;  %264 = vst [vmem:[%s175_s29 + $0x60] sm:$0xff] %v263_v12  ;;  %266 = vst [vmem:[%s175_s29 + $0x68] sm:$0xff] %v265_v13  ;;  %v269_v15 = vld [vmem:[%s958_s28 + $0xf0] sm:$0xff] }
  0x1d   : > { %268 = vst [vmem:[%s175_s29 + $0x70] sm:$0xff] %v267_v14  ;;  %270 = vst [vmem:[%s175_s29 + $0x78] sm:$0xff] %v269_v15 }
  0x1e PF: > { %p736_p8 = scmp.ge.s32.totalorder %s887_s16, 1  ;;  %p283_p9 = scmp.lt.s32.totalorder %s887_s16, 3 }
  0x20   : > { %p284_p10 = pnand %p736_p8, %p283_p9 }
  0x21   : > { %s290_s30 = sand.u32 (!%p284_p10), 1, %s871_s12   ;;  %v889_v16 = vmov (!%p284_p10), 0   ;;  %v847_v33 = vld [vmem:[%s1032_s0] sm:$0xff] (!%p284_p10)   ;;  %v848_v34 = vld [vmem:[%s1032_s0 + $0x8] sm:$0xff] (!%p284_p10)   ;;  %s739_s10 = sshll.u32 (!%p284_p10), %s879_s14, 1  ;;  %v557_v35 = vlaneseq (!%p284_p10) }
  0x22   : > { %287 = sbr.rel (%p284_p10) target bundleno = 296 (0x128), region = 66  ;;  %s737_s4 = sshll.u32 (!%p284_p10), %s290_s30, 7  ;;  %507 = vmatprep.mubr.bf16.mxu0 (!%p284_p10), %v889_v16  ;;  %517 = vmatprep.mubr.bf16.mxu1 (!%p284_p10), %v889_v16 }
  0x23   : > { %s981_s5 = scalar_lea.vmem (!%p284_p10), [#allocation2], %s737_s4  ;;  %p336_p11 = scmp.lt.s32.totalorder (!%p284_p10), %s739_s10, 3  ;;  %v558_v36 = vshrl.u32 (!%p284_p10), %v557_v35, 7 }
  0x24   : > { %v823_v17 = vld [vmem:[%s981_s5 + $0x4] ss:$8 sps:$4 sm:$0xff] (!%p284_p10)   ;;  %v825_v18 = vld [vmem:[%s981_s5] ss:$8 sps:$4 sm:$0xff] (!%p284_p10)   ;;  %v826_v19 = vld [vmem:[%s981_s5 + $0x14] ss:$8 sps:$4 sm:$0xff] (!%p284_p10)  }
  0x25   : > { %475 = vmatprep.subr.bf16.mxu0 (!%p284_p10), %v823_v17  ;;  %765 = vmatprep.subr.bf16.mxu1 (!%p284_p10), %v823_v17  ;;  %v828_v20 = vld [vmem:[%s981_s5 + $0x10] ss:$8 sps:$4 sm:$0xff] (!%p284_p10)   ;;  %v829_v21 = vld [vmem:[%s981_s5 + $0x24] ss:$8 sps:$4 sm:$0xff] (!%p284_p10)   ;;  %v831_v22 = vld [vmem:[%s981_s5 + $0x20] ss:$8 sps:$4 sm:$0xff] (!%p284_p10)  }
  0x26   : > { %476 = vmatpush1.bf16.msra.mxu0 (!%p284_p10), %v825_v18  ;;  %773 = vmatpush1.bf16.msra.mxu1 (!%p284_p10), %v825_v18  ;;  %v832_v23 = vld [vmem:[%s981_s5 + $0x34] ss:$8 sps:$4 sm:$0xff] (!%p284_p10)   ;;  %v834_v24 = vld [vmem:[%s981_s5 + $0x30] ss:$8 sps:$4 sm:$0xff] (!%p284_p10)   ;;  %v835_v25 = vld [vmem:[%s981_s5 + $0x44] ss:$8 sps:$4 sm:$0xff] (!%p284_p10)  }
  0x27   : > { %477 = vmatprep.subr.bf16.mxu0 (!%p284_p10), %v826_v19  ;;  %766 = vmatprep.subr.bf16.mxu1 (!%p284_p10), %v826_v19  ;;  %v837_v26 = vld [vmem:[%s981_s5 + $0x40] ss:$8 sps:$4 sm:$0xff] (!%p284_p10)   ;;  %v838_v27 = vld [vmem:[%s981_s5 + $0x54] ss:$8 sps:$4 sm:$0xff] (!%p284_p10)   ;;  %v840_v28 = vld [vmem:[%s981_s5 + $0x50] ss:$8 sps:$4 sm:$0xff] (!%p284_p10)  }
  0x28   : > { %v841_v29 = vld [vmem:[%s981_s5 + $0x64] ss:$8 sps:$4 sm:$0xff] (!%p284_p10)   ;;  %v843_v30 = vld [vmem:[%s981_s5 + $0x60] ss:$8 sps:$4 sm:$0xff] (!%p284_p10)   ;;  %v844_v31 = vld [vmem:[%s981_s5 + $0x74] ss:$8 sps:$4 sm:$0xff] (!%p284_p10)  }
  0x29   : > { %v846_v32 = vld [vmem:[%s981_s5 + $0x70] ss:$8 sps:$4 sm:$0xff]   ;;  %s1044_s10 = smov (!%p336_p11, %s739_s10), 3  ;;  %v559_v37 = vsub.s32 0, %v558_v36  ;;  %v563_v39 = vsub.s32 1, %v558_v36  ;;  %s738_s20 = sshll.u32 %s290_s30, 6 }
  0x2a   : > { %478 = vmatpush1.bf16.msra.mxu0 %v828_v20  ;;  %774 = vmatpush1.bf16.msra.mxu1 %v828_v20  ;;  %s338_s19 = scalar_lea.vmem %s1034_s2, %s1044_s10  ;;  %s323_s23 = scalar_lea.vmem [#allocation3], %s738_s20 }
  0x2b   : > { %479 = vmatprep.subr.bf16.mxu0 %v829_v21  ;;  %767 = vmatprep.subr.bf16.mxu1 %v829_v21  ;;  %v555_v38 = vld [vmem:[%s338_s19] sm:$0x3]  ;;  %s764_s12 = sshll.u32 (%p945_p6), %s879_s14, 4 }
  0x2c   : > { %v560_v40 = vrot.slane %v555_v38, %v559_v37  ;;  %v564_v43 = vrot.slane %v555_v38, %v563_v39  ;;  %s595_s26 = scalar_lea.vmem (%p945_p6), %s1035_s3, %s764_s12 }
  0x2e   : > { %480 = vmatpush1.bf16.msra.mxu0 %v831_v22  ;;  %775 = vmatpush1.bf16.msra.mxu1 %v831_v22 }
  0x2f   : > { %481 = vmatprep.subr.bf16.mxu0 %v832_v23  ;;  %768 = vmatprep.subr.bf16.mxu1 %v832_v23 }
  0x32   : > { %482 = vmatpush1.bf16.msra.mxu0 %v834_v24  ;;  %776 = vmatpush1.bf16.msra.mxu1 %v834_v24 }
  0x33   : > { %483 = vmatprep.subr.bf16.mxu0 %v835_v25  ;;  %769 = vmatprep.subr.bf16.mxu1 %v835_v25 }
  0x36   : > { %484 = vmatpush1.bf16.msra.mxu0 %v837_v26  ;;  %777 = vmatpush1.bf16.msra.mxu1 %v837_v26 }
  0x37   : > { %485 = vmatprep.subr.bf16.mxu0 %v838_v27  ;;  %770 = vmatprep.subr.bf16.mxu1 %v838_v27 }
  0x3a   : > { %486 = vmatpush1.bf16.msra.mxu0 %v840_v28  ;;  %778 = vmatpush1.bf16.msra.mxu1 %v840_v28 }
  0x3b   : > { %487 = vmatprep.subr.bf16.mxu0 %v841_v29  ;;  %771 = vmatprep.subr.bf16.mxu1 %v841_v29 }
  0x3e   : > { %488 = vmatpush1.bf16.msra.mxu0 %v843_v30  ;;  %779 = vmatpush1.bf16.msra.mxu1 %v843_v30 }
  0x3f   : > { %489 = vmatprep.subr.bf16.mxu0 %v844_v31  ;;  %772 = vmatprep.subr.bf16.mxu1 %v844_v31 }
  0x42   : > { %490 = vmatpush1.bf16.msra.mxu0 %v846_v32  ;;  %780 = vmatpush1.bf16.msra.mxu1 %v846_v32 }
  0x45   : > { %508 = vmatmul.mubr.bf16.vlgmr.msra.gmra.mrb[0].mxu0 %v847_v33  ;;  %518 = vmatmul.mubr.bf16.vlgmr.msra.gmra.mrb[0].mxu1 %v848_v34 }
 0x118   : > { %v509_v41 = vpop.f32.mrb[0].mxu0  ;;  %v519_v42 = vpop.f32.mrb[0].mxu1  ;;  %589 = sbr.rel (!%p945_p6) target bundleno = 296 (0x128), region = 82 }
 0x119   : > { %v511_v44 = vpop.f32.mrb[1].mxu0  ;;  %v521_v45 = vpop.f32.mrb[1].mxu1  ;;  %v567_v48 = vadd.f32 %v560_v40, %v509_v41  ;;  %v571_v49 = vadd.f32 %v560_v40, %v519_v42 }
 0x11a   : > { %v513_v46 = vpop.f32.mrb[2].mxu0  ;;  %v523_v47 = vpop.f32.mrb[2].mxu1  ;;  %v568_v52 = vadd.f32 %v564_v43, %v511_v44  ;;  %v572_v53 = vadd.f32 %v564_v43, %v521_v45 }
 0x11b   : > { %v515_v50 = vpop.f32.mrb[3].mxu0  ;;  %v525_v51 = vpop.f32.mrb[3].mxu1  ;;  %575 = vst [vmem:[%s323_s23] sm:$0xff] %v567_v48  ;;  %579 = vst [vmem:[%s323_s23 + $0x20] sm:$0xff] %v571_v49  ;;  %v569_v54 = vadd.f32 %v560_v40, %v513_v46  ;;  %v573_v55 = vadd.f32 %v560_v40, %v523_v47 }
 0x11c   : > { %576 = vst [vmem:[%s323_s23 + $0x8] sm:$0xff] %v568_v52  ;;  %580 = vst [vmem:[%s323_s23 + $0x28] sm:$0xff] %v572_v53  ;;  %v570_v56 = vadd.f32 %v564_v43, %v515_v50  ;;  %v574_v57 = vadd.f32 %v564_v43, %v525_v51 }
 0x11d   : > { %577 = vst [vmem:[%s323_s23 + $0x10] sm:$0xff] %v569_v54  ;;  %581 = vst [vmem:[%s323_s23 + $0x30] sm:$0xff] %v573_v55 }
 0x11e   : > { %578 = vst [vmem:[%s323_s23 + $0x18] sm:$0xff] %v570_v56  ;;  %582 = vst [vmem:[%s323_s23 + $0x38] sm:$0xff] %v574_v57 }
 0x122   : > { %v608_v58 = vld [vmem:[%s323_s23] sm:$0xff] }
 0x123   : > { %v610_v59 = vld [vmem:[%s323_s23 + $0x8] sm:$0xff]  ;;  %v616_v62 = vld [vmem:[%s323_s23 + $0x20] sm:$0xff]  ;;  %609 = vst [vmem:[%s595_s26] sm:$0xff] %v608_v58 }
 0x124   : > { %v612_v60 = vld [vmem:[%s323_s23 + $0x10] sm:$0xff]  ;;  %v618_v63 = vld [vmem:[%s323_s23 + $0x28] sm:$0xff]  ;;  %611 = vst [vmem:[%s595_s26 + $0x8] sm:$0xff] %v610_v59  ;;  %617 = vst [vmem:[%s595_s26 + $0x40] sm:$0xff] %v616_v62 }
 0x125   : > { %v614_v61 = vld [vmem:[%s323_s23 + $0x18] sm:$0xff]  ;;  %613 = vst [vmem:[%s595_s26 + $0x20] sm:$0xff] %v612_v60  ;;  %619 = vst [vmem:[%s595_s26 + $0x48] sm:$0xff] %v618_v63  ;;  %v620_v0 = vld [vmem:[%s323_s23 + $0x30] sm:$0xff] }
 0x126   : > { %615 = vst [vmem:[%s595_s26 + $0x28] sm:$0xff] %v614_v61  ;;  %v622_v1 = vld [vmem:[%s323_s23 + $0x38] sm:$0xff]  ;;  %621 = vst [vmem:[%s595_s26 + $0x60] sm:$0xff] %v620_v0 }
 0x127   : > { %623 = vst [vmem:[%s595_s26 + $0x68] sm:$0xff] %v622_v1 }
 0x128 PF: > { %s13_s16 = sadd.s32 1, %s887_s16   ;;  %s1037_s12 = smov %s875_s13 }
 0x129   : > { %p10_p12 = scmp.ge.s32.totalorder %s13_s16, 4   ;;  %s1038_s13 = smov %s950_s22 }
 0x12a   : > { %s1039_s14 = smov %s883_s15  ;;  %s1040_s15 = smov %s1042_s17 }
 0x12b   :  { %12 = sbr.rel (!%p10_p12) target bundleno = 3 (0x3), region = 142 }

// kernel: unet_forward.52
= control target key start
LH: loop header
LB: loop body
LE: loop exit
PB: predicated region body
PF: predicated region fallthrough
CT: control target
= control target key end

     0   :  { %s1246_s12 = smov 0   ;;  %s1248_s13 = smov 0   ;;  %s1530_s0 = inlined_call_operand.vmem [shape: bf16[128,128], index: 0, kind: input, shape index: {}]   ;;  %s1531_s1 = inlined_call_operand.vmem [shape: bf16[128,512], index: 1, kind: input, shape index: {}]   ;;  %s1532_s2 = inlined_call_operand.vmem [shape: f32[1,512], index: 2, kind: input, shape index: {}]   ;;  %s1533_s3 = inlined_call_operand.vmem [shape: f32[128,512], index: 3, kind: output, shape index: {}]  }
   0x1   :  { %s1250_s14 = smov 0   ;;  %s1252_s15 = smov 0  }
   0x2   :  { %s1254_s16 = smov 0  }
   0x3 LB: > { %s28_s17 = sadd.s32 1, %s1219_s15  ;;  %s1052_s18 = sadd.s32 4294967295, %s1223_s16   ;;  %s1223_s16 = sphi %s1254_s16, %s13_s16   ;;  %s1219_s15 = sphi %s1252_s15, %s1538_s15   ;;  %s1215_s14 = sphi %s1250_s14, %s1537_s14   ;;  %s1211_s13 = sphi %s1248_s13, %s1536_s13   ;;  %s1207_s12 = sphi %s1246_s12, %s1535_s12  }
   0x4   : > { %p30_p0 = scmp.ge.s32.totalorder %s28_s17, 2  ;;  %p76_p1 = scmp.ne.s32.totalorder %s1211_s13, %s1207_s12 }
   0x5   : > { %p77_p2 = scmp.eq.s32.totalorder %s1223_s16, 0  ;;  %p134_p4 = scmp.eq.s32.totalorder %s1052_s18, 1 }
   0x6   : > { %s1540_s17 = smov (%p30_p0, %s28_s17), 0  ;;  %s69_s20 = sadd.s32 1, %s1211_s13 }
   0x7   : > { %p78_p3 = por %p77_p2, %p76_p1  ;;  %s65_s19 = ssub.s32 %s1219_s15, %s1540_s17 }
   0x8   : > { %p67_p5 = scmp.eq.s32.totalorder %s65_s19, 0  ;;  %p1281_p6 = por %p134_p4, %p76_p1 }
   0x9   : > { %p1056_p7 = scmp.ge.s32.totalorder %s1223_s16, 2 }
   0xa   : > { %s1286_s22 = scalar_select %p67_p5, %s1211_s13, %s69_s20  }
   0xb   : > { %168 = sbr.rel (%p1056_p7) target bundleno = 30 (0x1e), region = 20 }
  0x12   : > { %171 = sbr.rel (!%p78_p3) target bundleno = 30 (0x1e), region = 24  ;;  %s173_s23 = sand.u32 (%p78_p3), 1, %s1211_s13  }
  0x13   : > { %s1093_s24 = sshll.u32 (%p78_p3), %s1219_s15, 3  ;;  %s1057_s25 = sshll.u32 (%p78_p3), %s173_s23, 7 }
  0x14   : > { %s1294_s28 = scalar_lea.vmem (%p78_p3), %s1531_s1, %s1093_s24  ;;  %s175_s29 = scalar_lea.vmem (%p78_p3), [#allocation2], %s1057_s25 }
  0x15   : > { %v239_v0 = vld [vmem:[%s1294_s28] sm:$0xff] (%p78_p3)  ;;  %v241_v1 = vld [vmem:[%s1294_s28 + $0x10] sm:$0xff] (%p78_p3) }
  0x16   : > { %v243_v2 = vld [vmem:[%s1294_s28 + $0x20] sm:$0xff] (%p78_p3)  ;;  %240 = vst [vmem:[%s175_s29] sm:$0xff] (%p78_p3), %v239_v0  ;;  %242 = vst [vmem:[%s175_s29 + $0x8] sm:$0xff] (%p78_p3), %v241_v1  ;;  %v245_v3 = vld [vmem:[%s1294_s28 + $0x30] sm:$0xff] (%p78_p3) }
  0x17   : > { %244 = vst [vmem:[%s175_s29 + $0x10] sm:$0xff] (%p78_p3), %v243_v2  ;;  %v247_v4 = vld [vmem:[%s1294_s28 + $0x40] sm:$0xff] (%p78_p3)  ;;  %v249_v5 = vld [vmem:[%s1294_s28 + $0x50] sm:$0xff] (%p78_p3)  ;;  %246 = vst [vmem:[%s175_s29 + $0x18] sm:$0xff] (%p78_p3), %v245_v3 }
  0x18   : > { %248 = vst [vmem:[%s175_s29 + $0x20] sm:$0xff] (%p78_p3), %v247_v4  ;;  %250 = vst [vmem:[%s175_s29 + $0x28] sm:$0xff] (%p78_p3), %v249_v5  ;;  %v251_v6 = vld [vmem:[%s1294_s28 + $0x60] sm:$0xff] (%p78_p3)  ;;  %v253_v7 = vld [vmem:[%s1294_s28 + $0x70] sm:$0xff] (%p78_p3) }
  0x19   : > { %v255_v8 = vld [vmem:[%s1294_s28 + $0x80] sm:$0xff]  ;;  %252 = vst [vmem:[%s175_s29 + $0x30] sm:$0xff] %v251_v6  ;;  %254 = vst [vmem:[%s175_s29 + $0x38] sm:$0xff] %v253_v7  ;;  %v257_v9 = vld [vmem:[%s1294_s28 + $0x90] sm:$0xff] }
  0x1a   : > { %256 = vst [vmem:[%s175_s29 + $0x40] sm:$0xff] %v255_v8  ;;  %v259_v10 = vld [vmem:[%s1294_s28 + $0xa0] sm:$0xff]  ;;  %v261_v11 = vld [vmem:[%s1294_s28 + $0xb0] sm:$0xff]  ;;  %258 = vst [vmem:[%s175_s29 + $0x48] sm:$0xff] %v257_v9 }
  0x1b   : > { %260 = vst [vmem:[%s175_s29 + $0x50] sm:$0xff] %v259_v10  ;;  %262 = vst [vmem:[%s175_s29 + $0x58] sm:$0xff] %v261_v11  ;;  %v263_v12 = vld [vmem:[%s1294_s28 + $0xc0] sm:$0xff]  ;;  %v265_v13 = vld [vmem:[%s1294_s28 + $0xd0] sm:$0xff] }
  0x1c   : > { %v267_v14 = vld [vmem:[%s1294_s28 + $0xe0] sm:$0xff]  ;;  %264 = vst [vmem:[%s175_s29 + $0x60] sm:$0xff] %v263_v12  ;;  %266 = vst [vmem:[%s175_s29 + $0x68] sm:$0xff] %v265_v13  ;;  %v269_v15 = vld [vmem:[%s1294_s28 + $0xf0] sm:$0xff] }
  0x1d   : > { %268 = vst [vmem:[%s175_s29 + $0x70] sm:$0xff] %v267_v14  ;;  %270 = vst [vmem:[%s175_s29 + $0x78] sm:$0xff] %v269_v15 }
  0x1e PF: > { %p1060_p8 = scmp.ge.s32.totalorder %s1223_s16, 1  ;;  %p283_p9 = scmp.lt.s32.totalorder %s1223_s16, 3 }
  0x20   : > { %p284_p10 = pnand %p1060_p8, %p283_p9 }
  0x21   : > { %s290_s30 = sand.u32 (!%p284_p10), 1, %s1207_s12   ;;  %v1225_v16 = vmov (!%p284_p10), 0   ;;  %v1177_v33 = vld [vmem:[%s1530_s0] sm:$0xff] (!%p284_p10)   ;;  %v1179_v35 = vld [vmem:[%s1530_s0 + $0x8] sm:$0xff] (!%p284_p10)   ;;  %v1181_v37 = vld [vmem:[%s1530_s0 + $0x10] sm:$0xff] (!%p284_p10)   ;;  %v785_v41 = vlaneseq (!%p284_p10) }
  0x22   : > { %287 = sbr.rel (%p284_p10) target bundleno = 320 (0x140), region = 66  ;;  %s1061_s4 = sshll.u32 (!%p284_p10), %s290_s30, 7  ;;  %603 = vmatprep.mubr.bf16.mxu0 (!%p284_p10), %v1225_v16  ;;  %643 = vmatprep.mubr.bf16.mxu1 (!%p284_p10), %v1225_v16  ;;  %v1178_v34 = vld [vmem:[%s1530_s0 + $0x20] sm:$0xff] (!%p284_p10)   ;;  %v1180_v36 = vld [vmem:[%s1530_s0 + $0x28] sm:$0xff] (!%p284_p10)   ;;  %v1182_v38 = vld [vmem:[%s1530_s0 + $0x30] sm:$0xff] (!%p284_p10)  }
  0x23   : > { %s1319_s5 = scalar_lea.vmem (!%p284_p10), [#allocation2], %s1061_s4  ;;  %v1183_v39 = vld [vmem:[%s1530_s0 + $0x18] sm:$0xff] (!%p284_p10)   ;;  %s1063_s4 = sshll.u32 (!%p284_p10), %s1215_s14, 1  ;;  %v786_v42 = vshrl.u32 (!%p284_p10), %v785_v41, 7 }
  0x24   : > { %v1153_v17 = vld [vmem:[%s1319_s5 + $0x4] ss:$8 sps:$4 sm:$0xff] (!%p284_p10)   ;;  %v1155_v18 = vld [vmem:[%s1319_s5] ss:$8 sps:$4 sm:$0xff] (!%p284_p10)   ;;  %v1156_v19 = vld [vmem:[%s1319_s5 + $0x14] ss:$8 sps:$4 sm:$0xff] (!%p284_p10)  }
  0x25   : > { %571 = vmatprep.subr.bf16.mxu0 (!%p284_p10), %v1153_v17  ;;  %1095 = vmatprep.subr.bf16.mxu1 (!%p284_p10), %v1153_v17  ;;  %v1158_v20 = vld [vmem:[%s1319_s5 + $0x10] ss:$8 sps:$4 sm:$0xff] (!%p284_p10)   ;;  %v1159_v21 = vld [vmem:[%s1319_s5 + $0x24] ss:$8 sps:$4 sm:$0xff] (!%p284_p10)   ;;  %v1161_v22 = vld [vmem:[%s1319_s5 + $0x20] ss:$8 sps:$4 sm:$0xff] (!%p284_p10)  }
  0x26   : > { %572 = vmatpush1.bf16.msra.mxu0 (!%p284_p10), %v1155_v18  ;;  %1103 = vmatpush1.bf16.msra.mxu1 (!%p284_p10), %v1155_v18  ;;  %v1162_v23 = vld [vmem:[%s1319_s5 + $0x34] ss:$8 sps:$4 sm:$0xff] (!%p284_p10)   ;;  %v1164_v24 = vld [vmem:[%s1319_s5 + $0x30] ss:$8 sps:$4 sm:$0xff] (!%p284_p10)   ;;  %v1165_v25 = vld [vmem:[%s1319_s5 + $0x44] ss:$8 sps:$4 sm:$0xff] (!%p284_p10)  }
  0x27   : > { %573 = vmatprep.subr.bf16.mxu0 (!%p284_p10), %v1156_v19  ;;  %1096 = vmatprep.subr.bf16.mxu1 (!%p284_p10), %v1156_v19  ;;  %v1167_v26 = vld [vmem:[%s1319_s5 + $0x40] ss:$8 sps:$4 sm:$0xff] (!%p284_p10)   ;;  %v1168_v27 = vld [vmem:[%s1319_s5 + $0x54] ss:$8 sps:$4 sm:$0xff] (!%p284_p10)   ;;  %v1170_v28 = vld [vmem:[%s1319_s5 + $0x50] ss:$8 sps:$4 sm:$0xff] (!%p284_p10)  }
  0x28   : > { %v1171_v29 = vld [vmem:[%s1319_s5 + $0x64] ss:$8 sps:$4 sm:$0xff] (!%p284_p10)   ;;  %v1173_v30 = vld [vmem:[%s1319_s5 + $0x60] ss:$8 sps:$4 sm:$0xff] (!%p284_p10)   ;;  %v1174_v31 = vld [vmem:[%s1319_s5 + $0x74] ss:$8 sps:$4 sm:$0xff] (!%p284_p10)  }
  0x29   : > { %v1176_v32 = vld [vmem:[%s1319_s5 + $0x70] ss:$8 sps:$4 sm:$0xff]   ;;  %p336_p11 = scmp.lt.s32.totalorder %s1063_s4, 3  ;;  %v787_v43 = vsub.s32 0, %v786_v42  ;;  %v791_v45 = vsub.s32 1, %v786_v42  ;;  %s1062_s8 = sshll.u32 %s290_s30, 8 }
  0x2a   : > { %574 = vmatpush1.bf16.msra.mxu0 %v1158_v20  ;;  %1104 = vmatpush1.bf16.msra.mxu1 %v1158_v20  ;;  %v1184_v40 = vld [vmem:[%s1530_s0 + $0x38] sm:$0xff]   ;;  %s1381_s12 = scalar_lea.vmem [#allocation3], %s1062_s8  ;;  %s1094_s30 = sshll.u32 (%p1281_p6), %s1215_s14, 4 }
  0x2b   : > { %575 = vmatprep.subr.bf16.mxu0 %v1159_v21  ;;  %1097 = vmatprep.subr.bf16.mxu1 %v1159_v21  ;;  %s1542_s4 = smov (!%p336_p11, %s1063_s4), 3  ;;  %s1452_s11 = scalar_lea.vmem (%p1281_p6), %s1533_s3, %s1094_s30 }
  0x2c   : > { %s338_s7 = scalar_lea.vmem %s1532_s2, %s1542_s4 }
  0x2d   : > { %v783_v44 = vld [vmem:[%s338_s7] sm:$0x3] }
  0x2e   : > { %576 = vmatpush1.bf16.msra.mxu0 %v1161_v22  ;;  %1105 = vmatpush1.bf16.msra.mxu1 %v1161_v22  ;;  %v1373_v46 = vrot.slane %v783_v44, %v787_v43  ;;  %v1375_v49 = vrot.slane %v783_v44, %v791_v45 }
  0x2f   : > { %577 = vmatprep.subr.bf16.mxu0 %v1162_v23  ;;  %1098 = vmatprep.subr.bf16.mxu1 %v1162_v23 }
  0x32   : > { %578 = vmatpush1.bf16.msra.mxu0 %v1164_v24  ;;  %1106 = vmatpush1.bf16.msra.mxu1 %v1164_v24 }
  0x33   : > { %579 = vmatprep.subr.bf16.mxu0 %v1165_v25  ;;  %1099 = vmatprep.subr.bf16.mxu1 %v1165_v25 }
  0x36   : > { %580 = vmatpush1.bf16.msra.mxu0 %v1167_v26  ;;  %1107 = vmatpush1.bf16.msra.mxu1 %v1167_v26 }
  0x37   : > { %581 = vmatprep.subr.bf16.mxu0 %v1168_v27  ;;  %1100 = vmatprep.subr.bf16.mxu1 %v1168_v27 }
  0x3a   : > { %582 = vmatpush1.bf16.msra.mxu0 %v1170_v28  ;;  %1108 = vmatpush1.bf16.msra.mxu1 %v1170_v28 }
  0x3b   : > { %583 = vmatprep.subr.bf16.mxu0 %v1171_v29  ;;  %1101 = vmatprep.subr.bf16.mxu1 %v1171_v29 }
  0x3e   : > { %584 = vmatpush1.bf16.msra.mxu0 %v1173_v30  ;;  %1109 = vmatpush1.bf16.msra.mxu1 %v1173_v30 }
  0x3f   : > { %585 = vmatprep.subr.bf16.mxu0 %v1174_v31  ;;  %1102 = vmatprep.subr.bf16.mxu1 %v1174_v31 }
  0x42   : > { %586 = vmatpush1.bf16.msra.mxu0 %v1176_v32  ;;  %1110 = vmatpush1.bf16.msra.mxu1 %v1176_v32 }
  0x45   : > { %604 = vmatmul.mubr.bf16.vlgmr.msra.gmra.mrb[0].mxu0 %v1177_v33  ;;  %644 = vmatmul.mubr.bf16.vlgmr.msra.gmra.mrb[0].mxu1 %v1178_v34 }
  0x46   : > { %613 = vmatprep.mubr.bf16.mxu0 %v1225_v16  ;;  %653 = vmatprep.mubr.bf16.mxu1 %v1225_v16 }
  0x4d   : > { %614 = vmatmul.mubr.bf16.gmra.mrb[4].mxu0 %v1179_v35  ;;  %654 = vmatmul.mubr.bf16.gmra.mrb[4].mxu1 %v1180_v36 }
  0x4e   : > { %623 = vmatprep.mubr.bf16.mxu0 %v1225_v16  ;;  %663 = vmatprep.mubr.bf16.mxu1 %v1225_v16 }
  0x55   : > { %624 = vmatmul.mubr.bf16.gmra.mrb[8].mxu0 %v1181_v37  ;;  %664 = vmatmul.mubr.bf16.gmra.mrb[8].mxu1 %v1182_v38 }
  0x56   : > { %633 = vmatprep.mubr.bf16.mxu0 %v1225_v16  ;;  %673 = vmatprep.mubr.bf16.mxu1 %v1225_v16 }
  0x5d   : > { %634 = vmatmul.mubr.bf16.gmra.mrb[12].mxu0 %v1183_v39  ;;  %674 = vmatmul.mubr.bf16.gmra.mrb[12].mxu1 %v1184_v40 }
 0x118   : > { %v605_v47 = vpop.f32.mrb[0].mxu0  ;;  %v645_v48 = vpop.f32.mrb[0].mxu1 }
 0x119   : > { %v607_v50 = vpop.f32.mrb[1].mxu0  ;;  %v647_v51 = vpop.f32.mrb[1].mxu1  ;;  %v795_v54 = vadd.f32 %v1373_v46, %v605_v47  ;;  %v811_v55 = vadd.f32 %v1373_v46, %v645_v48 }
 0x11a   : > { %v609_v52 = vpop.f32.mrb[2].mxu0  ;;  %v649_v53 = vpop.f32.mrb[2].mxu1  ;;  %v796_v58 = vadd.f32 %v1375_v49, %v607_v50  ;;  %v812_v59 = vadd.f32 %v1375_v49, %v647_v51 }
 0x11b   : > { %v611_v56 = vpop.f32.mrb[3].mxu0  ;;  %v651_v57 = vpop.f32.mrb[3].mxu1  ;;  %827 = vst [vmem:[%s1381_s12] sm:$0xff] %v795_v54  ;;  %843 = vst [vmem:[%s1381_s12 + $0x80] sm:$0xff] %v811_v55  ;;  %v797_v60 = vadd.f32 %v1373_v46, %v609_v52  ;;  %v813_v61 = vadd.f32 %v1373_v46, %v649_v53 }
 0x11c   : > { %828 = vst [vmem:[%s1381_s12 + $0x8] sm:$0xff] %v796_v58  ;;  %844 = vst [vmem:[%s1381_s12 + $0x88] sm:$0xff] %v812_v59  ;;  %v798_v62 = vadd.f32 %v1375_v49, %v611_v56  ;;  %v814_v63 = vadd.f32 %v1375_v49, %v651_v57 }
 0x11d   : > { %829 = vst [vmem:[%s1381_s12 + $0x10] sm:$0xff] %v797_v60  ;;  %845 = vst [vmem:[%s1381_s12 + $0x90] sm:$0xff] %v813_v61 }
 0x11e   : > { %830 = vst [vmem:[%s1381_s12 + $0x18] sm:$0xff] %v798_v62  ;;  %846 = vst [vmem:[%s1381_s12 + $0x98] sm:$0xff] %v814_v63 }
 0x120   : > { %v615_v0 = vpop.f32.mrb[4].mxu0  ;;  %v655_v1 = vpop.f32.mrb[4].mxu1 }
 0x121   : > { %v617_v2 = vpop.f32.mrb[5].mxu0  ;;  %v657_v3 = vpop.f32.mrb[5].mxu1  ;;  %v799_v6 = vadd.f32 %v1373_v46, %v615_v0  ;;  %v815_v7 = vadd.f32 %v1373_v46, %v655_v1 }
 0x122   : > { %v619_v4 = vpop.f32.mrb[6].mxu0  ;;  %v659_v5 = vpop.f32.mrb[6].mxu1  ;;  %v800_v10 = vadd.f32 %v1375_v49, %v617_v2  ;;  %v816_v11 = vadd.f32 %v1375_v49, %v657_v3  ;;  %v916_v0 = vld [vmem:[%s1381_s12 + $0x80] sm:$0xff] (%p1281_p6) }
 0x123   : > { %v621_v8 = vpop.f32.mrb[7].mxu0  ;;  %v661_v9 = vpop.f32.mrb[7].mxu1  ;;  %831 = vst [vmem:[%s1381_s12 + $0x20] sm:$0xff] %v799_v6  ;;  %847 = vst [vmem:[%s1381_s12 + $0xa0] sm:$0xff] %v815_v7  ;;  %v801_v12 = vadd.f32 %v1373_v46, %v619_v4  ;;  %v817_v13 = vadd.f32 %v1373_v46, %v659_v5  ;;  %v918_v1 = vld [vmem:[%s1381_s12 + $0x88] sm:$0xff] (%p1281_p6) }
 0x124   : > { %832 = vst [vmem:[%s1381_s12 + $0x28] sm:$0xff] %v800_v10  ;;  %848 = vst [vmem:[%s1381_s12 + $0xa8] sm:$0xff] %v816_v11  ;;  %v802_v14 = vadd.f32 %v1375_v49, %v621_v8  ;;  %v818_v15 = vadd.f32 %v1375_v49, %v661_v9  ;;  %v888_v50 = vld [vmem:[%s1381_s12 + $0x10] sm:$0xff] (%p1281_p6) }
 0x125   : > { %833 = vst [vmem:[%s1381_s12 + $0x30] sm:$0xff] %v801_v12  ;;  %849 = vst [vmem:[%s1381_s12 + $0xb0] sm:$0xff] %v817_v13  ;;  %v890_v51 = vld [vmem:[%s1381_s12 + $0x18] sm:$0xff] (%p1281_p6)  ;;  %v920_v2 = vld [vmem:[%s1381_s12 + $0x90] sm:$0xff] (%p1281_p6) }
 0x126   : > { %834 = vst [vmem:[%s1381_s12 + $0x38] sm:$0xff] %v802_v14  ;;  %850 = vst [vmem:[%s1381_s12 + $0xb8] sm:$0xff] %v818_v15  ;;  %v922_v3 = vld [vmem:[%s1381_s12 + $0x98] sm:$0xff] (%p1281_p6) }
 0x127   : > { %889 = vst [vmem:[%s1452_s11 + $0x20] sm:$0xff] (%p1281_p6), %v888_v50  ;;  %891 = vst [vmem:[%s1452_s11 + $0x28] sm:$0xff] (%p1281_p6), %v890_v51 }
 0x128   : > { %v625_v16 = vpop.f32.mrb[8].mxu0  ;;  %v665_v17 = vpop.f32.mrb[8].mxu1  ;;  %917 = vst [vmem:[%s1452_s11 + $0x100] sm:$0xff] (%p1281_p6), %v916_v0  ;;  %919 = vst [vmem:[%s1452_s11 + $0x108] sm:$0xff] (%p1281_p6), %v918_v1 }
 0x129   : > { %v627_v18 = vpop.f32.mrb[9].mxu0  ;;  %v667_v19 = vpop.f32.mrb[9].mxu1  ;;  %v803_v22 = vadd.f32 %v1373_v46, %v625_v16  ;;  %v819_v23 = vadd.f32 %v1373_v46, %v665_v17  ;;  %921 = vst [vmem:[%s1452_s11 + $0x120] sm:$0xff] (%p1281_p6), %v920_v2  ;;  %923 = vst [vmem:[%s1452_s11 + $0x128] sm:$0xff] (%p1281_p6), %v922_v3 }
 0x12a   : > { %v629_v20 = vpop.f32.mrb[10].mxu0  ;;  %v669_v21 = vpop.f32.mrb[10].mxu1  ;;  %v804_v26 = vadd.f32 %v1375_v49, %v627_v18  ;;  %v820_v27 = vadd.f32 %v1375_v49, %v667_v19  ;;  %v892_v52 = vld [vmem:[%s1381_s12 + $0x20] sm:$0xff] (%p1281_p6) }
 0x12b   : > { %v631_v24 = vpop.f32.mrb[11].mxu0  ;;  %v671_v25 = vpop.f32.mrb[11].mxu1  ;;  %835 = vst [vmem:[%s1381_s12 + $0x40] sm:$0xff] %v803_v22  ;;  %851 = vst [vmem:[%s1381_s12 + $0xc0] sm:$0xff] %v819_v23  ;;  %v805_v28 = vadd.f32 %v1373_v46, %v629_v20  ;;  %v821_v29 = vadd.f32 %v1373_v46, %v669_v21  ;;  %v894_v53 = vld [vmem:[%s1381_s12 + $0x28] sm:$0xff] (%p1281_p6)  ;;  %v924_v4 = vld [vmem:[%s1381_s12 + $0xa0] sm:$0xff] (%p1281_p6) }
 0x12c   : > { %836 = vst [vmem:[%s1381_s12 + $0x48] sm:$0xff] %v804_v26  ;;  %852 = vst [vmem:[%s1381_s12 + $0xc8] sm:$0xff] %v820_v27  ;;  %v806_v30 = vadd.f32 %v1375_v49, %v631_v24  ;;  %v822_v31 = vadd.f32 %v1375_v49, %v671_v25  ;;  %v896_v54 = vld [vmem:[%s1381_s12 + $0x30] sm:$0xff] (%p1281_p6)  ;;  %v926_v5 = vld [vmem:[%s1381_s12 + $0xa8] sm:$0xff] (%p1281_p6) }
 0x12d   : > { %837 = vst [vmem:[%s1381_s12 + $0x50] sm:$0xff] %v805_v28  ;;  %853 = vst [vmem:[%s1381_s12 + $0xd0] sm:$0xff] %v821_v29  ;;  %v898_v55 = vld [vmem:[%s1381_s12 + $0x38] sm:$0xff] (%p1281_p6)  ;;  %v928_v6 = vld [vmem:[%s1381_s12 + $0xb0] sm:$0xff] (%p1281_p6) }
 0x12e   : > { %838 = vst [vmem:[%s1381_s12 + $0x58] sm:$0xff] %v806_v30  ;;  %854 = vst [vmem:[%s1381_s12 + $0xd8] sm:$0xff] %v822_v31  ;;  %v930_v7 = vld [vmem:[%s1381_s12 + $0xb8] sm:$0xff] (%p1281_p6) }
 0x12f   : > { %893 = vst [vmem:[%s1452_s11 + $0x40] sm:$0xff] (%p1281_p6), %v892_v52  ;;  %895 = vst [vmem:[%s1452_s11 + $0x48] sm:$0xff] (%p1281_p6), %v894_v53 }
 0x130   : > { %v635_v32 = vpop.f32.mrb[12].mxu0  ;;  %v675_v33 = vpop.f32.mrb[12].mxu1  ;;  %865 = sbr.rel (!%p1281_p6) target bundleno = 320 (0x140), region = 82  ;;  %897 = vst [vmem:[%s1452_s11 + $0x60] sm:$0xff] (%p1281_p6), %v896_v54  ;;  %899 = vst [vmem:[%s1452_s11 + $0x68] sm:$0xff] (%p1281_p6), %v898_v55 }
 0x131   : > { %v637_v34 = vpop.f32.mrb[13].mxu0  ;;  %v677_v35 = vpop.f32.mrb[13].mxu1  ;;  %v807_v38 = vadd.f32 %v1373_v46, %v635_v32  ;;  %v823_v39 = vadd.f32 %v1373_v46, %v675_v33  ;;  %925 = vst [vmem:[%s1452_s11 + $0x140] sm:$0xff] (%p1281_p6), %v924_v4  ;;  %927 = vst [vmem:[%s1452_s11 + $0x148] sm:$0xff] (%p1281_p6), %v926_v5 }
 0x132   : > { %v639_v36 = vpop.f32.mrb[14].mxu0  ;;  %v679_v37 = vpop.f32.mrb[14].mxu1  ;;  %v808_v42 = vadd.f32 %v1375_v49, %v637_v34  ;;  %v824_v43 = vadd.f32 %v1375_v49, %v677_v35  ;;  %v900_v56 = vld [vmem:[%s1381_s12 + $0x40] sm:$0xff] (%p1281_p6)  ;;  %929 = vst [vmem:[%s1452_s11 + $0x160] sm:$0xff] (%p1281_p6), %v928_v6  ;;  %931 = vst [vmem:[%s1452_s11 + $0x168] sm:$0xff] (%p1281_p6), %v930_v7 }
 0x133   : > { %v641_v40 = vpop.f32.mrb[15].mxu0  ;;  %v681_v41 = vpop.f32.mrb[15].mxu1  ;;  %839 = vst [vmem:[%s1381_s12 + $0x60] sm:$0xff] %v807_v38  ;;  %855 = vst [vmem:[%s1381_s12 + $0xe0] sm:$0xff] %v823_v39  ;;  %v809_v44 = vadd.f32 %v1373_v46, %v639_v36  ;;  %v825_v45 = vadd.f32 %v1373_v46, %v679_v37  ;;  %v884_v46 = vld [vmem:[%s1381_s12] sm:$0xff] (%p1281_p6)  ;;  %v902_v57 = vld [vmem:[%s1381_s12 + $0x48] sm:$0xff] (%p1281_p6) }
 0x134   : > { %840 = vst [vmem:[%s1381_s12 + $0x68] sm:$0xff] %v808_v42  ;;  %856 = vst [vmem:[%s1381_s12 + $0xe8] sm:$0xff] %v824_v43  ;;  %v810_v47 = vadd.f32 %v1375_v49, %v641_v40  ;;  %v826_v48 = vadd.f32 %v1375_v49, %v681_v41  ;;  %v886_v49 = vld [vmem:[%s1381_s12 + $0x8] sm:$0xff] (%p1281_p6)  ;;  %v904_v58 = vld [vmem:[%s1381_s12 + $0x50] sm:$0xff] (%p1281_p6) }
 0x135   : > { %841 = vst [vmem:[%s1381_s12 + $0x70] sm:$0xff] %v809_v44  ;;  %857 = vst [vmem:[%s1381_s12 + $0xf0] sm:$0xff] %v825_v45  ;;  %v906_v59 = vld [vmem:[%s1381_s12 + $0x58] sm:$0xff] (%p1281_p6)  ;;  %v932_v8 = vld [vmem:[%s1381_s12 + $0xc0] sm:$0xff] (%p1281_p6) }
 0x136   : > { %842 = vst [vmem:[%s1381_s12 + $0x78] sm:$0xff] %v810_v47  ;;  %858 = vst [vmem:[%s1381_s12 + $0xf8] sm:$0xff] %v826_v48  ;;  %v934_v9 = vld [vmem:[%s1381_s12 + $0xc8] sm:$0xff] (%p1281_p6)  ;;  %v936_v10 = vld [vmem:[%s1381_s12 + $0xd0] sm:$0xff] (%p1281_p6) }
 0x137   : > { %885 = vst [vmem:[%s1452_s11] sm:$0xff] %v884_v46  ;;  %887 = vst [vmem:[%s1452_s11 + $0x8] sm:$0xff] %v886_v49  ;;  %v938_v11 = vld [vmem:[%s1381_s12 + $0xd8] sm:$0xff] }
 0x138   : > { %901 = vst [vmem:[%s1452_s11 + $0x80] sm:$0xff] %v900_v56  ;;  %903 = vst [vmem:[%s1452_s11 + $0x88] sm:$0xff] %v902_v57 }
 0x139   : > { %905 = vst [vmem:[%s1452_s11 + $0xa0] sm:$0xff] %v904_v58  ;;  %907 = vst [vmem:[%s1452_s11 + $0xa8] sm:$0xff] %v906_v59 }
 0x13a   : > { %v908_v60 = vld [vmem:[%s1381_s12 + $0x60] sm:$0xff]  ;;  %933 = vst [vmem:[%s1452_s11 + $0x180] sm:$0xff] %v932_v8  ;;  %935 = vst [vmem:[%s1452_s11 + $0x188] sm:$0xff] %v934_v9 }
 0x13b   : > { %v910_v61 = vld [vmem:[%s1381_s12 + $0x68] sm:$0xff]  ;;  %909 = vst [vmem:[%s1452_s11 + $0xc0] sm:$0xff] %v908_v60  ;;  %937 = vst [vmem:[%s1452_s11 + $0x1a0] sm:$0xff] %v936_v10  ;;  %v940_v12 = vld [vmem:[%s1381_s12 + $0xe0] sm:$0xff] }
 0x13c   : > { %v912_v62 = vld [vmem:[%s1381_s12 + $0x70] sm:$0xff]  ;;  %911 = vst [vmem:[%s1452_s11 + $0xc8] sm:$0xff] %v910_v61  ;;  %v942_v13 = vld [vmem:[%s1381_s12 + $0xe8] sm:$0xff]  ;;  %939 = vst [vmem:[%s1452_s11 + $0x1a8] sm:$0xff] %v938_v11 }
 0x13d   : > { %913 = vst [vmem:[%s1452_s11 + $0xe0] sm:$0xff] %v912_v62  ;;  %v914_v63 = vld [vmem:[%s1381_s12 + $0x78] sm:$0xff]  ;;  %941 = vst [vmem:[%s1452_s11 + $0x1c0] sm:$0xff] %v940_v12  ;;  %v944_v14 = vld [vmem:[%s1381_s12 + $0xf0] sm:$0xff] }
 0x13e   : > { %915 = vst [vmem:[%s1452_s11 + $0xe8] sm:$0xff] %v914_v63  ;;  %943 = vst [vmem:[%s1452_s11 + $0x1c8] sm:$0xff] %v942_v13  ;;  %v946_v15 = vld [vmem:[%s1381_s12 + $0xf8] sm:$0xff] }
 0x13f   : > { %945 = vst [vmem:[%s1452_s11 + $0x1e0] sm:$0xff] %v944_v14  ;;  %947 = vst [vmem:[%s1452_s11 + $0x1e8] sm:$0xff] %v946_v15 }
 0x140 PF: > { %s13_s16 = sadd.s32 1, %s1223_s16   ;;  %s1535_s12 = smov %s1211_s13 }
 0x141   : > { %p10_p12 = scmp.ge.s32.totalorder %s13_s16, 4   ;;  %s1536_s13 = smov %s1286_s22 }
 0x142   : > { %s1537_s14 = smov %s1219_s15  ;;  %s1538_s15 = smov %s1540_s17 }
 0x143   :  { %12 = sbr.rel (!%p10_p12) target bundleno = 3 (0x3), region = 142 }

// kernel: unet_forward.50
= control target key start
LH: loop header
LB: loop body
LE: loop exit
PB: predicated region body
PF: predicated region fallthrough
CT: control target
= control target key end

     0   :  { %s1516_s12 = smov 0   ;;  %s1518_s13 = smov 0   ;;  %s1946_s0 = inlined_call_operand.vmem [shape: bf16[128,2304], index: 0, kind: input, shape index: {}]   ;;  %s1947_s1 = inlined_call_operand.vmem [shape: bf16[2304,128], index: 1, kind: input, shape index: {}]   ;;  %s1948_s2 = inlined_call_operand.vmem [shape: f32[1,128], index: 2, kind: input, shape index: {}]   ;;  %s1949_s3 = inlined_call_operand.vmem [shape: f32[128,128], index: 3, kind: output, shape index: {}]  }
   0x1   :  { %s1520_s14 = smov 0   ;;  %s1522_s15 = smov 0  }
   0x2   :  { %s1524_s16 = smov 0  }
   0x3 LB: > { %s25_s17 = sadd.s32 1, %s1489_s15  ;;  %p48_p1 = scmp.ne.s32.totalorder %s1481_s13, %s1477_s12  ;;  %s1493_s16 = sphi %s1524_s16, %s13_s16   ;;  %s1489_s15 = sphi %s1522_s15, %s1953_s15   ;;  %s1485_s14 = sphi %s1520_s14, %s1952_s14   ;;  %s1481_s13 = sphi %s1518_s13, %s1951_s13   ;;  %s1477_s12 = sphi %s1516_s12, %s1950_s12  }
   0x4   : > { %p26_p0 = scmp.ge.s32.totalorder %s25_s17, 6  ;;  %p49_p2 = scmp.eq.s32.totalorder %s1493_s16, 0 }
   0x5   : > { %s41_s19 = sadd.s32 1, %s1481_s13  ;;  %p1152_p5 = scmp.ge.s32.totalorder %s1493_s16, 6 }
   0x6   : > { %s1955_s17 = smov (%p26_p0, %s25_s17), 0  ;;  %p50_p3 = por %p49_p2, %p48_p1 }
   0x7   : > { %s37_s18 = ssub.s32 %s1489_s15, %s1955_s17  ;;  %162 = sbr.rel (%p1152_p5) target bundleno = 37 (0x25), region = 20 }
   0x8   : > { %p39_p4 = scmp.eq.s32.totalorder %s37_s18, 0 }
   0xa   : > { %s1551_s20 = scalar_select %p39_p4, %s1481_s13, %s41_s19  }
   0xe   : > { %165 = sbr.rel (!%p50_p3) target bundleno = 37 (0x25), region = 24  ;;  %s167_s21 = sand.u32 (%p50_p3), 1, %s1481_s13  }
   0xf   : > { %s1243_s22 = smul.u32 (%p50_p3), 12, %s1489_s15 }
  0x10   : > { %s1356_s23 = smul.u32 (%p50_p3), 192, %s167_s21 }
  0x11   : > { %s1559_s26 = scalar_lea.vmem (%p50_p3), %s1946_s0, %s1243_s22 }
  0x12   : > { %v190_v0 = vld [vmem:[%s1559_s26] sm:$0xff] (%p50_p3)  ;;  %v192_v1 = vld [vmem:[%s1559_s26 + $0x48] sm:$0xff] (%p50_p3)  ;;  %v194_v2 = vld [vmem:[%s1559_s26 + $0x90] sm:$0xff] (%p50_p3)  ;;  %s1564_s27 = scalar_lea.vmem (%p50_p3), [#allocation2], %s1356_s23 }
  0x13   : > { %191 = vst [vmem:[%s1564_s27] sm:$0xff] (%p50_p3), %v190_v0  ;;  %193 = vst [vmem:[%s1564_s27 + $0xc] sm:$0xff] (%p50_p3), %v192_v1  ;;  %v196_v3 = vld [vmem:[%s1559_s26 + $0xd8] sm:$0xff] (%p50_p3)  ;;  %v198_v4 = vld [vmem:[%s1559_s26 + $0x120] sm:$0xff] (%p50_p3) }
  0x14   : > { %195 = vst [vmem:[%s1564_s27 + $0x18] sm:$0xff] (%p50_p3), %v194_v2  ;;  %v200_v5 = vld [vmem:[%s1559_s26 + $0x168] sm:$0xff] (%p50_p3)  ;;  %197 = vst [vmem:[%s1564_s27 + $0x24] sm:$0xff] (%p50_p3), %v196_v3  ;;  %v202_v6 = vld [vmem:[%s1559_s26 + $0x1b0] sm:$0xff] (%p50_p3) }
  0x15   : > { %199 = vst [vmem:[%s1564_s27 + $0x30] sm:$0xff] %v198_v4  ;;  %201 = vst [vmem:[%s1564_s27 + $0x3c] sm:$0xff] %v200_v5  ;;  %v204_v7 = vld [vmem:[%s1559_s26 + $0x1f8] sm:$0xff]  ;;  %v206_v8 = vld [vmem:[%s1559_s26 + $0x240] sm:$0xff] }
  0x16   : > { %203 = vst [vmem:[%s1564_s27 + $0x48] sm:$0xff] %v202_v6  ;;  %205 = vst [vmem:[%s1564_s27 + $0x54] sm:$0xff] %v204_v7  ;;  %v208_v9 = vld [vmem:[%s1559_s26 + $0x288] sm:$0xff]  ;;  %v210_v10 = vld [vmem:[%s1559_s26 + $0x2d0] sm:$0xff] }
  0x17   : > { %207 = vst [vmem:[%s1564_s27 + $0x60] sm:$0xff] %v206_v8  ;;  %v212_v11 = vld [vmem:[%s1559_s26 + $0x318] sm:$0xff]  ;;  %209 = vst [vmem:[%s1564_s27 + $0x6c] sm:$0xff] %v208_v9  ;;  %v214_v12 = vld [vmem:[%s1559_s26 + $0x360] sm:$0xff] }
  0x18   : > { %211 = vst [vmem:[%s1564_s27 + $0x78] sm:$0xff] %v210_v10  ;;  %213 = vst [vmem:[%s1564_s27 + $0x84] sm:$0xff] %v212_v11  ;;  %v216_v13 = vld [vmem:[%s1559_s26 + $0x3a8] sm:$0xff]  ;;  %v218_v14 = vld [vmem:[%s1559_s26 + $0x3f0] sm:$0xff] }
  0x19   : > { %215 = vst [vmem:[%s1564_s27 + $0x90] sm:$0xff] %v214_v12  ;;  %217 = vst [vmem:[%s1564_s27 + $0x9c] sm:$0xff] %v216_v13  ;;  %v220_v15 = vld [vmem:[%s1559_s26 + $0x438] sm:$0xff]  ;;  %v1154_v16 = vld [vmem:[%s1559_s26 + $0x8] sm:$0xf] }
  0x1a   : > { %219 = vst [vmem:[%s1564_s27 + $0xa8] sm:$0xff] %v218_v14  ;;  %v1156_v17 = vld [vmem:[%s1559_s26 + $0x50] sm:$0xf]  ;;  %221 = vst [vmem:[%s1564_s27 + $0xb4] sm:$0xff] %v220_v15  ;;  %v1158_v18 = vld [vmem:[%s1559_s26 + $0x98] sm:$0xf] }
  0x1b   : > { %1155 = vst [vmem:[%s1564_s27 + $0x8] sm:$0xf] %v1154_v16  ;;  %1157 = vst [vmem:[%s1564_s27 + $0x14] sm:$0xf] %v1156_v17  ;;  %v1160_v19 = vld [vmem:[%s1559_s26 + $0xe0] sm:$0xf] }
  0x1c   : > { %v1162_v20 = vld [vmem:[%s1559_s26 + $0x128] sm:$0xf]  ;;  %1159 = vst [vmem:[%s1564_s27 + $0x20] sm:$0xf] %v1158_v18  ;;  %1161 = vst [vmem:[%s1564_s27 + $0x2c] sm:$0xf] %v1160_v19 }
  0x1d   : > { %1163 = vst [vmem:[%s1564_s27 + $0x38] sm:$0xf] %v1162_v20  ;;  %v1164_v21 = vld [vmem:[%s1559_s26 + $0x170] sm:$0xf]  ;;  %v1166_v22 = vld [vmem:[%s1559_s26 + $0x1b8] sm:$0xf] }
  0x1e   : > { %v1168_v23 = vld [vmem:[%s1559_s26 + $0x200] sm:$0xf]  ;;  %1165 = vst [vmem:[%s1564_s27 + $0x44] sm:$0xf] %v1164_v21  ;;  %1167 = vst [vmem:[%s1564_s27 + $0x50] sm:$0xf] %v1166_v22 }
  0x1f   : > { %1169 = vst [vmem:[%s1564_s27 + $0x5c] sm:$0xf] %v1168_v23  ;;  %v1170_v24 = vld [vmem:[%s1559_s26 + $0x248] sm:$0xf]  ;;  %v1172_v25 = vld [vmem:[%s1559_s26 + $0x290] sm:$0xf] }
  0x20   : > { %v1174_v26 = vld [vmem:[%s1559_s26 + $0x2d8] sm:$0xf]  ;;  %1171 = vst [vmem:[%s1564_s27 + $0x68] sm:$0xf] %v1170_v24  ;;  %1173 = vst [vmem:[%s1564_s27 + $0x74] sm:$0xf] %v1172_v25 }
  0x21   : > { %1175 = vst [vmem:[%s1564_s27 + $0x80] sm:$0xf] %v1174_v26  ;;  %v1176_v27 = vld [vmem:[%s1559_s26 + $0x320] sm:$0xf]  ;;  %v1178_v28 = vld [vmem:[%s1559_s26 + $0x368] sm:$0xf] }
  0x22   : > { %v1180_v29 = vld [vmem:[%s1559_s26 + $0x3b0] sm:$0xf]  ;;  %1177 = vst [vmem:[%s1564_s27 + $0x8c] sm:$0xf] %v1176_v27  ;;  %1179 = vst [vmem:[%s1564_s27 + $0x98] sm:$0xf] %v1178_v28 }
  0x23   : > { %1181 = vst [vmem:[%s1564_s27 + $0xa4] sm:$0xf] %v1180_v29  ;;  %v1182_v30 = vld [vmem:[%s1559_s26 + $0x3f8] sm:$0xf]  ;;  %v1184_v31 = vld [vmem:[%s1559_s26 + $0x440] sm:$0xf] }
  0x24   : > { %1183 = vst [vmem:[%s1564_s27 + $0xb0] sm:$0xf] %v1182_v30  ;;  %1185 = vst [vmem:[%s1564_s27 + $0xbc] sm:$0xf] %v1184_v31 }
  0x25 PF: > { %p1186_p6 = scmp.ge.s32.totalorder %s1493_s16, 1  ;;  %p277_p7 = scmp.lt.s32.totalorder %s1493_s16, 7 }
  0x27   : > { %p278_p8 = pnand %p1186_p6, %p277_p7 }
  0x28   : > { %s284_s28 = sand.u32 (!%p278_p8), 1, %s1477_s12   ;;  %s323_s29 = smul.u32 (!%p278_p8), 48, %s1485_s14 }
  0x29   : > { %281 = sbr.rel (%p278_p8) target bundleno = 381 (0x17d), region = 54  ;;  %p1188_p10 = scmp.ne.s32.totalorder (!%p278_p8), %s1485_s14, 0 }
  0x2a   : > { %s1357_s30 = smul.u32 (!%p278_p8), 192, %s284_s28  ;;  %p324_p9 = scmp.lt.s32.totalorder (!%p278_p8), %s323_s29, 287 }
  0x2c   : > { %s1636_s8 = scalar_lea.vmem (!%p278_p8), [#allocation2], %s1357_s30 }
  0x30   : > { %s1957_s29 = smov (!%p324_p9, %s323_s29), 287  ;;  %348 = sbr.rel (%p1188_p10) target bundleno = 58 (0x3a), region = 62 }
  0x31   : > { %s1187_s4 = sshll.u32 %s1957_s29, 2  ;;  %v1495_v32 = vmov (!%p1188_p10), 0.0  }
  0x32   : > { %s1634_s7 = scalar_lea.vmem %s1947_s1, %s1187_s4  ;;  %349 = vst [vmem:[%s1949_s3] sm:$0xff] (!%p1188_p10), %v1495_v32  ;;  %350 = vst [vmem:[%s1949_s3 + $0x8] sm:$0xff] (!%p1188_p10), %v1495_v32 }
  0x33   : > { %351 = vst [vmem:[%s1949_s3 + $0x10] sm:$0xff] (!%p1188_p10), %v1495_v32  ;;  %352 = vst [vmem:[%s1949_s3 + $0x18] sm:$0xff] (!%p1188_p10), %v1495_v32 }
  0x34   : > { %353 = vst [vmem:[%s1949_s3 + $0x20] sm:$0xff] (!%p1188_p10), %v1495_v32  ;;  %354 = vst [vmem:[%s1949_s3 + $0x28] sm:$0xff] (!%p1188_p10), %v1495_v32 }
  0x35   : > { %355 = vst [vmem:[%s1949_s3 + $0x30] sm:$0xff] (!%p1188_p10), %v1495_v32  ;;  %356 = vst [vmem:[%s1949_s3 + $0x38] sm:$0xff] (!%p1188_p10), %v1495_v32 }
  0x36   : > { %357 = vst [vmem:[%s1949_s3 + $0x40] sm:$0xff] (!%p1188_p10), %v1495_v32  ;;  %358 = vst [vmem:[%s1949_s3 + $0x48] sm:$0xff] (!%p1188_p10), %v1495_v32 }
  0x37   : > { %359 = vst [vmem:[%s1949_s3 + $0x50] sm:$0xff] %v1495_v32  ;;  %360 = vst [vmem:[%s1949_s3 + $0x58] sm:$0xff] %v1495_v32 }
  0x38   : > { %361 = vst [vmem:[%s1949_s3 + $0x60] sm:$0xff] %v1495_v32  ;;  %362 = vst [vmem:[%s1949_s3 + $0x68] sm:$0xff] %v1495_v32 }
  0x39   : > { %363 = vst [vmem:[%s1949_s3 + $0x70] sm:$0xff] %v1495_v32  ;;  %364 = vst [vmem:[%s1949_s3 + $0x78] sm:$0xff] %v1495_v32 }
  0x3a PF: > { %v1399_v33 = vld [vmem:[%s1634_s7 + $0x40] sm:$0xff]   ;;  %v1402_v36 = vld [vmem:[%s1634_s7 + $0x48] sm:$0xff]   ;;  %v1405_v39 = vld [vmem:[%s1634_s7 + $0x50] sm:$0xff]   ;;  %p1237_p11 = scmp.ne.s32.totalorder %s1485_s14, 5 }
  0x3b   : > { %v1400_v34 = vld [vmem:[%s1634_s7] sm:$0xff]   ;;  %1244 = vmatprep.subr.bf16.mxu0 %v1399_v33  ;;  %v1403_v37 = vld [vmem:[%s1634_s7 + $0x8] sm:$0xff]   ;;  %v1406_v40 = vld [vmem:[%s1634_s7 + $0x10] sm:$0xff]  }
  0x3c   : > { %v1401_v35 = vld [vmem:[%s1634_s7 + $0x80] sm:$0xff]   ;;  %1245 = vmatpush3.bf16.msra.mxu0 %v1400_v34  ;;  %v1404_v38 = vld [vmem:[%s1634_s7 + $0x88] sm:$0xff]   ;;  %v1407_v41 = vld [vmem:[%s1634_s7 + $0x90] sm:$0xff]  }
  0x3d   : > { %1324 = vmatprep.subr.bf16.mxu1 %v1401_v35  ;;  %1246 = vmatprep.subr.bf16.mxu0 %v1402_v36  ;;  %v1408_v42 = vld [vmem:[%s1634_s7 + $0x58] sm:$0xff]   ;;  %v1411_v45 = vld [vmem:[%s1634_s7 + $0x60] sm:$0xff]   ;;  %v1414_v48 = vld [vmem:[%s1634_s7 + $0x68] sm:$0xff]  }
  0x3e   : > { %1325 = vmatpush3.bf16.msra.mxu1 %v1401_v35  ;;  %v1409_v43 = vld [vmem:[%s1634_s7 + $0x18] sm:$0xff]   ;;  %v1413_v46 = vld [vmem:[%s1634_s7 + $0xa0] sm:$0xff]   ;;  %v1416_v49 = vld [vmem:[%s1634_s7 + $0xa8] sm:$0xff]  }
  0x3f   : > { %1326 = vmatprep.subr.bf16.mxu1 %v1404_v38  ;;  %v1410_v44 = vld [vmem:[%s1634_s7 + $0x98] sm:$0xff]   ;;  %v1412_v47 = vld [vmem:[%s1634_s7 + $0x20] sm:$0xff]   ;;  %v1415_v50 = vld [vmem:[%s1634_s7 + $0x28] sm:$0xff]  }
  0x40   : > { %1247 = vmatpush3.bf16.msra.mxu0 %v1403_v37  ;;  %v1417_v51 = vld [vmem:[%s1634_s7 + $0x70] sm:$0xff]   ;;  %v1420_v54 = vld [vmem:[%s1634_s7 + $0x78] sm:$0xff]   ;;  %v1423_v59 = vld [vmem:[%s1636_s8] ss:$12 sps:$4 sm:$0xff]  }
  0x41   : > { %1248 = vmatprep.subr.bf16.mxu0 %v1405_v39  ;;  %v1418_v52 = vld [vmem:[%s1634_s7 + $0x30] sm:$0xff]   ;;  %v1422_v55 = vld [vmem:[%s1634_s7 + $0xb8] sm:$0xff]   ;;  %v1427_v61 = vld [vmem:[%s1636_s8 + $0x20] ss:$12 sps:$4 sm:$0xff]  }
  0x42   : > { %1327 = vmatpush3.bf16.msra.mxu1 %v1404_v38  ;;  %v1419_v53 = vld [vmem:[%s1634_s7 + $0xb0] sm:$0xff]   ;;  %v1421_v58 = vld [vmem:[%s1634_s7 + $0x38] sm:$0xff]   ;;  %v1443_v5 = vld [vmem:[%s1636_s8 + $0x80] ss:$12 sps:$4 sm:$0xff]  }
  0x43   : > { %1328 = vmatprep.subr.bf16.mxu1 %v1407_v41  ;;  %v1425_v56 = vld [vmem:[%s1636_s8 + $0x4] ss:$12 sps:$4 sm:$0xff]   ;;  %v1426_v57 = vld [vmem:[%s1636_s8 + $0x8] ss:$12 sps:$4 sm:$0xff]   ;;  %v1436_v4 = vld [vmem:[%s1636_s8 + $0x4c] ss:$12 sps:$4 sm:$0xff]  }
  0x44   : > { %1249 = vmatpush3.bf16.msra.mxu0 %v1406_v40  ;;  %765 = vmatprep.mubr.bf16.mxu0 %v1425_v56  ;;  %v1428_v60 = vld [vmem:[%s1636_s8 + $0x1c] ss:$12 sps:$4 sm:$0xff]   ;;  %v1434_v62 = vld [vmem:[%s1636_s8 + $0x38] ss:$12 sps:$4 sm:$0xff]   ;;  %v1431_v0 = vld [vmem:[%s1636_s8 + $0x34] ss:$12 sps:$4 sm:$0xff]  }
  0x45   : > { %1250 = vmatprep.subr.bf16.mxu0 %v1408_v42  ;;  %1340 = vmatprep.mubr.bf16.mxu1 %v1426_v57  ;;  %v1430_v63 = vld [vmem:[%s1636_s8 + $0x18] ss:$12 sps:$4 sm:$0xff]   ;;  %v1435_v1 = vld [vmem:[%s1636_s8 + $0x50] ss:$12 sps:$4 sm:$0xff]   ;;  %v1442_v2 = vld [vmem:[%s1636_s8 + $0x68] ss:$12 sps:$4 sm:$0xff]  }
  0x46   : > { %1329 = vmatpush3.bf16.msra.mxu1 %v1407_v41  ;;  %v1433_v3 = vld [vmem:[%s1636_s8 + $0x30] ss:$12 sps:$4 sm:$0xff]   ;;  %v1450_v6 = vld [vmem:[%s1636_s8 + $0x98] ss:$12 sps:$4 sm:$0xff]   ;;  %v1438_v7 = vld [vmem:[%s1636_s8 + $0x48] ss:$12 sps:$4 sm:$0xff]  }
  0x47   : > { %1330 = vmatprep.subr.bf16.mxu1 %v1410_v44  ;;  %v1439_v8 = vld [vmem:[%s1636_s8 + $0x64] ss:$12 sps:$4 sm:$0xff]   ;;  %v1441_v10 = vld [vmem:[%s1636_s8 + $0x60] ss:$12 sps:$4 sm:$0xff]   ;;  %v1444_v11 = vld [vmem:[%s1636_s8 + $0x7c] ss:$12 sps:$4 sm:$0xff]  }
  0x48   : > { %1251 = vmatpush3.bf16.msra.mxu0 %v1409_v43  ;;  %v1451_v9 = vld [vmem:[%s1636_s8 + $0xb0] ss:$12 sps:$4 sm:$0xff]   ;;  %v1446_v12 = vld [vmem:[%s1636_s8 + $0x78] ss:$12 sps:$4 sm:$0xff]   ;;  %v1447_v13 = vld [vmem:[%s1636_s8 + $0x94] ss:$12 sps:$4 sm:$0xff]  }
  0x49   : > { %1252 = vmatprep.subr.bf16.mxu0 %v1411_v45  ;;  %v1449_v14 = vld [vmem:[%s1636_s8 + $0x90] ss:$12 sps:$4 sm:$0xff]   ;;  %v1452_v15 = vld [vmem:[%s1636_s8 + $0xac] ss:$12 sps:$4 sm:$0xff]   ;;  %v1454_v16 = vld [vmem:[%s1636_s8 + $0xa8] ss:$12 sps:$4 sm:$0xff]  }
  0x4a   : > { %1331 = vmatpush3.bf16.msra.mxu1 %v1410_v44  ;;  %v365_v23 = vld [vmem:[%s1949_s3] sm:$0xff]  ;;  %v366_v28 = vld [vmem:[%s1949_s3 + $0x8] sm:$0xff]  ;;  %v367_v38 = vld [vmem:[%s1949_s3 + $0x10] sm:$0xff] }
  0x4b   : > { %1332 = vmatprep.subr.bf16.mxu1 %v1413_v46  ;;  %v368_v44 = vld [vmem:[%s1949_s3 + $0x18] sm:$0xff] }
  0x4c   : > { %1253 = vmatpush3.bf16.msra.mxu0 %v1412_v47 }
  0x4d   : > { %1254 = vmatprep.subr.bf16.mxu0 %v1414_v48 }
  0x4e   : > { %1333 = vmatpush3.bf16.msra.mxu1 %v1413_v46 }
  0x4f   : > { %1334 = vmatprep.subr.bf16.mxu1 %v1416_v49 }
  0x50   : > { %1255 = vmatpush3.bf16.msra.mxu0 %v1415_v50 }
  0x51   : > { %1256 = vmatprep.subr.bf16.mxu0 %v1417_v51 }
  0x52   : > { %1335 = vmatpush3.bf16.msra.mxu1 %v1416_v49 }
  0x53   : > { %1336 = vmatprep.subr.bf16.mxu1 %v1419_v53 }
  0x54   : > { %1257 = vmatpush3.bf16.msra.mxu0 %v1418_v52 }
  0x55   : > { %1258 = vmatprep.subr.bf16.mxu0 %v1420_v54 }
  0x56   : > { %1337 = vmatpush3.bf16.msra.mxu1 %v1419_v53 }
  0x57   : > { %1338 = vmatprep.subr.bf16.mxu1 %v1422_v55 }
  0x58   : > { %1259 = vmatpush3.bf16.msra.mxu0 %v1421_v58 }
  0x5a   : > { %1339 = vmatpush3.bf16.msra.mxu1 %v1422_v55  ;;  %v369_v55 = vld [vmem:[%s1949_s3 + $0x20] sm:$0xff] }
  0x5b   : > { %766 = vmatmul.mubr.bf16.vlgmr.msra.gmra.mrb[0].mxu0 %v1423_v59 }
  0x5c   : > { %773 = vmatprep.mubr.bf16.mxu0 %v1428_v60  ;;  %v370_v60 = vld [vmem:[%s1949_s3 + $0x28] sm:$0xff] }
  0x5d   : > { %1341 = vmatmul.mubr.bf16.vlgmr.msra.gmra.mrb[0].mxu1 %v1427_v61 }
  0x5e   : > { %1344 = vmatprep.mubr.bf16.mxu1 %v1434_v62 }
  0x63   : > { %774 = vmatmul.mubr.bf16.gmra.mrb[4].mxu0 %v1430_v63 }
  0x64   : > { %781 = vmatprep.mubr.bf16.mxu0 %v1431_v0 }
  0x65   : > { %1345 = vmatmul.mubr.bf16.gmra.mrb[4].mxu1 %v1435_v1 }
  0x66   : > { %1348 = vmatprep.mubr.bf16.mxu1 %v1442_v2 }
  0x6b   : > { %782 = vmatmul.mubr.bf16.gmra.mrb[8].mxu0 %v1433_v3 }
  0x6c   : > { %789 = vmatprep.mubr.bf16.mxu0 %v1436_v4 }
  0x6d   : > { %1349 = vmatmul.mubr.bf16.gmra.mrb[8].mxu1 %v1443_v5 }
  0x6e   : > { %1352 = vmatprep.mubr.bf16.mxu1 %v1450_v6  ;;  %v371_v6 = vld [vmem:[%s1949_s3 + $0x30] sm:$0xff] }
  0x73   : > { %790 = vmatmul.mubr.bf16.gmra.mrb[12].mxu0 %v1438_v7 }
  0x74   : > { %797 = vmatprep.mubr.bf16.mxu0 %v1439_v8 }
  0x75   : > { %1353 = vmatmul.mubr.bf16.gmra.mrb[12].mxu1 %v1451_v9 }
  0x7b   : > { %798 = vmatmul.mubr.bf16.gmra.mrb[16].mxu0 %v1441_v10 }
  0x7c   : > { %805 = vmatprep.mubr.bf16.mxu0 %v1444_v11 }
  0x83   : > { %806 = vmatmul.mubr.bf16.gmra.mrb[20].mxu0 %v1446_v12  ;;  %v372_v12 = vld [vmem:[%s1949_s3 + $0x38] sm:$0xff] }
  0x84   : > { %813 = vmatprep.mubr.bf16.mxu0 %v1447_v13 }
  0x8b   : > { %814 = vmatmul.mubr.bf16.gmra.mrb[24].mxu0 %v1449_v14 }
  0x8c   : > { %821 = vmatprep.mubr.bf16.mxu0 %v1452_v15 }
  0x93   : > { %822 = vmatmul.mubr.bf16.gmra.mrb[28].mxu0 %v1454_v16 }
 0x12e   : > { %v1260_v17 = vpop.f32.mrb[0].mxu0 }
 0x12f   : > { %v1261_v18 = vpop.f32.mrb[1].mxu0 }
 0x130   : > { %v1262_v19 = vadd.f32 %v1261_v18, %v1260_v17  ;;  %v1263_v20 = vpop.f32.mrb[2].mxu0  ;;  %v1342_v21 = vpop.f32.mrb[0].mxu1 }
 0x131   : > { %v1264_v22 = vpop.f32.mrb[3].mxu0  ;;  %v864_v24 = vpop.f32.mrb[1].mxu1 }
 0x132   : > { %v1265_v25 = vadd.f32 %v1264_v22, %v1263_v20  ;;  %v865_v26 = vadd.f32 %v1262_v19, %v864_v24  ;;  %v1343_v27 = vpop.f32.mrb[2].mxu1  ;;  %v373_v22 = vld [vmem:[%s1949_s3 + $0x40] sm:$0xff] }
 0x133   : > { %v867_v29 = vpop.f32.mrb[3].mxu1 }
 0x134   : > { %v927_v30 = vadd.f32 %v865_v26, %v365_v23  ;;  %v868_v31 = vadd.f32 %v1265_v25, %v867_v29  ;;  %v374_v25 = vld [vmem:[%s1949_s3 + $0x48] sm:$0xff] }
 0x136   : > { %943 = vst [vmem:[%s1949_s3] sm:$0xff] %v927_v30  ;;  %v928_v32 = vadd.f32 %v868_v31, %v366_v28  ;;  %v1266_v33 = vpop.f32.mrb[4].mxu0 }
 0x137   : > { %v1267_v34 = vpop.f32.mrb[5].mxu0 }
 0x138   : > { %944 = vst [vmem:[%s1949_s3 + $0x8] sm:$0xff] %v928_v32  ;;  %v1268_v35 = vadd.f32 %v1267_v34, %v1266_v33  ;;  %v1269_v36 = vpop.f32.mrb[6].mxu0  ;;  %v1346_v37 = vpop.f32.mrb[4].mxu1  ;;  %v375_v33 = vld [vmem:[%s1949_s3 + $0x50] sm:$0xff] }
 0x139   : > { %v1270_v39 = vpop.f32.mrb[7].mxu0  ;;  %v880_v40 = vpop.f32.mrb[5].mxu1 }
 0x13a   : > { %v873_v41 = vadd.f32 %v1342_v21, %v1268_v35  ;;  %v1271_v42 = vadd.f32 %v1270_v39, %v1269_v36  ;;  %v1347_v43 = vpop.f32.mrb[6].mxu1 }
 0x13b   : > { %v883_v45 = vpop.f32.mrb[7].mxu1 }
 0x13c   : > { %v929_v46 = vadd.f32 %v873_v41, %v367_v38  ;;  %v876_v47 = vadd.f32 %v1343_v27, %v1271_v42 }
 0x13e   : > { %945 = vst [vmem:[%s1949_s3 + $0x10] sm:$0xff] %v929_v46  ;;  %v930_v48 = vadd.f32 %v876_v47, %v368_v44  ;;  %v1272_v49 = vpop.f32.mrb[8].mxu0  ;;  %v377_v46 = vld [vmem:[%s1949_s3 + $0x60] sm:$0xff] }
 0x13f   : > { %v1273_v50 = vpop.f32.mrb[9].mxu0 }
 0x140   : > { %946 = vst [vmem:[%s1949_s3 + $0x18] sm:$0xff] %v930_v48  ;;  %v1274_v51 = vadd.f32 %v1273_v50, %v1272_v49  ;;  %v1275_v52 = vpop.f32.mrb[10].mxu0  ;;  %v1350_v53 = vpop.f32.mrb[8].mxu1  ;;  %v378_v49 = vld [vmem:[%s1949_s3 + $0x68] sm:$0xff] }
 0x141   : > { %v1276_v54 = vpop.f32.mrb[11].mxu0  ;;  %v896_v56 = vpop.f32.mrb[9].mxu1 }
 0x142   : > { %v1277_v57 = vadd.f32 %v1276_v54, %v1275_v52  ;;  %v881_v58 = vadd.f32 %v1274_v51, %v880_v40  ;;  %v1351_v59 = vpop.f32.mrb[10].mxu1 }
 0x143   : > { %v899_v61 = vpop.f32.mrb[11].mxu1 }
 0x144   : > { %v931_v62 = vadd.f32 %v881_v58, %v369_v55  ;;  %v884_v63 = vadd.f32 %v1277_v57, %v883_v45  ;;  %v379_v57 = vld [vmem:[%s1949_s3 + $0x70] sm:$0xff] }
 0x146   : > { %947 = vst [vmem:[%s1949_s3 + $0x20] sm:$0xff] %v931_v62  ;;  %v932_v0 = vadd.f32 %v884_v63, %v370_v60  ;;  %v1278_v1 = vpop.f32.mrb[12].mxu0 }
 0x147   : > { %v1279_v2 = vpop.f32.mrb[13].mxu0 }
 0x148   : > { %948 = vst [vmem:[%s1949_s3 + $0x28] sm:$0xff] %v932_v0  ;;  %v1280_v3 = vadd.f32 %v1279_v2, %v1278_v1  ;;  %v1281_v4 = vpop.f32.mrb[14].mxu0  ;;  %v1354_v5 = vpop.f32.mrb[12].mxu1  ;;  %v963_v1 = vld [vmem:[%s1949_s3] sm:$0xff] (!%p1237_p11) }
 0x149   : > { %v1282_v7 = vpop.f32.mrb[15].mxu0  ;;  %v912_v8 = vpop.f32.mrb[13].mxu1  ;;  %v1238_v2 = vld [vmem:[%s1948_s2] ss:$0 sm:$0xff] (!%p1237_p11) }
 0x14a   : > { %v889_v9 = vadd.f32 %v1346_v37, %v1280_v3  ;;  %v1283_v10 = vadd.f32 %v1282_v7, %v1281_v4  ;;  %v1355_v11 = vpop.f32.mrb[14].mxu1  ;;  %v376_v37 = vld [vmem:[%s1949_s3 + $0x58] sm:$0xff]  ;;  %v964_v3 = vld [vmem:[%s1949_s3 + $0x8] sm:$0xff] (!%p1237_p11)  ;;  %v986_v4 = vadd.f32 (!%p1237_p11), %v1238_v2, %v963_v1 }
 0x14b   : > { %v915_v13 = vpop.f32.mrb[15].mxu1  ;;  %v966_v7 = vld [vmem:[%s1949_s3 + $0x18] sm:$0xff] (!%p1237_p11) }
 0x14c   : > { %v933_v14 = vadd.f32 %v889_v9, %v371_v6  ;;  %v892_v15 = vadd.f32 %v1347_v43, %v1283_v10  ;;  %v965_v6 = vld [vmem:[%s1949_s3 + $0x10] sm:$0xff] (!%p1237_p11)  ;;  %v989_v10 = vadd.f32 (!%p1237_p11), %v1238_v2, %v966_v7 }
 0x14d   : > { %v988_v9 = vadd.f32 (!%p1237_p11), %v1238_v2, %v965_v6 }
 0x14e   : > { %949 = vst [vmem:[%s1949_s3 + $0x30] sm:$0xff] %v933_v14  ;;  %v934_v16 = vadd.f32 %v892_v15, %v372_v12  ;;  %v1284_v17 = vpop.f32.mrb[16].mxu0  ;;  %v1002_v15 = vmax.f32 (!%p1237_p11), %v986_v4, 0.0 }
 0x14f   : > { %v1285_v18 = vpop.f32.mrb[17].mxu0  ;;  %v968_v12 = vld [vmem:[%s1949_s3 + $0x28] sm:$0xff] (!%p1237_p11) }
 0x150   : > { %950 = vst [vmem:[%s1949_s3 + $0x38] sm:$0xff] %v934_v16  ;;  %v1286_v19 = vadd.f32 %v1285_v18, %v1284_v17  ;;  %v1287_v20 = vpop.f32.mrb[18].mxu0  ;;  %v991_v17 = vadd.f32 (!%p1237_p11), %v1238_v2, %v968_v12  ;;  %1018 = vst [vmem:[%s1949_s3] sm:$0xff] (!%p1237_p11), %v1002_v15 }
 0x151   : > { %v1288_v21 = vpop.f32.mrb[19].mxu0 }
 0x152   : > { %v1289_v23 = vadd.f32 %v1288_v21, %v1287_v20  ;;  %v897_v24 = vadd.f32 %v1286_v19, %v896_v56 }
 0x154   : > { %v935_v26 = vadd.f32 %v897_v24, %v373_v22  ;;  %v900_v27 = vadd.f32 %v1289_v23, %v899_v61  ;;  %v380_v61 = vld [vmem:[%s1949_s3 + $0x78] sm:$0xff]  ;;  %v1004_v22 = vmax.f32 (!%p1237_p11), %v988_v9, 0.0  ;;  %v1005_v23 = vmax.f32 (!%p1237_p11), %v989_v10, 0.0 }
 0x156   : > { %951 = vst [vmem:[%s1949_s3 + $0x40] sm:$0xff] %v935_v26  ;;  %v936_v28 = vadd.f32 %v900_v27, %v374_v25  ;;  %v1290_v29 = vpop.f32.mrb[20].mxu0  ;;  %1020 = vst [vmem:[%s1949_s3 + $0x10] sm:$0xff] (!%p1237_p11), %v1004_v22 }
 0x157   : > { %v1291_v30 = vpop.f32.mrb[21].mxu0  ;;  %v970_v14 = vld [vmem:[%s1949_s3 + $0x38] sm:$0xff] (!%p1237_p11)  ;;  %1021 = vst [vmem:[%s1949_s3 + $0x18] sm:$0xff] (!%p1237_p11), %v1005_v23 }
 0x158   : > { %952 = vst [vmem:[%s1949_s3 + $0x48] sm:$0xff] %v936_v28  ;;  %v1292_v31 = vadd.f32 %v1291_v30, %v1290_v29  ;;  %v1293_v32 = vpop.f32.mrb[22].mxu0  ;;  %v993_v25 = vadd.f32 (!%p1237_p11), %v1238_v2, %v970_v14  ;;  %v1007_v29 = vmax.f32 (!%p1237_p11), %v991_v17, 0.0 }
 0x159   : > { %v1294_v34 = vpop.f32.mrb[23].mxu0 }
 0x15a   : > { %v905_v35 = vadd.f32 %v1350_v53, %v1292_v31  ;;  %v1295_v36 = vadd.f32 %v1294_v34, %v1293_v32  ;;  %1023 = vst [vmem:[%s1949_s3 + $0x28] sm:$0xff] (!%p1237_p11), %v1007_v29 }
 0x15c   : > { %v937_v38 = vadd.f32 %v905_v35, %v375_v33  ;;  %v908_v39 = vadd.f32 %v1351_v59, %v1295_v36  ;;  %v1009_v35 = vmax.f32 (!%p1237_p11), %v993_v25, 0.0 }
 0x15d   : > { %v971_v19 = vld [vmem:[%s1949_s3 + $0x40] sm:$0xff] (!%p1237_p11) }
 0x15e   : > { %953 = vst [vmem:[%s1949_s3 + $0x50] sm:$0xff] %v937_v38  ;;  %v938_v40 = vadd.f32 %v908_v39, %v376_v37  ;;  %v1296_v41 = vpop.f32.mrb[24].mxu0  ;;  %v994_v31 = vadd.f32 (!%p1237_p11), %v1238_v2, %v971_v19  ;;  %1025 = vst [vmem:[%s1949_s3 + $0x38] sm:$0xff] (!%p1237_p11), %v1009_v35 }
 0x15f   : > { %v1297_v42 = vpop.f32.mrb[25].mxu0  ;;  %v972_v20 = vld [vmem:[%s1949_s3 + $0x48] sm:$0xff] (!%p1237_p11) }
 0x160   : > { %954 = vst [vmem:[%s1949_s3 + $0x58] sm:$0xff] %v938_v40  ;;  %v1298_v43 = vadd.f32 %v1297_v42, %v1296_v41  ;;  %v1299_v44 = vpop.f32.mrb[26].mxu0  ;;  %v995_v32 = vadd.f32 (!%p1237_p11), %v1238_v2, %v972_v20  ;;  %v1010_v39 = vmax.f32 (!%p1237_p11), %v994_v31, 0.0 }
 0x161   : > { %v1300_v45 = vpop.f32.mrb[27].mxu0 }
 0x162   : > { %v1301_v47 = vadd.f32 %v1300_v45, %v1299_v44  ;;  %v913_v48 = vadd.f32 %v1298_v43, %v912_v8  ;;  %v967_v8 = vld [vmem:[%s1949_s3 + $0x20] sm:$0xff] (!%p1237_p11)  ;;  %v1011_v40 = vmax.f32 (!%p1237_p11), %v995_v32, 0.0  ;;  %1026 = vst [vmem:[%s1949_s3 + $0x40] sm:$0xff] (!%p1237_p11), %v1010_v39 }
 0x164   : > { %v939_v50 = vadd.f32 %v913_v48, %v377_v46  ;;  %v916_v51 = vadd.f32 %v1301_v47, %v915_v13  ;;  %v969_v13 = vld [vmem:[%s1949_s3 + $0x30] sm:$0xff] (!%p1237_p11)  ;;  %1027 = vst [vmem:[%s1949_s3 + $0x48] sm:$0xff] (!%p1237_p11), %v1011_v40 }
 0x165   : > { %v992_v18 = vadd.f32 (!%p1237_p11), %v1238_v2, %v969_v13  ;;  %v973_v21 = vld [vmem:[%s1949_s3 + $0x50] sm:$0xff] (!%p1237_p11) }
 0x166   : > { %955 = vst [vmem:[%s1949_s3 + $0x60] sm:$0xff] %v939_v50  ;;  %v940_v52 = vadd.f32 %v916_v51, %v378_v49  ;;  %v1302_v53 = vpop.f32.mrb[28].mxu0  ;;  %v996_v36 = vadd.f32 (!%p1237_p11), %v1238_v2, %v973_v21 }
 0x167   : > { %v1303_v54 = vpop.f32.mrb[29].mxu0  ;;  %v974_v26 = vld [vmem:[%s1949_s3 + $0x58] sm:$0xff] (!%p1237_p11)  ;;  %v1008_v30 = vmax.f32 (!%p1237_p11), %v992_v18, 0.0 }
 0x168   : > { %956 = vst [vmem:[%s1949_s3 + $0x68] sm:$0xff] %v940_v52  ;;  %v1304_v55 = vadd.f32 %v1303_v54, %v1302_v53  ;;  %v1305_v56 = vpop.f32.mrb[30].mxu0  ;;  %v997_v37 = vadd.f32 (!%p1237_p11), %v1238_v2, %v974_v26  ;;  %v1012_v43 = vmax.f32 (!%p1237_p11), %v996_v36, 0.0 }
 0x169   : > { %v1306_v58 = vpop.f32.mrb[31].mxu0  ;;  %1024 = vst [vmem:[%s1949_s3 + $0x30] sm:$0xff] (!%p1237_p11), %v1008_v30 }
 0x16a   : > { %v921_v59 = vadd.f32 %v1354_v5, %v1304_v55  ;;  %v1307_v60 = vadd.f32 %v1306_v58, %v1305_v56  ;;  %962 = sbr.rel (%p1237_p11) target bundleno = 381 (0x17d), region = 66  ;;  %v987_v5 = vadd.f32 (!%p1237_p11), %v1238_v2, %v964_v3  ;;  %v1013_v44 = vmax.f32 (!%p1237_p11), %v997_v37, 0.0  ;;  %1028 = vst [vmem:[%s1949_s3 + $0x50] sm:$0xff] (!%p1237_p11), %v1012_v43 }
 0x16c   : > { %v941_v62 = vadd.f32 %v921_v59, %v379_v57  ;;  %v924_v63 = vadd.f32 %v1355_v11, %v1307_v60  ;;  %v990_v11 = vadd.f32 (!%p1237_p11), %v1238_v2, %v967_v8  ;;  %v1003_v16 = vmax.f32 (!%p1237_p11), %v987_v5, 0.0  ;;  %1029 = vst [vmem:[%s1949_s3 + $0x58] sm:$0xff] (!%p1237_p11), %v1013_v44 }
 0x16d   : > { %v975_v27 = vld [vmem:[%s1949_s3 + $0x60] sm:$0xff] (!%p1237_p11) }
 0x16e   : > { %957 = vst [vmem:[%s1949_s3 + $0x70] sm:$0xff] %v941_v62  ;;  %v942_v0 = vadd.f32 %v924_v63, %v380_v61  ;;  %v1006_v24 = vmax.f32 (!%p1237_p11), %v990_v11, 0.0  ;;  %1019 = vst [vmem:[%s1949_s3 + $0x8] sm:$0xff] (!%p1237_p11), %v1003_v16  ;;  %v998_v38 = vadd.f32 (!%p1237_p11), %v1238_v2, %v975_v27 }
 0x16f   : > { %v976_v28 = vld [vmem:[%s1949_s3 + $0x68] sm:$0xff] (!%p1237_p11) }
 0x170   : > { %958 = vst [vmem:[%s1949_s3 + $0x78] sm:$0xff] %v942_v0  ;;  %1022 = vst [vmem:[%s1949_s3 + $0x20] sm:$0xff] (!%p1237_p11), %v1006_v24  ;;  %v999_v41 = vadd.f32 (!%p1237_p11), %v1238_v2, %v976_v28  ;;  %v1014_v45 = vmax.f32 (!%p1237_p11), %v998_v38, 0.0 }
 0x172   : > { %v1015_v47 = vmax.f32 %v999_v41, 0.0  ;;  %1030 = vst [vmem:[%s1949_s3 + $0x60] sm:$0xff] %v1014_v45 }
 0x174   : > { %1031 = vst [vmem:[%s1949_s3 + $0x68] sm:$0xff] %v1015_v47 }
 0x175   : > { %v977_v33 = vld [vmem:[%s1949_s3 + $0x70] sm:$0xff] }
 0x176   : > { %v1000_v42 = vadd.f32 %v1238_v2, %v977_v33 }
 0x177   : > { %v978_v34 = vld [vmem:[%s1949_s3 + $0x78] sm:$0xff] }
 0x178   : > { %v1001_v46 = vadd.f32 %v1238_v2, %v978_v34  ;;  %v1016_v48 = vmax.f32 %v1000_v42, 0.0 }
 0x17a   : > { %v1017_v49 = vmax.f32 %v1001_v46, 0.0  ;;  %1032 = vst [vmem:[%s1949_s3 + $0x70] sm:$0xff] %v1016_v48 }
 0x17c   : > { %1033 = vst [vmem:[%s1949_s3 + $0x78] sm:$0xff] %v1017_v49 }
 0x17d PF: > { %s13_s16 = sadd.s32 1, %s1493_s16   ;;  %s1950_s12 = smov %s1481_s13 }
 0x17e   : > { %p10_p12 = scmp.ge.s32.totalorder %s13_s16, 8   ;;  %s1951_s13 = smov %s1551_s20 }
 0x17f   : > { %s1952_s14 = smov %s1489_s15  ;;  %s1953_s15 = smov %s1955_s17 }
 0x180   :  { %12 = sbr.rel (!%p10_p12) target bundleno = 3 (0x3), region = 113 }

// kernel: unet_forward.53
= control target key start
LH: loop header
LB: loop body
LE: loop exit
PB: predicated region body
PF: predicated region fallthrough
CT: control target
= control target key end

     0   :  { %s2213_s12 = smov 0   ;;  %s2215_s13 = smov 0   ;;  %s2744_s0 = inlined_call_operand.vmem [shape: bf16[512,2304], index: 0, kind: input, shape index: {}]   ;;  %s2745_s1 = inlined_call_operand.vmem [shape: bf16[2304,128], index: 1, kind: input, shape index: {}]   ;;  %s2746_s2 = inlined_call_operand.vmem [shape: f32[1,128], index: 2, kind: input, shape index: {}]   ;;  %s2747_s3 = inlined_call_operand.vmem [shape: f32[512,128], index: 3, kind: output, shape index: {}]  }
   0x1   :  { %s2217_s14 = smov 0   ;;  %s2219_s15 = smov 0  }
   0x2   :  { %s2221_s16 = smov 0   ;;  %s2223_s17 = smov 0  }
   0x3   :  { %s2225_s18 = smov 0  }
   0x4 LB: > { %s25_s19 = sadd.s32 1, %s2182_s16  ;;  %s32_s20 = sadd.s32 1, %s2186_s17  ;;  %s2190_s18 = sphi %s2225_s18, %s13_s18   ;;  %s2186_s17 = sphi %s2223_s17, %s2753_s17   ;;  %s2182_s16 = sphi %s2221_s16, %s2752_s16   ;;  %s2178_s15 = sphi %s2219_s15, %s2751_s15   ;;  %s2174_s14 = sphi %s2217_s14, %s2750_s14   ;;  %s2170_s13 = sphi %s2215_s13, %s2749_s13   ;;  %s2166_s12 = sphi %s2213_s12, %s2748_s12  }
   0x5   : > { %p26_p0 = scmp.ge.s32.totalorder %s25_s19, 6  ;;  %p48_p1 = scmp.ne.s32.totalorder %s2170_s13, %s2166_s12 }
   0x6   : > { %p49_p2 = scmp.eq.s32.totalorder %s2190_s18, 0  ;;  %s41_s24 = sadd.s32 1, %s2170_s13 }
   0x7   : > { %s2755_s19 = smov (%p26_p0, %s25_s19), 0  ;;  %s2757_s20 = smov (!%p26_p0, %s32_s20), %s2186_s17 }
   0x8   : > { %p50_p3 = por %p49_p2, %p48_p1  ;;  %p34_p4 = scmp.ge.s32.totalorder %s2757_s20, 2 }
   0x9   : > { %s37_s21 = ssub.s32 %s2182_s16, %s2755_s19  ;;  %p1639_p6 = scmp.ge.s32.totalorder %s2190_s18, 12 }
   0xa   : > { %s2759_s20 = smov (%p34_p4, %s2757_s20), 0 }
   0xb   : > { %s36_s22 = ssub.s32 %s2186_s17, %s2759_s20  ;;  %162 = sbr.rel (%p1639_p6) target bundleno = 64 (0x40), region = 20 }
   0xc   : > { %s38_s23 = sor.u32 %s37_s21, %s36_s22 }
   0xd   : > { %p39_p5 = scmp.eq.s32.totalorder %s38_s23, 0 }
   0xf   : > { %s2264_s25 = scalar_select %p39_p5, %s2170_s13, %s41_s24  }
  0x12   : > { %165 = sbr.rel (!%p50_p3) target bundleno = 64 (0x40), region = 24  ;;  %s167_s26 = sand.u32 (%p50_p3), 1, %s2170_s13  }
  0x13   : > { %s171_s27 = smul.u32 (%p50_p3), 3, %s2182_s16 }
  0x14   : > { %s1988_s28 = smul.u32 (%p50_p3), 384, %s167_s26 }
  0x15   : > { %s1989_s29 = smul.u32 (%p50_p3), 576, %s2186_s17 }
  0x16   : > { %s2278_s8 = scalar_lea.vmem (%p50_p3), [#allocation2], %s1988_s28 }
  0x17   : > { %s173_s30 = sadd.s32 (%p50_p3), %s1989_s29, %s171_s27 }
  0x18   : > { %s1642_s4 = sshll.u32 (%p50_p3), %s173_s30, 2 }
  0x19   : > { %s2273_s7 = scalar_lea.vmem %s2744_s0, %s1642_s4 }
  0x1a   : > { %v190_v0 = vld [vmem:[%s2273_s7] sm:$0xff]  ;;  %v192_v1 = vld [vmem:[%s2273_s7 + $0x48] sm:$0xff]  ;;  %v194_v2 = vld [vmem:[%s2273_s7 + $0x90] sm:$0xff] }
  0x1b   : > { %191 = vst [vmem:[%s2278_s8] sm:$0xff] %v190_v0  ;;  %193 = vst [vmem:[%s2278_s8 + $0xc] sm:$0xff] %v192_v1  ;;  %v196_v3 = vld [vmem:[%s2273_s7 + $0xd8] sm:$0xff]  ;;  %v198_v4 = vld [vmem:[%s2273_s7 + $0x120] sm:$0xff] }
  0x1c   : > { %195 = vst [vmem:[%s2278_s8 + $0x18] sm:$0xff] %v194_v2  ;;  %v200_v5 = vld [vmem:[%s2273_s7 + $0x168] sm:$0xff]  ;;  %197 = vst [vmem:[%s2278_s8 + $0x24] sm:$0xff] %v196_v3  ;;  %v202_v6 = vld [vmem:[%s2273_s7 + $0x1b0] sm:$0xff] }
  0x1d   : > { %199 = vst [vmem:[%s2278_s8 + $0x30] sm:$0xff] %v198_v4  ;;  %201 = vst [vmem:[%s2278_s8 + $0x3c] sm:$0xff] %v200_v5  ;;  %v204_v7 = vld [vmem:[%s2273_s7 + $0x1f8] sm:$0xff]  ;;  %v206_v8 = vld [vmem:[%s2273_s7 + $0x240] sm:$0xff] }
  0x1e   : > { %203 = vst [vmem:[%s2278_s8 + $0x48] sm:$0xff] %v202_v6  ;;  %205 = vst [vmem:[%s2278_s8 + $0x54] sm:$0xff] %v204_v7  ;;  %v208_v9 = vld [vmem:[%s2273_s7 + $0x288] sm:$0xff]  ;;  %v210_v10 = vld [vmem:[%s2273_s7 + $0x2d0] sm:$0xff] }
  0x1f   : > { %207 = vst [vmem:[%s2278_s8 + $0x60] sm:$0xff] %v206_v8  ;;  %v212_v11 = vld [vmem:[%s2273_s7 + $0x318] sm:$0xff]  ;;  %209 = vst [vmem:[%s2278_s8 + $0x6c] sm:$0xff] %v208_v9  ;;  %v214_v12 = vld [vmem:[%s2273_s7 + $0x360] sm:$0xff] }
  0x20   : > { %211 = vst [vmem:[%s2278_s8 + $0x78] sm:$0xff] %v210_v10  ;;  %213 = vst [vmem:[%s2278_s8 + $0x84] sm:$0xff] %v212_v11  ;;  %v216_v13 = vld [vmem:[%s2273_s7 + $0x3a8] sm:$0xff]  ;;  %v218_v14 = vld [vmem:[%s2273_s7 + $0x3f0] sm:$0xff] }
  0x21   : > { %215 = vst [vmem:[%s2278_s8 + $0x90] sm:$0xff] %v214_v12  ;;  %217 = vst [vmem:[%s2278_s8 + $0x9c] sm:$0xff] %v216_v13  ;;  %v220_v15 = vld [vmem:[%s2273_s7 + $0x438] sm:$0xff]  ;;  %v222_v16 = vld [vmem:[%s2273_s7 + $0x480] sm:$0xff] }
  0x22   : > { %219 = vst [vmem:[%s2278_s8 + $0xa8] sm:$0xff] %v218_v14  ;;  %v224_v17 = vld [vmem:[%s2273_s7 + $0x4c8] sm:$0xff]  ;;  %221 = vst [vmem:[%s2278_s8 + $0xb4] sm:$0xff] %v220_v15  ;;  %v226_v18 = vld [vmem:[%s2273_s7 + $0x510] sm:$0xff] }
  0x23   : > { %223 = vst [vmem:[%s2278_s8 + $0xc0] sm:$0xff] %v222_v16  ;;  %225 = vst [vmem:[%s2278_s8 + $0xcc] sm:$0xff] %v224_v17  ;;  %v228_v19 = vld [vmem:[%s2273_s7 + $0x558] sm:$0xff]  ;;  %v230_v20 = vld [vmem:[%s2273_s7 + $0x5a0] sm:$0xff] }
  0x24   : > { %227 = vst [vmem:[%s2278_s8 + $0xd8] sm:$0xff] %v226_v18  ;;  %229 = vst [vmem:[%s2278_s8 + $0xe4] sm:$0xff] %v228_v19  ;;  %v232_v21 = vld [vmem:[%s2273_s7 + $0x5e8] sm:$0xff]  ;;  %v234_v22 = vld [vmem:[%s2273_s7 + $0x630] sm:$0xff] }
  0x25   : > { %231 = vst [vmem:[%s2278_s8 + $0xf0] sm:$0xff] %v230_v20  ;;  %v236_v23 = vld [vmem:[%s2273_s7 + $0x678] sm:$0xff]  ;;  %233 = vst [vmem:[%s2278_s8 + $0xfc] sm:$0xff] %v232_v21  ;;  %v238_v24 = vld [vmem:[%s2273_s7 + $0x6c0] sm:$0xff] }
  0x26   : > { %235 = vst [vmem:[%s2278_s8 + $0x108] sm:$0xff] %v234_v22  ;;  %237 = vst [vmem:[%s2278_s8 + $0x114] sm:$0xff] %v236_v23  ;;  %v240_v25 = vld [vmem:[%s2273_s7 + $0x708] sm:$0xff]  ;;  %v242_v26 = vld [vmem:[%s2273_s7 + $0x750] sm:$0xff] }
  0x27   : > { %239 = vst [vmem:[%s2278_s8 + $0x120] sm:$0xff] %v238_v24  ;;  %241 = vst [vmem:[%s2278_s8 + $0x12c] sm:$0xff] %v240_v25  ;;  %v244_v27 = vld [vmem:[%s2273_s7 + $0x798] sm:$0xff]  ;;  %v246_v28 = vld [vmem:[%s2273_s7 + $0x7e0] sm:$0xff] }
  0x28   : > { %243 = vst [vmem:[%s2278_s8 + $0x138] sm:$0xff] %v242_v26  ;;  %v248_v29 = vld [vmem:[%s2273_s7 + $0x828] sm:$0xff]  ;;  %245 = vst [vmem:[%s2278_s8 + $0x144] sm:$0xff] %v244_v27  ;;  %v250_v30 = vld [vmem:[%s2273_s7 + $0x870] sm:$0xff] }
  0x29   : > { %247 = vst [vmem:[%s2278_s8 + $0x150] sm:$0xff] %v246_v28  ;;  %249 = vst [vmem:[%s2278_s8 + $0x15c] sm:$0xff] %v248_v29  ;;  %v252_v31 = vld [vmem:[%s2273_s7 + $0x8b8] sm:$0xff]  ;;  %v1643_v32 = vld [vmem:[%s2273_s7 + $0x8] sm:$0xf] }
  0x2a   : > { %251 = vst [vmem:[%s2278_s8 + $0x168] sm:$0xff] %v250_v30  ;;  %253 = vst [vmem:[%s2278_s8 + $0x174] sm:$0xff] %v252_v31  ;;  %v1645_v33 = vld [vmem:[%s2273_s7 + $0x50] sm:$0xf]  ;;  %v1647_v34 = vld [vmem:[%s2273_s7 + $0x98] sm:$0xf] }
  0x2b   : > { %1644 = vst [vmem:[%s2278_s8 + $0x8] sm:$0xf] %v1643_v32  ;;  %v1649_v35 = vld [vmem:[%s2273_s7 + $0xe0] sm:$0xf]  ;;  %1646 = vst [vmem:[%s2278_s8 + $0x14] sm:$0xf] %v1645_v33 }
  0x2c   : > { %1648 = vst [vmem:[%s2278_s8 + $0x20] sm:$0xf] %v1647_v34  ;;  %1650 = vst [vmem:[%s2278_s8 + $0x2c] sm:$0xf] %v1649_v35  ;;  %v1651_v36 = vld [vmem:[%s2273_s7 + $0x128] sm:$0xf] }
  0x2d   : > { %v1653_v37 = vld [vmem:[%s2273_s7 + $0x170] sm:$0xf]  ;;  %v1655_v38 = vld [vmem:[%s2273_s7 + $0x1b8] sm:$0xf]  ;;  %1652 = vst [vmem:[%s2278_s8 + $0x38] sm:$0xf] %v1651_v36 }
  0x2e   : > { %1654 = vst [vmem:[%s2278_s8 + $0x44] sm:$0xf] %v1653_v37  ;;  %1656 = vst [vmem:[%s2278_s8 + $0x50] sm:$0xf] %v1655_v38  ;;  %v1657_v39 = vld [vmem:[%s2273_s7 + $0x200] sm:$0xf] }
  0x2f   : > { %v1659_v40 = vld [vmem:[%s2273_s7 + $0x248] sm:$0xf]  ;;  %v1661_v41 = vld [vmem:[%s2273_s7 + $0x290] sm:$0xf]  ;;  %1658 = vst [vmem:[%s2278_s8 + $0x5c] sm:$0xf] %v1657_v39 }
  0x30   : > { %1660 = vst [vmem:[%s2278_s8 + $0x68] sm:$0xf] %v1659_v40  ;;  %1662 = vst [vmem:[%s2278_s8 + $0x74] sm:$0xf] %v1661_v41  ;;  %v1663_v42 = vld [vmem:[%s2273_s7 + $0x2d8] sm:$0xf] }
  0x31   : > { %v1665_v43 = vld [vmem:[%s2273_s7 + $0x320] sm:$0xf]  ;;  %v1667_v44 = vld [vmem:[%s2273_s7 + $0x368] sm:$0xf]  ;;  %1664 = vst [vmem:[%s2278_s8 + $0x80] sm:$0xf] %v1663_v42 }
  0x32   : > { %1666 = vst [vmem:[%s2278_s8 + $0x8c] sm:$0xf] %v1665_v43  ;;  %1668 = vst [vmem:[%s2278_s8 + $0x98] sm:$0xf] %v1667_v44  ;;  %v1669_v45 = vld [vmem:[%s2273_s7 + $0x3b0] sm:$0xf] }
  0x33   : > { %v1671_v46 = vld [vmem:[%s2273_s7 + $0x3f8] sm:$0xf]  ;;  %v1673_v47 = vld [vmem:[%s2273_s7 + $0x440] sm:$0xf]  ;;  %1670 = vst [vmem:[%s2278_s8 + $0xa4] sm:$0xf] %v1669_v45 }
  0x34   : > { %1672 = vst [vmem:[%s2278_s8 + $0xb0] sm:$0xf] %v1671_v46  ;;  %1674 = vst [vmem:[%s2278_s8 + $0xbc] sm:$0xf] %v1673_v47  ;;  %v1675_v48 = vld [vmem:[%s2273_s7 + $0x488] sm:$0xf] }
  0x35   : > { %v1677_v49 = vld [vmem:[%s2273_s7 + $0x4d0] sm:$0xf]  ;;  %v1679_v50 = vld [vmem:[%s2273_s7 + $0x518] sm:$0xf]  ;;  %1676 = vst [vmem:[%s2278_s8 + $0xc8] sm:$0xf] %v1675_v48 }
  0x36   : > { %1678 = vst [vmem:[%s2278_s8 + $0xd4] sm:$0xf] %v1677_v49  ;;  %1680 = vst [vmem:[%s2278_s8 + $0xe0] sm:$0xf] %v1679_v50  ;;  %v1681_v51 = vld [vmem:[%s2273_s7 + $0x560] sm:$0xf] }
  0x37   : > { %v1683_v52 = vld [vmem:[%s2273_s7 + $0x5a8] sm:$0xf]  ;;  %v1685_v53 = vld [vmem:[%s2273_s7 + $0x5f0] sm:$0xf]  ;;  %1682 = vst [vmem:[%s2278_s8 + $0xec] sm:$0xf] %v1681_v51 }
  0x38   : > { %1684 = vst [vmem:[%s2278_s8 + $0xf8] sm:$0xf] %v1683_v52  ;;  %1686 = vst [vmem:[%s2278_s8 + $0x104] sm:$0xf] %v1685_v53  ;;  %v1687_v54 = vld [vmem:[%s2273_s7 + $0x638] sm:$0xf] }
  0x39   : > { %v1689_v55 = vld [vmem:[%s2273_s7 + $0x680] sm:$0xf]  ;;  %v1691_v56 = vld [vmem:[%s2273_s7 + $0x6c8] sm:$0xf]  ;;  %1688 = vst [vmem:[%s2278_s8 + $0x110] sm:$0xf] %v1687_v54 }
  0x3a   : > { %1690 = vst [vmem:[%s2278_s8 + $0x11c] sm:$0xf] %v1689_v55  ;;  %1692 = vst [vmem:[%s2278_s8 + $0x128] sm:$0xf] %v1691_v56  ;;  %v1693_v57 = vld [vmem:[%s2273_s7 + $0x710] sm:$0xf] }
  0x3b   : > { %v1695_v58 = vld [vmem:[%s2273_s7 + $0x758] sm:$0xf]  ;;  %v1697_v59 = vld [vmem:[%s2273_s7 + $0x7a0] sm:$0xf]  ;;  %1694 = vst [vmem:[%s2278_s8 + $0x134] sm:$0xf] %v1693_v57 }
  0x3c   : > { %1696 = vst [vmem:[%s2278_s8 + $0x140] sm:$0xf] %v1695_v58  ;;  %1698 = vst [vmem:[%s2278_s8 + $0x14c] sm:$0xf] %v1697_v59  ;;  %v1699_v60 = vld [vmem:[%s2273_s7 + $0x7e8] sm:$0xf] }
  0x3d   : > { %v1701_v61 = vld [vmem:[%s2273_s7 + $0x830] sm:$0xf]  ;;  %v1703_v62 = vld [vmem:[%s2273_s7 + $0x878] sm:$0xf]  ;;  %1700 = vst [vmem:[%s2278_s8 + $0x158] sm:$0xf] %v1699_v60 }
  0x3e   : > { %1702 = vst [vmem:[%s2278_s8 + $0x164] sm:$0xf] %v1701_v61  ;;  %1704 = vst [vmem:[%s2278_s8 + $0x170] sm:$0xf] %v1703_v62  ;;  %v1705_v63 = vld [vmem:[%s2273_s7 + $0x8c0] sm:$0xf] }
  0x3f   : > { %1706 = vst [vmem:[%s2278_s8 + $0x17c] sm:$0xf] %v1705_v63 }
  0x40 PF: > { %p1707_p7 = scmp.ge.s32.totalorder %s2190_s18, 1  ;;  %p341_p8 = scmp.lt.s32.totalorder %s2190_s18, 13 }
  0x42   : > { %p342_p9 = pnand %p1707_p7, %p341_p8 }
  0x43   : > { %s348_s9 = sand.u32 (!%p342_p9), 1, %s2166_s12   ;;  %s387_s10 = smul.u32 (!%p342_p9), 48, %s2174_s14 }
  0x44   : > { %345 = sbr.rel (%p342_p9) target bundleno = 453 (0x1c5), region = 54  ;;  %s1709_s21 = sshll.u32 (!%p342_p9), %s2178_s15, 5 }
  0x45   : > { %s1990_s11 = smul.u32 (!%p342_p9), 384, %s348_s9  ;;  %p388_p10 = scmp.lt.s32.totalorder (!%p342_p9), %s387_s10, 287 }
  0x46   : > { %p400_p11 = scmp.lt.s32.totalorder (!%p342_p9), %s1709_s21, 63  ;;  %p1711_p12 = scmp.ne.s32.totalorder (!%p342_p9), %s2174_s14, 0 }
  0x47   : > { %s2420_s12 = scalar_lea.vmem (!%p342_p9), [#allocation2], %s1990_s11 }
  0x4b   : > { %s2761_s10 = smov (!%p388_p10, %s387_s10), 287  ;;  %s2763_s21 = smov (!%p400_p11, %s1709_s21), 63 }
  0x4c   : > { %s1708_s22 = sshll.u32 %s2761_s10, 2  ;;  %s1710_s27 = sshll.u32 %s2763_s21, 3  ;;  %v2192_v0 = vmov (!%p1711_p12), 0.0  }
  0x4d   : > { %s2413_s26 = scalar_lea.vmem %s2745_s1, %s1708_s22  ;;  %s2418_s30 = scalar_lea.vmem %s2747_s3, %s1710_s27 }
  0x4e   : > { %412 = sbr.rel (%p1711_p12) target bundleno = 94 (0x5e), region = 62  ;;  %413 = vst [vmem:[%s2418_s30] sm:$0xff] (!%p1711_p12), %v2192_v0  ;;  %414 = vst [vmem:[%s2418_s30 + $0x8] sm:$0xff] (!%p1711_p12), %v2192_v0 }
  0x4f   : > { %415 = vst [vmem:[%s2418_s30 + $0x10] sm:$0xff] (!%p1711_p12), %v2192_v0  ;;  %416 = vst [vmem:[%s2418_s30 + $0x18] sm:$0xff] (!%p1711_p12), %v2192_v0 }
  0x50   : > { %417 = vst [vmem:[%s2418_s30 + $0x20] sm:$0xff] (!%p1711_p12), %v2192_v0  ;;  %418 = vst [vmem:[%s2418_s30 + $0x28] sm:$0xff] (!%p1711_p12), %v2192_v0 }
  0x51   : > { %419 = vst [vmem:[%s2418_s30 + $0x30] sm:$0xff] (!%p1711_p12), %v2192_v0  ;;  %420 = vst [vmem:[%s2418_s30 + $0x38] sm:$0xff] (!%p1711_p12), %v2192_v0 }
  0x52   : > { %421 = vst [vmem:[%s2418_s30 + $0x40] sm:$0xff] (!%p1711_p12), %v2192_v0  ;;  %422 = vst [vmem:[%s2418_s30 + $0x48] sm:$0xff] (!%p1711_p12), %v2192_v0 }
  0x53   : > { %423 = vst [vmem:[%s2418_s30 + $0x50] sm:$0xff] (!%p1711_p12), %v2192_v0  ;;  %424 = vst [vmem:[%s2418_s30 + $0x58] sm:$0xff] (!%p1711_p12), %v2192_v0 }
  0x54   : > { %425 = vst [vmem:[%s2418_s30 + $0x60] sm:$0xff] (!%p1711_p12), %v2192_v0  ;;  %426 = vst [vmem:[%s2418_s30 + $0x68] sm:$0xff] (!%p1711_p12), %v2192_v0 }
  0x55   : > { %427 = vst [vmem:[%s2418_s30 + $0x70] sm:$0xff] %v2192_v0  ;;  %428 = vst [vmem:[%s2418_s30 + $0x78] sm:$0xff] %v2192_v0 }
  0x56   : > { %429 = vst [vmem:[%s2418_s30 + $0x80] sm:$0xff] %v2192_v0  ;;  %430 = vst [vmem:[%s2418_s30 + $0x88] sm:$0xff] %v2192_v0 }
  0x57   : > { %431 = vst [vmem:[%s2418_s30 + $0x90] sm:$0xff] %v2192_v0  ;;  %432 = vst [vmem:[%s2418_s30 + $0x98] sm:$0xff] %v2192_v0 }
  0x58   : > { %433 = vst [vmem:[%s2418_s30 + $0xa0] sm:$0xff] %v2192_v0  ;;  %434 = vst [vmem:[%s2418_s30 + $0xa8] sm:$0xff] %v2192_v0 }
  0x59   : > { %435 = vst [vmem:[%s2418_s30 + $0xb0] sm:$0xff] %v2192_v0  ;;  %436 = vst [vmem:[%s2418_s30 + $0xb8] sm:$0xff] %v2192_v0 }
  0x5a   : > { %437 = vst [vmem:[%s2418_s30 + $0xc0] sm:$0xff] %v2192_v0  ;;  %438 = vst [vmem:[%s2418_s30 + $0xc8] sm:$0xff] %v2192_v0 }
  0x5b   : > { %439 = vst [vmem:[%s2418_s30 + $0xd0] sm:$0xff] %v2192_v0  ;;  %440 = vst [vmem:[%s2418_s30 + $0xd8] sm:$0xff] %v2192_v0 }
  0x5c   : > { %441 = vst [vmem:[%s2418_s30 + $0xe0] sm:$0xff] %v2192_v0  ;;  %442 = vst [vmem:[%s2418_s30 + $0xe8] sm:$0xff] %v2192_v0 }
  0x5d   : > { %443 = vst [vmem:[%s2418_s30 + $0xf0] sm:$0xff] %v2192_v0  ;;  %444 = vst [vmem:[%s2418_s30 + $0xf8] sm:$0xff] %v2192_v0 }
  0x5e PF: > { %v2048_v1 = vld [vmem:[%s2413_s26 + $0x40] sm:$0xff]   ;;  %v2050_v3 = vld [vmem:[%s2413_s26 + $0x48] sm:$0xff]   ;;  %v2052_v5 = vld [vmem:[%s2413_s26 + $0x50] sm:$0xff]   ;;  %p1784_p13 = scmp.ne.s32.totalorder %s2174_s14, 5 }
  0x5f   : > { %v2049_v2 = vld [vmem:[%s2413_s26] sm:$0xff]   ;;  %1788 = vmatprep.subr.bf16.mxu0 %v2048_v1  ;;  %1972 = vmatprep.subr.bf16.mxu1 %v2048_v1  ;;  %v2051_v4 = vld [vmem:[%s2413_s26 + $0x8] sm:$0xff]   ;;  %v2053_v6 = vld [vmem:[%s2413_s26 + $0x10] sm:$0xff]  }
  0x60   : > { %1789 = vmatpush3.bf16.msra.mxu0 %v2049_v2  ;;  %1980 = vmatpush3.bf16.msra.mxu1 %v2049_v2  ;;  %v2054_v7 = vld [vmem:[%s2413_s26 + $0x58] sm:$0xff]   ;;  %v2056_v9 = vld [vmem:[%s2413_s26 + $0x60] sm:$0xff]   ;;  %v2058_v11 = vld [vmem:[%s2413_s26 + $0x68] sm:$0xff]  }
  0x61   : > { %1790 = vmatprep.subr.bf16.mxu0 %v2050_v3  ;;  %1973 = vmatprep.subr.bf16.mxu1 %v2050_v3  ;;  %v2055_v8 = vld [vmem:[%s2413_s26 + $0x18] sm:$0xff]   ;;  %v2057_v10 = vld [vmem:[%s2413_s26 + $0x20] sm:$0xff]   ;;  %v2059_v14 = vld [vmem:[%s2413_s26 + $0x28] sm:$0xff]  }
  0x62   : > { %v2066_v12 = vld [vmem:[%s2420_s12 + $0x4] ss:$12 sps:$4 sm:$0xff]   ;;  %v2062_v17 = vld [vmem:[%s2413_s26 + $0x78] sm:$0xff]   ;;  %v2064_v20 = vld [vmem:[%s2420_s12] ss:$12 sps:$4 sm:$0xff]  }
  0x63   : > { %v2069_v13 = vld [vmem:[%s2420_s12 + $0x124] ss:$12 sps:$4 sm:$0xff]   ;;  %1021 = vmatprep.mubr.bf16.mxu0 %v2066_v12  ;;  %v2063_v18 = vld [vmem:[%s2413_s26 + $0x38] sm:$0xff]   ;;  %v2067_v21 = vld [vmem:[%s2420_s12 + $0x120] ss:$12 sps:$4 sm:$0xff]  }
  0x64   : > { %1791 = vmatpush3.bf16.msra.mxu0 %v2051_v4  ;;  %1981 = vmatpush3.bf16.msra.mxu1 %v2051_v4  ;;  %v2060_v15 = vld [vmem:[%s2413_s26 + $0x70] sm:$0xff]   ;;  %v2070_v19 = vld [vmem:[%s2413_s26 + $0x80] sm:$0xff]   ;;  %v2072_v22 = vld [vmem:[%s2420_s12 + $0x1c] ss:$12 sps:$4 sm:$0xff]  }
  0x65   : > { %1792 = vmatprep.subr.bf16.mxu0 %v2052_v5  ;;  %1974 = vmatprep.subr.bf16.mxu1 %v2052_v5  ;;  %v2061_v16 = vld [vmem:[%s2413_s26 + $0x30] sm:$0xff]   ;;  %v2071_v23 = vld [vmem:[%s2413_s26 + $0x88] sm:$0xff]   ;;  %v2076_v25 = vld [vmem:[%s2420_s12 + $0x18] ss:$12 sps:$4 sm:$0xff]  }
  0x66   : > { %1117 = vmatprep.mubr.bf16.mxu1 %v2069_v13  ;;  %v2074_v24 = vld [vmem:[%s2420_s12 + $0x13c] ss:$12 sps:$4 sm:$0xff]   ;;  %v2078_v26 = vld [vmem:[%s2413_s26 + $0x90] sm:$0xff]   ;;  %v2077_v27 = vld [vmem:[%s2420_s12 + $0x138] ss:$12 sps:$4 sm:$0xff]  }
  0x67   : > { %v2079_v28 = vld [vmem:[%s2413_s26 + $0x98] sm:$0xff]   ;;  %v2080_v29 = vld [vmem:[%s2420_s12 + $0x34] ss:$12 sps:$4 sm:$0xff]   ;;  %v2087_v34 = vld [vmem:[%s2413_s26 + $0xa8] sm:$0xff]  }
  0x68   : > { %1793 = vmatpush3.bf16.msra.mxu0 %v2053_v6  ;;  %1982 = vmatpush3.bf16.msra.mxu1 %v2053_v6  ;;  %v2082_v30 = vld [vmem:[%s2420_s12 + $0x154] ss:$12 sps:$4 sm:$0xff]   ;;  %v2084_v32 = vld [vmem:[%s2420_s12 + $0x30] ss:$12 sps:$4 sm:$0xff]   ;;  %v2088_v35 = vld [vmem:[%s2420_s12 + $0x4c] ss:$12 sps:$4 sm:$0xff]  }
  0x69   : > { %1794 = vmatprep.subr.bf16.mxu0 %v2054_v7  ;;  %1975 = vmatprep.subr.bf16.mxu1 %v2054_v7  ;;  %v2086_v31 = vld [vmem:[%s2413_s26 + $0xa0] sm:$0xff]   ;;  %v2085_v33 = vld [vmem:[%s2420_s12 + $0x150] ss:$12 sps:$4 sm:$0xff]   ;;  %v2090_v36 = vld [vmem:[%s2420_s12 + $0x16c] ss:$12 sps:$4 sm:$0xff]  }
  0x6a   : > { %v2094_v37 = vld [vmem:[%s2413_s26 + $0xb0] sm:$0xff]   ;;  %v2095_v41 = vld [vmem:[%s2413_s26 + $0xb8] sm:$0xff]   ;;  %v2099_v43 = vld [vmem:[%s2420_s12 + $0x60] ss:$12 sps:$4 sm:$0xff]  }
  0x6b   : > { %v2092_v38 = vld [vmem:[%s2420_s12 + $0x48] ss:$12 sps:$4 sm:$0xff]   ;;  %v2096_v40 = vld [vmem:[%s2420_s12 + $0x64] ss:$12 sps:$4 sm:$0xff]   ;;  %v2100_v44 = vld [vmem:[%s2420_s12 + $0x20] ss:$12 sps:$4 sm:$0xff]  }
  0x6c   : > { %1795 = vmatpush3.bf16.msra.mxu0 %v2055_v8  ;;  %1983 = vmatpush3.bf16.msra.mxu1 %v2055_v8  ;;  %v2093_v39 = vld [vmem:[%s2420_s12 + $0x168] ss:$12 sps:$4 sm:$0xff]   ;;  %v2103_v46 = vld [vmem:[%s2420_s12 + $0x38] ss:$12 sps:$4 sm:$0xff]   ;;  %v2105_v48 = vld [vmem:[%s2420_s12 + $0x50] ss:$12 sps:$4 sm:$0xff]  }
  0x6d   : > { %1796 = vmatprep.subr.bf16.mxu0 %v2056_v9  ;;  %1976 = vmatprep.subr.bf16.mxu1 %v2056_v9  ;;  %v2098_v42 = vld [vmem:[%s2420_s12 + $0x8] ss:$12 sps:$4 sm:$0xff]   ;;  %v2104_v47 = vld [vmem:[%s2420_s12 + $0x78] ss:$12 sps:$4 sm:$0xff]   ;;  %v2109_v51 = vld [vmem:[%s2420_s12 + $0x90] ss:$12 sps:$4 sm:$0xff]  }
  0x6e   : > { %v2101_v45 = vld [vmem:[%s2420_s12 + $0x7c] ss:$12 sps:$4 sm:$0xff]   ;;  %v2106_v49 = vld [vmem:[%s2420_s12 + $0x94] ss:$12 sps:$4 sm:$0xff]   ;;  %v2111_v53 = vld [vmem:[%s2420_s12 + $0xac] ss:$12 sps:$4 sm:$0xff]  }
  0x6f   : > { %v2108_v50 = vld [vmem:[%s2420_s12 + $0x68] ss:$12 sps:$4 sm:$0xff]   ;;  %v2110_v52 = vld [vmem:[%s2420_s12 + $0x80] ss:$12 sps:$4 sm:$0xff]   ;;  %v2113_v54 = vld [vmem:[%s2420_s12 + $0x98] ss:$12 sps:$4 sm:$0xff]  }
  0x70   : > { %1797 = vmatpush3.bf16.msra.mxu0 %v2057_v10  ;;  %1984 = vmatpush3.bf16.msra.mxu1 %v2057_v10  ;;  %v2114_v55 = vld [vmem:[%s2420_s12 + $0xa8] ss:$12 sps:$4 sm:$0xff]   ;;  %v2115_v56 = vld [vmem:[%s2420_s12 + $0xb0] ss:$12 sps:$4 sm:$0xff]   ;;  %v2119_v59 = vld [vmem:[%s2420_s12 + $0xc0] ss:$12 sps:$4 sm:$0xff]  }
  0x71   : > { %1798 = vmatprep.subr.bf16.mxu0 %v2058_v11  ;;  %1977 = vmatprep.subr.bf16.mxu1 %v2058_v11  ;;  %v2116_v57 = vld [vmem:[%s2420_s12 + $0xc4] ss:$12 sps:$4 sm:$0xff]   ;;  %v2118_v58 = vld [vmem:[%s2420_s12 + $0xc8] ss:$12 sps:$4 sm:$0xff]   ;;  %v2120_v60 = vld [vmem:[%s2420_s12 + $0xe0] ss:$12 sps:$4 sm:$0xff]  }
  0x72   : > { %v2121_v61 = vld [vmem:[%s2420_s12 + $0xdc] ss:$12 sps:$4 sm:$0xff]   ;;  %v2123_v62 = vld [vmem:[%s2420_s12 + $0xf8] ss:$12 sps:$4 sm:$0xff]   ;;  %v2126_v1 = vld [vmem:[%s2420_s12 + $0xf4] ss:$12 sps:$4 sm:$0xff]  }
  0x73   : > { %v2124_v63 = vld [vmem:[%s2420_s12 + $0xd8] ss:$12 sps:$4 sm:$0xff]   ;;  %v2125_v0 = vld [vmem:[%s2420_s12 + $0x110] ss:$12 sps:$4 sm:$0xff]   ;;  %v2128_v2 = vld [vmem:[%s2420_s12 + $0x128] ss:$12 sps:$4 sm:$0xff]  }
  0x74   : > { %1799 = vmatpush3.bf16.msra.mxu0 %v2059_v14  ;;  %1985 = vmatpush3.bf16.msra.mxu1 %v2059_v14  ;;  %v2129_v3 = vld [vmem:[%s2420_s12 + $0xf0] ss:$12 sps:$4 sm:$0xff]   ;;  %v2130_v4 = vld [vmem:[%s2420_s12 + $0x140] ss:$12 sps:$4 sm:$0xff]   ;;  %v2133_v6 = vld [vmem:[%s2420_s12 + $0x158] ss:$12 sps:$4 sm:$0xff]  }
  0x75   : > { %1800 = vmatprep.subr.bf16.mxu0 %v2060_v15  ;;  %1978 = vmatprep.subr.bf16.mxu1 %v2060_v15  ;;  %v2131_v5 = vld [vmem:[%s2420_s12 + $0x10c] ss:$12 sps:$4 sm:$0xff]   ;;  %v2134_v7 = vld [vmem:[%s2420_s12 + $0x108] ss:$12 sps:$4 sm:$0xff]   ;;  %v2135_v8 = vld [vmem:[%s2420_s12 + $0x170] ss:$12 sps:$4 sm:$0xff]  }
  0x78   : > { %1801 = vmatpush3.bf16.msra.mxu0 %v2061_v16  ;;  %1986 = vmatpush3.bf16.msra.mxu1 %v2061_v16 }
  0x79   : > { %1802 = vmatprep.subr.bf16.mxu0 %v2062_v17  ;;  %1979 = vmatprep.subr.bf16.mxu1 %v2062_v17 }
  0x7c   : > { %1803 = vmatpush3.bf16.msra.mxu0 %v2063_v18  ;;  %1987 = vmatpush3.bf16.msra.mxu1 %v2063_v18 }
  0x7d   : > { %1924 = vmatprep.subr.bf16.mxu1 %v2070_v19 }
  0x7f   : > { %1022 = vmatmul.mubr.bf16.vlgmr.msra.gmra.mrb[0].mxu0 %v2064_v20  ;;  %1118 = vmatmul.mubr.bf16.vlgmr.msra.gmra.mrb[0].mxu1 %v2067_v21 }
  0x80   : > { %1925 = vmatpush3.bf16.msra.mxu1 %v2070_v19  ;;  %1029 = vmatprep.mubr.bf16.mxu0 %v2072_v22 }
  0x81   : > { %1926 = vmatprep.subr.bf16.mxu1 %v2071_v23  ;;  %1125 = vmatprep.mubr.bf16.mxu1 %v2074_v24 }
  0x84   : > { %1927 = vmatpush3.bf16.msra.mxu1 %v2071_v23 }
  0x85   : > { %1928 = vmatprep.subr.bf16.mxu1 %v2078_v26 }
  0x87   : > { %1030 = vmatmul.mubr.bf16.gmra.mrb[4].mxu0 %v2076_v25  ;;  %1126 = vmatmul.mubr.bf16.gmra.mrb[4].mxu1 %v2077_v27 }
  0x88   : > { %1929 = vmatpush3.bf16.msra.mxu1 %v2078_v26  ;;  %1037 = vmatprep.mubr.bf16.mxu0 %v2080_v29 }
  0x89   : > { %1930 = vmatprep.subr.bf16.mxu1 %v2079_v28  ;;  %1133 = vmatprep.mubr.bf16.mxu1 %v2082_v30 }
  0x8c   : > { %1931 = vmatpush3.bf16.msra.mxu1 %v2079_v28 }
  0x8d   : > { %1932 = vmatprep.subr.bf16.mxu1 %v2086_v31 }
  0x8f   : > { %1038 = vmatmul.mubr.bf16.gmra.mrb[8].mxu0 %v2084_v32  ;;  %1134 = vmatmul.mubr.bf16.gmra.mrb[8].mxu1 %v2085_v33 }
  0x90   : > { %1933 = vmatpush3.bf16.msra.mxu1 %v2086_v31  ;;  %1045 = vmatprep.mubr.bf16.mxu0 %v2088_v35 }
  0x91   : > { %1934 = vmatprep.subr.bf16.mxu1 %v2087_v34  ;;  %1141 = vmatprep.mubr.bf16.mxu1 %v2090_v36 }
  0x94   : > { %1935 = vmatpush3.bf16.msra.mxu1 %v2087_v34 }
  0x95   : > { %1936 = vmatprep.subr.bf16.mxu1 %v2094_v37 }
  0x97   : > { %1046 = vmatmul.mubr.bf16.gmra.mrb[12].mxu0 %v2092_v38  ;;  %1142 = vmatmul.mubr.bf16.gmra.mrb[12].mxu1 %v2093_v39 }
  0x98   : > { %1937 = vmatpush3.bf16.msra.mxu1 %v2094_v37  ;;  %1053 = vmatprep.mubr.bf16.mxu0 %v2096_v40 }
  0x99   : > { %1938 = vmatprep.subr.bf16.mxu1 %v2095_v41  ;;  %1940 = vmatprep.mubr.bf16.mxu1 %v2098_v42 }
  0x9c   : > { %1939 = vmatpush3.bf16.msra.mxu1 %v2095_v41 }
  0x9f   : > { %1054 = vmatmul.mubr.bf16.gmra.mrb[16].mxu0 %v2099_v43  ;;  %1941 = vmatmul.mubr.bf16.vlgmr.msra.gmra.mrb[16].mxu1 %v2100_v44 }
  0xa0   : > { %1061 = vmatprep.mubr.bf16.mxu0 %v2101_v45  ;;  %1944 = vmatprep.mubr.bf16.mxu1 %v2103_v46 }
  0xa7   : > { %1062 = vmatmul.mubr.bf16.gmra.mrb[20].mxu0 %v2104_v47  ;;  %1945 = vmatmul.mubr.bf16.gmra.mrb[20].mxu1 %v2105_v48 }
  0xa8   : > { %1069 = vmatprep.mubr.bf16.mxu0 %v2106_v49  ;;  %1948 = vmatprep.mubr.bf16.mxu1 %v2108_v50 }
  0xaf   : > { %1070 = vmatmul.mubr.bf16.gmra.mrb[24].mxu0 %v2109_v51  ;;  %1949 = vmatmul.mubr.bf16.gmra.mrb[24].mxu1 %v2110_v52 }
  0xb0   : > { %1077 = vmatprep.mubr.bf16.mxu0 %v2111_v53  ;;  %1952 = vmatprep.mubr.bf16.mxu1 %v2113_v54 }
  0xb7   : > { %1078 = vmatmul.mubr.bf16.gmra.mrb[28].mxu0 %v2114_v55  ;;  %1953 = vmatmul.mubr.bf16.gmra.mrb[28].mxu1 %v2115_v56 }
  0xb8   : > { %1085 = vmatprep.mubr.bf16.mxu0 %v2116_v57  ;;  %1956 = vmatprep.mubr.bf16.mxu1 %v2118_v58  ;;  %v447_v58 = vld [vmem:[%s2418_s30 + $0x10] sm:$0xff] }
  0xbf   : > { %1086 = vmatmul.mubr.bf16.gmra.mrb[32].mxu0 %v2119_v59  ;;  %1957 = vmatmul.mubr.bf16.gmra.mrb[32].mxu1 %v2120_v60 }
  0xc0   : > { %1093 = vmatprep.mubr.bf16.mxu0 %v2121_v61  ;;  %1960 = vmatprep.mubr.bf16.mxu1 %v2123_v62  ;;  %v445_v62 = vld [vmem:[%s2418_s30] sm:$0xff] }
  0xc7   : > { %1094 = vmatmul.mubr.bf16.gmra.mrb[36].mxu0 %v2124_v63  ;;  %1961 = vmatmul.mubr.bf16.gmra.mrb[36].mxu1 %v2125_v0 }
  0xc8   : > { %1101 = vmatprep.mubr.bf16.mxu0 %v2126_v1  ;;  %1964 = vmatprep.mubr.bf16.mxu1 %v2128_v2 }
  0xcf   : > { %1102 = vmatmul.mubr.bf16.gmra.mrb[40].mxu0 %v2129_v3  ;;  %1965 = vmatmul.mubr.bf16.gmra.mrb[40].mxu1 %v2130_v4  ;;  %v448_v3 = vld [vmem:[%s2418_s30 + $0x18] sm:$0xff] }
  0xd0   : > { %1109 = vmatprep.mubr.bf16.mxu0 %v2131_v5  ;;  %1968 = vmatprep.mubr.bf16.mxu1 %v2133_v6 }
  0xd7   : > { %1110 = vmatmul.mubr.bf16.gmra.mrb[44].mxu0 %v2134_v7  ;;  %1969 = vmatmul.mubr.bf16.gmra.mrb[44].mxu1 %v2135_v8  ;;  %v446_v8 = vld [vmem:[%s2418_s30 + $0x8] sm:$0xff] }
 0x152   : > { %v1804_v9 = vpop.f32.mrb[0].mxu0  ;;  %v1876_v10 = vpop.f32.mrb[0].mxu1 }
 0x153   : > { %v1805_v11 = vpop.f32.mrb[1].mxu0  ;;  %v1877_v12 = vpop.f32.mrb[1].mxu1 }
 0x154   : > { %v1806_v13 = vadd.f32 %v1805_v11, %v1804_v9  ;;  %v2527_v14 = vadd.f32 %v1877_v12, %v1876_v10  ;;  %v1807_v15 = vpop.f32.mrb[2].mxu0  ;;  %v1879_v16 = vpop.f32.mrb[2].mxu1 }
 0x155   : > { %v1808_v17 = vpop.f32.mrb[3].mxu0  ;;  %v1880_v18 = vpop.f32.mrb[3].mxu1 }
 0x156   : > { %v1809_v19 = vadd.f32 %v1808_v17, %v1807_v15  ;;  %v2529_v20 = vadd.f32 %v1880_v18, %v1879_v16  ;;  %v451_v17 = vld [vmem:[%s2418_s30 + $0x30] sm:$0xff] }
 0x15a   : > { %v1810_v21 = vpop.f32.mrb[4].mxu0  ;;  %v1882_v22 = vpop.f32.mrb[4].mxu1 }
 0x15b   : > { %v1811_v23 = vpop.f32.mrb[5].mxu0  ;;  %v1883_v24 = vpop.f32.mrb[5].mxu1 }
 0x15c   : > { %v1812_v25 = vadd.f32 %v1811_v23, %v1810_v21  ;;  %v2531_v26 = vadd.f32 %v1883_v24, %v1882_v22  ;;  %v1813_v27 = vpop.f32.mrb[6].mxu0  ;;  %v1885_v28 = vpop.f32.mrb[6].mxu1  ;;  %v449_v23 = vld [vmem:[%s2418_s30 + $0x20] sm:$0xff] }
 0x15d   : > { %v1814_v29 = vpop.f32.mrb[7].mxu0  ;;  %v1886_v30 = vpop.f32.mrb[7].mxu1 }
 0x15e   : > { %v1815_v31 = vadd.f32 %v1814_v29, %v1813_v27  ;;  %v2533_v32 = vadd.f32 %v1886_v30, %v1885_v28  ;;  %v452_v28 = vld [vmem:[%s2418_s30 + $0x38] sm:$0xff] }
 0x162   : > { %v1816_v33 = vpop.f32.mrb[8].mxu0  ;;  %v1888_v34 = vpop.f32.mrb[8].mxu1 }
 0x163   : > { %v1817_v35 = vpop.f32.mrb[9].mxu0  ;;  %v1889_v36 = vpop.f32.mrb[9].mxu1 }
 0x164   : > { %v1818_v37 = vadd.f32 %v1817_v35, %v1816_v33  ;;  %v2535_v38 = vadd.f32 %v1889_v36, %v1888_v34  ;;  %v1819_v39 = vpop.f32.mrb[10].mxu0  ;;  %v1891_v40 = vpop.f32.mrb[10].mxu1  ;;  %v450_v34 = vld [vmem:[%s2418_s30 + $0x28] sm:$0xff] }
 0x165   : > { %v1820_v41 = vpop.f32.mrb[11].mxu0  ;;  %v1892_v42 = vpop.f32.mrb[11].mxu1 }
 0x166   : > { %v1821_v43 = vadd.f32 %v1820_v41, %v1819_v39  ;;  %v2537_v44 = vadd.f32 %v1892_v42, %v1891_v40 }
 0x16a   : > { %v1822_v45 = vpop.f32.mrb[12].mxu0  ;;  %v1894_v46 = vpop.f32.mrb[12].mxu1 }
 0x16b   : > { %v1823_v47 = vpop.f32.mrb[13].mxu0  ;;  %v1895_v48 = vpop.f32.mrb[13].mxu1 }
 0x16c   : > { %v1824_v49 = vadd.f32 %v1823_v47, %v1822_v45  ;;  %v2539_v50 = vadd.f32 %v1895_v48, %v1894_v46  ;;  %v1825_v51 = vpop.f32.mrb[14].mxu0  ;;  %v1897_v52 = vpop.f32.mrb[14].mxu1  ;;  %v455_v45 = vld [vmem:[%s2418_s30 + $0x50] sm:$0xff] }
 0x16d   : > { %v1826_v53 = vpop.f32.mrb[15].mxu0  ;;  %v1898_v54 = vpop.f32.mrb[15].mxu1 }
 0x16e   : > { %v1827_v55 = vadd.f32 %v1826_v53, %v1825_v51  ;;  %v2541_v56 = vadd.f32 %v1898_v54, %v1897_v52  ;;  %v456_v54 = vld [vmem:[%s2418_s30 + $0x58] sm:$0xff] }
 0x172   : > { %v1828_v57 = vpop.f32.mrb[16].mxu0  ;;  %v1942_v59 = vpop.f32.mrb[16].mxu1 }
 0x173   : > { %v1193_v60 = vadd.f32 %v1942_v59, %v1812_v25  ;;  %v1829_v61 = vpop.f32.mrb[17].mxu0  ;;  %v1184_v63 = vpop.f32.mrb[17].mxu1 }
 0x174   : > { %v1830_v0 = vadd.f32 %v1829_v61, %v1828_v57  ;;  %v1185_v1 = vadd.f32 %v1806_v13, %v1184_v63  ;;  %v1831_v2 = vpop.f32.mrb[18].mxu0  ;;  %v1943_v4 = vpop.f32.mrb[18].mxu1 }
 0x175   : > { %v1313_v5 = vadd.f32 %v1193_v60, %v447_v58  ;;  %v1196_v6 = vadd.f32 %v1943_v4, %v1815_v31  ;;  %v1832_v7 = vpop.f32.mrb[19].mxu0  ;;  %v1187_v9 = vpop.f32.mrb[19].mxu1  ;;  %v454_v60 = vld [vmem:[%s2418_s30 + $0x48] sm:$0xff] }
 0x176   : > { %v1311_v10 = vadd.f32 %v1185_v1, %v445_v62  ;;  %v1833_v11 = vadd.f32 %v1832_v7, %v1831_v2  ;;  %v1188_v12 = vadd.f32 %v1809_v19, %v1187_v9 }
 0x177   : > { %1345 = vst [vmem:[%s2418_s30 + $0x10] sm:$0xff] %v1313_v5  ;;  %v1314_v15 = vadd.f32 %v1196_v6, %v448_v3  ;;  %v457_v6 = vld [vmem:[%s2418_s30 + $0x60] sm:$0xff] }
 0x178   : > { %1343 = vst [vmem:[%s2418_s30] sm:$0xff] %v1311_v10  ;;  %v1312_v13 = vadd.f32 %v1188_v12, %v446_v8  ;;  %v459_v12 = vld [vmem:[%s2418_s30 + $0x70] sm:$0xff] }
 0x179   : > { %1346 = vst [vmem:[%s2418_s30 + $0x18] sm:$0xff] %v1314_v15 }
 0x17a   : > { %1344 = vst [vmem:[%s2418_s30 + $0x8] sm:$0xff] %v1312_v13  ;;  %v1834_v16 = vpop.f32.mrb[20].mxu0  ;;  %v1946_v18 = vpop.f32.mrb[20].mxu1  ;;  %v458_v13 = vld [vmem:[%s2418_s30 + $0x68] sm:$0xff] }
 0x17b   : > { %v1209_v21 = vadd.f32 %v1946_v18, %v1824_v49  ;;  %v1835_v22 = vpop.f32.mrb[21].mxu0  ;;  %v1200_v24 = vpop.f32.mrb[21].mxu1  ;;  %v453_v49 = vld [vmem:[%s2418_s30 + $0x40] sm:$0xff] }
 0x17c   : > { %v1836_v25 = vadd.f32 %v1835_v22, %v1834_v16  ;;  %v1201_v27 = vadd.f32 %v1818_v37, %v1200_v24  ;;  %v1837_v19 = vpop.f32.mrb[22].mxu0  ;;  %v1947_v29 = vpop.f32.mrb[22].mxu1 }
 0x17d   : > { %v1317_v30 = vadd.f32 %v1209_v21, %v451_v17  ;;  %v1212_v31 = vadd.f32 %v1947_v29, %v1827_v55  ;;  %v1838_v33 = vpop.f32.mrb[23].mxu0  ;;  %v1203_v35 = vpop.f32.mrb[23].mxu1 }
 0x17e   : > { %v1315_v36 = vadd.f32 %v1201_v27, %v449_v23  ;;  %v1839_v39 = vadd.f32 %v1838_v33, %v1837_v19  ;;  %v1204_v40 = vadd.f32 %v1821_v43, %v1203_v35  ;;  %v460_v23 = vld [vmem:[%s2418_s30 + $0x78] sm:$0xff] }
 0x17f   : > { %1349 = vst [vmem:[%s2418_s30 + $0x30] sm:$0xff] %v1317_v30  ;;  %v1318_v41 = vadd.f32 %v1212_v31, %v452_v28 }
 0x180   : > { %1347 = vst [vmem:[%s2418_s30 + $0x20] sm:$0xff] %v1315_v36  ;;  %v1316_v37 = vadd.f32 %v1204_v40, %v450_v34  ;;  %v461_v36 = vld [vmem:[%s2418_s30 + $0x80] sm:$0xff] }
 0x181   : > { %1350 = vst [vmem:[%s2418_s30 + $0x38] sm:$0xff] %v1318_v41 }
 0x182   : > { %1348 = vst [vmem:[%s2418_s30 + $0x28] sm:$0xff] %v1316_v37  ;;  %v1840_v42 = vpop.f32.mrb[24].mxu0  ;;  %v1950_v46 = vpop.f32.mrb[24].mxu1 }
 0x183   : > { %v1225_v47 = vadd.f32 %v1950_v46, %v1836_v25  ;;  %v1841_v48 = vpop.f32.mrb[25].mxu0  ;;  %v1216_v51 = vpop.f32.mrb[25].mxu1 }
 0x184   : > { %v1842_v52 = vadd.f32 %v1841_v48, %v1840_v42  ;;  %v1217_v53 = vadd.f32 %v1830_v0, %v1216_v51  ;;  %v1843_v43 = vpop.f32.mrb[26].mxu0  ;;  %v1951_v55 = vpop.f32.mrb[26].mxu1  ;;  %v462_v42 = vld [vmem:[%s2418_s30 + $0x88] sm:$0xff] }
 0x185   : > { %v1321_v57 = vadd.f32 %v1225_v47, %v455_v45  ;;  %v1228_v58 = vadd.f32 %v1951_v55, %v1839_v39  ;;  %v1844_v59 = vpop.f32.mrb[27].mxu0  ;;  %v1219_v61 = vpop.f32.mrb[27].mxu1  ;;  %v463_v55 = vld [vmem:[%s2418_s30 + $0x90] sm:$0xff] }
 0x186   : > { %v1319_v62 = vadd.f32 %v1217_v53, %v453_v49  ;;  %v1845_v63 = vadd.f32 %v1844_v59, %v1843_v43  ;;  %v1220_v1 = vadd.f32 %v1833_v11, %v1219_v61  ;;  %v464_v61 = vld [vmem:[%s2418_s30 + $0x98] sm:$0xff] }
 0x187   : > { %1353 = vst [vmem:[%s2418_s30 + $0x50] sm:$0xff] %v1321_v57  ;;  %v1322_v2 = vadd.f32 %v1228_v58, %v456_v54 }
 0x188   : > { %1351 = vst [vmem:[%s2418_s30 + $0x40] sm:$0xff] %v1319_v62  ;;  %v1320_v0 = vadd.f32 %v1220_v1, %v454_v60 }
 0x189   : > { %1354 = vst [vmem:[%s2418_s30 + $0x58] sm:$0xff] %v1322_v2 }
 0x18a   : > { %1352 = vst [vmem:[%s2418_s30 + $0x48] sm:$0xff] %v1320_v0  ;;  %v1846_v3 = vpop.f32.mrb[28].mxu0  ;;  %v1954_v4 = vpop.f32.mrb[28].mxu1  ;;  %v471_v0 = vld [vmem:[%s2418_s30 + $0xd0] sm:$0xff] }
 0x18b   : > { %v1847_v5 = vpop.f32.mrb[29].mxu0  ;;  %v1232_v7 = vpop.f32.mrb[29].mxu1 }
 0x18c   : > { %v1848_v8 = vadd.f32 %v1847_v5, %v1846_v3  ;;  %v1233_v9 = vadd.f32 %v1842_v52, %v1232_v7  ;;  %v1849_v10 = vpop.f32.mrb[30].mxu0  ;;  %v1955_v11 = vpop.f32.mrb[30].mxu1 }
 0x18d   : > { %v1850_v15 = vpop.f32.mrb[31].mxu0  ;;  %v1235_v16 = vpop.f32.mrb[31].mxu1 }
 0x18e   : > { %v1241_v17 = vadd.f32 %v1954_v4, %v1848_v8  ;;  %v1323_v18 = vadd.f32 %v1233_v9, %v457_v6  ;;  %v1851_v21 = vadd.f32 %v1850_v15, %v1849_v10  ;;  %v1236_v22 = vadd.f32 %v1845_v63, %v1235_v16  ;;  %v469_v6 = vld [vmem:[%s2418_s30 + $0xc0] sm:$0xff] }
 0x190   : > { %v1325_v24 = vadd.f32 %v1241_v17, %v459_v12  ;;  %1355 = vst [vmem:[%s2418_s30 + $0x60] sm:$0xff] %v1323_v18  ;;  %v1244_v25 = vadd.f32 %v1955_v11, %v1851_v21  ;;  %v1324_v27 = vadd.f32 %v1236_v22, %v458_v13  ;;  %v472_v11 = vld [vmem:[%s2418_s30 + $0xd8] sm:$0xff]  ;;  %v465_v13 = vld [vmem:[%s2418_s30 + $0xa0] sm:$0xff]  ;;  %v470_v17 = vld [vmem:[%s2418_s30 + $0xc8] sm:$0xff] }
 0x192   : > { %1357 = vst [vmem:[%s2418_s30 + $0x70] sm:$0xff] %v1325_v24  ;;  %v1326_v19 = vadd.f32 %v1244_v25, %v460_v23  ;;  %1356 = vst [vmem:[%s2418_s30 + $0x68] sm:$0xff] %v1324_v27  ;;  %v1852_v28 = vpop.f32.mrb[32].mxu0  ;;  %v1958_v29 = vpop.f32.mrb[32].mxu1  ;;  %v466_v25 = vld [vmem:[%s2418_s30 + $0xa8] sm:$0xff] }
 0x193   : > { %v1853_v30 = vpop.f32.mrb[33].mxu0  ;;  %v1248_v31 = vpop.f32.mrb[33].mxu1 }
 0x194   : > { %1358 = vst [vmem:[%s2418_s30 + $0x78] sm:$0xff] %v1326_v19  ;;  %v1854_v33 = vadd.f32 %v1853_v30, %v1852_v28  ;;  %v1855_v34 = vpop.f32.mrb[34].mxu0  ;;  %v1959_v35 = vpop.f32.mrb[34].mxu1  ;;  %v475_v30 = vld [vmem:[%s2418_s30 + $0xf0] sm:$0xff] }
 0x195   : > { %v1856_v39 = vpop.f32.mrb[35].mxu0  ;;  %v1251_v40 = vpop.f32.mrb[35].mxu1 }
 0x196   : > { %v1249_v41 = vadd.f32 %v1854_v33, %v1248_v31  ;;  %v1857_v37 = vadd.f32 %v1856_v39, %v1855_v34  ;;  %v473_v34 = vld [vmem:[%s2418_s30 + $0xe0] sm:$0xff] }
 0x198   : > { %v1327_v45 = vadd.f32 %v1249_v41, %v461_v36  ;;  %v1252_v46 = vadd.f32 %v1857_v37, %v1251_v40  ;;  %v476_v41 = vld [vmem:[%s2418_s30 + $0xf8] sm:$0xff] }
 0x19a   : > { %1359 = vst [vmem:[%s2418_s30 + $0x80] sm:$0xff] %v1327_v45  ;;  %v1328_v47 = vadd.f32 %v1252_v46, %v462_v42  ;;  %v1858_v48 = vpop.f32.mrb[36].mxu0  ;;  %v2578_v49 = vpop.f32.mrb[36].mxu1  ;;  %v467_v45 = vld [vmem:[%s2418_s30 + $0xb0] sm:$0xff] }
 0x19b   : > { %v1859_v51 = vpop.f32.mrb[37].mxu0  ;;  %v1264_v52 = vpop.f32.mrb[37].mxu1 }
 0x19c   : > { %1360 = vst [vmem:[%s2418_s30 + $0x88] sm:$0xff] %v1328_v47  ;;  %v1860_v53 = vadd.f32 %v1859_v51, %v1858_v48  ;;  %v1861_v43 = vpop.f32.mrb[38].mxu0  ;;  %v2581_v54 = vpop.f32.mrb[38].mxu1  ;;  %v474_v47 = vld [vmem:[%s2418_s30 + $0xe8] sm:$0xff] }
 0x19d   : > { %v1862_v57 = vpop.f32.mrb[39].mxu0  ;;  %v1267_v58 = vpop.f32.mrb[39].mxu1 }
 0x19e   : > { %v1257_v59 = vadd.f32 %v1958_v29, %v1860_v53  ;;  %v1863_v60 = vadd.f32 %v1862_v57, %v1861_v43 }
 0x1a0   : > { %v1329_v62 = vadd.f32 %v1257_v59, %v463_v55  ;;  %v1260_v63 = vadd.f32 %v1959_v35, %v1863_v60  ;;  %v468_v55 = vld [vmem:[%s2418_s30 + $0xb8] sm:$0xff] }
 0x1a2   : > { %1361 = vst [vmem:[%s2418_s30 + $0x90] sm:$0xff] %v1329_v62  ;;  %v1330_v1 = vadd.f32 %v1260_v63, %v464_v61  ;;  %v1864_v2 = vpop.f32.mrb[40].mxu0  ;;  %v1966_v3 = vpop.f32.mrb[40].mxu1  ;;  %v1381_v62 = vld [vmem:[%s2418_s30 + $0x10] sm:$0xff] (!%p1784_p13)  ;;  %v1382_v63 = vld [vmem:[%s2418_s30 + $0x18] sm:$0xff] (!%p1784_p13) }
 0x1a3   : > { %v1289_v4 = vadd.f32 %v1966_v3, %v2531_v26  ;;  %v1865_v5 = vpop.f32.mrb[41].mxu0  ;;  %v1280_v7 = vpop.f32.mrb[41].mxu1 }
 0x1a4   : > { %1362 = vst [vmem:[%s2418_s30 + $0x98] sm:$0xff] %v1330_v1  ;;  %v1866_v8 = vadd.f32 %v1865_v5, %v1864_v2  ;;  %v1281_v9 = vadd.f32 %v2527_v14, %v1280_v7  ;;  %v1867_v10 = vpop.f32.mrb[42].mxu0  ;;  %v1967_v12 = vpop.f32.mrb[42].mxu1  ;;  %v1383_v1 = vld [vmem:[%s2418_s30 + $0x20] sm:$0xff] (!%p1784_p13)  ;;  %v1385_v5 = vld [vmem:[%s2418_s30 + $0x30] sm:$0xff] (!%p1784_p13) }
 0x1a5   : > { %v1337_v15 = vadd.f32 %v1289_v4, %v471_v0  ;;  %v1292_v16 = vadd.f32 %v1967_v12, %v2533_v32  ;;  %v1868_v26 = vpop.f32.mrb[43].mxu0  ;;  %v1283_v18 = vpop.f32.mrb[43].mxu1  ;;  %v1384_v4 = vld [vmem:[%s2418_s30 + $0x28] sm:$0xff] (!%p1784_p13) }
 0x1a6   : > { %v1265_v21 = vadd.f32 %v1866_v8, %v1264_v52  ;;  %v1335_v22 = vadd.f32 %v1281_v9, %v469_v6  ;;  %v1869_v23 = vadd.f32 %v1868_v26, %v1867_v10  ;;  %v1284_v14 = vadd.f32 %v2529_v20, %v1283_v18  ;;  %v1386_v6 = vld [vmem:[%s2418_s30 + $0x38] sm:$0xff] (!%p1784_p13)  ;;  %v1388_v12 = vld [vmem:[%s2418_s30 + $0x48] sm:$0xff] (!%p1784_p13) }
 0x1a7   : > { %1369 = vst [vmem:[%s2418_s30 + $0xd0] sm:$0xff] %v1337_v15  ;;  %v1338_v24 = vadd.f32 %v1292_v16, %v472_v11  ;;  %v1387_v11 = vld [vmem:[%s2418_s30 + $0x40] sm:$0xff] (!%p1784_p13)  ;;  %v1389_v15 = vld [vmem:[%s2418_s30 + $0x50] sm:$0xff] (!%p1784_p13)  ;;  %v1390_v18 = vld [vmem:[%s2418_s30 + $0x58] sm:$0xff] (!%p1784_p13) }
 0x1a8   : > { %v1331_v27 = vadd.f32 %v1265_v21, %v465_v13  ;;  %1367 = vst [vmem:[%s2418_s30 + $0xc0] sm:$0xff] %v1335_v22  ;;  %v1268_v19 = vadd.f32 %v1869_v23, %v1267_v58  ;;  %v1336_v32 = vadd.f32 %v1284_v14, %v470_v17  ;;  %v1391_v21 = vld [vmem:[%s2418_s30 + $0x60] sm:$0xff] (!%p1784_p13)  ;;  %v1392_v22 = vld [vmem:[%s2418_s30 + $0x68] sm:$0xff] (!%p1784_p13) }
 0x1a9   : > { %1370 = vst [vmem:[%s2418_s30 + $0xd8] sm:$0xff] %v1338_v24 }
 0x1aa   : > { %1363 = vst [vmem:[%s2418_s30 + $0xa0] sm:$0xff] %v1331_v27  ;;  %v1332_v28 = vadd.f32 %v1268_v19, %v466_v25  ;;  %1368 = vst [vmem:[%s2418_s30 + $0xc8] sm:$0xff] %v1336_v32  ;;  %v1870_v29 = vpop.f32.mrb[44].mxu0  ;;  %v1970_v31 = vpop.f32.mrb[44].mxu1  ;;  %v1393_v27 = vld [vmem:[%s2418_s30 + $0x70] sm:$0xff] (!%p1784_p13)  ;;  %v1394_v19 = vld [vmem:[%s2418_s30 + $0x78] sm:$0xff] (!%p1784_p13) }
 0x1ab   : > { %v1305_v20 = vadd.f32 %v1970_v31, %v2539_v50  ;;  %v1871_v33 = vpop.f32.mrb[45].mxu0  ;;  %v1296_v35 = vpop.f32.mrb[45].mxu1  ;;  %v1395_v31 = vld [vmem:[%s2418_s30 + $0x80] sm:$0xff] (!%p1784_p13) }
 0x1ac   : > { %1364 = vst [vmem:[%s2418_s30 + $0xa8] sm:$0xff] %v1332_v28  ;;  %v1872_v36 = vadd.f32 %v1871_v33, %v1870_v29  ;;  %v1297_v39 = vadd.f32 %v2535_v38, %v1296_v35  ;;  %v1873_v40 = vpop.f32.mrb[46].mxu0  ;;  %v1971_v37 = vpop.f32.mrb[46].mxu1 }
 0x1ad   : > { %v1341_v42 = vadd.f32 %v1305_v20, %v475_v30  ;;  %v1308_v46 = vadd.f32 %v1971_v37, %v2541_v56  ;;  %v1874_v50 = vpop.f32.mrb[47].mxu0  ;;  %v1299_v48 = vpop.f32.mrb[47].mxu1  ;;  %v1396_v20 = vld [vmem:[%s2418_s30 + $0x88] sm:$0xff] (!%p1784_p13) }
 0x1ae   : > { %v1273_v51 = vadd.f32 %v2578_v49, %v1872_v36  ;;  %v1339_v52 = vadd.f32 %v1297_v39, %v473_v34  ;;  %v1875_v38 = vadd.f32 %v1874_v50, %v1873_v40  ;;  %v1300_v53 = vadd.f32 %v2537_v44, %v1299_v48  ;;  %1378 = sbr.rel (%p1784_p13) target bundleno = 453 (0x1c5), region = 66  ;;  %v1379_v44 = vld [vmem:[%s2418_s30] sm:$0xff] (!%p1784_p13)  ;;  %v1397_v39 = vld [vmem:[%s2418_s30 + $0x90] sm:$0xff] (!%p1784_p13)  ;;  %v1398_v40 = vld [vmem:[%s2418_s30 + $0x98] sm:$0xff] (!%p1784_p13) }
 0x1af   : > { %1373 = vst [vmem:[%s2418_s30 + $0xf0] sm:$0xff] %v1341_v42  ;;  %v1342_v43 = vadd.f32 %v1308_v46, %v476_v41  ;;  %v2626_v49 = vld [vmem:[%s2746_s2] ss:$0 sm:$0xff] (!%p1784_p13) }
 0x1b0   : > { %v1333_v57 = vadd.f32 %v1273_v51, %v467_v45  ;;  %1371 = vst [vmem:[%s2418_s30 + $0xe0] sm:$0xff] %v1339_v52  ;;  %v1276_v58 = vadd.f32 %v2581_v54, %v1875_v38  ;;  %v1340_v56 = vadd.f32 %v1300_v53, %v474_v47  ;;  %v1380_v54 = vld [vmem:[%s2418_s30 + $0x8] sm:$0xff] (!%p1784_p13)  ;;  %v1418_v60 = vadd.f32 (!%p1784_p13), %v2626_v49, %v1379_v44 }
 0x1b1   : > { %1374 = vst [vmem:[%s2418_s30 + $0xf8] sm:$0xff] %v1342_v43  ;;  %v1419_v61 = vadd.f32 (!%p1784_p13), %v2626_v49, %v1380_v54  ;;  %v1420_v2 = vadd.f32 (!%p1784_p13), %v2626_v49, %v1381_v62  ;;  %v1421_v0 = vadd.f32 (!%p1784_p13), %v2626_v49, %v1382_v63  ;;  %v1422_v3 = vadd.f32 (!%p1784_p13), %v2626_v49, %v1383_v1  ;;  %v1399_v41 = vld [vmem:[%s2418_s30 + $0xa0] sm:$0xff] (!%p1784_p13)  ;;  %v1405_v62 = vld [vmem:[%s2418_s30 + $0xd0] sm:$0xff] (!%p1784_p13)  ;;  %v1406_v63 = vld [vmem:[%s2418_s30 + $0xd8] sm:$0xff] (!%p1784_p13) }
 0x1b2   : > { %1365 = vst [vmem:[%s2418_s30 + $0xb0] sm:$0xff] %v1333_v57  ;;  %v1334_v59 = vadd.f32 %v1276_v58, %v468_v55  ;;  %1372 = vst [vmem:[%s2418_s30 + $0xe8] sm:$0xff] %v1340_v56  ;;  %v1450_v7 = vmax.f32 (!%p1784_p13), %v1418_v60, 0.0  ;;  %v1423_v9 = vadd.f32 (!%p1784_p13), %v2626_v49, %v1384_v4  ;;  %v1424_v10 = vadd.f32 (!%p1784_p13), %v2626_v49, %v1385_v5  ;;  %v1403_v56 = vld [vmem:[%s2418_s30 + $0xc0] sm:$0xff] (!%p1784_p13) }
 0x1b3   : > { %v1451_v8 = vmax.f32 (!%p1784_p13), %v1419_v61, 0.0  ;;  %v1452_v13 = vmax.f32 (!%p1784_p13), %v1420_v2, 0.0  ;;  %v1453_v16 = vmax.f32 (!%p1784_p13), %v1421_v0, 0.0  ;;  %v1454_v26 = vmax.f32 (!%p1784_p13), %v1422_v3, 0.0  ;;  %v1400_v50 = vld [vmem:[%s2418_s30 + $0xa8] sm:$0xff] (!%p1784_p13) }
 0x1b4   : > { %1366 = vst [vmem:[%s2418_s30 + $0xb8] sm:$0xff] %v1334_v59  ;;  %v1425_v17 = vadd.f32 (!%p1784_p13), %v2626_v49, %v1386_v6  ;;  %1482 = vst [vmem:[%s2418_s30] sm:$0xff] (!%p1784_p13), %v1450_v7  ;;  %v1455_v23 = vmax.f32 (!%p1784_p13), %v1423_v9, 0.0  ;;  %v1456_v14 = vmax.f32 (!%p1784_p13), %v1424_v10, 0.0  ;;  %v1426_v24 = vadd.f32 (!%p1784_p13), %v2626_v49, %v1387_v11  ;;  %v1404_v59 = vld [vmem:[%s2418_s30 + $0xc8] sm:$0xff] (!%p1784_p13) }
 0x1b5   : > { %1483 = vst [vmem:[%s2418_s30 + $0x8] sm:$0xff] %v1451_v8  ;;  %v1427_v25 = vadd.f32 %v2626_v49, %v1388_v12  ;;  %1484 = vst [vmem:[%s2418_s30 + $0x10] sm:$0xff] %v1452_v13  ;;  %v1428_v28 = vadd.f32 %v2626_v49, %v1389_v15  ;;  %v1429_v29 = vadd.f32 %v2626_v49, %v1390_v18 }
 0x1b6   : > { %1485 = vst [vmem:[%s2418_s30 + $0x18] sm:$0xff] %v1453_v16  ;;  %1486 = vst [vmem:[%s2418_s30 + $0x20] sm:$0xff] %v1454_v26  ;;  %v1457_v32 = vmax.f32 %v1425_v17, 0.0  ;;  %v1430_v30 = vadd.f32 %v2626_v49, %v1391_v21  ;;  %v1458_v33 = vmax.f32 %v1426_v24, 0.0  ;;  %v1431_v35 = vadd.f32 %v2626_v49, %v1392_v22  ;;  %v1409_v6 = vld [vmem:[%s2418_s30 + $0xf0] sm:$0xff] }
 0x1b7   : > { %1487 = vst [vmem:[%s2418_s30 + $0x28] sm:$0xff] %v1455_v23  ;;  %1488 = vst [vmem:[%s2418_s30 + $0x30] sm:$0xff] %v1456_v14  ;;  %v1459_v34 = vmax.f32 %v1427_v25, 0.0  ;;  %v1432_v36 = vadd.f32 %v2626_v49, %v1393_v27  ;;  %v1460_v37 = vmax.f32 %v1428_v28, 0.0  ;;  %v1461_v42 = vmax.f32 %v1429_v29, 0.0  ;;  %v1407_v1 = vld [vmem:[%s2418_s30 + $0xe0] sm:$0xff] }
 0x1b8   : > { %1489 = vst [vmem:[%s2418_s30 + $0x38] sm:$0xff] %v1457_v32  ;;  %v1462_v45 = vmax.f32 %v1430_v30, 0.0  ;;  %v1433_v46 = vadd.f32 %v2626_v49, %v1394_v19  ;;  %1490 = vst [vmem:[%s2418_s30 + $0x40] sm:$0xff] %v1458_v33  ;;  %v1463_v48 = vmax.f32 %v1431_v35, 0.0  ;;  %v1434_v52 = vadd.f32 %v2626_v49, %v1395_v31  ;;  %v1410_v11 = vld [vmem:[%s2418_s30 + $0xf8] sm:$0xff] }
 0x1b9   : > { %v1401_v47 = vld [vmem:[%s2418_s30 + $0xb0] sm:$0xff]  ;;  %1491 = vst [vmem:[%s2418_s30 + $0x48] sm:$0xff] %v1459_v34  ;;  %v1464_v51 = vmax.f32 %v1432_v36, 0.0  ;;  %v1435_v38 = vadd.f32 %v2626_v49, %v1396_v20  ;;  %1492 = vst [vmem:[%s2418_s30 + $0x50] sm:$0xff] %v1460_v37  ;;  %v1436_v55 = vadd.f32 %v2626_v49, %v1397_v39  ;;  %v1437_v57 = vadd.f32 %v2626_v49, %v1398_v40  ;;  %v1408_v5 = vld [vmem:[%s2418_s30 + $0xe8] sm:$0xff] }
 0x1ba   : > { %1493 = vst [vmem:[%s2418_s30 + $0x58] sm:$0xff] %v1461_v42  ;;  %1494 = vst [vmem:[%s2418_s30 + $0x60] sm:$0xff] %v1462_v45  ;;  %v1465_v43 = vmax.f32 %v1433_v46, 0.0  ;;  %v1438_v58 = vadd.f32 %v2626_v49, %v1399_v41  ;;  %v1466_v44 = vmax.f32 %v1434_v52, 0.0  ;;  %v1439_v60 = vadd.f32 %v2626_v49, %v1400_v50 }
 0x1bb   : > { %v1402_v53 = vld [vmem:[%s2418_s30 + $0xb8] sm:$0xff]  ;;  %1495 = vst [vmem:[%s2418_s30 + $0x68] sm:$0xff] %v1463_v48  ;;  %1496 = vst [vmem:[%s2418_s30 + $0x70] sm:$0xff] %v1464_v51  ;;  %v1467_v54 = vmax.f32 %v1435_v38, 0.0  ;;  %v1440_v61 = vadd.f32 %v2626_v49, %v1401_v47  ;;  %v1468_v2 = vmax.f32 %v1436_v55, 0.0  ;;  %v1469_v0 = vmax.f32 %v1437_v57, 0.0 }
 0x1bc   : > { %1497 = vst [vmem:[%s2418_s30 + $0x78] sm:$0xff] %v1465_v43  ;;  %v1470_v3 = vmax.f32 %v1438_v58, 0.0  ;;  %v1441_v4 = vadd.f32 %v2626_v49, %v1402_v53  ;;  %1498 = vst [vmem:[%s2418_s30 + $0x80] sm:$0xff] %v1466_v44  ;;  %v1471_v7 = vmax.f32 %v1439_v60, 0.0  ;;  %v1442_v9 = vadd.f32 %v2626_v49, %v1403_v56 }
 0x1bd   : > { %1499 = vst [vmem:[%s2418_s30 + $0x88] sm:$0xff] %v1467_v54  ;;  %v1472_v8 = vmax.f32 %v1440_v61, 0.0  ;;  %v1443_v10 = vadd.f32 %v2626_v49, %v1404_v59  ;;  %1500 = vst [vmem:[%s2418_s30 + $0x90] sm:$0xff] %v1468_v2  ;;  %v1444_v15 = vadd.f32 %v2626_v49, %v1405_v62  ;;  %v1445_v13 = vadd.f32 %v2626_v49, %v1406_v63 }
 0x1be   : > { %1501 = vst [vmem:[%s2418_s30 + $0x98] sm:$0xff] %v1469_v0  ;;  %1502 = vst [vmem:[%s2418_s30 + $0xa0] sm:$0xff] %v1470_v3  ;;  %v1473_v12 = vmax.f32 %v1441_v4, 0.0  ;;  %v1446_v16 = vadd.f32 %v2626_v49, %v1407_v1  ;;  %v1474_v26 = vmax.f32 %v1442_v9, 0.0  ;;  %v1447_v18 = vadd.f32 %v2626_v49, %v1408_v5 }
 0x1bf   : > { %1503 = vst [vmem:[%s2418_s30 + $0xa8] sm:$0xff] %v1471_v7  ;;  %1504 = vst [vmem:[%s2418_s30 + $0xb0] sm:$0xff] %v1472_v8  ;;  %v1475_v17 = vmax.f32 %v1443_v10, 0.0  ;;  %v1448_v21 = vadd.f32 %v2626_v49, %v1409_v6  ;;  %v1476_v22 = vmax.f32 %v1444_v15, 0.0  ;;  %v1477_v23 = vmax.f32 %v1445_v13, 0.0 }
 0x1c0   : > { %1505 = vst [vmem:[%s2418_s30 + $0xb8] sm:$0xff] %v1473_v12  ;;  %v1478_v14 = vmax.f32 %v1446_v16, 0.0  ;;  %v1449_v24 = vadd.f32 %v2626_v49, %v1410_v11  ;;  %1506 = vst [vmem:[%s2418_s30 + $0xc0] sm:$0xff] %v1474_v26  ;;  %v1479_v25 = vmax.f32 %v1447_v18, 0.0 }
 0x1c1   : > { %1507 = vst [vmem:[%s2418_s30 + $0xc8] sm:$0xff] %v1475_v17  ;;  %v1480_v27 = vmax.f32 %v1448_v21, 0.0  ;;  %1508 = vst [vmem:[%s2418_s30 + $0xd0] sm:$0xff] %v1476_v22 }
 0x1c2   : > { %1509 = vst [vmem:[%s2418_s30 + $0xd8] sm:$0xff] %v1477_v23  ;;  %1510 = vst [vmem:[%s2418_s30 + $0xe0] sm:$0xff] %v1478_v14  ;;  %v1481_v19 = vmax.f32 %v1449_v24, 0.0 }
 0x1c3   : > { %1511 = vst [vmem:[%s2418_s30 + $0xe8] sm:$0xff] %v1479_v25  ;;  %1512 = vst [vmem:[%s2418_s30 + $0xf0] sm:$0xff] %v1480_v27 }
 0x1c4   : > { %1513 = vst [vmem:[%s2418_s30 + $0xf8] sm:$0xff] %v1481_v19 }
 0x1c5 PF: > { %s13_s18 = sadd.s32 1, %s2190_s18   ;;  %s2748_s12 = smov %s2170_s13 }
 0x1c6   : > { %p10_p0 = scmp.ge.s32.totalorder %s13_s18, 14   ;;  %s2749_s13 = smov %s2264_s25 }
 0x1c7   : > { %s2750_s14 = smov %s2182_s16  ;;  %s2751_s15 = smov %s2186_s17 }
 0x1c8   : > { %s2752_s16 = smov %s2755_s19  ;;  %s2753_s17 = smov %s2759_s20 }
 0x1c9   :  { %12 = sbr.rel (!%p10_p0) target bundleno = 4 (0x4), region = 113 }

// kernel: unet_forward.55
= control target key start
LH: loop header
LB: loop body
LE: loop exit
PB: predicated region body
PF: predicated region fallthrough
CT: control target
= control target key end

     0   :  { %s1181_s12 = smov 0   ;;  %s1183_s13 = smov 0   ;;  %s1331_s0 = inlined_call_operand.vmem [shape: bf16[512,128], index: 0, kind: input, shape index: {}]   ;;  %s1332_s1 = inlined_call_operand.vmem [shape: bf16[128,128], index: 1, kind: input, shape index: {}]   ;;  %s1333_s2 = inlined_call_operand.vmem [shape: f32[1,128], index: 2, kind: input, shape index: {}]   ;;  %s1334_s3 = inlined_call_operand.vmem [shape: f32[512,128], index: 3, kind: output, shape index: {}]  }
   0x1   :  { %s1185_s14 = smov 0  }
   0x2 LB: > { %s32_s15 = sadd.s32 1, %s1155_s13  ;;  %p968_p0 = scmp.ge.s32.totalorder %s1159_s14, 1  ;;  %s1159_s14 = sphi %s1185_s14, %s13_s14   ;;  %s1155_s13 = sphi %s1183_s13, %s1336_s13   ;;  %s1151_s12 = sphi %s1181_s12, %s1335_s12  }
   0x3   : > { %p34_p1 = scmp.ge.s32.totalorder %s32_s15, 2  ;;  %p188_p2 = scmp.lt.s32.totalorder %s1159_s14, 3 }
   0x5   : > { %s1338_s15 = smov (%p34_p1, %s32_s15), 0  ;;  %p189_p3 = pnand %p968_p0, %p188_p2 }
   0x6   : > { %v1113_v0 = vld [vmem:[%s1332_s1] sm:$0xff] (!%p189_p3)   ;;  %s969_s18 = sshll.u32 (!%p189_p3), %s1151_s12, 5  ;;  %v1114_v1 = vld [vmem:[%s1332_s1 + $0x8] sm:$0xff] (!%p189_p3)   ;;  %v1115_v2 = vld [vmem:[%s1332_s1 + $0x10] sm:$0xff] (!%p189_p3)  }
   0x7   : > { %192 = sbr.rel (%p189_p3) target bundleno = 281 (0x119), region = 32  ;;  %p230_p4 = scmp.lt.s32.totalorder (!%p189_p3), %s969_s18, 63  ;;  %1024 = vmatprep.subr.bf16.mxu0 (!%p189_p3), %v1113_v0  ;;  %1072 = vmatprep.subr.bf16.mxu1 (!%p189_p3), %v1113_v0  ;;  %v1116_v3 = vld [vmem:[%s1332_s1 + $0x18] sm:$0xff] (!%p189_p3)   ;;  %v1117_v6 = vld [vmem:[%s1332_s1 + $0x20] sm:$0xff] (!%p189_p3)   ;;  %v1118_v7 = vld [vmem:[%s1332_s1 + $0x28] sm:$0xff] (!%p189_p3)  }
   0x8   : > { %1025 = vmatpush3.bf16.msra.mxu0 (!%p189_p3), %v1113_v0  ;;  %1080 = vmatpush3.bf16.msra.mxu1 (!%p189_p3), %v1113_v0  ;;  %v1119_v8 = vld [vmem:[%s1332_s1 + $0x30] sm:$0xff] (!%p189_p3)   ;;  %v1120_v9 = vld [vmem:[%s1332_s1 + $0x38] sm:$0xff] (!%p189_p3)   ;;  %v1251_v25 = vld [vmem:[%s1333_s2] ss:$0 sm:$0xff] (!%p189_p3) }
   0x9   : > { %1026 = vmatprep.subr.bf16.mxu0 (!%p189_p3), %v1114_v1  ;;  %1073 = vmatprep.subr.bf16.mxu1 (!%p189_p3), %v1114_v1 }
   0xc   : > { %1027 = vmatpush3.bf16.msra.mxu0 (!%p189_p3), %v1114_v1  ;;  %1081 = vmatpush3.bf16.msra.mxu1 (!%p189_p3), %v1114_v1 }
   0xd   : > { %1028 = vmatprep.subr.bf16.mxu0 (!%p189_p3), %v1115_v2  ;;  %1074 = vmatprep.subr.bf16.mxu1 (!%p189_p3), %v1115_v2 }
   0xe   : > { %s1340_s18 = smov (!%p230_p4, %s969_s18), 63 }
   0xf   : > { %s970_s23 = sshll.u32 %s1340_s18, 2  ;;  %s972_s10 = sshll.u32 %s1340_s18, 3 }
  0x10   : > { %s1214_s26 = scalar_lea.vmem %s1331_s0, %s970_s23  ;;  %1029 = vmatpush3.bf16.msra.mxu0 %v1115_v2  ;;  %1082 = vmatpush3.bf16.msra.mxu1 %v1115_v2  ;;  %s1256_s19 = scalar_lea.vmem %s1334_s3, %s972_s10 }
  0x11   : > { %v1121_v4 = vld [vmem:[%s1214_s26] sm:$0xff]   ;;  %1030 = vmatprep.subr.bf16.mxu0 %v1116_v3  ;;  %1075 = vmatprep.subr.bf16.mxu1 %v1116_v3  ;;  %v1123_v10 = vld [vmem:[%s1214_s26 + $0x8] sm:$0xff]   ;;  %v1125_v12 = vld [vmem:[%s1214_s26 + $0x10] sm:$0xff]  }
  0x12   : > { %v1122_v5 = vld [vmem:[%s1214_s26 + $0x40] sm:$0xff]   ;;  %1040 = vmatprep.mubr.bf16.mxu0 %v1121_v4  ;;  %v1124_v11 = vld [vmem:[%s1214_s26 + $0x48] sm:$0xff]   ;;  %v1126_v13 = vld [vmem:[%s1214_s26 + $0x50] sm:$0xff]  }
  0x13   : > { %1056 = vmatprep.mubr.bf16.mxu1 %v1122_v5  ;;  %v1127_v14 = vld [vmem:[%s1214_s26 + $0x18] sm:$0xff]   ;;  %v1129_v16 = vld [vmem:[%s1214_s26 + $0x20] sm:$0xff]   ;;  %v1131_v18 = vld [vmem:[%s1214_s26 + $0x28] sm:$0xff]  }
  0x14   : > { %1031 = vmatpush3.bf16.msra.mxu0 %v1116_v3  ;;  %1083 = vmatpush3.bf16.msra.mxu1 %v1116_v3  ;;  %v1128_v15 = vld [vmem:[%s1214_s26 + $0x58] sm:$0xff]   ;;  %v1130_v17 = vld [vmem:[%s1214_s26 + $0x60] sm:$0xff]   ;;  %v1132_v19 = vld [vmem:[%s1214_s26 + $0x68] sm:$0xff]  }
  0x15   : > { %1032 = vmatprep.subr.bf16.mxu0 %v1117_v6  ;;  %1076 = vmatprep.subr.bf16.mxu1 %v1117_v6  ;;  %v1133_v20 = vld [vmem:[%s1214_s26 + $0x30] sm:$0xff]   ;;  %v1135_v22 = vld [vmem:[%s1214_s26 + $0x38] sm:$0xff]  }
  0x16   : > { %v1134_v21 = vld [vmem:[%s1214_s26 + $0x70] sm:$0xff]   ;;  %v1136_v23 = vld [vmem:[%s1214_s26 + $0x78] sm:$0xff]  }
  0x18   : > { %1033 = vmatpush3.bf16.msra.mxu0 %v1117_v6  ;;  %1084 = vmatpush3.bf16.msra.mxu1 %v1117_v6 }
  0x19   : > { %1034 = vmatprep.subr.bf16.mxu0 %v1118_v7  ;;  %1077 = vmatprep.subr.bf16.mxu1 %v1118_v7 }
  0x1c   : > { %1035 = vmatpush3.bf16.msra.mxu0 %v1118_v7  ;;  %1085 = vmatpush3.bf16.msra.mxu1 %v1118_v7 }
  0x1d   : > { %1036 = vmatprep.subr.bf16.mxu0 %v1119_v8  ;;  %1078 = vmatprep.subr.bf16.mxu1 %v1119_v8 }
  0x20   : > { %1037 = vmatpush3.bf16.msra.mxu0 %v1119_v8  ;;  %1086 = vmatpush3.bf16.msra.mxu1 %v1119_v8 }
  0x21   : > { %1038 = vmatprep.subr.bf16.mxu0 %v1120_v9  ;;  %1079 = vmatprep.subr.bf16.mxu1 %v1120_v9 }
  0x24   : > { %1039 = vmatpush3.bf16.msra.mxu0 %v1120_v9  ;;  %1087 = vmatpush3.bf16.msra.mxu1 %v1120_v9 }
  0x27   : > { %1041 = vmatmul.mubr.bf16.vlgmr.msra.gmra.mrb[0].mxu0 %v1123_v10  ;;  %1057 = vmatmul.mubr.bf16.vlgmr.msra.gmra.mrb[0].mxu1 %v1124_v11 }
  0x28   : > { %1044 = vmatprep.mubr.bf16.mxu0 %v1125_v12  ;;  %1060 = vmatprep.mubr.bf16.mxu1 %v1126_v13 }
  0x2f   : > { %1045 = vmatmul.mubr.bf16.gmra.mrb[4].mxu0 %v1127_v14  ;;  %1061 = vmatmul.mubr.bf16.gmra.mrb[4].mxu1 %v1128_v15 }
  0x30   : > { %1048 = vmatprep.mubr.bf16.mxu0 %v1129_v16  ;;  %1064 = vmatprep.mubr.bf16.mxu1 %v1130_v17 }
  0x37   : > { %1049 = vmatmul.mubr.bf16.gmra.mrb[8].mxu0 %v1131_v18  ;;  %1065 = vmatmul.mubr.bf16.gmra.mrb[8].mxu1 %v1132_v19 }
  0x38   : > { %1052 = vmatprep.mubr.bf16.mxu0 %v1133_v20  ;;  %1068 = vmatprep.mubr.bf16.mxu1 %v1134_v21 }
  0x3f   : > { %1053 = vmatmul.mubr.bf16.gmra.mrb[12].mxu0 %v1135_v22  ;;  %1069 = vmatmul.mubr.bf16.gmra.mrb[12].mxu1 %v1136_v23 }
  0xfa   : > { %v1042_v24 = vpop.f32.mrb[0].mxu0  ;;  %v1058_v26 = vpop.f32.mrb[0].mxu1 }
  0xfb   : > { %v554_v27 = vpop.f32.mrb[1].mxu0  ;;  %v618_v28 = vpop.f32.mrb[1].mxu1  ;;  %v789_v31 = vadd.f32 %v1042_v24, %v1251_v25  ;;  %v805_v32 = vadd.f32 %v1058_v26, %v1251_v25 }
  0xfc   : > { %v1043_v29 = vpop.f32.mrb[2].mxu0  ;;  %v1059_v30 = vpop.f32.mrb[2].mxu1  ;;  %v787_v35 = vadd.f32 %v1251_v25, %v554_v27  ;;  %v803_v36 = vadd.f32 %v1251_v25, %v618_v28 }
  0xfd   : > { %v557_v33 = vpop.f32.mrb[3].mxu0  ;;  %v621_v34 = vpop.f32.mrb[3].mxu1  ;;  %821 = vst [vmem:[%s1256_s19 + $0x10] sm:$0xff] %v789_v31  ;;  %837 = vst [vmem:[%s1256_s19 + $0x90] sm:$0xff] %v805_v32  ;;  %v790_v37 = vadd.f32 %v1043_v29, %v1251_v25  ;;  %v806_v38 = vadd.f32 %v1059_v30, %v1251_v25 }
  0xfe   : > { %819 = vst [vmem:[%s1256_s19] sm:$0xff] %v787_v35  ;;  %835 = vst [vmem:[%s1256_s19 + $0x80] sm:$0xff] %v803_v36  ;;  %v788_v39 = vadd.f32 %v1251_v25, %v557_v33  ;;  %v804_v40 = vadd.f32 %v1251_v25, %v621_v34 }
  0xff   : > { %822 = vst [vmem:[%s1256_s19 + $0x18] sm:$0xff] %v790_v37  ;;  %838 = vst [vmem:[%s1256_s19 + $0x98] sm:$0xff] %v806_v38 }
 0x100   : > { %820 = vst [vmem:[%s1256_s19 + $0x8] sm:$0xff] %v788_v39  ;;  %836 = vst [vmem:[%s1256_s19 + $0x88] sm:$0xff] %v804_v40 }
 0x102   : > { %v1046_v41 = vpop.f32.mrb[4].mxu0  ;;  %v1062_v42 = vpop.f32.mrb[4].mxu1 }
 0x103   : > { %v570_v43 = vpop.f32.mrb[5].mxu0  ;;  %v634_v44 = vpop.f32.mrb[5].mxu1  ;;  %v793_v47 = vadd.f32 %v1046_v41, %v1251_v25  ;;  %v809_v48 = vadd.f32 %v1062_v42, %v1251_v25 }
 0x104   : > { %v1047_v45 = vpop.f32.mrb[6].mxu0  ;;  %v1063_v46 = vpop.f32.mrb[6].mxu1  ;;  %v791_v51 = vadd.f32 %v1251_v25, %v570_v43  ;;  %v807_v52 = vadd.f32 %v1251_v25, %v634_v44 }
 0x105   : > { %v573_v49 = vpop.f32.mrb[7].mxu0  ;;  %v637_v50 = vpop.f32.mrb[7].mxu1  ;;  %825 = vst [vmem:[%s1256_s19 + $0x30] sm:$0xff] %v793_v47  ;;  %841 = vst [vmem:[%s1256_s19 + $0xb0] sm:$0xff] %v809_v48  ;;  %v794_v53 = vadd.f32 %v1047_v45, %v1251_v25  ;;  %v810_v54 = vadd.f32 %v1063_v46, %v1251_v25 }
 0x106   : > { %823 = vst [vmem:[%s1256_s19 + $0x20] sm:$0xff] %v791_v51  ;;  %839 = vst [vmem:[%s1256_s19 + $0xa0] sm:$0xff] %v807_v52  ;;  %v792_v55 = vadd.f32 %v1251_v25, %v573_v49  ;;  %v808_v56 = vadd.f32 %v1251_v25, %v637_v50 }
 0x107   : > { %826 = vst [vmem:[%s1256_s19 + $0x38] sm:$0xff] %v794_v53  ;;  %842 = vst [vmem:[%s1256_s19 + $0xb8] sm:$0xff] %v810_v54 }
 0x108   : > { %824 = vst [vmem:[%s1256_s19 + $0x28] sm:$0xff] %v792_v55  ;;  %840 = vst [vmem:[%s1256_s19 + $0xa8] sm:$0xff] %v808_v56 }
 0x10a   : > { %v1050_v57 = vpop.f32.mrb[8].mxu0  ;;  %v1066_v58 = vpop.f32.mrb[8].mxu1 }
 0x10b   : > { %v586_v59 = vpop.f32.mrb[9].mxu0  ;;  %v650_v60 = vpop.f32.mrb[9].mxu1  ;;  %v797_v63 = vadd.f32 %v1050_v57, %v1251_v25  ;;  %v813_v0 = vadd.f32 %v1066_v58, %v1251_v25 }
 0x10c   : > { %v1051_v61 = vpop.f32.mrb[10].mxu0  ;;  %v1067_v62 = vpop.f32.mrb[10].mxu1  ;;  %v795_v3 = vadd.f32 %v1251_v25, %v586_v59  ;;  %v811_v4 = vadd.f32 %v1251_v25, %v650_v60 }
 0x10d   : > { %v589_v1 = vpop.f32.mrb[11].mxu0  ;;  %v653_v2 = vpop.f32.mrb[11].mxu1  ;;  %829 = vst [vmem:[%s1256_s19 + $0x50] sm:$0xff] %v797_v63  ;;  %845 = vst [vmem:[%s1256_s19 + $0xd0] sm:$0xff] %v813_v0  ;;  %v798_v5 = vadd.f32 %v1051_v61, %v1251_v25  ;;  %v814_v6 = vadd.f32 %v1067_v62, %v1251_v25 }
 0x10e   : > { %827 = vst [vmem:[%s1256_s19 + $0x40] sm:$0xff] %v795_v3  ;;  %843 = vst [vmem:[%s1256_s19 + $0xc0] sm:$0xff] %v811_v4  ;;  %v796_v7 = vadd.f32 %v1251_v25, %v589_v1  ;;  %v812_v8 = vadd.f32 %v1251_v25, %v653_v2 }
 0x10f   : > { %830 = vst [vmem:[%s1256_s19 + $0x58] sm:$0xff] %v798_v5  ;;  %846 = vst [vmem:[%s1256_s19 + $0xd8] sm:$0xff] %v814_v6 }
 0x110   : > { %828 = vst [vmem:[%s1256_s19 + $0x48] sm:$0xff] %v796_v7  ;;  %844 = vst [vmem:[%s1256_s19 + $0xc8] sm:$0xff] %v812_v8 }
 0x112   : > { %v1054_v9 = vpop.f32.mrb[12].mxu0  ;;  %v1070_v10 = vpop.f32.mrb[12].mxu1 }
 0x113   : > { %v602_v11 = vpop.f32.mrb[13].mxu0  ;;  %v666_v12 = vpop.f32.mrb[13].mxu1  ;;  %v801_v15 = vadd.f32 %v1054_v9, %v1251_v25  ;;  %v817_v16 = vadd.f32 %v1070_v10, %v1251_v25 }
 0x114   : > { %v1055_v13 = vpop.f32.mrb[14].mxu0  ;;  %v1071_v14 = vpop.f32.mrb[14].mxu1  ;;  %v799_v19 = vadd.f32 %v1251_v25, %v602_v11  ;;  %v815_v20 = vadd.f32 %v1251_v25, %v666_v12 }
 0x115   : > { %v605_v17 = vpop.f32.mrb[15].mxu0  ;;  %v669_v18 = vpop.f32.mrb[15].mxu1  ;;  %833 = vst [vmem:[%s1256_s19 + $0x70] sm:$0xff] %v801_v15  ;;  %849 = vst [vmem:[%s1256_s19 + $0xf0] sm:$0xff] %v817_v16  ;;  %v802_v21 = vadd.f32 %v1055_v13, %v1251_v25  ;;  %v818_v22 = vadd.f32 %v1071_v14, %v1251_v25 }
 0x116   : > { %831 = vst [vmem:[%s1256_s19 + $0x60] sm:$0xff] %v799_v19  ;;  %847 = vst [vmem:[%s1256_s19 + $0xe0] sm:$0xff] %v815_v20  ;;  %v800_v23 = vadd.f32 %v1251_v25, %v605_v17  ;;  %v816_v24 = vadd.f32 %v1251_v25, %v669_v18 }
 0x117   : > { %834 = vst [vmem:[%s1256_s19 + $0x78] sm:$0xff] %v802_v21  ;;  %850 = vst [vmem:[%s1256_s19 + $0xf8] sm:$0xff] %v818_v22 }
 0x118   : > { %832 = vst [vmem:[%s1256_s19 + $0x68] sm:$0xff] %v800_v23  ;;  %848 = vst [vmem:[%s1256_s19 + $0xe8] sm:$0xff] %v816_v24 }
 0x119 PF: > { %s13_s14 = sadd.s32 1, %s1159_s14   ;;  %s1335_s12 = smov %s1155_s13 }
 0x11a   : > { %p10_p5 = scmp.ge.s32.totalorder %s13_s14, 4   ;;  %s1336_s13 = smov %s1338_s15 }
 0x11c   :  { %12 = sbr.rel (!%p10_p5) target bundleno = 2 (0x2), region = 76 }

</bundles_post_ra>
